<compile_context>
chip_gen: v7x
topology: tpu7x:2x2x1
jax: 0.10.0
libtpu: 0.0.40
codegen_flags: <defaults>
</compile_context>

<pallas_src>
import jax
import jax.numpy as jnp
from jax.experimental import pallas as pl
from jax.experimental.pallas import tpu as pltpu


# ----------------------------------------------------------------------------
# Fused kernel: one grid step == one image.
#   p1_ref : (1, H*W, 9*Cin)  bf16   im2col patches of the input
#   w1_ref : (9*Cin, 128)     bf16   folded layer-1 weight
#   b1_ref : (1, 128)         f32
#   w2_ref : (9*128, C2)      bf16   folded layer-2 weight (taps in K, C2=256)
#   b2_ref : (1, C2)          f32
#   w3_ref : (9*C2, C3)       bf16   folded layer-3 weight (taps in K, C3>=128)
#   b3_ref : (1, C3)          f32
#   o_ref  : (1, H/2, W/2, C3) f32
#   pad2   : (H+2, W+2, 128)  bf16   zero-halo scratch (layer-1 output)
#   pad3   : (H+2, W+2, C2)   bf16   zero-halo scratch (layer-2 output)
#   pool   : (4*W, C3)        f32    pool scratch (stride-2 compaction)
# ----------------------------------------------------------------------------
def _downconv_kernel(p1_ref, w1_ref, b1_ref, w2_ref, b2_ref, w3_ref, b3_ref,
                     o_ref, pad2_ref, pad3_ref, pool_ref):
    hp2, wp2, c1 = pad2_ref.shape
    h, w = hp2 - 2, wp2 - 2
    c2 = pad3_ref.shape[-1]
    c3 = o_ref.shape[-1]
    m = 8 * w                       # rows per M-tile (8 image rows)
    n_mb = h // 8
    taps = [(dy, dx) for dy in range(3) for dx in range(3)]

    # Zero the halo scratches every step (cheap; the interior is fully
    # rewritten below, and doing it unconditionally stays correct when the
    # batch axis is sharded across TensorCores).
    pad2_ref[...] = jnp.zeros_like(pad2_ref)
    pad3_ref[...] = jnp.zeros_like(pad3_ref)

    # ---- layer 1: conv3x3(Cin->128) as ONE im2col matmul (K = 9*Cin) -------
    y1 = jnp.dot(p1_ref[0], w1_ref[...], preferred_element_type=jnp.float32)
    y1 = jnp.maximum(y1 + b1_ref[...], 0.0)                  # (H*W, 128) f32
    pad2_ref[1:h + 1, 1:w + 1, :] = y1.reshape(h, w, c1).astype(pad2_ref.dtype)

    # ---- layer 2: conv3x3(128->C2), taps folded into K, 8-row M-tiles ------
    for mb in range(n_mb):
        y0 = mb * 8
        pcat = jnp.concatenate(
            [pad2_ref[dy + y0:dy + y0 + 8, dx:dx + w, :].reshape(m, c1)
             for dy, dx in taps], axis=1)                     # (m, 9*128) bf16
        y2 = jnp.dot(pcat, w2_ref[...], preferred_element_type=jnp.float32)
        y2 = jnp.maximum(y2 + b2_ref[...], 0.0)               # (m, C2) f32
        pad3_ref[1 + y0:9 + y0, 1:w + 1, :] = (
            y2.reshape(8, w, c2).astype(pad3_ref.dtype))

    # ---- layer 3: conv3x3(C2->C3) + fused 2x2 max-pool, 8-row M-tiles ------
    for mb in range(n_mb):
        y0 = mb * 8
        pcat = jnp.concatenate(
            [pad3_ref[dy + y0:dy + y0 + 8, dx:dx + w, :].reshape(m, c2)
             for dy, dx in taps], axis=1)                     # (m, 9*C2) bf16
        y3 = jnp.dot(pcat, w3_ref[...], preferred_element_type=jnp.float32)
        y3 = jnp.maximum(y3 + b3_ref[...], 0.0)               # (m, C3) f32

        # 2x2 max-pool.  H pairs: split on a leading (non-tile) axis -> free.
        # W pairs: stride-2 strided reads of a VMEM scratch, so the (8,128)
        # sublane/lane tiling is never reshaped across tile boundaries.
        y3r = y3.reshape(4, 2, w, c3)
        pool_ref[...] = jnp.maximum(y3r[:, 0], y3r[:, 1]).reshape(4 * w, c3)
        pooled = jnp.maximum(pool_ref[pl.ds(0, 2 * w, 2), :],
                             pool_ref[pl.ds(1, 2 * w, 2), :])  # (2*w, C3)
        o_ref[0, mb * 4:mb * 4 + 4, :, :] = (
            pooled.reshape(4, w // 2, c3).astype(o_ref.dtype))


def _round_up(x, mult):
    return (x + mult - 1) // mult * mult


def downconv_forward(x_nchw, params):
    """Pallas implementation.  x_nchw: (N, Cin, H, W) f32 -> (N, Cout, H/2, W/2)."""
    n, cin, h, w = x_nchw.shape
    assert h % 8 == 0 and w % 8 == 0, "kernel tiles H in 8-row strips, W%8==0"
    (w1, b1), (w2, b2), (w3, b3) = params
    c1 = w1.shape[-1]                       # 128
    c2 = _round_up(w2.shape[-1], 128)       # 196 -> 256
    cout = w3.shape[-1]
    c3 = _round_up(cout, 128)               # 64 -> 128 (lane-dense output)

    # Layer-1 im2col on the (tiny) input: (N, H*W, 9*Cin), cast to bf16.
    x = jnp.transpose(x_nchw, (0, 2, 3, 1))                  # NCHW -> NHWC
    xp = jnp.pad(x, ((0, 0), (1, 1), (1, 1), (0, 0)))
    p1 = jnp.concatenate(
        [xp[:, dy:dy + h, dx:dx + w, :] for dy in range(3) for dx in range(3)],
        axis=-1).reshape(n, h * w, 9 * cin).astype(jnp.bfloat16)

    # Fold the 3x3 taps into K, pad channels to lane multiples, cast to bf16.
    w1f = w1.reshape(9 * cin, c1).astype(jnp.bfloat16)
    b1f = b1.reshape(1, c1).astype(jnp.float32)

    w2p = jnp.zeros((3, 3, c1, c2), jnp.float32).at[:, :, :, :w2.shape[-1]].set(w2)
    b2f = jnp.zeros((1, c2), jnp.float32).at[0, :b2.shape[0]].set(b2)
    w2f = w2p.reshape(9 * c1, c2).astype(jnp.bfloat16)

    w3p = jnp.zeros((3, 3, c2, c3), jnp.float32).at[:, :, :w3.shape[2], :cout].set(w3)
    b3f = jnp.zeros((1, c3), jnp.float32).at[0, :cout].set(b3)
    w3f = w3p.reshape(9 * c2, c3).astype(jnp.bfloat16)

    hp, wp = h // 2, w // 2
    out = pl.pallas_call(
        _downconv_kernel,
        out_shape=jax.ShapeDtypeStruct((n, hp, wp, c3), jnp.float32),
        grid=(n,),
        in_specs=[
            pl.BlockSpec((1, h * w, 9 * cin), lambda i: (i, 0, 0)),
            pl.BlockSpec((9 * cin, c1), lambda i: (0, 0)),
            pl.BlockSpec((1, c1), lambda i: (0, 0)),
            pl.BlockSpec((9 * c1, c2), lambda i: (0, 0)),
            pl.BlockSpec((1, c2), lambda i: (0, 0)),
            pl.BlockSpec((9 * c2, c3), lambda i: (0, 0)),
            pl.BlockSpec((1, c3), lambda i: (0, 0)),
        ],
        out_specs=pl.BlockSpec((1, hp, wp, c3), lambda i: (i, 0, 0, 0)),
        scratch_shapes=[
            pltpu.VMEM((h + 2, w + 2, c1), jnp.bfloat16),   # padded layer-1 out
            pltpu.VMEM((h + 2, w + 2, c2), jnp.bfloat16),   # padded layer-2 out
            pltpu.VMEM((4 * w, c3), jnp.float32),           # pool scratch
        ],
        compiler_params=pltpu.CompilerParams(
            dimension_semantics=("parallel",)),
    )(p1, w1f, b1f, w2f, b2f, w3f, b3f)

    out = out[..., :cout]                                   # drop padded lanes
    return jnp.transpose(out, (0, 3, 1, 2))                 # NHWC -> NCHW


# ----------------------------------------------------------------------------
# Parameter construction (deterministic, synthetic) + BN folding.
# ----------------------------------------------------------------------------
def _make_layer_params(key, cin, cout):
    kw, kb, kg, kbe, km, kv = jax.random.split(key, 6)
    w = 0.1 * jax.random.normal(kw, (3, 3, cin, cout), jnp.float32)  # HWIO
    b = 0.1 * jax.random.normal(kb, (cout,), jnp.float32)
    gamma = 1.0 + 0.1 * jax.random.normal(kg, (cout,), jnp.float32)
    beta = 0.1 * jax.random.normal(kbe, (cout,), jnp.float32)
    rmean = 0.1 * jax.random.normal(km, (cout,), jnp.float32)
    rvar = 0.5 + 0.5 * jnp.abs(jax.random.normal(kv, (cout,), jnp.float32))
    eps = 1e-5
    # Fold BN (inference form: running stats) into conv weight / bias.
    scale = gamma / jnp.sqrt(rvar + eps)
    w_f = w * scale[None, None, None, :]
    b_f = (b - rmean) * scale + beta
    return w_f, b_f


def make_downconv_params(key, in_channels, out_channels):
    k1, k2, k3 = jax.random.split(key, 3)
    return [
        _make_layer_params(k1, in_channels, 128),
        _make_layer_params(k2, 128, 196),
        _make_layer_params(k3, 196, out_channels),
    ]


# ----------------------------------------------------------------------------
# Pure-JAX reference.  Uses the same numerics as the kernel (weights and
# inter-layer activations rounded to bf16, f32 accumulation), so the check
# verifies the kernel's structure (padding, taps, fusion, pooling) tightly.
# ----------------------------------------------------------------------------
def downconv_reference(x_nchw, params):
    def q(a):  # bf16 quantize (matches the kernel's MXU input precision)
        return a.astype(jnp.bfloat16).astype(jnp.float32)

    y = x_nchw
    for w, b in params:
        y = jax.lax.conv_general_dilated(
            q(y), q(w), window_strides=(1, 1), padding=((1, 1), (1, 1)),
            dimension_numbers=("NCHW", "HWIO", "NCHW"),
            precision=jax.lax.Precision.HIGHEST)
        y = jnp.maximum(y + b.reshape(1, -1, 1, 1), 0.0)
    return jax.lax.reduce_window(
        y, -jnp.inf, jax.lax.max,
        window_dimensions=(1, 1, 2, 2), window_strides=(1, 1, 2, 2),
        padding="VALID")


if __name__ == "__main__":
    key = jax.random.PRNGKey(0)
    kx, kp = jax.random.split(key)

    N, CIN, H, W = 2, 4, 16, 16
    COUT = 64

    x = jax.random.normal(kx, (N, CIN, H, W), jnp.float32)
    params = make_downconv_params(kp, CIN, COUT)

    out = jax.block_until_ready(downconv_forward(x, params))
    assert out.shape == (N, COUT, H // 2, W // 2), out.shape

    ref = jax.block_until_ready(downconv_reference(x, params))
    if not jnp.allclose(out, ref, rtol=2e-2, atol=2e-2):
        max_err = float(jnp.max(jnp.abs(out - ref)))
        raise AssertionError(f"mismatch vs reference, max abs err = {max_err}")

    print("KERNEL_OK")
</pallas_src>

<mosaic_0001>
module attributes {stable_mosaic.version = 11 : i64} {
  func.func @_downconv_kernel(%arg0: i32, %arg1: memref<1x256x36xbf16, #tpu.memory_space<vmem>>, %arg2: memref<36x128xbf16, #tpu.memory_space<vmem>>, %arg3: memref<1x128xf32, #tpu.memory_space<vmem>>, %arg4: memref<1152x256xbf16, #tpu.memory_space<vmem>>, %arg5: memref<1x256xf32, #tpu.memory_space<vmem>>, %arg6: memref<2304x128xbf16, #tpu.memory_space<vmem>>, %arg7: memref<1x128xf32, #tpu.memory_space<vmem>>, %arg8: memref<1x8x8x128xf32, #tpu.memory_space<vmem>>, %arg9: memref<18x18x128xbf16, #tpu.memory_space<vmem>>, %arg10: memref<18x18x256xbf16, #tpu.memory_space<vmem>>, %arg11: memref<64x128xf32, #tpu.memory_space<vmem>>) attributes {dimension_semantics = [#tpu.dimension_semantics<parallel>], iteration_bounds = array<i64: 2>, scalar_prefetch = 0 : i64, scratch_operands = 3 : i64, tpu.core_type = #tpu.core_type<tc>, window_params = [{transform_indices = @transform_0, window_bounds = array<i64: 1, 256, 36>}, {pipeline_mode = #tpu.pipeline_mode<synchronous>, transform_indices = @transform_1, window_bounds = array<i64: 36, 128>}, {pipeline_mode = #tpu.pipeline_mode<synchronous>, transform_indices = @transform_2, window_bounds = array<i64: 1, 128>}, {pipeline_mode = #tpu.pipeline_mode<synchronous>, transform_indices = @transform_3, window_bounds = array<i64: 1152, 256>}, {pipeline_mode = #tpu.pipeline_mode<synchronous>, transform_indices = @transform_4, window_bounds = array<i64: 1, 256>}, {pipeline_mode = #tpu.pipeline_mode<synchronous>, transform_indices = @transform_5, window_bounds = array<i64: 2304, 128>}, {pipeline_mode = #tpu.pipeline_mode<synchronous>, transform_indices = @transform_6, window_bounds = array<i64: 1, 128>}, {transform_indices = @transform_7, window_bounds = array<i64: 1, 8, 8, 128>}]} {
    %cst = arith.constant 0.000000e+00 : bf16
    %0 = vector.broadcast %cst : bf16 to vector<18x18x128xbf16>
    %c0 = arith.constant 0 : index
    %c0_0 = arith.constant 0 : index
    %c0_1 = arith.constant 0 : index
    %1 = vector.load %arg9[%c0, %c0_0, %c0_1] : memref<18x18x128xbf16, #tpu.memory_space<vmem>>, vector<18x18x128xbf16>
    tpu.vector_store %arg9[%c0, %c0_0, %c0_1], %0 {strides = array<i32>} : memref<18x18x128xbf16, #tpu.memory_space<vmem>>, vector<18x18x128xbf16>,
    %cst_2 = arith.constant 0.000000e+00 : bf16
    %2 = vector.broadcast %cst_2 : bf16 to vector<18x18x256xbf16>
    %c0_3 = arith.constant 0 : index
    %c0_4 = arith.constant 0 : index
    %c0_5 = arith.constant 0 : index
    %3 = vector.load %arg10[%c0_3, %c0_4, %c0_5] : memref<18x18x256xbf16, #tpu.memory_space<vmem>>, vector<18x18x256xbf16>
    tpu.vector_store %arg10[%c0_3, %c0_4, %c0_5], %2 {strides = array<i32>} : memref<18x18x256xbf16, #tpu.memory_space<vmem>>, vector<18x18x256xbf16>,
    %c0_6 = arith.constant 0 : index
    %c0_7 = arith.constant 0 : index
    %c0_8 = arith.constant 0 : index
    %4 = vector.load %arg1[%c0_6, %c0_7, %c0_8] : memref<1x256x36xbf16, #tpu.memory_space<vmem>>, vector<1x256x36xbf16>
    %5 = vector.shape_cast %4 : vector<1x256x36xbf16> to vector<256x36xbf16>
    %c0_9 = arith.constant 0 : index
    %c0_10 = arith.constant 0 : index
    %6 = vector.load %arg2[%c0_9, %c0_10] : memref<36x128xbf16, #tpu.memory_space<vmem>>, vector<36x128xbf16>
    %cst_11 = arith.constant dense<0.000000e+00> : vector<256x128xf32>
    %7 = tpu.matmul %5, %6, %cst_11 {dimension_numbers = #tpu.dot_dimension_numbers<[1], [0], [0], [1], [0, 0, 1, 1], [], []>} : vector<256x36xbf16>, vector<36x128xbf16>, vector<256x128xf32> -> vector<256x128xf32>
    %c0_12 = arith.constant 0 : index
    %c0_13 = arith.constant 0 : index
    %8 = vector.load %arg3[%c0_12, %c0_13] : memref<1x128xf32, #tpu.memory_space<vmem>>, vector<1x128xf32>
    %9 = vector.broadcast %8 : vector<1x128xf32> to vector<256x128xf32>
    %10 = arith.addf %7, %9 : vector<256x128xf32>
    %cst_14 = arith.constant 0.000000e+00 : f32
    %11 = vector.broadcast %cst_14 : f32 to vector<256x128xf32>
    %12 = arith.maximumf %10, %11 : vector<256x128xf32>
    %13 = vector.shape_cast %12 : vector<256x128xf32> to vector<16x16x128xf32>
    %14 = arith.truncf %13 : vector<16x16x128xf32> to vector<16x16x128xbf16>
    %c1 = arith.constant 1 : index
    %c1_15 = arith.constant 1 : index
    %c0_16 = arith.constant 0 : index
    %15 = vector.load %arg9[%c1, %c1_15, %c0_16] : memref<18x18x128xbf16, #tpu.memory_space<vmem>>, vector<16x16x128xbf16>
    tpu.vector_store %arg9[%c1, %c1_15, %c0_16], %14 {strides = array<i32>} : memref<18x18x128xbf16, #tpu.memory_space<vmem>>, vector<16x16x128xbf16>,
    %c0_17 = arith.constant 0 : index
    %c0_18 = arith.constant 0 : index
    %c0_19 = arith.constant 0 : index
    %16 = vector.load %arg9[%c0_17, %c0_18, %c0_19] : memref<18x18x128xbf16, #tpu.memory_space<vmem>>, vector<8x16x128xbf16>
    %17 = vector.shape_cast %16 : vector<8x16x128xbf16> to vector<128x128xbf16>
    %c0_20 = arith.constant 0 : index
    %c1_21 = arith.constant 1 : index
    %c0_22 = arith.constant 0 : index
    %18 = vector.load %arg9[%c0_20, %c1_21, %c0_22] : memref<18x18x128xbf16, #tpu.memory_space<vmem>>, vector<8x16x128xbf16>
    %19 = vector.shape_cast %18 : vector<8x16x128xbf16> to vector<128x128xbf16>
    %c0_23 = arith.constant 0 : index
    %c2 = arith.constant 2 : index
    %c0_24 = arith.constant 0 : index
    %20 = vector.load %arg9[%c0_23, %c2, %c0_24] : memref<18x18x128xbf16, #tpu.memory_space<vmem>>, vector<8x16x128xbf16>
    %21 = vector.shape_cast %20 : vector<8x16x128xbf16> to vector<128x128xbf16>
    %c1_25 = arith.constant 1 : index
    %c0_26 = arith.constant 0 : index
    %c0_27 = arith.constant 0 : index
    %22 = vector.load %arg9[%c1_25, %c0_26, %c0_27] : memref<18x18x128xbf16, #tpu.memory_space<vmem>>, vector<8x16x128xbf16>
    %23 = vector.shape_cast %22 : vector<8x16x128xbf16> to vector<128x128xbf16>
    %c1_28 = arith.constant 1 : index
    %c1_29 = arith.constant 1 : index
    %c0_30 = arith.constant 0 : index
    %24 = vector.load %arg9[%c1_28, %c1_29, %c0_30] : memref<18x18x128xbf16, #tpu.memory_space<vmem>>, vector<8x16x128xbf16>
    %25 = vector.shape_cast %24 : vector<8x16x128xbf16> to vector<128x128xbf16>
    %c1_31 = arith.constant 1 : index
    %c2_32 = arith.constant 2 : index
    %c0_33 = arith.constant 0 : index
    %26 = vector.load %arg9[%c1_31, %c2_32, %c0_33] : memref<18x18x128xbf16, #tpu.memory_space<vmem>>, vector<8x16x128xbf16>
    %27 = vector.shape_cast %26 : vector<8x16x128xbf16> to vector<128x128xbf16>
    %c2_34 = arith.constant 2 : index
    %c0_35 = arith.constant 0 : index
    %c0_36 = arith.constant 0 : index
    %28 = vector.load %arg9[%c2_34, %c0_35, %c0_36] : memref<18x18x128xbf16, #tpu.memory_space<vmem>>, vector<8x16x128xbf16>
    %29 = vector.shape_cast %28 : vector<8x16x128xbf16> to vector<128x128xbf16>
    %c2_37 = arith.constant 2 : index
    %c1_38 = arith.constant 1 : index
    %c0_39 = arith.constant 0 : index
    %30 = vector.load %arg9[%c2_37, %c1_38, %c0_39] : memref<18x18x128xbf16, #tpu.memory_space<vmem>>, vector<8x16x128xbf16>
    %31 = vector.shape_cast %30 : vector<8x16x128xbf16> to vector<128x128xbf16>
    %c2_40 = arith.constant 2 : index
    %c2_41 = arith.constant 2 : index
    %c0_42 = arith.constant 0 : index
    %32 = vector.load %arg9[%c2_40, %c2_41, %c0_42] : memref<18x18x128xbf16, #tpu.memory_space<vmem>>, vector<8x16x128xbf16>
    %33 = vector.shape_cast %32 : vector<8x16x128xbf16> to vector<128x128xbf16>
    %34 = tpu.concatenate %17, %19, %21, %23, %25, %27, %29, %31, %33 in 1 : vector<128x128xbf16>, vector<128x128xbf16>, vector<128x128xbf16>, vector<128x128xbf16>, vector<128x128xbf16>, vector<128x128xbf16>, vector<128x128xbf16>, vector<128x128xbf16>, vector<128x128xbf16> -> vector<128x1152xbf16>
    %c0_43 = arith.constant 0 : index
    %c0_44 = arith.constant 0 : index
    %35 = vector.load %arg4[%c0_43, %c0_44] : memref<1152x256xbf16, #tpu.memory_space<vmem>>, vector<1152x256xbf16>
    %cst_45 = arith.constant dense<0.000000e+00> : vector<128x256xf32>
    %36 = tpu.matmul %34, %35, %cst_45 {dimension_numbers = #tpu.dot_dimension_numbers<[1], [0], [0], [1], [0, 0, 1, 1], [], []>} : vector<128x1152xbf16>, vector<1152x256xbf16>, vector<128x256xf32> -> vector<128x256xf32>
    %c0_46 = arith.constant 0 : index
    %c0_47 = arith.constant 0 : index
    %37 = vector.load %arg5[%c0_46, %c0_47] : memref<1x256xf32, #tpu.memory_space<vmem>>, vector<1x256xf32>
    %38 = vector.broadcast %37 : vector<1x256xf32> to vector<128x256xf32>
    %39 = arith.addf %36, %38 : vector<128x256xf32>
    %cst_48 = arith.constant 0.000000e+00 : f32
    %40 = vector.broadcast %cst_48 : f32 to vector<128x256xf32>
    %41 = arith.maximumf %39, %40 : vector<128x256xf32>
    %42 = vector.shape_cast %41 : vector<128x256xf32> to vector<8x16x256xf32>
    %43 = arith.truncf %42 : vector<8x16x256xf32> to vector<8x16x256xbf16>
    %c1_49 = arith.constant 1 : index
    %c1_50 = arith.constant 1 : index
    %c0_51 = arith.constant 0 : index
    %44 = vector.load %arg10[%c1_49, %c1_50, %c0_51] : memref<18x18x256xbf16, #tpu.memory_space<vmem>>, vector<8x16x256xbf16>
    tpu.vector_store %arg10[%c1_49, %c1_50, %c0_51], %43 {strides = array<i32>} : memref<18x18x256xbf16, #tpu.memory_space<vmem>>, vector<8x16x256xbf16>,
    %c8 = arith.constant 8 : index
    %c0_52 = arith.constant 0 : index
    %c0_53 = arith.constant 0 : index
    %45 = vector.load %arg9[%c8, %c0_52, %c0_53] : memref<18x18x128xbf16, #tpu.memory_space<vmem>>, vector<8x16x128xbf16>
    %46 = vector.shape_cast %45 : vector<8x16x128xbf16> to vector<128x128xbf16>
    %c8_54 = arith.constant 8 : index
    %c1_55 = arith.constant 1 : index
    %c0_56 = arith.constant 0 : index
    %47 = vector.load %arg9[%c8_54, %c1_55, %c0_56] : memref<18x18x128xbf16, #tpu.memory_space<vmem>>, vector<8x16x128xbf16>
    %48 = vector.shape_cast %47 : vector<8x16x128xbf16> to vector<128x128xbf16>
    %c8_57 = arith.constant 8 : index
    %c2_58 = arith.constant 2 : index
    %c0_59 = arith.constant 0 : index
    %49 = vector.load %arg9[%c8_57, %c2_58, %c0_59] : memref<18x18x128xbf16, #tpu.memory_space<vmem>>, vector<8x16x128xbf16>
    %50 = vector.shape_cast %49 : vector<8x16x128xbf16> to vector<128x128xbf16>
    %c9 = arith.constant 9 : index
    %c0_60 = arith.constant 0 : index
    %c0_61 = arith.constant 0 : index
    %51 = vector.load %arg9[%c9, %c0_60, %c0_61] : memref<18x18x128xbf16, #tpu.memory_space<vmem>>, vector<8x16x128xbf16>
    %52 = vector.shape_cast %51 : vector<8x16x128xbf16> to vector<128x128xbf16>
    %c9_62 = arith.constant 9 : index
    %c1_63 = arith.constant 1 : index
    %c0_64 = arith.constant 0 : index
    %53 = vector.load %arg9[%c9_62, %c1_63, %c0_64] : memref<18x18x128xbf16, #tpu.memory_space<vmem>>, vector<8x16x128xbf16>
    %54 = vector.shape_cast %53 : vector<8x16x128xbf16> to vector<128x128xbf16>
    %c9_65 = arith.constant 9 : index
    %c2_66 = arith.constant 2 : index
    %c0_67 = arith.constant 0 : index
    %55 = vector.load %arg9[%c9_65, %c2_66, %c0_67] : memref<18x18x128xbf16, #tpu.memory_space<vmem>>, vector<8x16x128xbf16>
    %56 = vector.shape_cast %55 : vector<8x16x128xbf16> to vector<128x128xbf16>
    %c10 = arith.constant 10 : index
    %c0_68 = arith.constant 0 : index
    %c0_69 = arith.constant 0 : index
    %57 = vector.load %arg9[%c10, %c0_68, %c0_69] : memref<18x18x128xbf16, #tpu.memory_space<vmem>>, vector<8x16x128xbf16>
    %58 = vector.shape_cast %57 : vector<8x16x128xbf16> to vector<128x128xbf16>
    %c10_70 = arith.constant 10 : index
    %c1_71 = arith.constant 1 : index
    %c0_72 = arith.constant 0 : index
    %59 = vector.load %arg9[%c10_70, %c1_71, %c0_72] : memref<18x18x128xbf16, #tpu.memory_space<vmem>>, vector<8x16x128xbf16>
    %60 = vector.shape_cast %59 : vector<8x16x128xbf16> to vector<128x128xbf16>
    %c10_73 = arith.constant 10 : index
    %c2_74 = arith.constant 2 : index
    %c0_75 = arith.constant 0 : index
    %61 = vector.load %arg9[%c10_73, %c2_74, %c0_75] : memref<18x18x128xbf16, #tpu.memory_space<vmem>>, vector<8x16x128xbf16>
    %62 = vector.shape_cast %61 : vector<8x16x128xbf16> to vector<128x128xbf16>
    %63 = tpu.concatenate %46, %48, %50, %52, %54, %56, %58, %60, %62 in 1 : vector<128x128xbf16>, vector<128x128xbf16>, vector<128x128xbf16>, vector<128x128xbf16>, vector<128x128xbf16>, vector<128x128xbf16>, vector<128x128xbf16>, vector<128x128xbf16>, vector<128x128xbf16> -> vector<128x1152xbf16>
    %c0_76 = arith.constant 0 : index
    %c0_77 = arith.constant 0 : index
    %64 = vector.load %arg4[%c0_76, %c0_77] : memref<1152x256xbf16, #tpu.memory_space<vmem>>, vector<1152x256xbf16>
    %cst_78 = arith.constant dense<0.000000e+00> : vector<128x256xf32>
    %65 = tpu.matmul %63, %64, %cst_78 {dimension_numbers = #tpu.dot_dimension_numbers<[1], [0], [0], [1], [0, 0, 1, 1], [], []>} : vector<128x1152xbf16>, vector<1152x256xbf16>, vector<128x256xf32> -> vector<128x256xf32>
    %c0_79 = arith.constant 0 : index
    %c0_80 = arith.constant 0 : index
    %66 = vector.load %arg5[%c0_79, %c0_80] : memref<1x256xf32, #tpu.memory_space<vmem>>, vector<1x256xf32>
    %67 = vector.broadcast %66 : vector<1x256xf32> to vector<128x256xf32>
    %68 = arith.addf %65, %67 : vector<128x256xf32>
    %cst_81 = arith.constant 0.000000e+00 : f32
    %69 = vector.broadcast %cst_81 : f32 to vector<128x256xf32>
    %70 = arith.maximumf %68, %69 : vector<128x256xf32>
    %71 = vector.shape_cast %70 : vector<128x256xf32> to vector<8x16x256xf32>
    %72 = arith.truncf %71 : vector<8x16x256xf32> to vector<8x16x256xbf16>
    %c9_82 = arith.constant 9 : index
    %c1_83 = arith.constant 1 : index
    %c0_84 = arith.constant 0 : index
    %73 = vector.load %arg10[%c9_82, %c1_83, %c0_84] : memref<18x18x256xbf16, #tpu.memory_space<vmem>>, vector<8x16x256xbf16>
    tpu.vector_store %arg10[%c9_82, %c1_83, %c0_84], %72 {strides = array<i32>} : memref<18x18x256xbf16, #tpu.memory_space<vmem>>, vector<8x16x256xbf16>,
    %c0_85 = arith.constant 0 : index
    %c0_86 = arith.constant 0 : index
    %c0_87 = arith.constant 0 : index
    %74 = vector.load %arg10[%c0_85, %c0_86, %c0_87] : memref<18x18x256xbf16, #tpu.memory_space<vmem>>, vector<8x16x256xbf16>
    %75 = vector.shape_cast %74 : vector<8x16x256xbf16> to vector<128x256xbf16>
    %c0_88 = arith.constant 0 : index
    %c1_89 = arith.constant 1 : index
    %c0_90 = arith.constant 0 : index
    %76 = vector.load %arg10[%c0_88, %c1_89, %c0_90] : memref<18x18x256xbf16, #tpu.memory_space<vmem>>, vector<8x16x256xbf16>
    %77 = vector.shape_cast %76 : vector<8x16x256xbf16> to vector<128x256xbf16>
    %c0_91 = arith.constant 0 : index
    %c2_92 = arith.constant 2 : index
    %c0_93 = arith.constant 0 : index
    %78 = vector.load %arg10[%c0_91, %c2_92, %c0_93] : memref<18x18x256xbf16, #tpu.memory_space<vmem>>, vector<8x16x256xbf16>
    %79 = vector.shape_cast %78 : vector<8x16x256xbf16> to vector<128x256xbf16>
    %c1_94 = arith.constant 1 : index
    %c0_95 = arith.constant 0 : index
    %c0_96 = arith.constant 0 : index
    %80 = vector.load %arg10[%c1_94, %c0_95, %c0_96] : memref<18x18x256xbf16, #tpu.memory_space<vmem>>, vector<8x16x256xbf16>
    %81 = vector.shape_cast %80 : vector<8x16x256xbf16> to vector<128x256xbf16>
    %c1_97 = arith.constant 1 : index
    %c1_98 = arith.constant 1 : index
    %c0_99 = arith.constant 0 : index
    %82 = vector.load %arg10[%c1_97, %c1_98, %c0_99] : memref<18x18x256xbf16, #tpu.memory_space<vmem>>, vector<8x16x256xbf16>
    %83 = vector.shape_cast %82 : vector<8x16x256xbf16> to vector<128x256xbf16>
    %c1_100 = arith.constant 1 : index
    %c2_101 = arith.constant 2 : index
    %c0_102 = arith.constant 0 : index
    %84 = vector.load %arg10[%c1_100, %c2_101, %c0_102] : memref<18x18x256xbf16, #tpu.memory_space<vmem>>, vector<8x16x256xbf16>
    %85 = vector.shape_cast %84 : vector<8x16x256xbf16> to vector<128x256xbf16>
    %c2_103 = arith.constant 2 : index
    %c0_104 = arith.constant 0 : index
    %c0_105 = arith.constant 0 : index
    %86 = vector.load %arg10[%c2_103, %c0_104, %c0_105] : memref<18x18x256xbf16, #tpu.memory_space<vmem>>, vector<8x16x256xbf16>
    %87 = vector.shape_cast %86 : vector<8x16x256xbf16> to vector<128x256xbf16>
    %c2_106 = arith.constant 2 : index
    %c1_107 = arith.constant 1 : index
    %c0_108 = arith.constant 0 : index
    %88 = vector.load %arg10[%c2_106, %c1_107, %c0_108] : memref<18x18x256xbf16, #tpu.memory_space<vmem>>, vector<8x16x256xbf16>
    %89 = vector.shape_cast %88 : vector<8x16x256xbf16> to vector<128x256xbf16>
    %c2_109 = arith.constant 2 : index
    %c2_110 = arith.constant 2 : index
    %c0_111 = arith.constant 0 : index
    %90 = vector.load %arg10[%c2_109, %c2_110, %c0_111] : memref<18x18x256xbf16, #tpu.memory_space<vmem>>, vector<8x16x256xbf16>
    %91 = vector.shape_cast %90 : vector<8x16x256xbf16> to vector<128x256xbf16>
    %92 = tpu.concatenate %75, %77, %79, %81, %83, %85, %87, %89, %91 in 1 : vector<128x256xbf16>, vector<128x256xbf16>, vector<128x256xbf16>, vector<128x256xbf16>, vector<128x256xbf16>, vector<128x256xbf16>, vector<128x256xbf16>, vector<128x256xbf16>, vector<128x256xbf16> -> vector<128x2304xbf16>
    %c0_112 = arith.constant 0 : index
    %c0_113 = arith.constant 0 : index
    %93 = vector.load %arg6[%c0_112, %c0_113] : memref<2304x128xbf16, #tpu.memory_space<vmem>>, vector<2304x128xbf16>
    %cst_114 = arith.constant dense<0.000000e+00> : vector<128x128xf32>
    %94 = tpu.matmul %92, %93, %cst_114 {dimension_numbers = #tpu.dot_dimension_numbers<[1], [0], [0], [1], [0, 0, 1, 1], [], []>} : vector<128x2304xbf16>, vector<2304x128xbf16>, vector<128x128xf32> -> vector<128x128xf32>
    %c0_115 = arith.constant 0 : index
    %c0_116 = arith.constant 0 : index
    %95 = vector.load %arg7[%c0_115, %c0_116] : memref<1x128xf32, #tpu.memory_space<vmem>>, vector<1x128xf32>
    %96 = vector.broadcast %95 : vector<1x128xf32> to vector<128x128xf32>
    %97 = arith.addf %94, %96 : vector<128x128xf32>
    %cst_117 = arith.constant 0.000000e+00 : f32
    %98 = vector.broadcast %cst_117 : f32 to vector<128x128xf32>
    %99 = arith.maximumf %97, %98 : vector<128x128xf32>
    %100 = vector.shape_cast %99 : vector<128x128xf32> to vector<4x2x16x128xf32>
    %101 = vector.extract_strided_slice %100 {offsets = [0, 0, 0, 0], sizes = [4, 1, 16, 128], strides = [1, 1, 1, 1]} : vector<4x2x16x128xf32> to vector<4x1x16x128xf32>
    %102 = vector.shape_cast %101 : vector<4x1x16x128xf32> to vector<4x16x128xf32>
    %103 = vector.extract_strided_slice %100 {offsets = [0, 1, 0, 0], sizes = [4, 1, 16, 128], strides = [1, 1, 1, 1]} : vector<4x2x16x128xf32> to vector<4x1x16x128xf32>
    %104 = vector.shape_cast %103 : vector<4x1x16x128xf32> to vector<4x16x128xf32>
    %105 = arith.maximumf %102, %104 : vector<4x16x128xf32>
    %106 = vector.shape_cast %105 : vector<4x16x128xf32> to vector<64x128xf32>
    %c0_118 = arith.constant 0 : index
    %c0_119 = arith.constant 0 : index
    %107 = vector.load %arg11[%c0_118, %c0_119] : memref<64x128xf32, #tpu.memory_space<vmem>>, vector<64x128xf32>
    tpu.vector_store %arg11[%c0_118, %c0_119], %106 {strides = array<i32>} : memref<64x128xf32, #tpu.memory_space<vmem>>, vector<64x128xf32>,
    %c0_120 = arith.constant 0 : index
    %c0_121 = arith.constant 0 : index
    %108 = tpu.strided_load %arg11[%c0_120, %c0_121] {strides = array<i32: 2, 1>} : memref<64x128xf32, #tpu.memory_space<vmem>>, vector<32x128xf32>
    %c1_122 = arith.constant 1 : index
    %c0_123 = arith.constant 0 : index
    %109 = tpu.strided_load %arg11[%c1_122, %c0_123] {strides = array<i32: 2, 1>} : memref<64x128xf32, #tpu.memory_space<vmem>>, vector<32x128xf32>
    %110 = arith.maximumf %108, %109 : vector<32x128xf32>
    %111 = vector.shape_cast %110 : vector<32x128xf32> to vector<4x8x128xf32>
    %c0_124 = arith.constant 0 : index
    %c0_125 = arith.constant 0 : index
    %c0_126 = arith.constant 0 : index
    %c0_127 = arith.constant 0 : index
    %112 = vector.load %arg8[%c0_124, %c0_125, %c0_126, %c0_127] : memref<1x8x8x128xf32, #tpu.memory_space<vmem>>, vector<1x4x8x128xf32>
    %113 = vector.shape_cast %112 : vector<1x4x8x128xf32> to vector<4x8x128xf32>
    %114 = vector.shape_cast %111 : vector<4x8x128xf32> to vector<1x4x8x128xf32>
    tpu.vector_store %arg8[%c0_124, %c0_125, %c0_126, %c0_127], %114 {strides = array<i32>} : memref<1x8x8x128xf32, #tpu.memory_space<vmem>>, vector<1x4x8x128xf32>,
    %c8_128 = arith.constant 8 : index
    %c0_129 = arith.constant 0 : index
    %c0_130 = arith.constant 0 : index
    %115 = vector.load %arg10[%c8_128, %c0_129, %c0_130] : memref<18x18x256xbf16, #tpu.memory_space<vmem>>, vector<8x16x256xbf16>
    %116 = vector.shape_cast %115 : vector<8x16x256xbf16> to vector<128x256xbf16>
    %c8_131 = arith.constant 8 : index
    %c1_132 = arith.constant 1 : index
    %c0_133 = arith.constant 0 : index
    %117 = vector.load %arg10[%c8_131, %c1_132, %c0_133] : memref<18x18x256xbf16, #tpu.memory_space<vmem>>, vector<8x16x256xbf16>
    %118 = vector.shape_cast %117 : vector<8x16x256xbf16> to vector<128x256xbf16>
    %c8_134 = arith.constant 8 : index
    %c2_135 = arith.constant 2 : index
    %c0_136 = arith.constant 0 : index
    %119 = vector.load %arg10[%c8_134, %c2_135, %c0_136] : memref<18x18x256xbf16, #tpu.memory_space<vmem>>, vector<8x16x256xbf16>
    %120 = vector.shape_cast %119 : vector<8x16x256xbf16> to vector<128x256xbf16>
    %c9_137 = arith.constant 9 : index
    %c0_138 = arith.constant 0 : index
    %c0_139 = arith.constant 0 : index
    %121 = vector.load %arg10[%c9_137, %c0_138, %c0_139] : memref<18x18x256xbf16, #tpu.memory_space<vmem>>, vector<8x16x256xbf16>
    %122 = vector.shape_cast %121 : vector<8x16x256xbf16> to vector<128x256xbf16>
    %c9_140 = arith.constant 9 : index
    %c1_141 = arith.constant 1 : index
    %c0_142 = arith.constant 0 : index
    %123 = vector.load %arg10[%c9_140, %c1_141, %c0_142] : memref<18x18x256xbf16, #tpu.memory_space<vmem>>, vector<8x16x256xbf16>
    %124 = vector.shape_cast %123 : vector<8x16x256xbf16> to vector<128x256xbf16>
    %c9_143 = arith.constant 9 : index
    %c2_144 = arith.constant 2 : index
    %c0_145 = arith.constant 0 : index
    %125 = vector.load %arg10[%c9_143, %c2_144, %c0_145] : memref<18x18x256xbf16, #tpu.memory_space<vmem>>, vector<8x16x256xbf16>
    %126 = vector.shape_cast %125 : vector<8x16x256xbf16> to vector<128x256xbf16>
    %c10_146 = arith.constant 10 : index
    %c0_147 = arith.constant 0 : index
    %c0_148 = arith.constant 0 : index
    %127 = vector.load %arg10[%c10_146, %c0_147, %c0_148] : memref<18x18x256xbf16, #tpu.memory_space<vmem>>, vector<8x16x256xbf16>
    %128 = vector.shape_cast %127 : vector<8x16x256xbf16> to vector<128x256xbf16>
    %c10_149 = arith.constant 10 : index
    %c1_150 = arith.constant 1 : index
    %c0_151 = arith.constant 0 : index
    %129 = vector.load %arg10[%c10_149, %c1_150, %c0_151] : memref<18x18x256xbf16, #tpu.memory_space<vmem>>, vector<8x16x256xbf16>
    %130 = vector.shape_cast %129 : vector<8x16x256xbf16> to vector<128x256xbf16>
    %c10_152 = arith.constant 10 : index
    %c2_153 = arith.constant 2 : index
    %c0_154 = arith.constant 0 : index
    %131 = vector.load %arg10[%c10_152, %c2_153, %c0_154] : memref<18x18x256xbf16, #tpu.memory_space<vmem>>, vector<8x16x256xbf16>
    %132 = vector.shape_cast %131 : vector<8x16x256xbf16> to vector<128x256xbf16>
    %133 = tpu.concatenate %116, %118, %120, %122, %124, %126, %128, %130, %132 in 1 : vector<128x256xbf16>, vector<128x256xbf16>, vector<128x256xbf16>, vector<128x256xbf16>, vector<128x256xbf16>, vector<128x256xbf16>, vector<128x256xbf16>, vector<128x256xbf16>, vector<128x256xbf16> -> vector<128x2304xbf16>
    %c0_155 = arith.constant 0 : index
    %c0_156 = arith.constant 0 : index
    %134 = vector.load %arg6[%c0_155, %c0_156] : memref<2304x128xbf16, #tpu.memory_space<vmem>>, vector<2304x128xbf16>
    %cst_157 = arith.constant dense<0.000000e+00> : vector<128x128xf32>
    %135 = tpu.matmul %133, %134, %cst_157 {dimension_numbers = #tpu.dot_dimension_numbers<[1], [0], [0], [1], [0, 0, 1, 1], [], []>} : vector<128x2304xbf16>, vector<2304x128xbf16>, vector<128x128xf32> -> vector<128x128xf32>
    %c0_158 = arith.constant 0 : index
    %c0_159 = arith.constant 0 : index
    %136 = vector.load %arg7[%c0_158, %c0_159] : memref<1x128xf32, #tpu.memory_space<vmem>>, vector<1x128xf32>
    %137 = vector.broadcast %136 : vector<1x128xf32> to vector<128x128xf32>
    %138 = arith.addf %135, %137 : vector<128x128xf32>
    %cst_160 = arith.constant 0.000000e+00 : f32
    %139 = vector.broadcast %cst_160 : f32 to vector<128x128xf32>
    %140 = arith.maximumf %138, %139 : vector<128x128xf32>
    %141 = vector.shape_cast %140 : vector<128x128xf32> to vector<4x2x16x128xf32>
    %142 = vector.extract_strided_slice %141 {offsets = [0, 0, 0, 0], sizes = [4, 1, 16, 128], strides = [1, 1, 1, 1]} : vector<4x2x16x128xf32> to vector<4x1x16x128xf32>
    %143 = vector.shape_cast %142 : vector<4x1x16x128xf32> to vector<4x16x128xf32>
    %144 = vector.extract_strided_slice %141 {offsets = [0, 1, 0, 0], sizes = [4, 1, 16, 128], strides = [1, 1, 1, 1]} : vector<4x2x16x128xf32> to vector<4x1x16x128xf32>
    %145 = vector.shape_cast %144 : vector<4x1x16x128xf32> to vector<4x16x128xf32>
    %146 = arith.maximumf %143, %145 : vector<4x16x128xf32>
    %147 = vector.shape_cast %146 : vector<4x16x128xf32> to vector<64x128xf32>
    %c0_161 = arith.constant 0 : index
    %c0_162 = arith.constant 0 : index
    %148 = vector.load %arg11[%c0_161, %c0_162] : memref<64x128xf32, #tpu.memory_space<vmem>>, vector<64x128xf32>
    tpu.vector_store %arg11[%c0_161, %c0_162], %147 {strides = array<i32>} : memref<64x128xf32, #tpu.memory_space<vmem>>, vector<64x128xf32>,
    %c0_163 = arith.constant 0 : index
    %c0_164 = arith.constant 0 : index
    %149 = tpu.strided_load %arg11[%c0_163, %c0_164] {strides = array<i32: 2, 1>} : memref<64x128xf32, #tpu.memory_space<vmem>>, vector<32x128xf32>
    %c1_165 = arith.constant 1 : index
    %c0_166 = arith.constant 0 : index
    %150 = tpu.strided_load %arg11[%c1_165, %c0_166] {strides = array<i32: 2, 1>} : memref<64x128xf32, #tpu.memory_space<vmem>>, vector<32x128xf32>
    %151 = arith.maximumf %149, %150 : vector<32x128xf32>
    %152 = vector.shape_cast %151 : vector<32x128xf32> to vector<4x8x128xf32>
    %c0_167 = arith.constant 0 : index
    %c4 = arith.constant 4 : index
    %c0_168 = arith.constant 0 : index
    %c0_169 = arith.constant 0 : index
    %153 = vector.load %arg8[%c0_167, %c4, %c0_168, %c0_169] : memref<1x8x8x128xf32, #tpu.memory_space<vmem>>, vector<1x4x8x128xf32>
    %154 = vector.shape_cast %153 : vector<1x4x8x128xf32> to vector<4x8x128xf32>
    %155 = vector.shape_cast %152 : vector<4x8x128xf32> to vector<1x4x8x128xf32>
    tpu.vector_store %arg8[%c0_167, %c4, %c0_168, %c0_169], %155 {strides = array<i32>} : memref<1x8x8x128xf32, #tpu.memory_space<vmem>>, vector<1x4x8x128xf32>,
    return
  }
  func.func @transform_0(%arg0: i32) -> (i32, i32, i32) {
    %c0_i32 = arith.constant 0 : i32
    %c0_i32_0 = arith.constant 0 : i32
    %c0_i32_1 = arith.constant 0 : i32
    return %arg0, %c0_i32, %c0_i32_0 : i32, i32, i32
  }
  func.func @transform_1(%arg0: i32) -> (i32, i32) {
    %c0_i32 = arith.constant 0 : i32
    %c0_i32_0 = arith.constant 0 : i32
    %c0_i32_1 = arith.constant 0 : i32
    return %c0_i32, %c0_i32_0 : i32, i32
  }
  func.func @transform_2(%arg0: i32) -> (i32, i32) {
    %c0_i32 = arith.constant 0 : i32
    %c0_i32_0 = arith.constant 0 : i32
    %c0_i32_1 = arith.constant 0 : i32
    return %c0_i32, %c0_i32_0 : i32, i32
  }
  func.func @transform_3(%arg0: i32) -> (i32, i32) {
    %c0_i32 = arith.constant 0 : i32
    %c0_i32_0 = arith.constant 0 : i32
    %c0_i32_1 = arith.constant 0 : i32
    return %c0_i32, %c0_i32_0 : i32, i32
  }
  func.func @transform_4(%arg0: i32) -> (i32, i32) {
    %c0_i32 = arith.constant 0 : i32
    %c0_i32_0 = arith.constant 0 : i32
    %c0_i32_1 = arith.constant 0 : i32
    return %c0_i32, %c0_i32_0 : i32, i32
  }
  func.func @transform_5(%arg0: i32) -> (i32, i32) {
    %c0_i32 = arith.constant 0 : i32
    %c0_i32_0 = arith.constant 0 : i32
    %c0_i32_1 = arith.constant 0 : i32
    return %c0_i32, %c0_i32_0 : i32, i32
  }
  func.func @transform_6(%arg0: i32) -> (i32, i32) {
    %c0_i32 = arith.constant 0 : i32
    %c0_i32_0 = arith.constant 0 : i32
    %c0_i32_1 = arith.constant 0 : i32
    return %c0_i32, %c0_i32_0 : i32, i32
  }
  func.func @transform_7(%arg0: i32) -> (i32, i32, i32, i32) {
    %c0_i32 = arith.constant 0 : i32
    %c0_i32_0 = arith.constant 0 : i32
    %c0_i32_1 = arith.constant 0 : i32
    %c0_i32_2 = arith.constant 0 : i32
    return %arg0, %c0_i32, %c0_i32_0, %c0_i32_1 : i32, i32, i32, i32
  }
}

</mosaic_0001>

<bundles_post_ra>
// kernel: tpu_custom_call.1
= control target key start
LH: loop header
LB: loop body
LE: loop exit
PB: predicated region body
PF: predicated region fallthrough
CT: control target
= control target key end

     0   :  { %12 = vsyncpa [#allocation6], 0  ;;  %s23571_s0 = inlined_call_operand.vmem [shape: bf16[2,256,36], index: 0, kind: input, shape index: {}]   ;;  %s23572_s1 = inlined_call_operand.vmem [shape: bf16[36,128], index: 1, kind: input, shape index: {}]   ;;  %s23573_s2 = inlined_call_operand.vmem [shape: f32[1,128], index: 2, kind: input, shape index: {}]   ;;  %s23574_s3 = inlined_call_operand.hbm [shape: bf16[1152,256], index: 3, kind: input, shape index: {}]   ;;  %s23575_s4 = inlined_call_operand.vmem [shape: f32[1,256], index: 4, kind: input, shape index: {}]   ;;  %s23576_s5 = inlined_call_operand.hbm [shape: bf16[2304,128], index: 5, kind: input, shape index: {}]   ;;  %s23577_s6 = inlined_call_operand.vmem [shape: f32[1,128], index: 6, kind: input, shape index: {}]   ;;  %s23578_s7 = inlined_call_operand.hbm [shape: f32[2,8,8,128], index: 7, kind: output, shape index: {}]  }
   0x1   :  { %13 = vsyncpa [#allocation9], 0 }
   0x2   :  { %14 = vsyncpa [#allocation7], 0 }
   0x3   :  { %16 = vsyncpa [#allocation7 + $0x1], 0  ;;  %s18417_s24 = smov 0   ;;  %s18419_s25 = smov 0  }
   0x4   :  { %s18421_s26 = smov 0   ;;  %s18423_s27 = smov 0  }
   0x5 LB: > { %s18438_s28 = sadd.s32 4294967295, %s18365_s27   ;;  %s14637_s29 = sadd.s32 4294967294, %s18365_s27   ;;  %s18365_s27 = sphi %s18423_s27, %s23982_s27   ;;  %s18361_s26 = sphi %s18421_s26, %s23981_s26   ;;  %s18357_s25 = sphi %s18419_s25, %s23980_s25   ;;  %s18353_s24 = sphi %s18417_s24, %s23979_s24  }
   0x6   : > { %s18442_s30 = sadd.s32 1, %s18365_s27   ;;  %s181_s8 = sadd.s32 1, %s18361_s26 }
   0x7   : > { %s178_s9 = ssub.s32 %s18365_s27, %s18442_s30  ;;  %p191_p0 = scmp.ne.s32.totalorder %s18361_s26, %s18357_s25 }
   0x8   : > { %p179_p1 = scmp.eq.s32.totalorder %s178_s9, 0  ;;  %p192_p2 = scmp.eq.s32.totalorder %s18438_s28, 1 }
   0x9   : > { %p197_p3 = scmp.ne.s32.totalorder %s18357_s25, %s18353_s24  ;;  %p198_p4 = scmp.eq.s32.totalorder %s14637_s29, 1 }
   0xa   : > { %s18453_s10 = scalar_select %p179_p1, %s18361_s26, %s181_s8  }
   0xb   : > { %p18455_p5 = por %p192_p2, %p191_p0  ;;  %p18459_p6 = por %p198_p4, %p197_p3 }
   0xc   : > { %23679 = sst [smem:[#allocation14_spill]] %s18453_s10  ;;  %p14638_p7 = scmp.ge.s32.totalorder %s18365_s27, 1 }
   0xd   : > { %s23680_s11 = scalar_select %p18455_p5, 1, 0 }
   0xe   : > { %s23681_s12 = scalar_select %p18459_p6, 1, 0 }
   0xf   : > { %p205_p8 = scmp.lt.s32.totalorder %s18365_s27, 3  ;;  %p23579_p9 = scmp.eq.s32.totalorder %s18438_s28, 0 }
  0x10   : > { %s18367_s14 = smov [#allocation5]   ;;  %s18368_s17 = smov [#allocation8]  }
  0x11   : > { %p18466_p10 = pnand %p14638_p7, %p205_p8  ;;  %s223_s15 = sshll.u32 %s18367_s14, 4  ;;  %s224_s15 = int_to_ptr.vmem [resolvable:$true] %s223_s15 }
  0x12   : > { %s239_s18 = sshll.u32 %s18368_s17, 4  ;;  %s18239_s21 = scalar_lea.hbm %s23574_s3, 18432  ;;  %s18478_s18 = int_to_ptr.vmem [resolvable:$true] %s239_s18 }
  0x13   : > { %s23682_s13 = scalar_select %p18466_p10, 1, 0 }
  0x14   : > { %p17469_p11 = pneg %p18466_p10  ;;  %p18240_p13 = scmp.ne.s32.totalorder %s23574_s3, %s18239_s21 }
  0x15   : > { %p18246_p3 = scmp.lt.u32.totalorder %s18239_s21, %s23574_s3 }
  0x16   : > { %p18474_p12 = pnand %p23579_p9, %p17469_p11 }
  0x18   : > { %p18241_p0 = pneg %p18474_p12 }
  0x1a   : > { %p18242_p1 = pnand %p18241_p0, %p18240_p13 }
  0x1c   : > { %p18243_p2 = pneg %p18242_p1 }
  0x1e   : > { %p18248_p4 = pnand %p18246_p3, %p18243_p2 }
  0x20   : > { %18251 = shalt.err (!%p18248_p4)
}
  0x21   : > { %s18252_s9 = scalar_lea.vmem %s224_s15, 18432  ;;  %p18260_p9 = scmp.lt.s32.totalorder %s224_s15, %s224_s15 }
  0x22   : > { %p18253_p7 = scmp.ne.s32.totalorder %s224_s15, %s18252_s9  ;;  %p18261_p6 = scmp.lt.s32.totalorder %s18252_s9, %s18252_s9 }
  0x24   : > { %p18255_p8 = pnand %p18253_p7, %p18241_p0  ;;  %p18262_p5 = por %p18261_p6, %p18260_p9 }
  0x26   : > { %p18256_p11 = pneg %p18255_p8 }
  0x28   : > { %p18263_p10 = pnand %p18262_p5, %p18256_p11 }
  0x2a   : > { %18266 = shalt.err (!%p18263_p10)
}
  0x2b   : > { %s18369_s14 = smov 128   ;;  %s18370_s17 = smov 8  }
  0x2c   : > { %17472 = dma.hbm_to_vmem [thread:$0]  (!%p18474_p12), %s23574_s3, 18432, %s224_s15, [#allocation6], %s18369_s14, %s18369_s14, %s18370_s17  }
  0x2d   : > { %s18267_s23 = scalar_lea.hbm %s23576_s5, 18432 }
  0x2e   : > { %p18268_p13 = scmp.ne.s32.totalorder %s23576_s5, %s18267_s23  ;;  %p18274_p9 = scmp.lt.u32.totalorder %s18267_s23, %s23576_s5 }
  0x30   : > { %p18270_p5 = pnand %p18268_p13, %p18241_p0 }
  0x32   : > { %p18271_p6 = pneg %p18270_p5 }
  0x34   : > { %p18276_p10 = pnand %p18274_p9, %p18271_p6 }
  0x36   : > { %18279 = shalt.err (!%p18276_p10)
}
  0x37   : > { %s18280_s15 = scalar_lea.vmem %s18478_s18, 18432  ;;  %p18288_p4 = scmp.lt.s32.totalorder %s18478_s18, %s18478_s18 }
  0x38   : > { %p18281_p1 = scmp.ne.s32.totalorder %s18478_s18, %s18280_s15  ;;  %p18289_p7 = scmp.lt.s32.totalorder %s18280_s15, %s18280_s15 }
  0x3a   : > { %p18283_p2 = pnand %p18281_p1, %p18241_p0  ;;  %p18290_p8 = por %p18289_p7, %p18288_p4 }
  0x3c   : > { %p18284_p3 = pneg %p18283_p2 }
  0x3e   : > { %p18291_p11 = pnand %p18290_p8, %p18284_p3 }
  0x40   : > { %18294 = shalt.err (!%p18291_p11)
}
  0x41   : > { %s18371_s10 = smov 64   ;;  %s18372_s14 = smov 4  }
  0x42   : > { %17475 = dma.hbm_to_vmem [thread:$0]  (!%p18474_p12), %s23576_s5, 18432, %s18478_s18, [#allocation9], %s18371_s10, %s18371_s10, %s18372_s14  }
  0x43   : > { %p23684_p13 = scmp.ne.s32.totalorder %s23682_s13, 0 }
  0x45   : > { %266 = sbr.rel (%p23684_p13) target bundleno = 1787 (0x6fb), region = 48 }
  0x4c   : > { %p23685_p0 = scmp.eq.s32.totalorder %s18438_s28, 0 }
  0x4e   : > { %18340 = dma.done.wait (%p23685_p0), [#allocation6], 18432   ;;  %p23686_p5 = pmov %p23685_p0 }
  0x4f   : > { %p23687_p6 = pmov %p23685_p0 }
  0x50   : > { %18342 = vsyncadd (%p23686_p5), [#allocation6], 4294948864 }
  0x51   : > { %18344 = dma.done.wait (%p23687_p6), [#allocation9], 18432   ;;  %p23688_p9 = pmov %p23685_p0 }
  0x52   : > { %p302_p10 = scmp.lt.s32.totalorder %s18438_s28, 1  ;;  %v18373_v0 = vmov 0   ;;  %v17526_v1 = vld [vmem:[%s23572_s1] sm:$0xff]   ;;  %v17527_v2 = vld [vmem:[%s23572_s1 + $0x8] sm:$0xff]   ;;  %vm555_vm0 = vcmask 293888   ;;  %vm604_vm1 = vcmask 1041408  }
  0x53   : > { %18346 = vsyncadd (%p23688_p9), [#allocation9], 4294948864  ;;  %314 = vst [vmem:[#allocation2 + $0x18] sm:$0xf] %v18373_v0  ;;  %17100 = vmatprep.subr.bf16.mxu0 %v17526_v1  ;;  %v17545_v10 = vld [vmem:[#allocation5 + $0x4] ss:$8 sps:$4 sm:$0xff]  }
  0x54   : > { %308 = vst [vmem:[#allocation2] sm:$0xf] %v18373_v0  ;;  %309 = vst [vmem:[#allocation2 + $0x4] sm:$0xf] %v18373_v0  ;;  %s303_s13 = scalar_select %p302_p10, %s18438_s28, 1  ;;  %17101 = vmatpush3.bf16.msra.mxu0 %v17526_v1  ;;  %3445 = vmatprep.subr.bf16.mxu1 %v17545_v10  ;;  %vm1589_vm5 = vcmask 1042432  }
  0x55   : > { %310 = vst [vmem:[#allocation2 + $0x8] sm:$0x1] %v18373_v0  ;;  %311 = vst [vmem:[#allocation2 + $0xc] sm:$0xf] %v18373_v0  ;;  %17102 = vmatprep.subr.bf16.mxu0 %v17527_v2  ;;  %v17547_v11 = vld [vmem:[#allocation5] ss:$8 sps:$4 sm:$0xff]  }
  0x56   : > { %312 = vst [vmem:[#allocation2 + $0x10] sm:$0xf] %v18373_v0  ;;  %313 = vst [vmem:[#allocation2 + $0x14] sm:$0x1] %v18373_v0  ;;  %s15863_s16 = sshll.u32 %s303_s13, 7  ;;  %3446 = vmatpush1.bf16.msra.mxu1 %v17547_v11  ;;  %vm1590_vm6 = vcmask 1046532  }
  0x57   : > { %315 = vst [vmem:[#allocation2 + $0x1c] sm:$0xf] %v18373_v0  ;;  %316 = vst [vmem:[#allocation2 + $0x20] sm:$0x1] %v18373_v0  ;;  %s18618_s21 = scalar_lea.vmem %s23571_s0, %s15863_s16  ;;  %v17548_v12 = vld [vmem:[#allocation5 + $0x14] ss:$8 sps:$4 sm:$0xff]  }
  0x58   : > { %317 = vst [vmem:[#allocation2 + $0x24] sm:$0xf] %v18373_v0  ;;  %318 = vst [vmem:[#allocation2 + $0x28] sm:$0xf] %v18373_v0  ;;  %v17529_v4 = vld [vmem:[%s18618_s21] sm:$0xff]   ;;  %17103 = vmatpush3.bf16.msra.mxu0 %v17527_v2  ;;  %v17530_v6 = vld [vmem:[%s18618_s21 + $0x8] sm:$0xff]   ;;  %3447 = vmatprep.subr.bf16.mxu1 %v17548_v12 }
  0x59   : > { %319 = vst [vmem:[#allocation2 + $0x2c] sm:$0x1] %v18373_v0  ;;  %320 = vst [vmem:[#allocation2 + $0x30] sm:$0xf] %v18373_v0  ;;  %17106 = vmatprep.mubr.msk.bf16.mxu0 %vm555_vm0, %v17529_v4  ;;  %v17531_v7 = vld [vmem:[%s18618_s21 + $0x10] sm:$0xff]   ;;  %v17532_v8 = vld [vmem:[%s18618_s21 + $0x18] sm:$0xff]  }
  0x5a   : > { %321 = vst [vmem:[#allocation2 + $0x34] sm:$0xf] %v18373_v0  ;;  %322 = vst [vmem:[#allocation2 + $0x38] sm:$0x1] %v18373_v0  ;;  %v17533_v9 = vld [vmem:[%s18618_s21 + $0x20] sm:$0xff]   ;;  %v17534_v15 = vld [vmem:[%s18618_s21 + $0x28] sm:$0xff]  }
  0x5b   : > { %323 = vst [vmem:[#allocation2 + $0x3c] sm:$0xf] %v18373_v0  ;;  %324 = vst [vmem:[#allocation2 + $0x40] sm:$0xf] %v18373_v0  ;;  %v17550_v13 = vld [vmem:[#allocation5 + $0x10] ss:$8 sps:$4 sm:$0xff]  }
  0x5c   : > { %325 = vst [vmem:[#allocation2 + $0x44] sm:$0x1] %v18373_v0  ;;  %326 = vst [vmem:[#allocation2 + $0x48] sm:$0xf] %v18373_v0  ;;  %v17551_v14 = vld [vmem:[#allocation5 + $0x24] ss:$8 sps:$4 sm:$0xff]   ;;  %3448 = vmatpush1.bf16.msra.mxu1 %v17550_v13 }
  0x5d   : > { %327 = vst [vmem:[#allocation2 + $0x4c] sm:$0xf] %v18373_v0  ;;  %328 = vst [vmem:[#allocation2 + $0x50] sm:$0x1] %v18373_v0  ;;  %v17553_v16 = vld [vmem:[#allocation5 + $0x20] ss:$8 sps:$4 sm:$0xff]   ;;  %3449 = vmatprep.subr.bf16.mxu1 %v17551_v14 }
  0x5e   : > { %329 = vst [vmem:[#allocation2 + $0x54] sm:$0xf] %v18373_v0  ;;  %330 = vst [vmem:[#allocation2 + $0x58] sm:$0xf] %v18373_v0  ;;  %v17535_v17 = vld [vmem:[%s18618_s21 + $0x30] sm:$0xff]   ;;  %v17536_v21 = vld [vmem:[%s18618_s21 + $0x38] sm:$0xff]  }
  0x5f   : > { %331 = vst [vmem:[#allocation2 + $0x5c] sm:$0x1] %v18373_v0  ;;  %332 = vst [vmem:[#allocation2 + $0x60] sm:$0xf] %v18373_v0  ;;  %v17554_v18 = vld [vmem:[#allocation5 + $0x34] ss:$8 sps:$4 sm:$0xff]  }
  0x60   : > { %333 = vst [vmem:[#allocation2 + $0x64] sm:$0xf] %v18373_v0  ;;  %334 = vst [vmem:[#allocation2 + $0x68] sm:$0x1] %v18373_v0  ;;  %3450 = vmatpush1.bf16.msra.mxu1 %v17553_v16  ;;  %v17556_v19 = vld [vmem:[#allocation5 + $0x30] ss:$8 sps:$4 sm:$0xff]  }
  0x61   : > { %335 = vst [vmem:[#allocation2 + $0x6c] sm:$0xf] %v18373_v0  ;;  %336 = vst [vmem:[#allocation2 + $0x70] sm:$0xf] %v18373_v0  ;;  %v17557_v20 = vld [vmem:[#allocation5 + $0x44] ss:$8 sps:$4 sm:$0xff]   ;;  %3451 = vmatprep.subr.bf16.mxu1 %v17554_v18 }
  0x62   : > { %337 = vst [vmem:[#allocation2 + $0x74] sm:$0x1] %v18373_v0  ;;  %338 = vst [vmem:[#allocation2 + $0x78] sm:$0xf] %v18373_v0  ;;  %v17559_v22 = vld [vmem:[#allocation5 + $0x40] ss:$8 sps:$4 sm:$0xff]  }
  0x63   : > { %339 = vst [vmem:[#allocation2 + $0x7c] sm:$0xf] %v18373_v0  ;;  %340 = vst [vmem:[#allocation2 + $0x80] sm:$0x1] %v18373_v0  ;;  %v17537_v23 = vld [vmem:[%s18618_s21 + $0x40] sm:$0xff]   ;;  %v17538_v27 = vld [vmem:[%s18618_s21 + $0x48] sm:$0xff]  }
  0x64   : > { %341 = vst [vmem:[#allocation2 + $0x84] sm:$0xf] %v18373_v0  ;;  %342 = vst [vmem:[#allocation2 + $0x88] sm:$0xf] %v18373_v0  ;;  %v17560_v24 = vld [vmem:[#allocation5 + $0x54] ss:$8 sps:$4 sm:$0xff]   ;;  %3452 = vmatpush1.bf16.msra.mxu1 %v17556_v19 }
  0x65   : > { %343 = vst [vmem:[#allocation2 + $0x8c] sm:$0x1] %v18373_v0  ;;  %344 = vst [vmem:[#allocation2 + $0x90] sm:$0xf] %v18373_v0  ;;  %3453 = vmatprep.subr.bf16.mxu1 %v17557_v20  ;;  %v17562_v25 = vld [vmem:[#allocation5 + $0x50] ss:$8 sps:$4 sm:$0xff]  }
  0x66   : > { %345 = vst [vmem:[#allocation2 + $0x94] sm:$0xf] %v18373_v0  ;;  %346 = vst [vmem:[#allocation2 + $0x98] sm:$0x1] %v18373_v0  ;;  %v17563_v26 = vld [vmem:[#allocation5 + $0x64] ss:$8 sps:$4 sm:$0xff]  }
  0x67   : > { %347 = vst [vmem:[#allocation2 + $0x9c] sm:$0xf] %v18373_v0  ;;  %348 = vst [vmem:[#allocation2 + $0xa0] sm:$0xf] %v18373_v0  ;;  %v17565_v28 = vld [vmem:[#allocation5 + $0x60] ss:$8 sps:$4 sm:$0xff]  }
  0x68   : > { %349 = vst [vmem:[#allocation2 + $0xa4] sm:$0x1] %v18373_v0  ;;  %350 = vst [vmem:[#allocation2 + $0xa8] sm:$0xf] %v18373_v0  ;;  %3454 = vmatpush1.bf16.msra.mxu1 %v17559_v22  ;;  %v17539_v29 = vld [vmem:[%s18618_s21 + $0x50] sm:$0xff]   ;;  %v17540_v33 = vld [vmem:[%s18618_s21 + $0x58] sm:$0xff]  }
  0x69   : > { %351 = vst [vmem:[#allocation2 + $0xac] sm:$0xf] %v18373_v0  ;;  %352 = vst [vmem:[#allocation2 + $0xb0] sm:$0x1] %v18373_v0  ;;  %3455 = vmatprep.subr.bf16.mxu1 %v17560_v24  ;;  %v17566_v30 = vld [vmem:[#allocation5 + $0x74] ss:$8 sps:$4 sm:$0xff]  }
  0x6a   : > { %353 = vst [vmem:[#allocation2 + $0xb4] sm:$0xf] %v18373_v0  ;;  %354 = vst [vmem:[#allocation2 + $0xb8] sm:$0xf] %v18373_v0  ;;  %v17568_v31 = vld [vmem:[#allocation5 + $0x70] ss:$8 sps:$4 sm:$0xff]  }
  0x6b   : > { %355 = vst [vmem:[#allocation2 + $0xbc] sm:$0x1] %v18373_v0  ;;  %356 = vst [vmem:[#allocation2 + $0xc0] sm:$0xf] %v18373_v0  ;;  %v17569_v32 = vld [vmem:[#allocation5 + $0x84] ss:$8 sps:$4 sm:$0xff]  }
  0x6c   : > { %357 = vst [vmem:[#allocation2 + $0xc4] sm:$0xf] %v18373_v0  ;;  %358 = vst [vmem:[#allocation2 + $0xc8] sm:$0x1] %v18373_v0  ;;  %3456 = vmatpush1.bf16.msra.mxu1 %v17562_v25  ;;  %v17571_v34 = vld [vmem:[#allocation5 + $0x80] ss:$8 sps:$4 sm:$0xff]  }
  0x6d   : > { %359 = vst [vmem:[#allocation2 + $0xcc] sm:$0xf] %v18373_v0  ;;  %360 = vst [vmem:[#allocation2 + $0xd0] sm:$0xf] %v18373_v0  ;;  %3457 = vmatprep.subr.bf16.mxu1 %v17563_v26  ;;  %v17541_v35 = vld [vmem:[%s18618_s21 + $0x60] sm:$0xff]   ;;  %v17542_v36 = vld [vmem:[%s18618_s21 + $0x68] sm:$0xff]  }
  0x6e   : > { %361 = vst [vmem:[#allocation2 + $0xd4] sm:$0x1] %v18373_v0  ;;  %362 = vst [vmem:[#allocation3] sm:$0xff] %v18373_v0  ;;  %v17528_v3 = vld [vmem:[%s23572_s1 + $0x10] ss:$0 sps:$4 sm:$0x33]  }
  0x6f   : > { %364 = vst [vmem:[#allocation3 + $0x10] sm:$0x11] %v18373_v0  ;;  %367 = vst [vmem:[#allocation3 + $0x28] sm:$0x11] %v18373_v0  ;;  %17458 = vmatprep.subr.msk.bf16.mxu0 %vm604_vm1, %v17528_v3  ;;  %v606_v5 = vsel %vm604_vm1, %v17528_v3, 0  ;;  %v17543_v37 = vld [vmem:[%s18618_s21 + $0x70] sm:$0xff]  }
  0x70   : > { %370 = vst [vmem:[#allocation3 + $0x40] sm:$0x11] %v18373_v0  ;;  %373 = vst [vmem:[#allocation3 + $0x58] sm:$0x11] %v18373_v0  ;;  %17105 = vmatpush3.bf16.msra.mxu0 %v606_v5  ;;  %3458 = vmatpush1.bf16.msra.mxu1 %v17565_v28  ;;  %v17544_v38 = vld [vmem:[%s18618_s21 + $0x78] sm:$0xff]   ;;  %vm1221_vm11 = vcmask 1043456  }
  0x71   : > { %376 = vst [vmem:[#allocation3 + $0x70] sm:$0x11] %v18373_v0  ;;  %379 = vst [vmem:[#allocation3 + $0x88] sm:$0x11] %v18373_v0  ;;  %6450 = vmatprep.subr.bf16.mxu0 %v17545_v10  ;;  %3459 = vmatprep.subr.bf16.mxu1 %v17566_v30  ;;  %v17572_v39 = vld [vmem:[#allocation5 + $0x94] ss:$8 sps:$4 sm:$0xff]  }
  0x72   : > { %382 = vst [vmem:[#allocation3 + $0xa0] sm:$0x11] %v18373_v0  ;;  %385 = vst [vmem:[#allocation3 + $0xb8] sm:$0x11] %v18373_v0  ;;  %v17574_v40 = vld [vmem:[#allocation5 + $0x90] ss:$8 sps:$4 sm:$0xff]  }
  0x73   : > { %388 = vst [vmem:[#allocation3 + $0xd0] sm:$0x11] %v18373_v0  ;;  %391 = vst [vmem:[#allocation3 + $0xe8] sm:$0x11] %v18373_v0  ;;  %17107 = vmatmul.mubr.msk.bf16.vlgmr.msra.gmra.mrb[0].mxu0 %vm555_vm0, %v17530_v6  ;;  %v17575_v41 = vld [vmem:[#allocation5 + $0xa4] ss:$8 sps:$4 sm:$0xff]  }
  0x74   : > { %394 = vst [vmem:[#allocation3 + $0x100] sm:$0x11] %v18373_v0  ;;  %397 = vst [vmem:[#allocation3 + $0x118] sm:$0x11] %v18373_v0  ;;  %17110 = vmatprep.mubr.msk.bf16.mxu0 %vm555_vm0, %v17531_v7  ;;  %6451 = vmatpush1.bf16.msra.mxu0 %v17547_v11  ;;  %v17577_v42 = vld [vmem:[#allocation5 + $0xa0] ss:$8 sps:$4 sm:$0xff]  }
  0x75   : > { %400 = vst [vmem:[#allocation3 + $0x130] sm:$0x11] %v18373_v0  ;;  %403 = vst [vmem:[#allocation3 + $0x148] sm:$0x11] %v18373_v0  ;;  %6452 = vmatprep.subr.bf16.mxu0 %v17548_v12  ;;  %3460 = vmatpush1.bf16.msra.mxu1 %v17568_v31  ;;  %v17578_v43 = vld [vmem:[#allocation5 + $0xb4] ss:$8 sps:$4 sm:$0xff]  }
  0x76   : > { %406 = vst [vmem:[#allocation3 + $0x160] sm:$0x11] %v18373_v0  ;;  %409 = vst [vmem:[#allocation3 + $0x178] sm:$0x11] %v18373_v0  ;;  %3461 = vmatprep.subr.bf16.mxu1 %v17569_v32  ;;  %v17580_v44 = vld [vmem:[#allocation5 + $0xb0] ss:$8 sps:$4 sm:$0xff]  }
  0x77   : > { %412 = vst [vmem:[#allocation3 + $0x190] sm:$0x11] %v18373_v0  ;;  %413 = vst [vmem:[#allocation3 + $0x198] sm:$0xff] %v18373_v0  ;;  %v17581_v45 = vld [vmem:[#allocation5 + $0xc4] ss:$8 sps:$4 sm:$0xff]   ;;  %vm1228_vm12 = vcmask 1040384  }
  0x78   : > { %415 = vst [vmem:[#allocation3 + $0x1a8] sm:$0x11] %v18373_v0  ;;  %6453 = vmatpush1.bf16.msra.mxu0 %v17550_v13  ;;  %v17583_v46 = vld [vmem:[#allocation5 + $0xc0] ss:$8 sps:$4 sm:$0xff]   ;;  %v17584_v47 = vld [vmem:[#allocation5 + $0xd4] ss:$8 sps:$4 sm:$0xff]   ;;  %vm18675_vm7 = vmor %vm1589_vm5, %vm1590_vm6 }
  0x79   : > { %6454 = vmatprep.subr.bf16.mxu0 %v17551_v14  ;;  %3462 = vmatpush1.bf16.msra.mxu1 %v17571_v34  ;;  %v17586_v48 = vld [vmem:[#allocation5 + $0xd0] ss:$8 sps:$4 sm:$0xff]   ;;  %v18661_v50 = vld [vmem:[#allocation2 + $0x4] sm:$0xf]  ;;  %v17587_v55 = vld [vmem:[#allocation5 + $0xe4] ss:$8 sps:$4 sm:$0xff]  }
  0x7a   : > { %3463 = vmatprep.subr.bf16.mxu1 %v17572_v39  ;;  %v1338_v49 = vld [vmem:[#allocation2] sm:$0xf]  ;;  %v1375_v53 = vshll.u32 %v18661_v50, 16  ;;  %v1379_v54 = vshrl.u32 %v18661_v50, 16  ;;  %v17589_v58 = vld [vmem:[#allocation5 + $0xe0] ss:$8 sps:$4 sm:$0xff]  }
  0x7b   : > { %17111 = vmatmul.mubr.msk.bf16.gmra.mrb[4].mxu0 %vm555_vm0, %v17532_v8  ;;  %v1366_v51 = vshrl.u32 %v1338_v49, 16  ;;  %v1369_v52 = vshll.u32 %v1338_v49, 16  ;;  %v1354_v59 = vld [vmem:[#allocation2 + $0x8] sm:$0x1]  ;;  %v17590_v1 = vld [vmem:[#allocation5 + $0xf4] ss:$8 sps:$4 sm:$0xff]   ;;  %v14740_v11 = vcombine.low %v1338_v49, %v18661_v50 }
  0x7c   : > { %17114 = vmatprep.mubr.msk.bf16.mxu0 %vm555_vm0, %v17533_v9  ;;  %6455 = vmatpush1.bf16.msra.mxu0 %v17553_v16  ;;  %v1377_v60 = vrot.slane %v1375_v53, 5  ;;  %v1381_v61 = vrot.slane %v1379_v54, 4  ;;  %v1385_v63 = vshll.u32 %v1354_v59, 16  ;;  %vm1362_vm2 = vsmask.f32 3328  ;;  %s299_s8 = sand.u32 1, %s18357_s25  }
  0x7d   : > { %6456 = vmatprep.subr.bf16.mxu0 %v17554_v18  ;;  %3464 = vmatpush1.bf16.msra.mxu1 %v17574_v40  ;;  %v1368_v56 = vrot.slane %v1366_v51, 4  ;;  %v1371_v57 = vrot.slane %v1369_v52, 5  ;;  %vm1363_vm3 = vsmask.f32 7440  ;;  %v17592_v2 = vld [vmem:[#allocation5 + $0xf0] ss:$8 sps:$4 sm:$0xff]  }
  0x7e   : > { %3465 = vmatprep.subr.bf16.mxu1 %v17575_v41  ;;  %v1382_v0 = vor.u32 %v1381_v61, %v1377_v60  ;;  %vm18665_vm4 = vmor %vm1362_vm2, %vm1363_vm3  ;;  %v1387_v6 = vrot.slane %v1385_v63, 5  ;;  %v17595_v8 = vld [vmem:[#allocation5 + $0x104] ss:$8 sps:$4 sm:$0xff]   ;;  %v17593_v10 = vld [vmem:[#allocation5 + $0x100] ss:$8 sps:$4 sm:$0xff]   ;;  %v1597_v16 = vrot.slane %v1354_v59, 5 }
  0x7f   : > { %v1372_v62 = vor.u32 %v1371_v57, %v1368_v56  ;;  %v17599_v13 = vld [vmem:[#allocation5 + $0x114] ss:$8 sps:$4 sm:$0xff]   ;;  %v17597_v14 = vld [vmem:[#allocation5 + $0x110] ss:$8 sps:$4 sm:$0xff]   ;;  %vm1222_vm8 = vsmask.f32 7938 }
  0x80   : > { %6457 = vmatpush1.bf16.msra.mxu0 %v17556_v19  ;;  %v1383_v5 = vrot.slane %v1382_v0, 4  ;;  %vm897_vm9 = vsmask.f32 256  ;;  %vm898_vm10 = vsmask.f32 4368  ;;  %vm18697_vm13 = vmand %vm1221_vm11, %vm1222_vm8  ;;  %vm4291_vm2 = vcmask 1044484  }
  0x81   : > { %6458 = vmatprep.subr.bf16.mxu0 %v17557_v20  ;;  %3466 = vmatpush1.bf16.msra.mxu1 %v17577_v42  ;;  %v1373_v4 = vrot.slane %v1372_v62, 4  ;;  %v17600_v20 = vld [vmem:[#allocation5 + $0x120] ss:$8 sps:$4 sm:$0xff]   ;;  %v17647_v49 = vld [vmem:[#allocation5 + $0x1e4] ss:$8 sps:$4 sm:$0xff]   ;;  %vm18704_vm14 = vmor %vm897_vm9, %vm898_vm10  ;;  %s14645_s9 = sshll.u32 %s299_s8, 6 }
  0x82   : > { %3467 = vmatprep.subr.bf16.mxu1 %v17578_v43  ;;  %v1388_v9 = vsel %vm18665_vm4, %v1383_v5, %v1387_v6  ;;  %vm18710_vm15 = vmand %vm1228_vm12, %vm897_vm9  ;;  %vm4284_vm1 = vsmask.f32 7954  ;;  %vm4292_vm3 = vsmask.f32 4352  ;;  %s23407_s15 = scalar_lea.vmem [#allocation10], %s14645_s9  ;;  %s15928_s10 = sshll.u32 %s18438_s28, 10 }
  0x83   : > { %17115 = vmatmul.mubr.msk.bf16.gmra.mrb[8].mxu0 %vm555_vm0, %v17534_v15  ;;  %v1378_v7 = vsel %vm18665_vm4, %v1373_v4, %v1377_v60  ;;  %v1594_v15 = vrot.slane %v18661_v50, 5  ;;  %vm20642_vm6 = vmand %vm4291_vm2, %vm4292_vm3  ;;  %s14553_s14 = sshll.u32 %s23407_s15, 4  ;;  %s23523_s13 = scalar_lea.hbm %s23578_s7, %s15928_s10  ;;  %s23525_s14 = int_to_ptr.vmem [resolvable:$true] %s14553_s14 }
  0x84   : > { %17118 = vmatprep.mubr.msk.bf16.mxu0 %vm555_vm0, %v17535_v17  ;;  %6459 = vmatpush1.bf16.msra.mxu0 %v17559_v22  ;;  %v14748_v12 = vcombine.low %v1378_v7, %v1388_v9  ;;  %v17604_v22 = vld [vmem:[#allocation5 + $0x130] ss:$8 sps:$4 sm:$0xff]   ;;  %vm20668_vm9 = vmor %vm20642_vm6, %vm18710_vm15  ;;  %s23530_s16 = scalar_lea.sflag [#allocation7], %s299_s8  ;;  %s18295_s18 = scalar_lea.vmem %s23525_s14, 1024 }
  0x85   : > { %6460 = vmatprep.subr.bf16.mxu0 %v17560_v24  ;;  %3468 = vmatpush1.bf16.msra.mxu1 %v17580_v44  ;;  %v1596_v18 = vrot.slane %v1594_v15, 4  ;;  %v17607_v24 = vld [vmem:[#allocation5 + $0x140] ss:$8 sps:$4 sm:$0xff]   ;;  %p18296_p12 = scmp.ne.s32.totalorder %s23525_s14, %s18295_s18  ;;  %p23976_p1 = scmp.ne.s32.totalorder %s23680_s11, 0 }
  0x86   : > { %3469 = vmatprep.subr.bf16.mxu1 %v17581_v45  ;;  %3477 = vmatprep.mubr.bf16.mxu1 %v14748_v12  ;;  %s18374_s28 = smov [#allocation10]  }
  0x87   : > { %v18683_v19 = vsel %vm18675_vm7, %v1596_v18, %v1597_v16  ;;  %v1237_v16 = vld [vmem:[#allocation2 + $0x20] sm:$0x1]  ;;  %p18297_p2 = pnand %p18296_p12, %p23976_p1  ;;  %s18299_s20 = sshll.u32 %s18374_s28, 4  ;;  %s18300_s20 = int_to_ptr.vmem [resolvable:$false] %s18299_s20 }
  0x88   : > { %6461 = vmatpush1.bf16.msra.mxu0 %v17562_v25  ;;  %v17609_v25 = vld [vmem:[#allocation5 + $0x144] ss:$8 sps:$4 sm:$0xff]   ;;  %s18301_s21 = scalar_lea.vmem %s18300_s20, 2048  ;;  %p18302_p4 = scmp.lt.s32.totalorder %s23525_s14, %s18300_s20 }
  0x89   : > { %6462 = vmatprep.subr.bf16.mxu0 %v17563_v26  ;;  %3470 = vmatpush1.bf16.msra.mxu1 %v17583_v46  ;;  %v17611_v26 = vld [vmem:[#allocation5 + $0x150] ss:$8 sps:$4 sm:$0xff]   ;;  %p18298_p3 = pneg %p18297_p2  ;;  %p18303_p7 = scmp.lt.s32.totalorder %s18301_s21, %s18295_s18 }
  0x8a   : > { %3471 = vmatprep.subr.bf16.mxu1 %v17584_v47 }
  0x8b   : > { %17119 = vmatmul.mubr.msk.bf16.gmra.mrb[12].mxu0 %vm555_vm0, %v17536_v21  ;;  %v17602_v21 = vld [vmem:[#allocation5 + $0x124] ss:$8 sps:$4 sm:$0xff]   ;;  %p18304_p8 = por %p18303_p7, %p18302_p4 }
  0x8c   : > { %17122 = vmatprep.mubr.msk.bf16.mxu0 %vm555_vm0, %v17537_v23  ;;  %6463 = vmatpush1.bf16.msra.mxu0 %v17565_v28  ;;  %v17606_v23 = vld [vmem:[#allocation5 + $0x134] ss:$8 sps:$4 sm:$0xff]   ;;  %v17614_v28 = vld [vmem:[#allocation5 + $0x160] ss:$8 sps:$4 sm:$0xff]  }
  0x8d   : > { %6464 = vmatprep.subr.bf16.mxu0 %v17566_v30  ;;  %3472 = vmatpush1.bf16.msra.mxu1 %v17586_v48  ;;  %v17618_v30 = vld [vmem:[#allocation5 + $0x170] ss:$8 sps:$4 sm:$0xff]   ;;  %p18305_p11 = pnand %p18304_p8, %p18298_p3 }
  0x8e   : > { %3473 = vmatprep.subr.bf16.mxu1 %v17587_v55 }
  0x90   : > { %6465 = vmatpush1.bf16.msra.mxu0 %v17568_v31  ;;  %v17620_v31 = vld [vmem:[#allocation5 + $0x174] ss:$8 sps:$4 sm:$0xff]  }
  0x91   : > { %6466 = vmatprep.subr.bf16.mxu0 %v17569_v32  ;;  %3474 = vmatpush1.bf16.msra.mxu1 %v17589_v58  ;;  %v17621_v32 = vld [vmem:[#allocation5 + $0x180] ss:$8 sps:$4 sm:$0xff]  }
  0x92   : > { %3475 = vmatprep.subr.bf16.mxu1 %v17590_v1 }
  0x93   : > { %17123 = vmatmul.mubr.msk.bf16.gmra.mrb[16].mxu0 %vm555_vm0, %v17538_v27  ;;  %v17613_v27 = vld [vmem:[#allocation5 + $0x154] ss:$8 sps:$4 sm:$0xff]  }
  0x94   : > { %17126 = vmatprep.mubr.msk.bf16.mxu0 %vm555_vm0, %v17539_v29  ;;  %6467 = vmatpush1.bf16.msra.mxu0 %v17571_v34  ;;  %v17616_v29 = vld [vmem:[#allocation5 + $0x164] ss:$8 sps:$4 sm:$0xff]   ;;  %v17626_v34 = vld [vmem:[#allocation5 + $0x190] ss:$8 sps:$4 sm:$0xff]  }
  0x95   : > { %6468 = vmatprep.subr.bf16.mxu0 %v17572_v39  ;;  %3476 = vmatpush1.bf16.msra.mxu1 %v17592_v2  ;;  %v17636_v39 = vld [vmem:[#allocation5 + $0x1b4] ss:$8 sps:$4 sm:$0xff]  }
  0x96   : > { %3558 = vmatprep.subr.bf16.mxu1 %v17595_v8 }
  0x98   : > { %6469 = vmatpush1.bf16.msra.mxu0 %v17574_v40  ;;  %3478 = vmatmul.mubr.bf16.vlgmr.msra.gmra.mrb[0].mxu1 %v14740_v11  ;;  %v17637_v40 = vld [vmem:[#allocation5 + $0x1c0] ss:$8 sps:$4 sm:$0xff]  }
  0x99   : > { %6470 = vmatprep.subr.bf16.mxu0 %v17575_v41  ;;  %3559 = vmatpush1.bf16.msra.mxu1 %v17593_v10  ;;  %v17639_v41 = vld [vmem:[#allocation5 + $0x1c4] ss:$8 sps:$4 sm:$0xff]  }
  0x9a   : > { %3560 = vmatprep.subr.bf16.mxu1 %v17599_v13  ;;  %v23693_v13 = vmov 0 }
  0x9b   : > { %17127 = vmatmul.mubr.msk.bf16.gmra.mrb[20].mxu0 %vm555_vm0, %v17540_v33  ;;  %v17623_v33 = vld [vmem:[#allocation5 + $0x184] ss:$8 sps:$4 sm:$0xff]   ;;  %v23694_v13 = vsel %vm18697_vm13, 4294967295, %v23693_v13 }
  0x9c   : > { %17130 = vmatprep.mubr.msk.bf16.mxu0 %vm555_vm0, %v17541_v35  ;;  %6471 = vmatpush1.bf16.msra.mxu0 %v17577_v42  ;;  %v17628_v35 = vld [vmem:[#allocation5 + $0x194] ss:$8 sps:$4 sm:$0xff]   ;;  %v18688_v42 = vld [vmem:[%s23573_s2] ss:$0 sm:$0xff]  ;;  %23695 = vst [vmem:[#allocation15_spill] sm:$0xff] %v23694_v13 }
  0x9d   : > { %6472 = vmatprep.subr.bf16.mxu0 %v17578_v43  ;;  %3561 = vmatpush1.bf16.msra.mxu1 %v17597_v14  ;;  %v17642_v43 = vld [vmem:[#allocation5 + $0x1d0] ss:$8 sps:$4 sm:$0xff]  }
  0x9e   : > { %3562 = vmatprep.subr.bf16.mxu1 %v17602_v21  ;;  %v18192_v13 = vld [vmem:[#allocation5 + $0x1f0] ss:$8 sps:$4 sm:$0xff]  }
  0xa0   : > { %6473 = vmatpush1.bf16.msra.mxu0 %v17580_v44  ;;  %v17644_v44 = vld [vmem:[#allocation5 + $0x1d4] ss:$8 sps:$4 sm:$0xff]  }
  0xa1   : > { %6474 = vmatprep.subr.bf16.mxu0 %v17581_v45  ;;  %3563 = vmatpush1.bf16.msra.mxu1 %v17600_v20 }
  0xa2   : > { %3564 = vmatprep.subr.bf16.mxu1 %v17606_v23 }
  0xa3   : > { %17131 = vmatmul.mubr.msk.bf16.gmra.mrb[24].mxu0 %vm555_vm0, %v17542_v36  ;;  %v17629_v36 = vld [vmem:[#allocation5 + $0x1a0] ss:$8 sps:$4 sm:$0xff]  }
  0xa4   : > { %17134 = vmatprep.mubr.msk.bf16.mxu0 %vm555_vm0, %v17543_v37  ;;  %6475 = vmatpush1.bf16.msra.mxu0 %v17583_v46  ;;  %v17631_v37 = vld [vmem:[#allocation5 + $0x1a4] ss:$8 sps:$4 sm:$0xff]  }
  0xa5   : > { %6476 = vmatprep.subr.bf16.mxu0 %v17584_v47  ;;  %3565 = vmatpush1.bf16.msra.mxu1 %v17604_v22 }
  0xa6   : > { %3566 = vmatprep.subr.bf16.mxu1 %v17609_v25  ;;  %v23696_v25 = vmov 0 }
  0xa7   : > { %v23697_v25 = vsel %vm18704_vm14, 4294967295, %v23696_v25 }
  0xa8   : > { %6477 = vmatpush1.bf16.msra.mxu0 %v17586_v48  ;;  %v17645_v48 = vld [vmem:[#allocation5 + $0x1e0] ss:$8 sps:$4 sm:$0xff]   ;;  %23698 = vst [vmem:[#allocation16_spill] sm:$0xff] %v23697_v25 }
  0xa9   : > { %6478 = vmatprep.subr.bf16.mxu0 %v17587_v55  ;;  %3567 = vmatpush1.bf16.msra.mxu1 %v17607_v24 }
  0xaa   : > { %3568 = vmatprep.subr.bf16.mxu1 %v17613_v27 }
  0xab   : > { %17135 = vmatmul.mubr.msk.bf16.gmra.mrb[28].mxu0 %vm555_vm0, %v17544_v38  ;;  %v17634_v38 = vld [vmem:[#allocation5 + $0x1b0] ss:$8 sps:$4 sm:$0xff]   ;;  %vm4283_vm0 = vcmask 1047556  }
  0xac   : > { %6479 = vmatpush1.bf16.msra.mxu0 %v17589_v58  ;;  %vm20629_vm5 = vmand %vm4283_vm0, %vm4284_vm1 }
  0xad   : > { %6480 = vmatprep.subr.bf16.mxu0 %v17590_v1  ;;  %3569 = vmatpush1.bf16.msra.mxu1 %v17611_v26  ;;  %v1233_v1 = vld [vmem:[#allocation2 + $0x18] sm:$0xf]  ;;  %vm20655_vm8 = vmor %vm20629_vm5, %vm18697_vm13 }
  0xae   : > { %3570 = vmatprep.subr.bf16.mxu1 %v17616_v29 }
  0xb0   : > { %6481 = vmatpush1.bf16.msra.mxu0 %v17592_v2 }
  0xb1   : > { %6563 = vmatprep.subr.bf16.mxu0 %v17595_v8  ;;  %3571 = vmatpush1.bf16.msra.mxu1 %v17614_v28  ;;  %v1224_v8 = vld [vmem:[#allocation2 + $0xc] sm:$0xf] }
  0xb2   : > { %3572 = vmatprep.subr.bf16.mxu1 %v17620_v31  ;;  %v23699_v31 = vmov 0 }
  0xb3   : > { %v23700_v31 = vsel %vm18710_vm15, 4294967295, %v23699_v31 }
  0xb4   : > { %23701 = vst [vmem:[#allocation17_spill] sm:$0xff] %v23700_v31  ;;  %v18191_v31 = vld [vmem:[#allocation5 + $0x1f4] ss:$8 sps:$4 sm:$0xff]  }
  0xb5   : > { %3573 = vmatpush1.bf16.msra.mxu1 %v17618_v30 }
  0xb6   : > { %3574 = vmatprep.subr.bf16.mxu1 %v17623_v33 }
  0xb9   : > { %3575 = vmatpush1.bf16.msra.mxu1 %v17621_v32 }
  0xba   : > { %3576 = vmatprep.subr.bf16.mxu1 %v17628_v35 }
  0xbd   : > { %3577 = vmatpush1.bf16.msra.mxu1 %v17626_v34  ;;  %v17651_v34 = vld [vmem:[#allocation5 + $0x1f0] ss:$8 sps:$4 sm:$0xff]  }
  0xbe   : > { %3578 = vmatprep.subr.bf16.mxu1 %v17631_v37 }
  0xc1   : > { %3579 = vmatpush1.bf16.msra.mxu1 %v17629_v36 }
  0xc2   : > { %3580 = vmatprep.subr.bf16.mxu1 %v17636_v39 }
  0xc5   : > { %3581 = vmatpush1.bf16.msra.mxu1 %v17634_v38  ;;  %v1230_v38 = vld [vmem:[#allocation2 + $0x14] sm:$0x1] }
  0xc6   : > { %3582 = vmatprep.subr.bf16.mxu1 %v17639_v41 }
  0xc9   : > { %3583 = vmatpush1.bf16.msra.mxu1 %v17637_v40  ;;  %v17653_v40 = vld [vmem:[#allocation5 + $0x1f4] ss:$8 sps:$4 sm:$0xff]  }
  0xca   : > { %3584 = vmatprep.subr.bf16.mxu1 %v17644_v44 }
  0xcd   : > { %3585 = vmatpush1.bf16.msra.mxu1 %v17642_v43 }
  0xce   : > { %3586 = vmatprep.subr.bf16.mxu1 %v17647_v49 }
  0xd1   : > { %3587 = vmatpush1.bf16.msra.mxu1 %v17645_v48 }
  0xd2   : > { %3588 = vmatprep.subr.bf16.mxu1 %v17653_v40 }
  0xd5   : > { %3589 = vmatpush1.bf16.msra.mxu1 %v17651_v34  ;;  %v1244_v34 = vld [vmem:[#allocation2 + $0x2c] sm:$0x1] }
 0x146   : > { %v17108_v45 = vpop.f32.mrb[0].mxu0 }
 0x147   : > { %v651_v46 = vadd.f32 %v17108_v45, %v18688_v42  ;;  %v642_v47 = vpop.f32.mrb[1].mxu0 }
 0x148   : > { %v643_v51 = vadd.f32 %v18688_v42, %v642_v47  ;;  %v17109_v52 = vpop.f32.mrb[2].mxu0 }
 0x149   : > { %v771_v53 = vmax.f32 %v651_v46, 0.0  ;;  %v654_v54 = vadd.f32 %v17109_v52, %v18688_v42  ;;  %v645_v55 = vpop.f32.mrb[3].mxu0  ;;  %v17656_v46 = vld [vmem:[#allocation5 + $0x204] ss:$8 sps:$4 sm:$0xff]  }
 0x14a   : > { %v769_v56 = vmax.f32 %v643_v51, 0.0  ;;  %v646_v57 = vadd.f32 %v18688_v42, %v645_v55  ;;  %3671 = vmatprep.subr.bf16.mxu1 %v17656_v46 }
 0x14b   : > { %v15866_v58 = vpack.c.bf16 %v771_v53, %v771_v53  ;;  %v772_v59 = vmax.f32 %v654_v54, 0.0  ;;  %v1247_v54 = vld [vmem:[#allocation2 + $0x30] sm:$0xf] }
 0x14c   : > { %v15864_v60 = vpack.c.bf16 %v769_v56, %v769_v56  ;;  %v770_v61 = vmax.f32 %v646_v57, 0.0 }
 0x14d   : > { %v918_v62 = vshrl.u32 %v15866_v58, 16  ;;  %v15867_v63 = vpack.c.bf16 %v772_v59, %v772_v59  ;;  %v921_v0 = vshll.u32 %v15866_v58, 16  ;;  %v18726_v58 = vld [vmem:[#allocation2] sm:$0xe] }
 0x14e   : > { %v901_v2 = vshrl.u32 %v15864_v60, 16  ;;  %v904_v4 = vshll.u32 %v15864_v60, 16  ;;  %v15865_v5 = vpack.c.bf16 %v770_v61, %v770_v61  ;;  %v17112_v6 = vpop.f32.mrb[4].mxu0  ;;  %v1240_v60 = vld [vmem:[#allocation2 + $0x24] sm:$0xf] }
 0x14f   : > { %v920_v7 = vrot.slane %v918_v62, 7  ;;  %v926_v9 = vshrl.u32 %v15867_v63, 16  ;;  %v929_v10 = vshll.u32 %v15867_v63, 16  ;;  %v667_v11 = vadd.f32 %v17112_v6, %v18688_v42  ;;  %v658_v12 = vpop.f32.mrb[5].mxu0 }
 0x150   : > { %v903_v14 = vrot.slane %v901_v2, 7  ;;  %v909_v18 = vshrl.u32 %v15865_v5, 16  ;;  %v912_v20 = vshll.u32 %v15865_v5, 16  ;;  %v659_v21 = vadd.f32 %v18688_v42, %v658_v12  ;;  %v17113_v22 = vpop.f32.mrb[6].mxu0 }
 0x151   : > { %v923_v23 = vor.u32 %v921_v0, %v920_v7  ;;  %v924_v24 = vrot.slane %v920_v7, 4  ;;  %v928_v26 = vrot.slane %v926_v9, 7  ;;  %v775_v27 = vmax.f32 %v667_v11, 0.0  ;;  %v661_v28 = vpop.f32.mrb[7].mxu0 }
 0x152   : > { %v906_v29 = vor.u32 %v904_v4, %v903_v14  ;;  %v907_v30 = vrot.slane %v903_v14, 4  ;;  %v911_v32 = vrot.slane %v909_v18, 7  ;;  %v773_v33 = vmax.f32 %v659_v21, 0.0 }
 0x153   : > { %v1234_v35 = vsel %vm18697_vm13, %v923_v23, %v1233_v1  ;;  %v931_v36 = vor.u32 %v929_v10, %v928_v26  ;;  %v933_v37 = vrot.slane %v928_v26, 4  ;;  %v15870_v39 = vpack.c.bf16 %v775_v27, %v775_v27 }
 0x154   : > { %1235 = vst [vmem:[#allocation2 + $0x18] sm:$0xf] %v1234_v35  ;;  %v1225_v41 = vsel %vm18697_vm13, %v906_v29, %v1224_v8  ;;  %v914_v43 = vor.u32 %v912_v20, %v911_v32  ;;  %v916_v44 = vrot.slane %v911_v32, 4  ;;  %v15868_v45 = vpack.c.bf16 %v773_v33, %v773_v33  ;;  %v1251_v33 = vld [vmem:[#allocation2 + $0x38] sm:$0x1] }
 0x155   : > { %1226 = vst [vmem:[#allocation2 + $0xc] sm:$0xf] %v1225_v41  ;;  %v932_v47 = vsel %vm18704_vm14, %v924_v24, %v931_v36  ;;  %v1238_v48 = vsel %vm18710_vm15, %v933_v37, %v1237_v16  ;;  %v952_v49 = vshrl.u32 %v15870_v39, 16  ;;  %v955_v51 = vshll.u32 %v15870_v39, 16 }
 0x156   : > { %1236 = vst [vmem:[#allocation2 + $0x1c] sm:$0xf] %v932_v47  ;;  %1239 = vst [vmem:[#allocation2 + $0x20] sm:$0x1] %v1238_v48  ;;  %v915_v52 = vsel %vm18704_vm14, %v907_v30, %v914_v43  ;;  %v1231_v53 = vsel %vm18710_vm15, %v916_v44, %v1230_v38  ;;  %v935_v55 = vshrl.u32 %v15868_v45, 16  ;;  %v938_v56 = vshll.u32 %v15868_v45, 16 }
 0x157   : > { %v17116_v57 = vpop.f32.mrb[8].mxu0  ;;  %1227 = vst [vmem:[#allocation2 + $0x10] sm:$0xf] %v915_v52  ;;  %1232 = vst [vmem:[#allocation2 + $0x14] sm:$0x1] %v1231_v53  ;;  %v18728_v59 = vrot.slane %v952_v49, 7  ;;  %v670_v61 = vadd.f32 %v17113_v22, %v18688_v42  ;;  %v662_v62 = vadd.f32 %v18688_v42, %v661_v28 }
 0x158   : > { %v683_v63 = vadd.f32 %v17116_v57, %v18688_v42  ;;  %v674_v0 = vpop.f32.mrb[9].mxu0  ;;  %v937_v1 = vrot.slane %v935_v55, 7  ;;  %v14716_v5 = vrot.slane %v18726_v58, 9  ;;  %v1261_v47 = vld [vmem:[#allocation2 + $0x48] sm:$0xf] }
 0x159   : > { %v675_v2 = vadd.f32 %v18688_v42, %v674_v0  ;;  %v17117_v4 = vpop.f32.mrb[10].mxu0  ;;  %v957_v6 = vor.u32 %v955_v51, %v18728_v59  ;;  %v958_v7 = vrot.slane %v18728_v59, 4  ;;  %v776_v8 = vmax.f32 %v670_v61, 0.0  ;;  %v1254_v57 = vld [vmem:[#allocation2 + $0x3c] sm:$0xf] }
 0x15a   : > { %v774_v9 = vmax.f32 %v662_v62, 0.0  ;;  %v677_v10 = vpop.f32.mrb[11].mxu0  ;;  %v940_v11 = vor.u32 %v938_v56, %v937_v1  ;;  %v941_v12 = vrot.slane %v937_v1, 4  ;;  %v779_v14 = vmax.f32 %v683_v63, 0.0 }
 0x15b   : > { %v777_v16 = vmax.f32 %v675_v2, 0.0  ;;  %v1248_v18 = vsel %vm18697_vm13, %v957_v6, %v1247_v54  ;;  %v15871_v20 = vpack.c.bf16 %v776_v8, %v776_v8  ;;  %v686_v22 = vadd.f32 %v17117_v4, %v18688_v42 }
 0x15c   : > { %v15869_v21 = vpack.c.bf16 %v774_v9, %v774_v9  ;;  %1249 = vst [vmem:[#allocation2 + $0x30] sm:$0xf] %v1248_v18  ;;  %v1241_v23 = vsel %vm18697_vm13, %v940_v11, %v1240_v60  ;;  %v15874_v24 = vpack.c.bf16 %v779_v14, %v779_v14  ;;  %v678_v27 = vadd.f32 %v18688_v42, %v677_v10 }
 0x15d   : > { %v15872_v26 = vpack.c.bf16 %v777_v16, %v777_v16  ;;  %1242 = vst [vmem:[#allocation2 + $0x24] sm:$0xf] %v1241_v23  ;;  %v960_v28 = vshrl.u32 %v15871_v20, 16  ;;  %v963_v29 = vshll.u32 %v15871_v20, 16  ;;  %v780_v43 = vmax.f32 %v686_v22, 0.0 }
 0x15e   : > { %v943_v30 = vshrl.u32 %v15869_v21, 16  ;;  %v946_v32 = vshll.u32 %v15869_v21, 16  ;;  %v986_v35 = vshrl.u32 %v15874_v24, 16  ;;  %v989_v36 = vshll.u32 %v15874_v24, 16  ;;  %v17120_v39 = vpop.f32.mrb[12].mxu0 }
 0x15f   : > { %v969_v37 = vshrl.u32 %v15872_v26, 16  ;;  %v972_v38 = vshll.u32 %v15872_v26, 16  ;;  %v962_v40 = vrot.slane %v960_v28, 7  ;;  %v778_v44 = vmax.f32 %v678_v27, 0.0  ;;  %v690_v45 = vpop.f32.mrb[13].mxu0 }
 0x160   : > { %v945_v41 = vrot.slane %v943_v30, 7  ;;  %v18743_v46 = vrot.slane %v986_v35, 7  ;;  %v699_v49 = vadd.f32 %v17120_v39, %v18688_v42  ;;  %v691_v51 = vadd.f32 %v18688_v42, %v690_v45  ;;  %v17121_v52 = vpop.f32.mrb[14].mxu0  ;;  %v1265_v23 = vld [vmem:[#allocation2 + $0x50] sm:$0x1] }
 0x161   : > { %v18745_v48 = vrot.slane %v969_v37, 7  ;;  %v965_v53 = vor.u32 %v963_v29, %v962_v40  ;;  %v967_v54 = vrot.slane %v962_v40, 4  ;;  %v693_v59 = vpop.f32.mrb[15].mxu0  ;;  %v15873_v9 = vpack.c.bf16 %v778_v44, %v778_v44 }
 0x162   : > { %v948_v55 = vor.u32 %v946_v32, %v945_v41  ;;  %v950_v56 = vrot.slane %v945_v41, 4  ;;  %v991_v60 = vor.u32 %v989_v36, %v18743_v46  ;;  %v992_v61 = vrot.slane %v18743_v46, 4 }
 0x163   : > { %v974_v62 = vor.u32 %v972_v38, %v18745_v48  ;;  %v975_v63 = vrot.slane %v18745_v48, 4  ;;  %v966_v0 = vsel %vm18704_vm14, %v958_v7, %v965_v53  ;;  %v1252_v1 = vsel %vm18710_vm15, %v967_v54, %v1251_v33  ;;  %v1258_v33 = vld [vmem:[#allocation2 + $0x44] sm:$0x1] }
 0x164   : > { %v949_v2 = vsel %vm18704_vm14, %v941_v12, %v948_v55  ;;  %v1245_v4 = vsel %vm18710_vm15, %v950_v56, %v1244_v34  ;;  %1250 = vst [vmem:[#allocation2 + $0x34] sm:$0xf] %v966_v0  ;;  %1253 = vst [vmem:[#allocation2 + $0x38] sm:$0x1] %v1252_v1  ;;  %v1262_v6 = vsel %vm18697_vm13, %v991_v60, %v1261_v47  ;;  %v783_v10 = vmax.f32 %v699_v49, 0.0 }
 0x165   : > { %1243 = vst [vmem:[#allocation2 + $0x28] sm:$0xf] %v949_v2  ;;  %1246 = vst [vmem:[#allocation2 + $0x2c] sm:$0x1] %v1245_v4  ;;  %v1255_v8 = vsel %vm18697_vm13, %v974_v62, %v1254_v57  ;;  %v15875_v7 = vpack.c.bf16 %v780_v43, %v780_v43  ;;  %v781_v11 = vmax.f32 %v691_v51, 0.0  ;;  %v702_v12 = vadd.f32 %v17121_v52, %v18688_v42 }
 0x166   : > { %1263 = vst [vmem:[#allocation2 + $0x48] sm:$0xf] %v1262_v6  ;;  %1256 = vst [vmem:[#allocation2 + $0x3c] sm:$0xf] %v1255_v8  ;;  %v694_v14 = vadd.f32 %v18688_v42, %v693_v59  ;;  %v977_v20 = vshrl.u32 %v15873_v9, 16  ;;  %v980_v21 = vshll.u32 %v15873_v9, 16  ;;  %v15878_v24 = vpack.c.bf16 %v783_v10, %v783_v10 }
 0x167   : > { %v994_v16 = vshrl.u32 %v15875_v7, 16  ;;  %v997_v18 = vshll.u32 %v15875_v7, 16  ;;  %v17124_v22 = vpop.f32.mrb[16].mxu0  ;;  %v15876_v26 = vpack.c.bf16 %v781_v11, %v781_v11  ;;  %v784_v27 = vmax.f32 %v702_v12, 0.0  ;;  %v1275_v56 = vld [vmem:[#allocation2 + $0x60] sm:$0xf] }
 0x168   : > { %v782_v28 = vmax.f32 %v694_v14, 0.0  ;;  %v706_v29 = vpop.f32.mrb[17].mxu0  ;;  %v979_v32 = vrot.slane %v977_v20, 7  ;;  %v715_v34 = vadd.f32 %v17124_v22, %v18688_v42  ;;  %v1020_v37 = vshrl.u32 %v15878_v24, 16  ;;  %v1268_v57 = vld [vmem:[#allocation2 + $0x54] sm:$0xf] }
 0x169   : > { %v996_v30 = vrot.slane %v994_v16, 7  ;;  %v707_v35 = vadd.f32 %v18688_v42, %v706_v29  ;;  %v17125_v36 = vpop.f32.mrb[18].mxu0  ;;  %v1023_v38 = vshll.u32 %v15878_v24, 16  ;;  %v1003_v39 = vshrl.u32 %v15876_v26, 16  ;;  %v1279_v14 = vld [vmem:[#allocation2 + $0x68] sm:$0x1] }
 0x16a   : > { %v1006_v40 = vshll.u32 %v15876_v26, 16  ;;  %v709_v41 = vpop.f32.mrb[19].mxu0  ;;  %v982_v45 = vor.u32 %v980_v21, %v979_v32  ;;  %v984_v46 = vrot.slane %v979_v32, 4  ;;  %v1022_v47 = vrot.slane %v1020_v37, 7  ;;  %v1272_v22 = vld [vmem:[#allocation2 + $0x5c] sm:$0x1] }
 0x16b   : > { %v999_v43 = vor.u32 %v997_v18, %v996_v30  ;;  %v1001_v44 = vrot.slane %v996_v30, 4  ;;  %v1005_v48 = vrot.slane %v1003_v39, 7  ;;  %v15879_v49 = vpack.c.bf16 %v784_v27, %v784_v27 }
 0x16c   : > { %v15877_v51 = vpack.c.bf16 %v782_v28, %v782_v28  ;;  %v983_v54 = vsel %vm18704_vm14, %v975_v63, %v982_v45  ;;  %v1259_v55 = vsel %vm18710_vm15, %v984_v46, %v1258_v33  ;;  %v1025_v59 = vor.u32 %v1023_v38, %v1022_v47  ;;  %v18795_v38 = vld [vmem:[#allocation2 + $0x10] sm:$0xf]  ;;  %v1282_v45 = vld [vmem:[#allocation2 + $0x6c] sm:$0xf] }
 0x16d   : > { %v1000_v52 = vsel %vm18704_vm14, %v992_v61, %v999_v43  ;;  %v1266_v53 = vsel %vm18710_vm15, %v1001_v44, %v1265_v23  ;;  %1257 = vst [vmem:[#allocation2 + $0x40] sm:$0xf] %v983_v54  ;;  %1260 = vst [vmem:[#allocation2 + $0x44] sm:$0x1] %v1259_v55  ;;  %v1026_v60 = vrot.slane %v1022_v47, 4  ;;  %v1008_v62 = vor.u32 %v1006_v40, %v1005_v48 }
 0x16e   : > { %1264 = vst [vmem:[#allocation2 + $0x4c] sm:$0xf] %v1000_v52  ;;  %1267 = vst [vmem:[#allocation2 + $0x50] sm:$0x1] %v1266_v53  ;;  %v1009_v0 = vrot.slane %v1005_v48, 4  ;;  %v1028_v1 = vshrl.u32 %v15879_v49, 16  ;;  %v1276_v8 = vsel %vm18697_vm13, %v1025_v59, %v1275_v56  ;;  %v718_v18 = vadd.f32 %v17125_v36, %v18688_v42 }
 0x16f   : > { %v18777_v61 = vld [vmem:[#allocation2 + $0xc] sm:$0xf]  ;;  %v1031_v2 = vshll.u32 %v15879_v49, 16  ;;  %v1011_v4 = vshrl.u32 %v15877_v51, 16  ;;  %v1014_v6 = vshll.u32 %v15877_v51, 16  ;;  %v18779_v63 = vpop.f32.mrb[20].mxu0  ;;  %v1269_v7 = vsel %vm18697_vm13, %v1008_v62, %v1268_v57 }
 0x170   : > { %v787_v9 = vmax.f32 %v715_v34, 0.0  ;;  %v785_v10 = vmax.f32 %v707_v35, 0.0  ;;  %v18785_v11 = vpop.f32.mrb[21].mxu0  ;;  %1277 = vst [vmem:[#allocation2 + $0x60] sm:$0xf] %v1276_v8  ;;  %v1030_v12 = vrot.slane %v1028_v1, 7  ;;  %v710_v20 = vadd.f32 %v18688_v42, %v709_v41 }
 0x171   : > { %1270 = vst [vmem:[#allocation2 + $0x54] sm:$0xf] %v1269_v7  ;;  %v1013_v16 = vrot.slane %v1011_v4, 7  ;;  %v18789_v21 = vpop.f32.mrb[22].mxu0  ;;  %v1390_v26 = vshrl.u32 %v18777_v61, 16  ;;  %v1393_v27 = vshll.u32 %v18777_v61, 16 }
 0x172   : > { %v15882_v23 = vpack.c.bf16 %v787_v9, %v787_v9  ;;  %v15880_v24 = vpack.c.bf16 %v785_v10, %v785_v10  ;;  %v18793_v28 = vpop.f32.mrb[23].mxu0  ;;  %v1033_v29 = vor.u32 %v1031_v2, %v1030_v12  ;;  %v1035_v30 = vrot.slane %v1030_v12, 4  ;;  %v1289_v44 = vld [vmem:[#allocation2 + $0x78] sm:$0xf]  ;;  %v1355_v51 = vld [vmem:[#allocation2 + $0x14] sm:$0x1] }
 0x173   : > { %v1016_v32 = vor.u32 %v1014_v6, %v1013_v16  ;;  %v1018_v33 = vrot.slane %v1013_v16, 4  ;;  %v788_v48 = vmax.f32 %v718_v18, 0.0  ;;  %v786_v49 = vmax.f32 %v710_v20, 0.0 }
 0x174   : > { %v1054_v34 = vshrl.u32 %v15882_v23, 16  ;;  %v1057_v35 = vshll.u32 %v15882_v23, 16  ;;  %v1037_v36 = vshrl.u32 %v15880_v24, 16  ;;  %v1040_v37 = vshll.u32 %v15880_v24, 16  ;;  %v18821_v24 = vld [vmem:[#allocation2 + $0x1c] sm:$0xf] }
 0x175   : > { %v1034_v39 = vsel %vm18704_vm14, %v1026_v60, %v1033_v29  ;;  %v1280_v40 = vsel %vm18710_vm15, %v1035_v30, %v1279_v14  ;;  %v1017_v41 = vsel %vm18704_vm14, %v1009_v0, %v1016_v32  ;;  %v1273_v43 = vsel %vm18710_vm15, %v1018_v33, %v1272_v22  ;;  %v18817_v14 = vld [vmem:[#allocation2 + $0x18] sm:$0xf]  ;;  %v1293_v33 = vld [vmem:[#allocation2 + $0x80] sm:$0x1] }
 0x176   : > { %1278 = vst [vmem:[#allocation2 + $0x64] sm:$0xf] %v1034_v39  ;;  %1281 = vst [vmem:[#allocation2 + $0x68] sm:$0x1] %v1280_v40  ;;  %v1056_v46 = vrot.slane %v1054_v34, 7  ;;  %v1039_v47 = vrot.slane %v1037_v36, 7  ;;  %v15883_v1 = vpack.c.bf16 %v788_v48, %v788_v48  ;;  %v15881_v2 = vpack.c.bf16 %v786_v49, %v786_v49 }
 0x177   : > { %1271 = vst [vmem:[#allocation2 + $0x58] sm:$0xf] %v1017_v41  ;;  %1274 = vst [vmem:[#allocation2 + $0x5c] sm:$0x1] %v1273_v43  ;;  %v1392_v52 = vrot.slane %v1390_v26, 4  ;;  %v1395_v53 = vrot.slane %v1393_v27, 5  ;;  %v14741_v30 = vcombine.low %v18777_v61, %v18795_v38 }
 0x178   : > { %v1399_v54 = vshll.u32 %v18795_v38, 16  ;;  %v1403_v55 = vshrl.u32 %v18795_v38, 16  ;;  %v18807_v56 = vpop.f32.mrb[24].mxu0  ;;  %v1059_v57 = vor.u32 %v1057_v35, %v1056_v46  ;;  %v1060_v59 = vrot.slane %v1056_v46, 4  ;;  %v1356_v38 = vld [vmem:[#allocation2 + $0x20] sm:$0x1] }
 0x179   : > { %v1042_v60 = vor.u32 %v1040_v37, %v1039_v47  ;;  %v1043_v62 = vrot.slane %v1039_v47, 4  ;;  %v18809_v0 = vpop.f32.mrb[25].mxu0  ;;  %v1396_v4 = vor.u32 %v1395_v53, %v1392_v52  ;;  %v1409_v12 = vshll.u32 %v1355_v51, 16  ;;  %v1286_v37 = vld [vmem:[#allocation2 + $0x74] sm:$0x1] }
 0x17a   : > { %v1401_v6 = vrot.slane %v1399_v54, 5  ;;  %v18811_v8 = vpop.f32.mrb[26].mxu0  ;;  %v1290_v7 = vsel %vm18697_vm13, %v1059_v57, %v1289_v44  ;;  %v1405_v10 = vrot.slane %v1403_v55, 4  ;;  %v1062_v18 = vshrl.u32 %v15883_v1, 16  ;;  %v18831_v47 = vld [vmem:[#allocation2 + $0x24] sm:$0xf] }
 0x17b   : > { %v1283_v9 = vsel %vm18697_vm13, %v1042_v60, %v1282_v45  ;;  %v18819_v16 = vpop.f32.mrb[27].mxu0  ;;  %1291 = vst [vmem:[#allocation2 + $0x78] sm:$0xf] %v1290_v7  ;;  %v1065_v20 = vshll.u32 %v15883_v1, 16  ;;  %v1045_v22 = vshrl.u32 %v15881_v2, 16  ;;  %v1048_v23 = vshll.u32 %v15881_v2, 16 }
 0x17c   : > { %1284 = vst [vmem:[#allocation2 + $0x6c] sm:$0xf] %v1283_v9  ;;  %v1397_v26 = vrot.slane %v1396_v4, 4  ;;  %v1406_v27 = vor.u32 %v1405_v10, %v1401_v6  ;;  %v1411_v29 = vrot.slane %v1409_v12, 5  ;;  %v1064_v32 = vrot.slane %v1062_v18, 7 }
 0x17d   : > { %v1047_v34 = vrot.slane %v1045_v22, 7  ;;  %v1414_v35 = vshrl.u32 %v18817_v14, 16  ;;  %v1417_v36 = vshll.u32 %v18817_v14, 16  ;;  %v1423_v41 = vshll.u32 %v18821_v24, 16  ;;  %v18835_v53 = vld [vmem:[#allocation2 + $0x28] sm:$0xf] }
 0x17e   : > { %v1402_v39 = vsel %vm18665_vm4, %v1397_v26, %v1401_v6  ;;  %v1407_v40 = vrot.slane %v1406_v27, 4  ;;  %v1427_v43 = vshrl.u32 %v18821_v24, 16  ;;  %v1067_v44 = vor.u32 %v1065_v20, %v1064_v32  ;;  %v18837_v54 = vpop.f32.mrb[28].mxu0 }
 0x17f   : > { %v1069_v45 = vrot.slane %v1064_v32, 4  ;;  %v1050_v46 = vor.u32 %v1048_v23, %v1047_v34  ;;  %v1052_v61 = vrot.slane %v1047_v34, 4  ;;  %v1416_v49 = vrot.slane %v1414_v35, 4  ;;  %v18847_v2 = vpop.f32.mrb[29].mxu0 }
 0x180   : > { %v1412_v48 = vsel %vm18665_vm4, %v1407_v40, %v1411_v29  ;;  %v1419_v51 = vrot.slane %v1417_v36, 5  ;;  %v1425_v52 = vrot.slane %v1423_v41, 5  ;;  %v1068_v55 = vsel %vm18704_vm14, %v1060_v59, %v1067_v44  ;;  %v1357_v59 = vld [vmem:[#allocation2 + $0x2c] sm:$0x1]  ;;  %v18854_v20 = vpop.f32.mrb[30].mxu0 }
 0x181   : > { %v1294_v57 = vsel %vm18710_vm15, %v1069_v45, %v1293_v33  ;;  %v1051_v60 = vsel %vm18704_vm14, %v1043_v62, %v1050_v46  ;;  %v1287_v1 = vsel %vm18710_vm15, %v1052_v61, %v1286_v37  ;;  %1292 = vst [vmem:[#allocation2 + $0x7c] sm:$0xf] %v1068_v55  ;;  %v14749_v4 = vcombine.low %v1402_v39, %v1412_v48  ;;  %v18857_v29 = vpop.f32.mrb[31].mxu0  ;;  %v18871_v61 = vld [vmem:[#allocation2 + $0x30] sm:$0xf] }
 0x182   : > { %1295 = vst [vmem:[#allocation2 + $0x80] sm:$0x1] %v1294_v57  ;;  %1285 = vst [vmem:[#allocation2 + $0x70] sm:$0xf] %v1051_v60  ;;  %v1420_v6 = vor.u32 %v1419_v51, %v1416_v49  ;;  %v1429_v7 = vrot.slane %v1427_v43, 4  ;;  %v1433_v9 = vshll.u32 %v1356_v38, 16  ;;  %v14742_v10 = vcombine.low %v18817_v14, %v18821_v24 }
 0x183   : > { %1288 = vst [vmem:[#allocation2 + $0x74] sm:$0x1] %v1287_v1  ;;  %v1438_v12 = vshrl.u32 %v18831_v47, 16  ;;  %v1441_v62 = vshll.u32 %v18831_v47, 16  ;;  %v1447_v18 = vshll.u32 %v18835_v53, 16  ;;  %3487 = vmatprep.mubr.bf16.mxu1 %v14749_v4  ;;  %v1451_v27 = vshrl.u32 %v18835_v53, 16 }
 0x184   : > { %v1421_v22 = vrot.slane %v1420_v6, 4  ;;  %v1430_v23 = vor.u32 %v1429_v7, %v1425_v52  ;;  %v1435_v26 = vrot.slane %v1433_v9, 5  ;;  %3488 = vmatmul.mubr.bf16.gmra.mrb[4].mxu1 %v14741_v30  ;;  %v1457_v24 = vshll.u32 %v1357_v59, 16 }
 0x185   : > { %v1440_v32 = vrot.slane %v1438_v12, 4  ;;  %v1443_v33 = vrot.slane %v1441_v62, 5  ;;  %v1449_v14 = vrot.slane %v1447_v18, 5  ;;  %v1453_v36 = vrot.slane %v1451_v27, 4  ;;  %v1303_v18 = vld [vmem:[#allocation2 + $0x90] sm:$0xf] }
 0x186   : > { %v1426_v34 = vsel %vm18665_vm4, %v1421_v22, %v1425_v52  ;;  %v1431_v35 = vrot.slane %v1430_v23, 4  ;;  %v731_v37 = vadd.f32 %v18779_v63, %v18688_v42  ;;  %v1459_v40 = vrot.slane %v1457_v24, 5 }
 0x187   : > { %v1444_v39 = vor.u32 %v1443_v33, %v1440_v32  ;;  %v723_v41 = vadd.f32 %v18688_v42, %v18785_v11  ;;  %v734_v30 = vadd.f32 %v18789_v21, %v18688_v42  ;;  %v1454_v44 = vor.u32 %v1453_v36, %v1449_v14  ;;  %v1296_v32 = vld [vmem:[#allocation2 + $0x84] sm:$0xf] }
 0x188   : > { %v1436_v43 = vsel %vm18665_vm4, %v1431_v35, %v1435_v26  ;;  %v791_v45 = vmax.f32 %v731_v37, 0.0  ;;  %v726_v46 = vadd.f32 %v18688_v42, %v18793_v28  ;;  %v14743_v21 = vcombine.low %v18831_v47, %v18835_v53  ;;  %v18880_v47 = vld [vmem:[#allocation2 + $0x34] sm:$0xf]  ;;  %v1307_v35 = vld [vmem:[#allocation2 + $0x98] sm:$0x1] }
 0x189   : > { %v14750_v38 = vcombine.low %v1426_v34, %v1436_v43  ;;  %v1445_v63 = vrot.slane %v1444_v39, 4  ;;  %v789_v48 = vmax.f32 %v723_v41, 0.0  ;;  %v792_v49 = vmax.f32 %v734_v30, 0.0  ;;  %v1300_v43 = vld [vmem:[#allocation2 + $0x8c] sm:$0x1] }
 0x18a   : > { %v1455_v51 = vrot.slane %v1454_v44, 4  ;;  %v15886_v52 = vpack.c.bf16 %v791_v45, %v791_v45  ;;  %v790_v11 = vmax.f32 %v726_v46, 0.0  ;;  %v1462_v28 = vshrl.u32 %v18871_v61, 16  ;;  %v1358_v44 = vld [vmem:[#allocation2 + $0x38] sm:$0x1] }
 0x18b   : > { %3497 = vmatprep.mubr.bf16.mxu1 %v14750_v38  ;;  %v1450_v55 = vsel %vm18665_vm4, %v1445_v63, %v1449_v14  ;;  %v15884_v57 = vpack.c.bf16 %v789_v48, %v789_v48  ;;  %v15887_v60 = vpack.c.bf16 %v792_v49, %v792_v49  ;;  %v1465_v24 = vshll.u32 %v18871_v61, 16  ;;  %v18886_v48 = vld [vmem:[#allocation2 + $0x60] sm:$0xf]  ;;  %v18888_v49 = vld [vmem:[#allocation2 + $0x64] sm:$0xf] }
 0x18c   : > { %v1460_v1 = vsel %vm18665_vm4, %v1455_v51, %v1459_v40  ;;  %v1088_v4 = vshrl.u32 %v15886_v52, 16  ;;  %v1091_v6 = vshll.u32 %v15886_v52, 16  ;;  %v15885_v7 = vpack.c.bf16 %v790_v11, %v790_v11  ;;  %3498 = vmatmul.mubr.bf16.gmra.mrb[8].mxu1 %v14742_v10 }
 0x18d   : > { %v14751_v9 = vcombine.low %v1450_v55, %v1460_v1  ;;  %v1071_v59 = vshrl.u32 %v15884_v57, 16  ;;  %v1074_v12 = vshll.u32 %v15884_v57, 16  ;;  %v1096_v62 = vshrl.u32 %v15887_v60, 16  ;;  %v18896_v57 = vld [vmem:[#allocation2 + $0x68] sm:$0x1] }
 0x18e   : > { %v1090_v53 = vrot.slane %v1088_v4, 7  ;;  %v1099_v22 = vshll.u32 %v15887_v60, 16  ;;  %v1079_v23 = vshrl.u32 %v15885_v7, 16  ;;  %v1082_v26 = vshll.u32 %v15885_v7, 16 }
 0x18f   : > { %3507 = vmatprep.mubr.bf16.mxu1 %v14751_v9  ;;  %v1073_v27 = vrot.slane %v1071_v59, 7  ;;  %v1098_v33 = vrot.slane %v1096_v62, 7  ;;  %v1464_v14 = vrot.slane %v1462_v28, 4  ;;  %v1471_v37 = vshll.u32 %v18880_v47, 16 }
 0x190   : > { %v1093_v34 = vor.u32 %v1091_v6, %v1090_v53  ;;  %v1094_v10 = vrot.slane %v1090_v53, 4  ;;  %v1081_v36 = vrot.slane %v1079_v23, 7  ;;  %v1467_v63 = vrot.slane %v1465_v24, 5 }
 0x191   : > { %v1076_v39 = vor.u32 %v1074_v12, %v1073_v27  ;;  %v1077_v40 = vrot.slane %v1073_v27, 4  ;;  %v1101_v41 = vor.u32 %v1099_v22, %v1098_v33  ;;  %v1103_v30 = vrot.slane %v1098_v33, 4 }
 0x192   : > { %v1304_v45 = vsel %vm18697_vm13, %v1093_v34, %v1303_v18  ;;  %v1084_v46 = vor.u32 %v1082_v26, %v1081_v36  ;;  %v1086_v38 = vrot.slane %v1081_v36, 4  ;;  %v1473_v55 = vrot.slane %v1471_v37, 5  ;;  %v18912_v34 = vld [vmem:[#allocation2 + $0x40] sm:$0xf] }
 0x193   : > { %1305 = vst [vmem:[#allocation2 + $0x90] sm:$0xf] %v1304_v45  ;;  %v1297_v51 = vsel %vm18697_vm13, %v1076_v39, %v1296_v32  ;;  %v1102_v52 = vsel %vm18704_vm14, %v1094_v10, %v1101_v41  ;;  %v1308_v11 = vsel %vm18710_vm15, %v1103_v30, %v1307_v35  ;;  %v1468_v1 = vor.u32 %v1467_v63, %v1464_v14  ;;  %v18908_v32 = vld [vmem:[#allocation2 + $0x3c] sm:$0xf]  ;;  %v1359_v10 = vld [vmem:[#allocation2 + $0x44] sm:$0x1] }
 0x194   : > { %1298 = vst [vmem:[#allocation2 + $0x84] sm:$0xf] %v1297_v51  ;;  %1306 = vst [vmem:[#allocation2 + $0x94] sm:$0xf] %v1102_v52  ;;  %v1085_v60 = vsel %vm18704_vm14, %v1077_v40, %v1084_v46  ;;  %v1301_v28 = vsel %vm18710_vm15, %v1086_v38, %v1300_v43  ;;  %v1475_v4 = vshrl.u32 %v18880_v47, 16  ;;  %3508 = vmatmul.mubr.bf16.gmra.mrb[12].mxu1 %v14743_v21  ;;  %v1481_v6 = vshll.u32 %v1358_v44, 16 }
 0x195   : > { %1309 = vst [vmem:[#allocation2 + $0x98] sm:$0x1] %v1308_v11  ;;  %1299 = vst [vmem:[#allocation2 + $0x88] sm:$0xf] %v1085_v60  ;;  %v4373_v7 = vshrl.u32 %v18886_v48, 16  ;;  %v4376_v9 = vshll.u32 %v18886_v48, 16  ;;  %v14744_v37 = vcombine.low %v18871_v61, %v18880_v47  ;;  %v14996_v39 = vcombine.low %v18886_v48, %v18888_v49 }
 0x196   : > { %1302 = vst [vmem:[#allocation2 + $0x8c] sm:$0x1] %v1301_v28  ;;  %v4382_v59 = vshll.u32 %v18888_v49, 16  ;;  %v1469_v12 = vrot.slane %v1468_v1, 4  ;;  %v1477_v62 = vrot.slane %v1475_v4, 4  ;;  %v4386_v53 = vshrl.u32 %v18888_v49, 16 }
 0x197   : > { %v4392_v18 = vshll.u32 %v18896_v57, 16  ;;  %v1483_v22 = vrot.slane %v1481_v6, 5  ;;  %v4375_v23 = vrot.slane %v4373_v7, 4  ;;  %v4378_v26 = vrot.slane %v4376_v9, 5 }
 0x198   : > { %v4384_v27 = vrot.slane %v4382_v59, 5  ;;  %v1474_v21 = vsel %vm18665_vm4, %v1469_v12, %v1473_v55  ;;  %v1478_v33 = vor.u32 %v1477_v62, %v1473_v55  ;;  %v4388_v14 = vrot.slane %v4386_v53, 4  ;;  %v18927_v55 = vld [vmem:[#allocation2 + $0x6c] sm:$0xf] }
 0x199   : > { %v4394_v24 = vrot.slane %v4392_v18, 5  ;;  %v4379_v35 = vor.u32 %v4378_v26, %v4375_v23  ;;  %v1486_v30 = vshrl.u32 %v18908_v32, 16  ;;  %v1489_v43 = vshll.u32 %v18908_v32, 16 }
 0x19a   : > { %v1479_v40 = vrot.slane %v1478_v33, 4  ;;  %v4389_v41 = vor.u32 %v4388_v14, %v4384_v27  ;;  %v1495_v45 = vshll.u32 %v18912_v34, 16  ;;  %v1499_v46 = vshrl.u32 %v18912_v34, 16  ;;  %v18157_v14 = vld [vmem:[#allocation5 + $0x100] ss:$8 sps:$4 sm:$0xff]  }
 0x19b   : > { %v4380_v44 = vrot.slane %v4379_v35, 4  ;;  %v1505_v38 = vshll.u32 %v1359_v10, 16  ;;  %v1488_v61 = vrot.slane %v1486_v30, 4  ;;  %v1491_v47 = vrot.slane %v1489_v43, 5 }
 0x19c   : > { %v1484_v63 = vsel %vm18665_vm4, %v1479_v40, %v1483_v22  ;;  %v4390_v51 = vrot.slane %v4389_v41, 4  ;;  %v1497_v49 = vrot.slane %v1495_v45, 5  ;;  %v1501_v11 = vrot.slane %v1499_v46, 4  ;;  %v18158_v40 = vld [vmem:[#allocation5 + $0x114] ss:$8 sps:$4 sm:$0xff]  }
 0x19d   : > { %v14752_v52 = vcombine.low %v1474_v21, %v1484_v63  ;;  %v4385_v48 = vsel %vm18665_vm4, %v4380_v44, %v4384_v27  ;;  %v1492_v28 = vor.u32 %v1491_v47, %v1488_v61  ;;  %v1507_v1 = vrot.slane %v1505_v38, 5  ;;  %v18945_v41 = vld [vmem:[#allocation2 + $0x70] sm:$0xf]  ;;  %v1317_v38 = vld [vmem:[#allocation2 + $0xa8] sm:$0xf] }
 0x19e   : > { %v4395_v60 = vsel %vm18665_vm4, %v4390_v51, %v4394_v24  ;;  %v747_v4 = vadd.f32 %v18807_v56, %v18688_v42  ;;  %v1502_v7 = vor.u32 %v1501_v11, %v1497_v49  ;;  %v739_v9 = vadd.f32 %v18688_v42, %v18809_v0 }
 0x19f   : > { %3517 = vmatprep.mubr.bf16.mxu1 %v14752_v52  ;;  %v15004_v6 = vcombine.low %v4385_v48, %v4395_v60  ;;  %v750_v59 = vadd.f32 %v18811_v8, %v18688_v42  ;;  %v1493_v12 = vrot.slane %v1492_v28, 4  ;;  %v742_v53 = vadd.f32 %v18688_v42, %v18819_v16  ;;  %v1310_v52 = vld [vmem:[#allocation2 + $0x9c] sm:$0xf] }
 0x1a0   : > { %3518 = vmatmul.mubr.bf16.gmra.mrb[16].mxu1 %v14744_v37  ;;  %v795_v62 = vmax.f32 %v747_v4, 0.0  ;;  %v4397_v18 = vshrl.u32 %v18927_v55, 16  ;;  %v1503_v22 = vrot.slane %v1502_v7, 4  ;;  %v793_v56 = vmax.f32 %v739_v9, 0.0  ;;  %v1321_v4 = vld [vmem:[#allocation2 + $0xb0] sm:$0x1] }
 0x1a1   : > { %6482 = vmatprep.mubr.bf16.mxu0 %v15004_v6  ;;  %v796_v23 = vmax.f32 %v750_v59, 0.0  ;;  %v4400_v26 = vshll.u32 %v18927_v55, 16  ;;  %v1498_v0 = vsel %vm18665_vm4, %v1493_v12, %v1497_v49  ;;  %v794_v8 = vmax.f32 %v742_v53, 0.0  ;;  %v18159_v49 = vld [vmem:[#allocation5 + $0x110] ss:$8 sps:$4 sm:$0xff]  }
 0x1a2   : > { %6483 = vmatmul.mubr.bf16.vlgmr.msra.gmra.mrb[32].mxu0 %v14996_v39  ;;  %v15890_v27 = vpack.c.bf16 %v795_v62, %v795_v62  ;;  %v4399_v21 = vrot.slane %v4397_v18, 4  ;;  %v1508_v33 = vsel %vm18665_vm4, %v1503_v22, %v1507_v1  ;;  %v15888_v42 = vpack.c.bf16 %v793_v56, %v793_v56  ;;  %v18160_v9 = vld [vmem:[#allocation5 + $0x124] ss:$8 sps:$4 sm:$0xff]   ;;  %v1314_v18 = vld [vmem:[#allocation2 + $0xa4] sm:$0x1] }
 0x1a3   : > { %6564 = vmatpush1.bf16.msra.mxu0 %v18157_v14  ;;  %v15891_v16 = vpack.c.bf16 %v796_v23, %v796_v23  ;;  %v4402_v24 = vrot.slane %v4400_v26, 5  ;;  %v14753_v10 = vcombine.low %v1498_v0, %v1508_v33  ;;  %v15889_v39 = vpack.c.bf16 %v794_v8, %v794_v8  ;;  %v18951_v22 = vld [vmem:[#allocation2 + $0x74] sm:$0x1] }
 0x1a4   : > { %v1122_v35 = vshrl.u32 %v15890_v27, 16  ;;  %v1125_v37 = vshll.u32 %v15890_v27, 16  ;;  %6565 = vmatprep.subr.bf16.mxu0 %v18158_v40  ;;  %v1105_v30 = vshrl.u32 %v15888_v42, 16  ;;  %v1108_v43 = vshll.u32 %v15888_v42, 16  ;;  %v18955_v27 = vld [vmem:[#allocation2 + $0x48] sm:$0xf] }
 0x1a5   : > { %v1130_v44 = vshrl.u32 %v15891_v16, 16  ;;  %v1133_v45 = vshll.u32 %v15891_v16, 16  ;;  %3527 = vmatprep.mubr.bf16.mxu1 %v14753_v10  ;;  %v1113_v63 = vshrl.u32 %v15889_v39, 16  ;;  %v1116_v51 = vshll.u32 %v15889_v39, 16  ;;  %v18963_v42 = vld [vmem:[#allocation2 + $0x4c] sm:$0xf] }
 0x1a6   : > { %v1124_v46 = vrot.slane %v1122_v35, 7  ;;  %v4403_v61 = vor.u32 %v4402_v24, %v4399_v21  ;;  %v1107_v47 = vrot.slane %v1105_v30, 7  ;;  %v4406_v11 = vshll.u32 %v18945_v41, 16  ;;  %v18161_v16 = vld [vmem:[#allocation5 + $0x120] ss:$8 sps:$4 sm:$0xff]  }
 0x1a7   : > { %v1132_v48 = vrot.slane %v1130_v44, 7  ;;  %6566 = vmatpush1.bf16.msra.mxu0 %v18159_v49  ;;  %v4410_v60 = vshrl.u32 %v18945_v41, 16  ;;  %v1115_v6 = vrot.slane %v1113_v63, 7  ;;  %v18973_v40 = vld [vmem:[#allocation2 + $0x50] sm:$0x1]  ;;  %v14745_v44 = vcombine.low %v18908_v32, %v18912_v34 }
 0x1a8   : > { %v1127_v28 = vor.u32 %v1125_v37, %v1124_v46  ;;  %v1128_v1 = vrot.slane %v1124_v46, 4  ;;  %v18949_v7 = vrot.slane %v4403_v61, 4  ;;  %6567 = vmatprep.subr.bf16.mxu0 %v18160_v9  ;;  %v1110_v59 = vor.u32 %v1108_v43, %v1107_v47  ;;  %v18162_v39 = vld [vmem:[#allocation5 + $0x134] ss:$8 sps:$4 sm:$0xff]   ;;  %v18975_v30 = vld [vmem:[#allocation2 + $0x78] sm:$0xf] }
 0x1a9   : > { %v1111_v12 = vrot.slane %v1107_v47, 4  ;;  %v1135_v62 = vor.u32 %v1133_v45, %v1132_v48  ;;  %v1137_v53 = vrot.slane %v1132_v48, 4  ;;  %v1118_v23 = vor.u32 %v1116_v51, %v1115_v6  ;;  %v18985_v47 = vld [vmem:[#allocation2 + $0x7c] sm:$0xf]  ;;  %3528 = vmatmul.mubr.bf16.gmra.mrb[20].mxu1 %v14745_v44  ;;  %v18163_v32 = vld [vmem:[#allocation5 + $0x130] ss:$8 sps:$4 sm:$0xff]  }
 0x1aa   : > { %v1318_v56 = vsel %vm18697_vm13, %v1127_v28, %v1317_v38  ;;  %v1120_v26 = vrot.slane %v1115_v6, 4  ;;  %v4408_v0 = vrot.slane %v4406_v11, 5  ;;  %v1311_v8 = vsel %vm18697_vm13, %v1110_v59, %v1310_v52  ;;  %v18989_v28 = vld [vmem:[#allocation2 + $0x80] sm:$0x1] }
 0x1ab   : > { %1319 = vst [vmem:[#allocation2 + $0xa8] sm:$0xf] %v1318_v56  ;;  %v1136_v21 = vsel %vm18704_vm14, %v1128_v1, %v1135_v62  ;;  %v1322_v33 = vsel %vm18710_vm15, %v1137_v53, %v1321_v4  ;;  %v4412_v14 = vrot.slane %v4410_v60, 4  ;;  %6568 = vmatpush1.bf16.msra.mxu0 %v18161_v16  ;;  %1312 = vst [vmem:[#allocation2 + $0x9c] sm:$0xf] %v1311_v8  ;;  %v4416_v37 = vshll.u32 %v18951_v22, 16 }
 0x1ac   : > { %1320 = vst [vmem:[#allocation2 + $0xac] sm:$0xf] %v1136_v21  ;;  %1323 = vst [vmem:[#allocation2 + $0xb0] sm:$0x1] %v1322_v33  ;;  %v1119_v24 = vsel %vm18704_vm14, %v1111_v12, %v1118_v23  ;;  %v1315_v10 = vsel %vm18710_vm15, %v1120_v26, %v1314_v18  ;;  %v4409_v35 = vsel %vm18665_vm4, %v18949_v7, %v4408_v0  ;;  %6569 = vmatprep.subr.bf16.mxu0 %v18162_v39  ;;  %v18164_v4 = vld [vmem:[#allocation5 + $0x144] ss:$8 sps:$4 sm:$0xff]  }
 0x1ad   : > { %1313 = vst [vmem:[#allocation2 + $0xa0] sm:$0xf] %v1119_v24  ;;  %1316 = vst [vmem:[#allocation2 + $0xa4] sm:$0x1] %v1315_v10  ;;  %v4413_v43 = vor.u32 %v4412_v14, %v4408_v0  ;;  %v14997_v45 = vcombine.low %v18927_v55, %v18945_v41  ;;  %v1510_v46 = vshrl.u32 %v18955_v27, 16  ;;  %v4418_v38 = vrot.slane %v4416_v37, 5 }
 0x1ae   : > { %v1513_v63 = vshll.u32 %v18955_v27, 16  ;;  %v1519_v51 = vshll.u32 %v18963_v42, 16  ;;  %v1523_v61 = vshrl.u32 %v18963_v42, 16  ;;  %v1529_v49 = vshll.u32 %v18973_v40, 16  ;;  %v18995_v56 = vld [vmem:[#allocation2 + $0x54] sm:$0xf] }
 0x1af   : > { %v4414_v52 = vrot.slane %v4413_v43, 4  ;;  %v1512_v48 = vrot.slane %v1510_v46, 4  ;;  %6570 = vmatpush1.bf16.msra.mxu0 %v18163_v32  ;;  %v4421_v34 = vshrl.u32 %v18975_v30, 16  ;;  %v4424_v1 = vshll.u32 %v18975_v30, 16  ;;  %v19001_v21 = vld [vmem:[#allocation2 + $0x58] sm:$0xf] }
 0x1b0   : > { %v1515_v55 = vrot.slane %v1513_v63, 5  ;;  %v1521_v11 = vrot.slane %v1519_v51, 5  ;;  %v1525_v60 = vrot.slane %v1523_v61, 4  ;;  %6571 = vmatprep.subr.bf16.mxu0 %v18164_v4  ;;  %v1531_v7 = vrot.slane %v1529_v49, 5  ;;  %v18165_v33 = vld [vmem:[#allocation5 + $0x140] ss:$8 sps:$4 sm:$0xff]  }
 0x1b1   : > { %v4419_v6 = vsel %vm18665_vm4, %v4414_v52, %v4418_v38  ;;  %v4423_v9 = vrot.slane %v4421_v34, 4  ;;  %v4430_v59 = vshll.u32 %v18985_v47, 16  ;;  %v4426_v18 = vrot.slane %v4424_v1, 5  ;;  %v19005_v43 = vld [vmem:[#allocation2 + $0x5c] sm:$0x1] }
 0x1b2   : > { %v15005_v12 = vcombine.low %v4409_v35, %v4419_v6  ;;  %v1516_v62 = vor.u32 %v1515_v55, %v1512_v48  ;;  %v1526_v53 = vor.u32 %v1525_v60, %v1521_v11  ;;  %v4434_v26 = vshrl.u32 %v18985_v47, 16  ;;  %v18166_v35 = vld [vmem:[#allocation5 + $0x154] ss:$8 sps:$4 sm:$0xff]   ;;  %v18167_v52 = vld [vmem:[#allocation5 + $0x150] ss:$8 sps:$4 sm:$0xff]  }
 0x1b3   : > { %v4432_v23 = vrot.slane %v4430_v59, 5  ;;  %v4440_v0 = vshll.u32 %v18989_v28, 16  ;;  %v14746_v8 = vcombine.low %v18955_v27, %v18963_v42  ;;  %6572 = vmatpush1.bf16.msra.mxu0 %v18165_v33  ;;  %v4427_v24 = vor.u32 %v4426_v18, %v4423_v9  ;;  %v18168_v55 = vld [vmem:[#allocation5 + $0x164] ss:$8 sps:$4 sm:$0xff]   ;;  %v18169_v1 = vld [vmem:[%s23573_s2] ss:$0 sm:$0xff] }
 0x1b4   : > { %6492 = vmatprep.mubr.bf16.mxu0 %v15005_v12  ;;  %v1517_v14 = vrot.slane %v1516_v62, 4  ;;  %v1527_v16 = vrot.slane %v1526_v53, 4  ;;  %v14998_v10 = vcombine.low %v18975_v30, %v18985_v47  ;;  %6573 = vmatprep.subr.bf16.mxu0 %v18166_v35  ;;  %v4436_v37 = vrot.slane %v4434_v26, 4  ;;  %v19025_v62 = vld [vmem:[#allocation2 + $0x84] sm:$0xf] }
 0x1b5   : > { %6493 = vmatmul.mubr.bf16.gmra.mrb[36].mxu0 %v14997_v45  ;;  %v4442_v39 = vrot.slane %v4440_v0, 5  ;;  %v1534_v27 = vshrl.u32 %v18995_v56, 16  ;;  %v1537_v42 = vshll.u32 %v18995_v56, 16  ;;  %v4428_v38 = vrot.slane %v4427_v24, 4  ;;  %v18170_v0 = vld [vmem:[#allocation5 + $0x160] ss:$8 sps:$4 sm:$0xff]  }
 0x1b6   : > { %v1522_v44 = vsel %vm18665_vm4, %v1517_v14, %v1521_v11  ;;  %v1532_v46 = vsel %vm18665_vm4, %v1527_v16, %v1531_v7  ;;  %v1543_v30 = vshll.u32 %v19001_v21, 16  ;;  %v4437_v51 = vor.u32 %v4436_v37, %v4432_v23  ;;  %v18171_v14 = vld [vmem:[#allocation5 + $0x174] ss:$8 sps:$4 sm:$0xff]  }
 0x1b7   : > { %v14754_v63 = vcombine.low %v1522_v44, %v1532_v46  ;;  %v1536_v45 = vrot.slane %v1534_v27, 4  ;;  %v1539_v61 = vrot.slane %v1537_v42, 5  ;;  %6574 = vmatpush1.bf16.msra.mxu0 %v18167_v52  ;;  %v4433_v48 = vsel %vm18665_vm4, %v4428_v38, %v4432_v23  ;;  %v18172_v52 = vld [vmem:[#allocation5 + $0x170] ss:$8 sps:$4 sm:$0xff]  }
 0x1b8   : > { %v1545_v49 = vrot.slane %v1543_v30, 5  ;;  %v1547_v32 = vshrl.u32 %v19001_v21, 16  ;;  %v1553_v34 = vshll.u32 %v19005_v43, 16  ;;  %6575 = vmatprep.subr.bf16.mxu0 %v18168_v55  ;;  %v4438_v11 = vrot.slane %v4437_v51, 4 }
 0x1b9   : > { %3537 = vmatprep.mubr.bf16.mxu1 %v14754_v63  ;;  %v1540_v60 = vor.u32 %v1539_v61, %v1536_v45  ;;  %v763_v4 = vadd.f32 %v18169_v1, %v18837_v54  ;;  %v755_v6 = vadd.f32 %v18169_v1, %v18847_v2  ;;  %v766_v59 = vadd.f32 %v18169_v1, %v18854_v20  ;;  %v1331_v63 = vld [vmem:[#allocation2 + $0xc0] sm:$0xf] }
 0x1ba   : > { %3538 = vmatmul.mubr.bf16.gmra.mrb[24].mxu1 %v14746_v8  ;;  %v1549_v7 = vrot.slane %v1547_v32, 4  ;;  %v1555_v9 = vrot.slane %v1553_v34, 5  ;;  %v758_v12 = vadd.f32 %v18169_v1, %v18857_v29  ;;  %v4443_v53 = vsel %vm18665_vm4, %v4438_v11, %v4442_v39  ;;  %v1324_v34 = vld [vmem:[#allocation2 + $0xb4] sm:$0xf]  ;;  %v19035_v1 = vld [vmem:[#allocation2 + $0x88] sm:$0xf] }
 0x1bb   : > { %v1541_v18 = vrot.slane %v1540_v60, 4  ;;  %v799_v23 = vmax.f32 %v763_v4, 0.0  ;;  %v797_v26 = vmax.f32 %v755_v6, 0.0  ;;  %6576 = vmatpush1.bf16.msra.mxu0 %v18170_v0  ;;  %v15006_v54 = vcombine.low %v4433_v48, %v4443_v53  ;;  %v18173_v11 = vld [vmem:[#allocation5 + $0x184] ss:$8 sps:$4 sm:$0xff]  }
 0x1bc   : > { %v1550_v33 = vor.u32 %v1549_v7, %v1545_v49  ;;  %v800_v2 = vmax.f32 %v766_v59, 0.0  ;;  %v798_v8 = vmax.f32 %v758_v12, 0.0  ;;  %6577 = vmatprep.subr.bf16.mxu0 %v18171_v14  ;;  %v4445_v24 = vshrl.u32 %v19025_v62, 16  ;;  %v1335_v53 = vld [vmem:[#allocation2 + $0xc8] sm:$0x1] }
 0x1bd   : > { %v1546_v20 = vsel %vm18665_vm4, %v1541_v18, %v1545_v49  ;;  %v15894_v29 = vpack.c.bf16 %v799_v23, %v799_v23  ;;  %v15892_v16 = vpack.c.bf16 %v797_v26, %v797_v26  ;;  %6502 = vmatprep.mubr.bf16.mxu0 %v15006_v54  ;;  %v4448_v27 = vshll.u32 %v19025_v62, 16  ;;  %v1328_v18 = vld [vmem:[#allocation2 + $0xbc] sm:$0x1] }
 0x1be   : > { %v1551_v35 = vrot.slane %v1550_v33, 4  ;;  %v15895_v37 = vpack.c.bf16 %v800_v2, %v800_v2  ;;  %v15893_v39 = vpack.c.bf16 %v798_v8, %v798_v8  ;;  %6503 = vmatmul.mubr.bf16.gmra.mrb[40].mxu0 %v14998_v10  ;;  %v4447_v4 = vrot.slane %v4445_v24, 4  ;;  %v19037_v33 = vld [vmem:[#allocation2 + $0x8c] sm:$0x1]  ;;  %v18174_v2 = vld [vmem:[#allocation5 + $0x180] ss:$8 sps:$4 sm:$0xff]  }
 0x1bf   : > { %v1156_v42 = vshrl.u32 %v15894_v29, 16  ;;  %v1159_v44 = vshll.u32 %v15894_v29, 16  ;;  %v1139_v46 = vshrl.u32 %v15892_v16, 16  ;;  %v1142_v38 = vshll.u32 %v15892_v16, 16  ;;  %6578 = vmatpush1.bf16.msra.mxu0 %v18172_v52  ;;  %v1648_v16 = vld [vmem:[#allocation2 + $0xc] sm:$0xf] }
 0x1c0   : > { %v1556_v30 = vsel %vm18665_vm4, %v1551_v35, %v1555_v9  ;;  %v1164_v51 = vshrl.u32 %v15895_v37, 16  ;;  %v1167_v45 = vshll.u32 %v15895_v37, 16  ;;  %v1147_v61 = vshrl.u32 %v15893_v39, 16  ;;  %6579 = vmatprep.subr.bf16.mxu0 %v18173_v11  ;;  %v18175_v24 = vld [vmem:[#allocation5 + $0x194] ss:$8 sps:$4 sm:$0xff]  }
 0x1c1   : > { %v14755_v48 = vcombine.low %v1546_v20, %v1556_v30  ;;  %v1158_v49 = vrot.slane %v1156_v42, 7  ;;  %v1141_v32 = vrot.slane %v1139_v46, 7  ;;  %v1150_v55 = vshll.u32 %v15893_v39, 16  ;;  %v19052_v42 = vld [vmem:[#allocation2 + $0x10] sm:$0xf] }
 0x1c2   : > { %v1166_v10 = vrot.slane %v1164_v51, 7  ;;  %v1149_v60 = vrot.slane %v1147_v61, 7  ;;  %v4450_v6 = vrot.slane %v4448_v27, 5  ;;  %v4454_v29 = vshll.u32 %v19035_v1, 16  ;;  %v19060_v52 = vld [vmem:[#allocation2 + $0x90] sm:$0xf] }
 0x1c3   : > { %3547 = vmatprep.mubr.bf16.mxu1 %v14755_v48  ;;  %v1161_v7 = vor.u32 %v1159_v44, %v1158_v49  ;;  %v1162_v9 = vrot.slane %v1158_v49, 4  ;;  %v1144_v59 = vor.u32 %v1142_v38, %v1141_v32  ;;  %v1145_v12 = vrot.slane %v1141_v32, 4  ;;  %6580 = vmatpush1.bf16.msra.mxu0 %v18174_v2  ;;  %v18176_v48 = vld [vmem:[#allocation5 + $0x190] ss:$8 sps:$4 sm:$0xff]   ;;  %v19065_v11 = vld [vmem:[#allocation2 + $0x94] sm:$0xf] }
 0x1c4   : > { %v1169_v23 = vor.u32 %v1167_v45, %v1166_v10  ;;  %v1171_v26 = vrot.slane %v1166_v10, 4  ;;  %v1152_v0 = vor.u32 %v1150_v55, %v1149_v60  ;;  %v1154_v54 = vrot.slane %v1149_v60, 4  ;;  %6581 = vmatprep.subr.bf16.mxu0 %v18175_v24  ;;  %v18177_v10 = vld [vmem:[#allocation5 + $0x1a4] ss:$8 sps:$4 sm:$0xff]  }
 0x1c5   : > { %v1332_v8 = vsel %vm18697_vm13, %v1161_v7, %v1331_v63  ;;  %v1325_v14 = vsel %vm18697_vm13, %v1144_v59, %v1324_v34  ;;  %v4451_v20 = vor.u32 %v4450_v6, %v4447_v4  ;;  %v4456_v46 = vrot.slane %v4454_v29, 5  ;;  %v19069_v7 = vld [vmem:[#allocation2 + $0x98] sm:$0x1] }
 0x1c6   : > { %1333 = vst [vmem:[#allocation2 + $0xc0] sm:$0xf] %v1332_v8  ;;  %1326 = vst [vmem:[#allocation2 + $0xb4] sm:$0xf] %v1325_v14  ;;  %v1170_v35 = vsel %vm18704_vm14, %v1162_v9, %v1169_v23  ;;  %v1336_v37 = vsel %vm18710_vm15, %v1171_v26, %v1335_v53  ;;  %v1153_v39 = vsel %vm18704_vm14, %v1145_v12, %v1152_v0  ;;  %v4458_v38 = vshrl.u32 %v19035_v1, 16 }
 0x1c7   : > { %v1329_v27 = vsel %vm18710_vm15, %v1154_v54, %v1328_v18  ;;  %1334 = vst [vmem:[#allocation2 + $0xc4] sm:$0xf] %v1170_v35  ;;  %1337 = vst [vmem:[#allocation2 + $0xc8] sm:$0x1] %v1336_v37  ;;  %v4452_v44 = vrot.slane %v4451_v20, 4  ;;  %v4464_v30 = vshll.u32 %v19037_v33, 16  ;;  %v14747_v63 = vcombine.low %v18995_v56, %v19001_v21  ;;  %6582 = vmatpush1.bf16.msra.mxu0 %v18176_v48 }
 0x1c8   : > { %1327 = vst [vmem:[#allocation2 + $0xb8] sm:$0xf] %v1153_v39  ;;  %1330 = vst [vmem:[#allocation2 + $0xbc] sm:$0x1] %v1329_v27  ;;  %v14999_v51 = vcombine.low %v19025_v62, %v19035_v1  ;;  %v1673_v45 = vshrl.u32 %v1648_v16, 16  ;;  %v1676_v61 = vshll.u32 %v1648_v16, 16  ;;  %6583 = vmatprep.subr.bf16.mxu0 %v18177_v10  ;;  %v14764_v6 = vcombine.low %v1648_v16, %v19052_v42 }
 0x1c9   : > { %v4457_v49 = vsel %vm18665_vm4, %v4452_v44, %v4456_v46  ;;  %v4460_v32 = vrot.slane %v4458_v38, 4  ;;  %v4466_v34 = vrot.slane %v4464_v30, 5  ;;  %v1682_v55 = vshll.u32 %v19052_v42, 16  ;;  %3548 = vmatmul.mubr.bf16.gmra.mrb[28].mxu1 %v14747_v63  ;;  %v18178_v54 = vld [vmem:[#allocation5 + $0x1a0] ss:$8 sps:$4 sm:$0xff]  }
 0x1ca   : > { %v1675_v56 = vrot.slane %v1673_v45, 4  ;;  %v1678_v60 = vrot.slane %v1676_v61, 5  ;;  %v1686_v4 = vshrl.u32 %v19052_v42, 16  ;;  %v4469_v12 = vshrl.u32 %v19060_v52, 16  ;;  %3590 = vmatprep.mubr.bf16.mxu1 %v14764_v6  ;;  %v19077_v8 = vld [vmem:[#allocation5 + $0x200] ss:$8 sps:$4 sm:$0xff]  }
 0x1cb   : > { %v4461_v9 = vor.u32 %v4460_v32, %v4456_v46  ;;  %v19071_v59 = vrot.slane %v1682_v55, 5  ;;  %v4472_v53 = vshll.u32 %v19060_v52, 16  ;;  %v4478_v26 = vshll.u32 %v19065_v11, 16  ;;  %6584 = vmatpush1.bf16.msra.mxu0 %v18178_v54  ;;  %v18179_v16 = vld [vmem:[#allocation5 + $0x1b4] ss:$8 sps:$4 sm:$0xff]  }
 0x1cc   : > { %v1679_v18 = vor.u32 %v1678_v60, %v1675_v56  ;;  %v1688_v23 = vrot.slane %v1686_v4, 4  ;;  %v4482_v0 = vshrl.u32 %v19065_v11, 16  ;;  %v4471_v14 = vrot.slane %v4469_v12, 4  ;;  %6585 = vmatprep.subr.bf16.mxu0 %v18179_v16  ;;  %v1650_v27 = vld [vmem:[#allocation2 + $0x18] sm:$0xf] }
 0x1cd   : > { %v4462_v2 = vrot.slane %v4461_v9, 4  ;;  %v4474_v20 = vrot.slane %v4472_v53, 5  ;;  %v4488_v29 = vshll.u32 %v19069_v7, 16  ;;  %v4480_v37 = vrot.slane %v4478_v26, 5  ;;  %v19091_v63 = vld [vmem:[#allocation2 + $0x1c] sm:$0xf] }
 0x1ce   : > { %v19080_v24 = vrot.slane %v1679_v18, 4  ;;  %v1689_v35 = vor.u32 %v1688_v23, %v19071_v59  ;;  %v4484_v39 = vrot.slane %v4482_v0, 4  ;;  %v1595_v30 = vsel %vm18675_vm7, %v14716_v5, %v1594_v15  ;;  %v19093_v45 = vld [vmem:[#allocation2 + $0x9c] sm:$0xf]  ;;  %v1558_v10 = vld [vmem:[#allocation2 + $0xc] sm:$0xe] }
 0x1cf   : > { %v4467_v44 = vsel %vm18665_vm4, %v4462_v2, %v4466_v34  ;;  %v4475_v46 = vor.u32 %v4474_v20, %v4471_v14  ;;  %v4490_v38 = vrot.slane %v4488_v29, 5  ;;  %v14756_v55 = vcombine.low %v1595_v30, %v18683_v19  ;;  %v19098_v34 = vld [vmem:[#allocation5 + $0x214] ss:$8 sps:$4 sm:$0xff]   ;;  %v18180_v56 = vld [vmem:[#allocation5 + $0x1b0] ss:$8 sps:$4 sm:$0xff]  }
 0x1d0   : > { %v15007_v61 = vcombine.low %v4457_v49, %v4467_v44  ;;  %v19095_v48 = vrot.slane %v1689_v35, 4  ;;  %v4485_v32 = vor.u32 %v4484_v39, %v4480_v37  ;;  %6586 = vmatpush1.bf16.msra.mxu0 %v18180_v56  ;;  %v15000_v58 = vcombine.low %v19060_v52, %v19065_v11  ;;  %v19102_v60 = vld [vmem:[#allocation5 + $0x210] ss:$8 sps:$4 sm:$0xff]   ;;  %v18181_v49 = vld [vmem:[#allocation5 + $0x1c4] ss:$8 sps:$4 sm:$0xff]  }
 0x1d1   : > { %v4476_v50 = vrot.slane %v4475_v46, 4  ;;  %v1697_v15 = vshrl.u32 %v1650_v27, 16  ;;  %v1700_v5 = vshll.u32 %v1650_v27, 16  ;;  %v19104_v4 = vld [vmem:[#allocation2 + $0xa0] sm:$0xf]  ;;  %6587 = vmatprep.subr.bf16.mxu0 %v18181_v49  ;;  %3591 = vmatmul.mubr.bf16.vlgmr.msra.gmra.mrb[0].mxu1 %v14756_v55  ;;  %v14765_v9 = vcombine.low %v1650_v27, %v19091_v63 }
 0x1d2   : > { %23702 = vst [vmem:[#allocation18_spill] sm:$0xff] %v19104_v4  ;;  %6512 = vmatprep.mubr.bf16.mxu0 %v15007_v61  ;;  %v4486_v6 = vrot.slane %v4485_v32, 4  ;;  %v19108_v12 = vld [vmem:[#allocation2 + $0xa4] sm:$0x1]  ;;  %v4493_v53 = vshrl.u32 %v19093_v45, 16  ;;  %3672 = vmatpush1.bf16.msra.mxu1 %v19077_v8  ;;  %v4496_v54 = vshll.u32 %v19093_v45, 16 }
 0x1d3   : > { %23703 = vst [vmem:[#allocation19_spill] sm:$0xff] %v19108_v12  ;;  %6513 = vmatmul.mubr.bf16.gmra.mrb[44].mxu0 %v14999_v51  ;;  %v4481_v18 = vsel %vm18665_vm4, %v4476_v50, %v4480_v37  ;;  %v19117_v23 = vrot.slane %v1697_v15, 4  ;;  %v19119_v26 = vrot.slane %v1700_v5, 5  ;;  %v19121_v0 = vld [vmem:[#allocation5 + $0x224] ss:$8 sps:$4 sm:$0xff]   ;;  %3600 = vmatprep.mubr.bf16.mxu1 %v14765_v9  ;;  %v4502_v51 = vshll.u32 %v19104_v4, 16 }
 0x1d4   : > { %v4491_v2 = vsel %vm18665_vm4, %v4486_v6, %v4490_v38  ;;  %3673 = vmatprep.subr.bf16.mxu1 %v19098_v34  ;;  %v4495_v62 = vrot.slane %v4493_v53, 4  ;;  %v4506_v14 = vshrl.u32 %v19104_v4, 16  ;;  %v19129_v20 = vld [vmem:[#allocation2 + $0x24] sm:$0xf]  ;;  %v4498_v16 = vrot.slane %v4496_v54, 5 }
 0x1d5   : > { %v15008_v29 = vcombine.low %v4481_v18, %v4491_v2  ;;  %v4512_v35 = vshll.u32 %v19108_v12, 16  ;;  %v14717_v37 = vrot.slane %v1558_v10, 9  ;;  %v18182_v39 = vld [vmem:[#allocation5 + $0x1c0] ss:$8 sps:$4 sm:$0xff]   ;;  %v4504_v27 = vrot.slane %v4502_v51, 5 }
 0x1d6   : > { %6588 = vmatpush1.bf16.msra.mxu0 %v18182_v39  ;;  %v4508_v44 = vrot.slane %v4506_v14, 4  ;;  %v18183_v46 = vld [vmem:[#allocation2 + $0x10] sm:$0xf]  ;;  %v18184_v30 = vld [vmem:[#allocation2 + $0x14] sm:$0x1]  ;;  %3674 = vmatpush1.bf16.msra.mxu1 %v19102_v60  ;;  %v4499_v50 = vor.u32 %v4498_v16, %v4495_v62  ;;  %v1721_v5 = vshrl.u32 %v19129_v20, 16 }
 0x1d7   : > { %v1601_v38 = vrot.slane %v18183_v46, 5  ;;  %v1604_v61 = vrot.slane %v18184_v30, 5  ;;  %v19132_v32 = vld [vmem:[#allocation2 + $0x28] sm:$0xf]  ;;  %v18185_v55 = vld [vmem:[#allocation5 + $0x1d4] ss:$8 sps:$4 sm:$0xff]   ;;  %6522 = vmatprep.mubr.bf16.mxu0 %v15008_v29  ;;  %3675 = vmatprep.subr.bf16.mxu1 %v19121_v0 }
 0x1d8   : > { %23704 = vst [vmem:[#allocation20_spill] sm:$0xff] %v19132_v32  ;;  %6589 = vmatprep.subr.bf16.mxu0 %v18185_v55  ;;  %v19135_v56 = vld [vmem:[#allocation5 + $0x220] ss:$8 sps:$4 sm:$0xff]   ;;  %v4514_v15 = vrot.slane %v4512_v35, 5  ;;  %v4509_v6 = vor.u32 %v4508_v44, %v4504_v27  ;;  %v1724_v18 = vshll.u32 %v19129_v20, 16  ;;  %v4500_v62 = vrot.slane %v4499_v50, 4 }
 0x1d9   : > { %v19140_v49 = vld [vmem:[#allocation2 + $0xa8] sm:$0xf]  ;;  %v1602_v9 = vsel %vm18675_vm7, %v14717_v37, %v1601_v38  ;;  %v1603_v53 = vrot.slane %v1601_v38, 4  ;;  %v19146_v54 = vld [vmem:[#allocation5 + $0x234] ss:$8 sps:$4 sm:$0xff]   ;;  %v19150_v51 = vrot.slane %v1721_v5, 4  ;;  %v14766_v29 = vcombine.low %v19129_v20, %v19132_v32 }
 0x1da   : > { %v19148_v2 = vld [vmem:[#allocation2 + $0xac] sm:$0xf]  ;;  %v19155_v16 = vld [vmem:[#allocation2 + $0xb0] sm:$0x1]  ;;  %v18186_v35 = vld [vmem:[#allocation5 + $0x1d0] ss:$8 sps:$4 sm:$0xff]   ;;  %v4505_v20 = vsel %vm18665_vm4, %v4500_v62, %v4504_v27  ;;  %3676 = vmatpush1.bf16.msra.mxu1 %v19135_v56 }
 0x1db   : > { %23705 = vst [vmem:[#allocation21_spill] sm:$0xff] %v19148_v2  ;;  %23706 = vst [vmem:[#allocation22_spill] sm:$0xff] %v19150_v51  ;;  %6590 = vmatpush1.bf16.msra.mxu0 %v18186_v35  ;;  %v4510_v37 = vrot.slane %v4509_v6, 4  ;;  %v1605_v39 = vsel %vm18675_vm7, %v1603_v53, %v1604_v61  ;;  %v19159_v44 = vrot.slane %v1724_v18, 5  ;;  %v4517_v46 = vshrl.u32 %v19140_v49, 16  ;;  %3677 = vmatprep.subr.bf16.mxu1 %v19146_v54 }
 0x1dc   : > { %23707 = vst [vmem:[#allocation23_spill] sm:$0xff] %v19155_v16  ;;  %v1559_v38 = vld [vmem:[#allocation2 + $0x18] sm:$0xe]  ;;  %v18187_v30 = vld [vmem:[#allocation5 + $0x1e4] ss:$8 sps:$4 sm:$0xff]   ;;  %6523 = vmatmul.mubr.bf16.gmra.mrb[48].mxu0 %v15000_v58  ;;  %v14757_v55 = vcombine.low %v1602_v9, %v1605_v39  ;;  %v4520_v5 = vshll.u32 %v19140_v49, 16 }
 0x1dd   : > { %23708 = vst [vmem:[#allocation24_spill] sm:$0xff] %v19159_v44  ;;  %6591 = vmatprep.subr.bf16.mxu0 %v18187_v30  ;;  %v19168_v50 = vld [vmem:[#allocation5 + $0x230] ss:$8 sps:$4 sm:$0xff]   ;;  %v19170_v61 = vld [vmem:[#allocation5 + $0x244] ss:$8 sps:$4 sm:$0xff]   ;;  %v4526_v6 = vshll.u32 %v19148_v2, 16  ;;  %v4515_v53 = vsel %vm18665_vm4, %v4510_v37, %v4514_v15 }
 0x1de   : > { %v4519_v52 = vrot.slane %v4517_v46, 4  ;;  %v4530_v58 = vshrl.u32 %v19148_v2, 16  ;;  %v4536_v27 = vshll.u32 %v19155_v16, 16  ;;  %v19179_v9 = vld [vmem:[#allocation2 + $0x30] sm:$0xf]  ;;  %v15009_v18 = vcombine.low %v4505_v20, %v4515_v53  ;;  %3601 = vmatmul.mubr.bf16.gmra.mrb[4].mxu1 %v14757_v55 }
 0x1df   : > { %v4522_v62 = vrot.slane %v4520_v5, 5  ;;  %v4528_v35 = vrot.slane %v4526_v6, 5  ;;  %v14718_v39 = vrot.slane %v1559_v38, 9  ;;  %v19181_v30 = vld [vmem:[#allocation2 + $0x34] sm:$0xf]  ;;  %3610 = vmatprep.mubr.bf16.mxu1 %v14766_v29  ;;  %3678 = vmatpush1.bf16.msra.mxu1 %v19168_v50  ;;  %v1748_v29 = vshll.u32 %v19179_v9, 16 }
 0x1e0   : > { %23709 = vst [vmem:[#allocation25_spill] sm:$0xff] %v19181_v30  ;;  %v18188_v14 = vld [vmem:[#allocation5 + $0x1e0] ss:$8 sps:$4 sm:$0xff]   ;;  %v4532_v37 = vrot.slane %v4530_v58, 4  ;;  %v4538_v46 = vrot.slane %v4536_v27, 5  ;;  %6532 = vmatprep.mubr.bf16.mxu0 %v15009_v18  ;;  %3679 = vmatprep.subr.bf16.mxu1 %v19170_v61 }
 0x1e1   : > { %6592 = vmatpush1.bf16.msra.mxu0 %v18188_v14  ;;  %v19183_v15 = vld [vmem:[#allocation5 + $0x240] ss:$8 sps:$4 sm:$0xff]   ;;  %v18189_v19 = vld [vmem:[#allocation2 + $0x1c] sm:$0xf]  ;;  %v18190_v10 = vld [vmem:[#allocation2 + $0x20] sm:$0x1]  ;;  %v4523_v20 = vor.u32 %v4522_v62, %v4519_v52  ;;  %v14767_v62 = vcombine.low %v19179_v9, %v19181_v30 }
 0x1e2   : > { %v1608_v36 = vrot.slane %v18189_v19, 5  ;;  %v1611_v25 = vrot.slane %v18190_v10, 5  ;;  %6593 = vmatprep.subr.bf16.mxu0 %v18191_v31  ;;  %v1745_v14 = vshrl.u32 %v19179_v9, 16  ;;  %v19190_v55 = vld [vmem:[#allocation5 + $0x254] ss:$8 sps:$4 sm:$0xff]   ;;  %v4533_v19 = vor.u32 %v4532_v37, %v4528_v35 }
 0x1e3   : > { %v19192_v5 = vld [vmem:[#allocation2 + $0xb4] sm:$0xf]  ;;  %v19198_v53 = vld [vmem:[#allocation2 + $0xb8] sm:$0xf]  ;;  %v1560_v52 = vld [vmem:[#allocation2 + $0x24] sm:$0xe]  ;;  %v23713_v9 = vcombine.low %v19093_v45, %v19104_v4  ;;  %3680 = vmatpush1.bf16.msra.mxu1 %v19183_v15 }
 0x1e4   : > { %v1609_v31 = vsel %vm18675_vm7, %v14718_v39, %v1608_v36  ;;  %v1610_v10 = vrot.slane %v1608_v36, 4  ;;  %v4524_v58 = vrot.slane %v4523_v20, 4  ;;  %v19200_v27 = vrot.slane %v1745_v14, 4  ;;  %v19206_v38 = vld [vmem:[#allocation5 + $0x250] ss:$8 sps:$4 sm:$0xff]   ;;  %3681 = vmatprep.subr.bf16.mxu1 %v19190_v55 }
 0x1e5   : > { %v19202_v18 = vrot.slane %v1748_v29, 5  ;;  %v19208_v37 = vld [vmem:[#allocation2 + $0xbc] sm:$0x1]  ;;  %6594 = vmatpush1.bf16.msra.mxu0 %v18192_v13  ;;  %v4534_v36 = vrot.slane %v4533_v19, 4  ;;  %v19212_v6 = vld [vmem:[#allocation5 + $0x264] ss:$8 sps:$4 sm:$0xff]  }
 0x1e6   : > { %23710 = vst [vmem:[#allocation26_spill] sm:$0xff] %v19200_v27  ;;  %23712 = vst [vmem:[#allocation28_spill] sm:$0xff] %v19208_v37  ;;  %v1612_v39 = vsel %vm18675_vm7, %v1610_v10, %v1611_v25  ;;  %v4541_v20 = vshrl.u32 %v19192_v5, 16  ;;  %v4544_v14 = vshll.u32 %v19192_v5, 16  ;;  %v19216_v29 = vld [vmem:[#allocation2 + $0x3c] sm:$0xf]  ;;  %6533 = vmatmul.mubr.bf16.gmra.mrb[52].mxu0 %v23713_v9  ;;  %v4529_v13 = vsel %vm18665_vm4, %v4524_v58, %v4528_v35 }
 0x1e7   : > { %23711 = vst [vmem:[#allocation27_spill] sm:$0xff] %v19202_v18  ;;  %v18193_v18 = vld [vmem:[#allocation5 + $0x204] ss:$8 sps:$4 sm:$0xff]   ;;  %v14758_v19 = vcombine.low %v1609_v31, %v1612_v39  ;;  %v4550_v25 = vshll.u32 %v19198_v53, 16  ;;  %v4554_v10 = vshrl.u32 %v19198_v53, 16  ;;  %v4539_v30 = vsel %vm18665_vm4, %v4534_v36, %v4538_v46  ;;  %3682 = vmatpush1.bf16.msra.mxu1 %v19206_v38 }
 0x1e8   : > { %6676 = vmatprep.subr.bf16.mxu0 %v18193_v18  ;;  %v19226_v27 = vld [vmem:[#allocation2 + $0x40] sm:$0xf]  ;;  %v4543_v18 = vrot.slane %v4541_v20, 4  ;;  %v4546_v45 = vrot.slane %v4544_v14, 5  ;;  %v4560_v9 = vshll.u32 %v19208_v37, 16  ;;  %v15010_v16 = vcombine.low %v4529_v13, %v4539_v30  ;;  %3683 = vmatprep.subr.bf16.mxu1 %v19212_v6 }
 0x1e9   : > { %23714 = vst [vmem:[#allocation29_spill] sm:$0xff] %v19226_v27  ;;  %3611 = vmatmul.mubr.bf16.gmra.mrb[8].mxu1 %v14758_v19  ;;  %v19232_v35 = vld [vmem:[#allocation5 + $0x260] ss:$8 sps:$4 sm:$0xff]   ;;  %v4552_v31 = vrot.slane %v4550_v25, 5  ;;  %v4556_v58 = vrot.slane %v4554_v10, 4  ;;  %v14719_v39 = vrot.slane %v1560_v52, 9 }
 0x1ea   : > { %3620 = vmatprep.mubr.bf16.mxu1 %v14767_v62  ;;  %v4547_v44 = vor.u32 %v4546_v45, %v4543_v18  ;;  %v4562_v51 = vrot.slane %v4560_v9, 5  ;;  %v18194_v32 = vld [vmem:[#allocation2 + $0x28] sm:$0xf]  ;;  %v18195_v4 = vld [vmem:[#allocation2 + $0x2c] sm:$0x1]  ;;  %6542 = vmatprep.mubr.bf16.mxu0 %v15010_v16  ;;  %v1769_v14 = vshrl.u32 %v19216_v29, 16  ;;  %v14768_v18 = vcombine.low %v19216_v29, %v19226_v27 }
 0x1eb   : > { %v1615_v12 = vrot.slane %v18194_v32, 5  ;;  %v1618_v46 = vrot.slane %v18195_v4, 5  ;;  %v19234_v36 = vld [vmem:[#allocation5 + $0x274] ss:$8 sps:$4 sm:$0xff]   ;;  %v4557_v20 = vor.u32 %v4556_v58, %v4552_v31  ;;  %v1772_v52 = vshll.u32 %v19216_v29, 16  ;;  %3684 = vmatpush1.bf16.msra.mxu1 %v19232_v35 }
 0x1ec   : > { %v4548_v62 = vrot.slane %v4547_v44, 4  ;;  %v19245_v16 = vld [vmem:[#allocation2 + $0x6c] sm:$0xf]  ;;  %v19247_v25 = vrot.slane %v1769_v14, 4  ;;  %v19253_v45 = vld [vmem:[#allocation2 + $0x70] sm:$0xf]  ;;  %3685 = vmatprep.subr.bf16.mxu1 %v19234_v36 }
 0x1ed   : > { %v1616_v32 = vsel %vm18675_vm7, %v14719_v39, %v1615_v12  ;;  %v1617_v4 = vrot.slane %v1615_v12, 4  ;;  %v4558_v19 = vrot.slane %v4557_v20, 4  ;;  %v19249_v10 = vrot.slane %v1772_v52, 5  ;;  %23717 = vst [vmem:[#allocation32_spill] sm:$0xff] %v19253_v45  ;;  %v1561_v39 = vld [vmem:[#allocation2 + $0x30] sm:$0xe] }
 0x1ee   : > { %23715 = vst [vmem:[#allocation30_spill] sm:$0xff] %v19247_v25  ;;  %v4553_v44 = vsel %vm18665_vm4, %v4548_v62, %v4552_v31  ;;  %v4678_v9 = vshrl.u32 %v19245_v16, 16  ;;  %v4681_v58 = vshll.u32 %v19245_v16, 16  ;;  %v23718_v20 = vcombine.low %v19140_v49, %v19148_v2  ;;  %v19267_v52 = vld [vmem:[#allocation5 + $0x270] ss:$8 sps:$4 sm:$0xff]  }
 0x1ef   : > { %23716 = vst [vmem:[#allocation31_spill] sm:$0xff] %v19249_v10  ;;  %v1619_v12 = vsel %vm18675_vm7, %v1617_v4, %v1618_v46  ;;  %v4563_v29 = vsel %vm18665_vm4, %v4558_v19, %v4562_v51  ;;  %v4687_v31 = vshll.u32 %v19253_v45, 16  ;;  %v4691_v46 = vshrl.u32 %v19253_v45, 16  ;;  %v4564_v62 = vld [vmem:[#allocation2 + $0x60] sm:$0xe]  ;;  %3686 = vmatpush1.bf16.msra.mxu1 %v19267_v52 }
 0x1f0   : > { %6543 = vmatmul.mubr.bf16.gmra.mrb[56].mxu0 %v23718_v20  ;;  %v14759_v14 = vcombine.low %v1616_v32, %v1619_v12  ;;  %v15011_v4 = vcombine.low %v4553_v44, %v4563_v29  ;;  %v19272_v13 = vld [vmem:[#allocation5 + $0x284] ss:$8 sps:$4 sm:$0xff]   ;;  %v4680_v49 = vrot.slane %v4678_v9, 4  ;;  %v4683_v20 = vrot.slane %v4681_v58, 5  ;;  %v19276_v32 = vld [vmem:[#allocation2 + $0x48] sm:$0xf] }
 0x1f1   : > { %23719 = vst [vmem:[#allocation33_spill] sm:$0xff] %v19272_v13  ;;  %v15020_v51 = vcombine.low %v19245_v16, %v19253_v45  ;;  %v19278_v19 = vld [vmem:[#allocation5 + $0x280] ss:$8 sps:$4 sm:$0xff]   ;;  %v19280_v12 = vrot.slane %v4687_v31, 5  ;;  %v4693_v30 = vrot.slane %v4691_v46, 4  ;;  %v14720_v10 = vrot.slane %v1561_v39, 9  ;;  %3687 = vmatprep.subr.bf16.mxu1 %v19272_v13 }
 0x1f2   : > { %3621 = vmatmul.mubr.bf16.gmra.mrb[12].mxu1 %v14759_v14  ;;  %v18196_v25 = vld [vmem:[#allocation2 + $0x34] sm:$0xf]  ;;  %v19282_v29 = vld [vmem:[#allocation2 + $0x4c] sm:$0xf]  ;;  %6552 = vmatprep.mubr.bf16.mxu0 %v15011_v4  ;;  %v4684_v9 = vor.u32 %v4683_v20, %v4680_v49  ;;  %v18197_v58 = vld [vmem:[#allocation2 + $0x38] sm:$0x1] }
 0x1f3   : > { %23720 = vst [vmem:[#allocation34_spill] sm:$0xff] %v19280_v12  ;;  %v1622_v44 = vrot.slane %v18196_v25, 5  ;;  %23721 = vst [vmem:[#allocation35_spill] sm:$0xff] %v19282_v29  ;;  %3630 = vmatprep.mubr.bf16.mxu1 %v14768_v18  ;;  %v1625_v27 = vrot.slane %v18197_v58, 5  ;;  %v14972_v37 = vrot.slane %v4564_v62, 9  ;;  %v4694_v14 = vor.u32 %v4693_v30, %v19280_v12  ;;  %3688 = vmatpush1.bf16.msra.mxu1 %v19278_v19 }
 0x1f4   : > { %v18198_v16 = vld [vmem:[#allocation2 + $0x64] sm:$0xf]  ;;  %v1793_v31 = vshrl.u32 %v19276_v32, 16  ;;  %v19291_v46 = vld [vmem:[#allocation2 + $0x78] sm:$0xf]  ;;  %v19294_v62 = vrot.slane %v4684_v9, 4 }
 0x1f5   : > { %v4598_v45 = vrot.slane %v18198_v16, 5  ;;  %v19284_v2 = vld [vmem:[#allocation5 + $0x294] ss:$8 sps:$4 sm:$0xff]   ;;  %v1623_v39 = vsel %vm18675_vm7, %v14720_v10, %v1622_v44  ;;  %v1624_v25 = vrot.slane %v1622_v44, 4  ;;  %v1796_v30 = vshll.u32 %v19276_v32, 16 }
 0x1f6   : > { %v1562_v18 = vld [vmem:[#allocation2 + $0x3c] sm:$0xe]  ;;  %23722 = vst [vmem:[#allocation36_spill] sm:$0xff] %v19294_v62  ;;  %v19303_v10 = vrot.slane %v4694_v14, 4  ;;  %v19307_v58 = vrot.slane %v1793_v31, 4  ;;  %v14769_v14 = vcombine.low %v19276_v32, %v19282_v29  ;;  %v23730_v31 = vcombine.low %v19192_v5, %v19198_v53  ;;  %3689 = vmatprep.subr.bf16.mxu1 %v19284_v2 }
 0x1f7   : > { %v19298_v4 = vsel %vm18675_vm7, %v14972_v37, %v4598_v45  ;;  %v4600_v49 = vrot.slane %v4598_v45, 4  ;;  %v19301_v20 = vld [vmem:[#allocation2 + $0x7c] sm:$0xf]  ;;  %v1626_v44 = vsel %vm18675_vm7, %v1624_v25, %v1625_v27  ;;  %v19310_v9 = vld [vmem:[#allocation5 + $0x290] ss:$8 sps:$4 sm:$0xff]   ;;  %v23726_v37 = vrot.slane %v18896_v57, 5 }
 0x1f8   : > { %23723 = vst [vmem:[#allocation37_spill] sm:$0xff] %v19301_v20  ;;  %23724 = vst [vmem:[#allocation38_spill] sm:$0xff] %v19303_v10  ;;  %v4565_v62 = vld [vmem:[#allocation2 + $0x6c] sm:$0xe]  ;;  %v14760_v12 = vcombine.low %v1623_v39, %v1626_v44  ;;  %v19316_v13 = vrot.slane %v1796_v30, 5  ;;  %6553 = vmatmul.mubr.bf16.gmra.mrb[60].mxu0 %v23730_v31  ;;  %v4702_v39 = vshrl.u32 %v19291_v46, 16  ;;  %v15021_v30 = vcombine.low %v19291_v46, %v19301_v20 }
 0x1f9   : > { %23725 = vst [vmem:[#allocation39_spill] sm:$0xff] %v19307_v58  ;;  %v4602_v45 = vsel %vm18675_vm7, %v4600_v49, %v23726_v37  ;;  %v19320_v10 = vld [vmem:[#allocation5 + $0x2a4] ss:$8 sps:$4 sm:$0xff]   ;;  %v19324_v25 = vld [vmem:[#allocation2 + $0x58] sm:$0xf]  ;;  %v4705_v49 = vshll.u32 %v19291_v46, 16  ;;  %6595 = vmatprep.mubr.bf16.mxu0 %v15020_v51  ;;  %3690 = vmatpush1.bf16.msra.mxu1 %v19310_v9 }
 0x1fa   : > { %23727 = vst [vmem:[#allocation40_spill] sm:$0xff] %v19316_v13  ;;  %23728 = vst [vmem:[#allocation41_spill] sm:$0xff] %v19320_v10  ;;  %v19322_v27 = vld [vmem:[#allocation2 + $0x54] sm:$0xf]  ;;  %v15012_v57 = vcombine.low %v19298_v4, %v4602_v45  ;;  %v14721_v44 = vrot.slane %v1562_v18, 9  ;;  %3631 = vmatmul.mubr.bf16.gmra.mrb[16].mxu1 %v14760_v12  ;;  %v19339_v4 = vrot.slane %v4702_v39, 4  ;;  %3691 = vmatprep.subr.bf16.mxu1 %v19320_v10 }
 0x1fb   : > { %23729 = vst [vmem:[#allocation42_spill] sm:$0xff] %v19324_v25  ;;  %v18199_v37 = vld [vmem:[#allocation2 + $0x40] sm:$0xf]  ;;  %v18200_v31 = vld [vmem:[#allocation2 + $0x44] sm:$0x1]  ;;  %v19341_v45 = vrot.slane %v4705_v49, 5  ;;  %3640 = vmatprep.mubr.bf16.mxu1 %v14769_v14 }
 0x1fc   : > { %v1629_v5 = vrot.slane %v18199_v37, 5  ;;  %v1632_v16 = vrot.slane %v18200_v31, 5  ;;  %v19337_v13 = vld [vmem:[#allocation5 + $0x2a0] ss:$8 sps:$4 sm:$0xff]   ;;  %23731 = vst [vmem:[#allocation43_spill] sm:$0xff] %v19339_v4  ;;  %v14973_v58 = vrot.slane %v4565_v62, 9 }
 0x1fd   : > { %23732 = vst [vmem:[#allocation44_spill] sm:$0xff] %v19341_v45  ;;  %v4605_v51 = vrot.slane %v18945_v41, 5  ;;  %v19344_v32 = vld [vmem:[#allocation2 + $0x84] sm:$0xf]  ;;  %v19346_v29 = vld [vmem:[#allocation2 + $0x88] sm:$0xf]  ;;  %3692 = vmatpush1.bf16.msra.mxu1 %v19337_v13 }
 0x1fe   : > { %v1630_v46 = vsel %vm18675_vm7, %v14721_v44, %v1629_v5  ;;  %v1631_v18 = vrot.slane %v1629_v5, 4  ;;  %v4608_v12 = vrot.slane %v18951_v22, 5  ;;  %v1817_v37 = vshrl.u32 %v19322_v27, 16  ;;  %v1563_v39 = vld [vmem:[#allocation2 + $0x48] sm:$0xe] }
 0x1ff   : > { %v19355_v62 = vsel %vm18675_vm7, %v14973_v58, %v4605_v51  ;;  %v4607_v41 = vrot.slane %v4605_v51, 4  ;;  %v1820_v49 = vshll.u32 %v19322_v27, 16  ;;  %v14770_v5 = vcombine.low %v19322_v27, %v19324_v25  ;;  %v19366_v31 = vld [vmem:[#allocation5 + $0x2b4] ss:$8 sps:$4 sm:$0xff]   ;;  %v4566_v45 = vld [vmem:[#allocation2 + $0x78] sm:$0xe] }
 0x200   : > { %v1633_v44 = vsel %vm18675_vm7, %v1631_v18, %v1632_v16  ;;  %v19362_v22 = vrot.slane %v1817_v37, 4  ;;  %v4726_v58 = vshrl.u32 %v19344_v32, 16  ;;  %v19369_v51 = vld [vmem:[#allocation2 + $0x60] sm:$0xf]  ;;  %v4729_v18 = vshll.u32 %v19344_v32, 16  ;;  %6596 = vmatmul.mubr.bf16.vlgmr.msra.gmra.mrb[32].mxu0 %v15012_v57  ;;  %3693 = vmatprep.subr.bf16.mxu1 %v19366_v31 }
 0x201   : > { %v14761_v4 = vcombine.low %v1630_v46, %v1633_v44  ;;  %v19373_v14 = vsel %vm18675_vm7, %v4607_v41, %v4608_v12  ;;  %v19375_v20 = vrot.slane %v1820_v49, 5  ;;  %v19377_v16 = vld [vmem:[#allocation5 + $0x2b0] ss:$8 sps:$4 sm:$0xff]   ;;  %v19380_v37 = vld [vmem:[#allocation2 + $0x64] sm:$0xf]  ;;  %v14722_v49 = vrot.slane %v1563_v39, 9  ;;  %6677 = vmatpush1.bf16.msra.mxu0 %v19077_v8  ;;  %6605 = vmatprep.mubr.bf16.mxu0 %v15021_v30 }
 0x202   : > { %23733 = vst [vmem:[#allocation45_spill] sm:$0xff] %v19362_v22  ;;  %23735 = vst [vmem:[#allocation47_spill] sm:$0xff] %v19380_v37  ;;  %v15013_v27 = vcombine.low %v19355_v62, %v19373_v14  ;;  %v19384_v22 = vrot.slane %v4726_v58, 4  ;;  %v19390_v12 = vld [vmem:[#allocation5 + $0x2c4] ss:$8 sps:$4 sm:$0xff]   ;;  %v19392_v41 = vrot.slane %v4729_v18, 5  ;;  %6678 = vmatprep.subr.bf16.mxu0 %v19098_v34  ;;  %3694 = vmatpush1.bf16.msra.mxu1 %v19377_v16 }
 0x203   : > { %23734 = vst [vmem:[#allocation46_spill] sm:$0xff] %v19375_v20  ;;  %v18201_v44 = vld [vmem:[#allocation2 + $0x4c] sm:$0xf]  ;;  %v1639_v10 = vrot.slane %v18973_v40, 5  ;;  %v14974_v62 = vrot.slane %v4566_v45, 9  ;;  %v4612_v14 = vrot.slane %v18985_v47, 5  ;;  %3641 = vmatmul.mubr.bf16.gmra.mrb[20].mxu1 %v14761_v4  ;;  %3695 = vmatprep.subr.bf16.mxu1 %v19390_v12 }
 0x204   : > { %v1636_v20 = vrot.slane %v18201_v44, 5  ;;  %v4615_v58 = vrot.slane %v18989_v28, 5  ;;  %v1841_v57 = vshrl.u32 %v19369_v51, 16  ;;  %v19399_v25 = vld [vmem:[#allocation2 + $0x90] sm:$0xf]  ;;  %v1844_v40 = vshll.u32 %v19369_v51, 16  ;;  %3650 = vmatprep.mubr.bf16.mxu1 %v14770_v5 }
 0x205   : > { %v19406_v30 = vld [vmem:[#allocation2 + $0x94] sm:$0xf]  ;;  %v19409_v47 = vld [vmem:[#allocation5 + $0x2c0] ss:$8 sps:$4 sm:$0xff]   ;;  %v19413_v28 = vsel %vm18675_vm7, %v14974_v62, %v4612_v14  ;;  %v4614_v34 = vrot.slane %v4612_v14, 4  ;;  %v4750_v44 = vshrl.u32 %v19399_v25, 16  ;;  %6679 = vmatpush1.bf16.msra.mxu0 %v19102_v60 }
 0x206   : > { %v1637_v39 = vsel %vm18675_vm7, %v14722_v49, %v1636_v20  ;;  %v1638_v18 = vrot.slane %v1636_v20, 4  ;;  %v19415_v4 = vrot.slane %v1841_v57, 4  ;;  %v14771_v20 = vcombine.low %v19369_v51, %v19380_v37  ;;  %v1564_v45 = vld [vmem:[#allocation2 + $0x54] sm:$0xe]  ;;  %v4567_v62 = vld [vmem:[#allocation2 + $0x84] sm:$0xe]  ;;  %6680 = vmatprep.subr.bf16.mxu0 %v19121_v0  ;;  %3696 = vmatpush1.bf16.msra.mxu1 %v19409_v47 }
 0x207   : > { %v19422_v49 = vrot.slane %v1844_v40, 5  ;;  %v4753_v8 = vshll.u32 %v19399_v25, 16  ;;  %v19430_v51 = vsel %vm18675_vm7, %v4614_v34, %v4615_v58  ;;  %v1864_v40 = vld [vmem:[#allocation2 + $0xc] sm:$0xe]  ;;  %v19438_v60 = vld [vmem:[#allocation5 + $0x2d0] ss:$8 sps:$4 sm:$0xff]  }
 0x208   : > { %23736 = vst [vmem:[#allocation48_spill] sm:$0xff] %v19415_v4  ;;  %v1640_v5 = vsel %vm18675_vm7, %v1638_v18, %v1639_v10  ;;  %v1664_v18 = vld [vmem:[#allocation2 + $0x14] sm:$0x1]  ;;  %v14723_v34 = vrot.slane %v1564_v45, 9  ;;  %v1643_v57 = vrot.slane %v19001_v21, 5  ;;  %v1646_v10 = vrot.slane %v19005_v43, 5  ;;  %6606 = vmatmul.mubr.bf16.gmra.mrb[36].mxu0 %v15013_v27 }
 0x209   : > { %23737 = vst [vmem:[#allocation49_spill] sm:$0xff] %v19422_v49  ;;  %v14762_v14 = vcombine.low %v1637_v39, %v1640_v5  ;;  %v19440_v49 = vld [vmem:[#allocation5 + $0x2d4] ss:$8 sps:$4 sm:$0xff]   ;;  %v19442_v39 = vrot.slane %v4750_v44, 4  ;;  %v19444_v58 = vrot.slane %v4753_v8, 5  ;;  %v14975_v4 = vrot.slane %v4567_v62, 9  ;;  %6681 = vmatpush1.bf16.msra.mxu0 %v19135_v56 }
 0x20a   : > { %v19446_v5 = vld [vmem:[#allocation5 + $0x2e4] ss:$8 sps:$4 sm:$0xff]   ;;  %v4619_v0 = vrot.slane %v19035_v1, 5  ;;  %v4622_v46 = vrot.slane %v19037_v33, 5  ;;  %v1692_v37 = vshll.u32 %v1664_v18, 16  ;;  %v14724_v44 = vrot.slane %v1864_v40, 9  ;;  %6682 = vmatprep.subr.bf16.mxu0 %v19146_v54  ;;  %3697 = vmatprep.subr.bf16.mxu1 %v19440_v49 }
 0x20b   : > { %23738 = vst [vmem:[#allocation50_spill] sm:$0xff] %v19444_v58  ;;  %v1898_v8 = vrot.slane %v19052_v42, 5  ;;  %v19454_v58 = vld [vmem:[#allocation2 + $0x9c] sm:$0xf]  ;;  %v23739_v21 = vcombine.low %v19344_v32, %v19346_v29  ;;  %v1644_v43 = vsel %vm18675_vm7, %v14723_v34, %v1643_v57  ;;  %v1645_v1 = vrot.slane %v1643_v57, 4  ;;  %3651 = vmatmul.mubr.bf16.gmra.mrb[24].mxu1 %v14762_v14 }
 0x20c   : > { %v19464_v27 = vsel %vm18675_vm7, %v14975_v4, %v4619_v0  ;;  %v4621_v33 = vrot.slane %v4619_v0, 4  ;;  %v4568_v45 = vld [vmem:[#allocation2 + $0x90] sm:$0xe]  ;;  %v1694_v56 = vrot.slane %v1692_v37, 5  ;;  %v1901_v40 = vrot.slane %v1664_v18, 5  ;;  %3660 = vmatprep.mubr.bf16.mxu1 %v14771_v20  ;;  %3698 = vmatpush1.bf16.msra.mxu1 %v19438_v60 }
 0x20d   : > { %6615 = vmatprep.mubr.bf16.mxu0 %v23739_v21  ;;  %v19467_v42 = vld [vmem:[#allocation5 + $0x2e0] ss:$8 sps:$4 sm:$0xff]   ;;  %v1899_v32 = vsel %vm18675_vm7, %v14724_v44, %v1898_v8  ;;  %v1900_v62 = vrot.slane %v1898_v8, 4  ;;  %v19471_v21 = vld [vmem:[#allocation2 + $0xa0] sm:$0xf]  ;;  %v1647_v4 = vsel %vm18675_vm7, %v1645_v1, %v1646_v10  ;;  %v4774_v14 = vshrl.u32 %v19454_v58, 16  ;;  %6683 = vmatpush1.bf16.msra.mxu0 %v19168_v50 }
 0x20e   : > { %23740 = vst [vmem:[#allocation51_spill] sm:$0xff] %v19471_v21  ;;  %v19478_v54 = vsel %vm18675_vm7, %v4621_v33, %v4622_v46  ;;  %v4777_v37 = vshll.u32 %v19454_v58, 16  ;;  %v19482_v57 = vld [vmem:[#allocation2 + $0x20] sm:$0x1]  ;;  %v1865_v34 = vld [vmem:[#allocation2 + $0x18] sm:$0xe]  ;;  %v14763_v18 = vcombine.low %v1644_v43, %v1647_v4  ;;  %3699 = vmatprep.subr.bf16.mxu1 %v19446_v5  ;;  %6684 = vmatprep.subr.bf16.mxu0 %v19170_v61 }
 0x20f   : > { %v15015_v20 = vcombine.low %v19464_v27, %v19478_v54  ;;  %v1902_v10 = vsel %vm18675_vm7, %v1900_v62, %v1901_v40  ;;  %v19492_v44 = vld [vmem:[#allocation5 + $0x2f4] ss:$8 sps:$4 sm:$0xff]   ;;  %v19494_v8 = vrot.slane %v4774_v14, 4  ;;  %v19500_v33 = vld [vmem:[#allocation2 + $0xa8] sm:$0xf]  ;;  %v1685_v50 = vsel %vm18665_vm4, %v19080_v24, %v19071_v59 }
 0x210   : > { %v14780_v46 = vcombine.low %v1899_v32, %v1902_v10  ;;  %v19496_v1 = vrot.slane %v4777_v37, 5  ;;  %v19503_v62 = vld [vmem:[#allocation5 + $0x2f0] ss:$8 sps:$4 sm:$0xff]   ;;  %v1695_v32 = vsel %vm18665_vm4, %v19095_v48, %v1694_v56  ;;  %v14976_v40 = vrot.slane %v4568_v45, 9  ;;  %v19517_v0 = vld [vmem:[#allocation2 + $0xac] sm:$0xf]  ;;  %3700 = vmatpush1.bf16.msra.mxu1 %v19467_v42 }
 0x211   : > { %v4626_v4 = vrot.slane %v19065_v11, 5  ;;  %v19513_v14 = vcombine.low %v1685_v50, %v1695_v32  ;;  %v4629_v37 = vrot.slane %v19069_v7, 5  ;;  %v14725_v10 = vrot.slane %v1865_v34, 9  ;;  %23741 = vst [vmem:[#allocation52_spill] sm:$0xff] %v19517_v0  ;;  %v19523_v59 = vld [vmem:[#allocation5 + $0x304] ss:$8 sps:$4 sm:$0xff]   ;;  %6685 = vmatpush1.bf16.msra.mxu0 %v19183_v15  ;;  %3701 = vmatprep.subr.bf16.mxu1 %v19492_v44 }
 0x212   : > { %v1905_v61 = vrot.slane %v19091_v63, 5  ;;  %v23742_v43 = vcombine.low %v19413_v28, %v19430_v51  ;;  %v1908_v7 = vrot.slane %v19482_v57, 5  ;;  %v4798_v48 = vshrl.u32 %v19500_v33, 16  ;;  %6686 = vmatprep.subr.bf16.mxu0 %v19190_v55 }
 0x213   : > { %v19527_v11 = vsel %vm18675_vm7, %v14976_v40, %v4626_v4  ;;  %v4628_v24 = vrot.slane %v4626_v4, 4  ;;  %v23743_v45 = vcombine.low %v19399_v25, %v19406_v30  ;;  %v4801_v56 = vshll.u32 %v19500_v33, 16  ;;  %3661 = vmatmul.mubr.bf16.gmra.mrb[28].mxu1 %v14763_v18  ;;  %v19571_v25 = vld [vmem:[#allocation2 + $0xb4] sm:$0xf] }
 0x214   : > { %6616 = vmatmul.mubr.bf16.gmra.mrb[40].mxu0 %v23742_v43  ;;  %v19537_v28 = vsel %vm18675_vm7, %v14725_v10, %v1905_v61  ;;  %v1907_v51 = vrot.slane %v1905_v61, 4  ;;  %v4569_v43 = vld [vmem:[#allocation2 + $0x9c] sm:$0xe]  ;;  %v19546_v50 = vrot.slane %v4798_v48, 4  ;;  %v1703_v32 = vor.u32 %v19119_v26, %v19117_v23  ;;  %3703 = vmatprep.mubr.bf16.mxu1 %v14780_v46  ;;  %v1866_v10 = vld [vmem:[#allocation2 + $0x24] sm:$0xe] }
 0x215   : > { %6625 = vmatprep.mubr.bf16.mxu0 %v23743_v45  ;;  %v19544_v15 = vsel %vm18675_vm7, %v4628_v24, %v4629_v37  ;;  %v19557_v18 = vrot.slane %v4801_v56, 5  ;;  %v1706_v4 = vshll.u32 %v19091_v63, 16  ;;  %v19560_v37 = vld [vmem:[#allocation2 + $0x2c] sm:$0x1]  ;;  %3702 = vmatpush1.bf16.msra.mxu1 %v19503_v62  ;;  %v23746_v46 = vshrl.u32 %v19091_v63, 16  ;;  %v23747_v45 = vld [vmem:[#allocation18_spill] sm:$0xff] }
 0x216   : > { %23744 = vst [vmem:[#allocation53_spill] sm:$0xff] %v19546_v50  ;;  %v1909_v55 = vsel %vm18675_vm7, %v1907_v51, %v1908_v7  ;;  %v1704_v26 = vrot.slane %v1703_v32, 4  ;;  %v1716_v24 = vshll.u32 %v19482_v57, 16  ;;  %6687 = vmatpush1.bf16.msra.mxu0 %v19206_v38  ;;  %3784 = vmatprep.subr.bf16.mxu1 %v19523_v59  ;;  %v14977_v48 = vrot.slane %v4569_v43, 9  ;;  %v23748_v56 = vld [vmem:[#allocation19_spill] sm:$0xff]  ;;  %v23749_v63 = vld [vmem:[#allocation20_spill] sm:$0xff] }
 0x217   : > { %23745 = vst [vmem:[#allocation54_spill] sm:$0xff] %v19557_v18  ;;  %v14781_v23 = vcombine.low %v19537_v28, %v1909_v55  ;;  %v1712_v61 = vrot.slane %v23746_v46, 4  ;;  %v1708_v7 = vrot.slane %v1706_v4, 5  ;;  %v4633_v51 = vrot.slane %v23747_v45, 5  ;;  %6688 = vmatprep.subr.bf16.mxu0 %v19212_v6  ;;  %v19576_v46 = vld [vmem:[#allocation2 + $0xb8] sm:$0xf] }
 0x218   : > { %v4636_v34 = vrot.slane %v23748_v56, 5  ;;  %v1718_v28 = vrot.slane %v1716_v24, 5  ;;  %v14726_v32 = vrot.slane %v1866_v10, 9  ;;  %v1912_v55 = vrot.slane %v23749_v63, 5  ;;  %v19578_v38 = vld [vmem:[#allocation5 + $0x300] ss:$8 sps:$4 sm:$0xff]  }
 0x219   : > { %v1915_v57 = vrot.slane %v19560_v37, 5  ;;  %v19580_v4 = vld [vmem:[#allocation5 + $0x314] ss:$8 sps:$4 sm:$0xff]   ;;  %v1709_v43 = vsel %vm18665_vm4, %v1704_v26, %v1708_v7  ;;  %v1713_v45 = vor.u32 %v1712_v61, %v1708_v7  ;;  %v19586_v56 = vsel %vm18675_vm7, %v14977_v48, %v4633_v51  ;;  %v4570_v26 = vld [vmem:[#allocation2 + $0xa8] sm:$0xe] }
 0x21a   : > { %v4635_v6 = vrot.slane %v4633_v51, 4  ;;  %v19593_v10 = vsel %vm18675_vm7, %v14726_v32, %v1912_v55  ;;  %v1914_v24 = vrot.slane %v1912_v55, 4  ;;  %v4822_v40 = vshrl.u32 %v19571_v25, 16  ;;  %6689 = vmatpush1.bf16.msra.mxu0 %v19232_v35  ;;  %v19601_v7 = vld [vmem:[#allocation5 + $0x310] ss:$8 sps:$4 sm:$0xff]   ;;  %v23757_v48 = vld [vmem:[#allocation23_spill] sm:$0xff] }
 0x21b   : > { %v4825_v18 = vshll.u32 %v19571_v25, 16  ;;  %v23750_v61 = vcombine.low %v19454_v58, %v19471_v21  ;;  %v1714_v27 = vrot.slane %v1713_v45, 4  ;;  %6690 = vmatprep.subr.bf16.mxu0 %v19234_v36  ;;  %3704 = vmatmul.mubr.bf16.vlgmr.msra.gmra.mrb[0].mxu1 %v19513_v14  ;;  %v23753_v55 = vld [vmem:[#allocation22_spill] sm:$0xff]  ;;  %v23754_v14 = vld [vmem:[#allocation24_spill] sm:$0xff]  ;;  %v4643_v35 = vrot.slane %v23757_v48, 5 }
 0x21c   : > { %6626 = vmatmul.mubr.bf16.gmra.mrb[44].mxu0 %v15015_v20  ;;  %v19605_v54 = vsel %vm18675_vm7, %v4635_v6, %v4636_v34  ;;  %v1916_v58 = vsel %vm18675_vm7, %v1914_v24, %v1915_v57  ;;  %v19616_v51 = vrot.slane %v4822_v40, 4  ;;  %3785 = vmatpush1.bf16.msra.mxu1 %v19578_v38  ;;  %v1727_v45 = vor.u32 %v23754_v14, %v23753_v55  ;;  %v1867_v57 = vld [vmem:[#allocation2 + $0x30] sm:$0xe]  ;;  %v19630_v40 = vld [vmem:[#allocation5 + $0x324] ss:$8 sps:$4 sm:$0xff]   ;;  %v23756_v14 = vld [vmem:[#allocation21_spill] sm:$0xff] }
 0x21d   : > { %6635 = vmatprep.mubr.bf16.mxu0 %v23750_v61  ;;  %v19618_v32 = vrot.slane %v4825_v18, 5  ;;  %3713 = vmatprep.mubr.bf16.mxu1 %v14781_v23  ;;  %v1719_v34 = vsel %vm18665_vm4, %v1714_v27, %v1718_v28  ;;  %v14782_v36 = vcombine.low %v19593_v10, %v1916_v58  ;;  %v1730_v6 = vshll.u32 %v23749_v63, 16  ;;  %v19627_v61 = vld [vmem:[#allocation2 + $0x38] sm:$0x1]  ;;  %v19636_v10 = vld [vmem:[#allocation5 + $0x320] ss:$8 sps:$4 sm:$0xff]  }
 0x21e   : > { %23751 = vst [vmem:[#allocation18_spill] sm:$0xff] %v19616_v51  ;;  %3786 = vmatprep.subr.bf16.mxu1 %v19580_v4  ;;  %v14773_v18 = vcombine.low %v1709_v43, %v1719_v34  ;;  %v23755_v23 = vshrl.u32 %v23749_v63, 16  ;;  %v1740_v28 = vshll.u32 %v19560_v37, 16  ;;  %v14978_v27 = vrot.slane %v4570_v26, 9  ;;  %6691 = vmatpush1.bf16.msra.mxu0 %v19267_v52  ;;  %v23758_v51 = vld [vmem:[#allocation33_spill] sm:$0xff] }
 0x21f   : > { %23752 = vst [vmem:[#allocation19_spill] sm:$0xff] %v19618_v32  ;;  %v1728_v58 = vrot.slane %v1727_v45, 4  ;;  %v1732_v55 = vrot.slane %v1730_v6, 5  ;;  %v4640_v20 = vrot.slane %v23756_v14, 5  ;;  %v19640_v32 = vld [vmem:[#allocation2 + $0xc0] sm:$0xf]  ;;  %6692 = vmatprep.subr.bf16.mxu0 %v23758_v51 }
 0x220   : > { %v1736_v24 = vrot.slane %v23755_v23, 4  ;;  %v19643_v43 = vld [vmem:[#allocation5 + $0x334] ss:$8 sps:$4 sm:$0xff]   ;;  %v1742_v63 = vrot.slane %v1740_v28, 5  ;;  %v14727_v34 = vrot.slane %v1867_v57, 9  ;;  %v1922_v52 = vrot.slane %v19627_v61, 5  ;;  %3787 = vmatpush1.bf16.msra.mxu1 %v19601_v7 }
 0x221   : > { %v23759_v37 = vld [vmem:[#allocation25_spill] sm:$0xff]  ;;  %v19647_v23 = vld [vmem:[#allocation2 + $0xc4] sm:$0xf]  ;;  %v1733_v45 = vsel %vm18665_vm4, %v1728_v58, %v1732_v55  ;;  %v19654_v6 = vsel %vm18675_vm7, %v14978_v27, %v4640_v20  ;;  %v4642_v51 = vrot.slane %v4640_v20, 4  ;;  %v4571_v14 = vld [vmem:[#allocation2 + $0xb4] sm:$0xe]  ;;  %v23760_v57 = vcombine.low %v19527_v11, %v19544_v15  ;;  %3788 = vmatprep.subr.bf16.mxu1 %v19630_v40 }
 0x222   : > { %v1919_v26 = vrot.slane %v23759_v37, 5  ;;  %v1737_v48 = vor.u32 %v1736_v24, %v1732_v55  ;;  %v4846_v58 = vshrl.u32 %v19640_v32, 16  ;;  %v4849_v24 = vshll.u32 %v19640_v32, 16  ;;  %6693 = vmatpush1.bf16.msra.mxu0 %v19278_v19  ;;  %v19670_v27 = vld [vmem:[#allocation5 + $0x330] ss:$8 sps:$4 sm:$0xff]   ;;  %v23765_v55 = vld [vmem:[#allocation27_spill] sm:$0xff] }
 0x223   : > { %v23761_v20 = vcombine.low %v19500_v33, %v19517_v0  ;;  %v19674_v15 = vsel %vm18675_vm7, %v4642_v51, %v4643_v35  ;;  %6694 = vmatprep.subr.bf16.mxu0 %v19284_v2  ;;  %3714 = vmatmul.mubr.bf16.gmra.mrb[4].mxu1 %v14773_v18  ;;  %v19682_v19 = vld [vmem:[#allocation5 + $0x344] ss:$8 sps:$4 sm:$0xff]   ;;  %v23764_v18 = vld [vmem:[#allocation26_spill] sm:$0xff]  ;;  %v1754_v33 = vshll.u32 %v23759_v37, 16 }
 0x224   : > { %6636 = vmatmul.mubr.bf16.gmra.mrb[48].mxu0 %v23760_v57  ;;  %v19662_v28 = vsel %vm18675_vm7, %v14727_v34, %v1919_v26  ;;  %v1921_v50 = vrot.slane %v1919_v26, 4  ;;  %v1738_v11 = vrot.slane %v1737_v48, 4  ;;  %v19679_v26 = vld [vmem:[#allocation2 + $0x44] sm:$0x1]  ;;  %v1868_v57 = vld [vmem:[#allocation2 + $0x3c] sm:$0xe]  ;;  %3789 = vmatpush1.bf16.msra.mxu1 %v19636_v10  ;;  %v1751_v34 = vor.u32 %v23765_v55, %v23764_v18 }
 0x225   : > { %6645 = vmatprep.mubr.bf16.mxu0 %v23761_v20  ;;  %v19688_v48 = vrot.slane %v4846_v58, 4  ;;  %v19690_v51 = vrot.slane %v4849_v24, 5  ;;  %3723 = vmatprep.mubr.bf16.mxu1 %v14782_v36  ;;  %v1764_v24 = vshll.u32 %v19627_v61, 16  ;;  %v4669_v36 = vld [vmem:[#allocation2 + $0x74] sm:$0x1] }
 0x226   : > { %v1923_v35 = vsel %vm18675_vm7, %v1921_v50, %v1922_v52  ;;  %v1743_v20 = vsel %vm18665_vm4, %v1738_v11, %v1742_v63  ;;  %3790 = vmatprep.subr.bf16.mxu1 %v19643_v43  ;;  %v23766_v52 = vshrl.u32 %v23759_v37, 16  ;;  %6695 = vmatpush1.bf16.msra.mxu0 %v19310_v9  ;;  %v1752_v63 = vrot.slane %v1751_v34, 4  ;;  %v4869_v18 = vld [vmem:[#allocation2 + $0x6c] sm:$0xe]  ;;  %v19710_v61 = vld [vmem:[#allocation5 + $0x340] ss:$8 sps:$4 sm:$0xff]  }
 0x227   : > { %23762 = vst [vmem:[#allocation20_spill] sm:$0xff] %v19688_v48  ;;  %23763 = vst [vmem:[#allocation22_spill] sm:$0xff] %v19690_v51  ;;  %v14783_v2 = vcombine.low %v19662_v28, %v1923_v35  ;;  %v14774_v50 = vcombine.low %v1733_v45, %v1743_v20  ;;  %v14979_v51 = vrot.slane %v4571_v14, 9  ;;  %v1756_v11 = vrot.slane %v1754_v33, 5  ;;  %v23767_v35 = vld [vmem:[#allocation28_spill] sm:$0xff]  ;;  %v23768_v48 = vld [vmem:[#allocation41_spill] sm:$0xff] }
 0x228   : > { %v1760_v58 = vrot.slane %v23766_v52, 4  ;;  %v4647_v28 = vrot.slane %v19198_v53, 5  ;;  %v4650_v55 = vrot.slane %v23767_v35, 5  ;;  %6696 = vmatprep.subr.bf16.mxu0 %v23768_v48  ;;  %v1766_v0 = vrot.slane %v1764_v24, 5  ;;  %v23769_v20 = vld [vmem:[#allocation29_spill] sm:$0xff]  ;;  %3791 = vmatpush1.bf16.msra.mxu1 %v19670_v27 }
 0x229   : > { %v14728_v45 = vrot.slane %v1868_v57, 9  ;;  %v1926_v37 = vrot.slane %v23769_v20, 5  ;;  %v1929_v52 = vrot.slane %v19679_v26, 5  ;;  %v19712_v9 = vld [vmem:[#allocation5 + $0x354] ss:$8 sps:$4 sm:$0xff]   ;;  %v1757_v53 = vsel %vm18665_vm4, %v1752_v63, %v1756_v11  ;;  %3792 = vmatprep.subr.bf16.mxu1 %v19682_v19 }
 0x22a   : > { %v1761_v14 = vor.u32 %v1760_v58, %v1756_v11  ;;  %v19718_v34 = vsel %vm18675_vm7, %v14979_v51, %v4647_v28  ;;  %v4649_v33 = vrot.slane %v4647_v28, 4  ;;  %v23770_v57 = vcombine.low %v19586_v56, %v19605_v54  ;;  %6697 = vmatpush1.bf16.msra.mxu0 %v19337_v13  ;;  %v19732_v58 = vld [vmem:[#allocation5 + $0x350] ss:$8 sps:$4 sm:$0xff]   ;;  %v23772_v54 = vld [vmem:[#allocation32_spill] sm:$0xff] }
 0x22b   : > { %v19726_v48 = vsel %vm18675_vm7, %v14728_v45, %v1926_v37  ;;  %v1928_v24 = vrot.slane %v1926_v37, 4  ;;  %v4697_v35 = vshll.u32 %v4669_v36, 16  ;;  %v14980_v21 = vrot.slane %v4869_v18, 9  ;;  %v1869_v45 = vld [vmem:[#allocation2 + $0x48] sm:$0xe]  ;;  %6698 = vmatprep.subr.bf16.mxu0 %v19366_v31  ;;  %3724 = vmatmul.mubr.bf16.gmra.mrb[8].mxu1 %v14774_v50 }
 0x22c   : > { %6646 = vmatmul.mubr.bf16.gmra.mrb[52].mxu0 %v23770_v57  ;;  %v23771_v51 = vcombine.low %v19571_v25, %v19576_v46  ;;  %v1762_v63 = vrot.slane %v1761_v14, 4  ;;  %v19736_v56 = vsel %vm18675_vm7, %v4649_v33, %v4650_v55  ;;  %v4903_v11 = vrot.slane %v23772_v54, 5  ;;  %v19740_v18 = vld [vmem:[#allocation5 + $0x364] ss:$8 sps:$4 sm:$0xff]   ;;  %v23773_v14 = vld [vmem:[#allocation30_spill] sm:$0xff]  ;;  %3793 = vmatpush1.bf16.msra.mxu1 %v19710_v61 }
 0x22d   : > { %v4906_v28 = vrot.slane %v4669_v36, 5  ;;  %v1930_v25 = vsel %vm18675_vm7, %v1928_v24, %v1929_v52  ;;  %v4699_v37 = vrot.slane %v4697_v35, 5  ;;  %v23774_v57 = vld [vmem:[#allocation31_spill] sm:$0xff]  ;;  %v19748_v33 = vld [vmem:[#allocation2 + $0x50] sm:$0x1]  ;;  %3733 = vmatprep.mubr.bf16.mxu1 %v14783_v2  ;;  %3794 = vmatprep.subr.bf16.mxu1 %v19712_v9  ;;  %v1778_v35 = vshll.u32 %v23769_v20, 16 }
 0x22e   : > { %6655 = vmatprep.mubr.bf16.mxu0 %v23771_v51  ;;  %v1775_v55 = vor.u32 %v23774_v57, %v23773_v14  ;;  %v1767_v31 = vsel %vm18665_vm4, %v1762_v63, %v1766_v0  ;;  %v14784_v50 = vcombine.low %v19726_v48, %v1930_v25  ;;  %v19756_v36 = vsel %vm18675_vm7, %v14980_v21, %v4903_v11  ;;  %v4870_v2 = vld [vmem:[#allocation2 + $0x78] sm:$0xe]  ;;  %v19763_v0 = vld [vmem:[#allocation5 + $0x360] ss:$8 sps:$4 sm:$0xff]   ;;  %v23776_v63 = vld [vmem:[#allocation34_spill] sm:$0xff] }
 0x22f   : > { %v4905_v51 = vrot.slane %v4903_v11, 4  ;;  %v14775_v52 = vcombine.low %v1757_v53, %v1767_v31  ;;  %v23775_v54 = vshrl.u32 %v23769_v20, 16  ;;  %6699 = vmatpush1.bf16.msra.mxu0 %v19377_v16  ;;  %v1788_v21 = vshll.u32 %v19679_v26, 16  ;;  %v23777_v11 = vld [vmem:[#allocation36_spill] sm:$0xff]  ;;  %v23778_v25 = vld [vmem:[#allocation38_spill] sm:$0xff] }
 0x230   : > { %v1776_v24 = vrot.slane %v1775_v55, 4  ;;  %v4690_v53 = vsel %vm18665_vm4, %v23777_v11, %v23776_v63  ;;  %v4700_v20 = vsel %vm18665_vm4, %v23778_v25, %v4699_v37  ;;  %v19777_v57 = vld [vmem:[#allocation2 + $0x80] sm:$0x1]  ;;  %6700 = vmatprep.subr.bf16.mxu0 %v19390_v12  ;;  %v19780_v16 = vld [vmem:[#allocation5 + $0x374] ss:$8 sps:$4 sm:$0xff]   ;;  %v1780_v55 = vrot.slane %v1778_v35, 5  ;;  %3795 = vmatpush1.bf16.msra.mxu1 %v19732_v58 }
 0x231   : > { %v1784_v14 = vrot.slane %v23775_v54, 4  ;;  %v19767_v48 = vsel %vm18675_vm7, %v4905_v51, %v4906_v28  ;;  %v19784_v26 = vcombine.low %v4690_v53, %v4700_v20  ;;  %v14729_v31 = vrot.slane %v1869_v45, 9  ;;  %v23779_v54 = vld [vmem:[#allocation35_spill] sm:$0xff]  ;;  %3796 = vmatprep.subr.bf16.mxu1 %v19740_v18  ;;  %v23781_v25 = vld [vmem:[#allocation37_spill] sm:$0xff] }
 0x232   : > { %v1790_v51 = vrot.slane %v1788_v21, 5  ;;  %v1933_v63 = vrot.slane %v23779_v54, 5  ;;  %v1936_v37 = vrot.slane %v19748_v33, 5  ;;  %v14981_v11 = vrot.slane %v4870_v2, 9  ;;  %v19801_v2 = vld [vmem:[#allocation5 + $0x370] ss:$8 sps:$4 sm:$0xff]  }
 0x233   : > { %v23780_v12 = vcombine.low %v19654_v6, %v19674_v15  ;;  %v1781_v35 = vsel %vm18665_vm4, %v1776_v24, %v1780_v55  ;;  %v1785_v53 = vor.u32 %v1784_v14, %v1780_v55  ;;  %v4910_v45 = vrot.slane %v23781_v25, 5  ;;  %6701 = vmatpush1.bf16.msra.mxu0 %v19409_v47  ;;  %v23784_v24 = vld [vmem:[#allocation40_spill] sm:$0xff]  ;;  %3734 = vmatmul.mubr.bf16.gmra.mrb[12].mxu1 %v14775_v52 }
 0x234   : > { %v4913_v20 = vrot.slane %v19777_v57, 5  ;;  %v23782_v21 = vcombine.low %v19640_v32, %v19647_v23  ;;  %v19805_v6 = vsel %vm18675_vm7, %v14729_v31, %v1933_v63  ;;  %v1935_v15 = vrot.slane %v1933_v63, 4  ;;  %6702 = vmatprep.subr.bf16.mxu0 %v19440_v49  ;;  %3797 = vmatpush1.bf16.msra.mxu1 %v19763_v0  ;;  %v19822_v52 = vld [vmem:[#allocation5 + $0x384] ss:$8 sps:$4 sm:$0xff]  }
 0x235   : > { %6656 = vmatmul.mubr.bf16.gmra.mrb[56].mxu0 %v23780_v12  ;;  %v23783_v12 = vld [vmem:[#allocation39_spill] sm:$0xff]  ;;  %v1802_v55 = vshll.u32 %v23779_v54, 16  ;;  %v1786_v47 = vrot.slane %v1785_v53, 4  ;;  %v19813_v32 = vsel %vm18675_vm7, %v14981_v11, %v4910_v45  ;;  %v23785_v28 = vshrl.u32 %v23779_v54, 16  ;;  %3743 = vmatprep.mubr.bf16.mxu1 %v14784_v50  ;;  %v23787_v53 = vld [vmem:[#allocation44_spill] sm:$0xff] }
 0x236   : > { %6665 = vmatprep.mubr.bf16.mxu0 %v23782_v21  ;;  %v1799_v14 = vor.u32 %v23784_v24, %v23783_v12  ;;  %v4912_v21 = vrot.slane %v4910_v45, 4  ;;  %v1937_v31 = vsel %vm18675_vm7, %v1935_v15, %v1936_v37  ;;  %v1812_v49 = vshll.u32 %v19748_v33, 16  ;;  %3798 = vmatprep.subr.bf16.mxu1 %v19780_v16  ;;  %v23786_v50 = vld [vmem:[#allocation43_spill] sm:$0xff]  ;;  %v19833_v45 = vld [vmem:[#allocation2 + $0x5c] sm:$0x1] }
 0x237   : > { %v1808_v13 = vrot.slane %v23785_v28, 4  ;;  %v1804_v12 = vrot.slane %v1802_v55, 5  ;;  %v1791_v11 = vsel %vm18665_vm4, %v1786_v47, %v1790_v51  ;;  %v14785_v54 = vcombine.low %v19805_v6, %v1937_v31  ;;  %v1870_v15 = vld [vmem:[#allocation2 + $0x54] sm:$0xe]  ;;  %6703 = vmatpush1.bf16.msra.mxu0 %v19438_v60  ;;  %v19836_v33 = vld [vmem:[#allocation5 + $0x380] ss:$8 sps:$4 sm:$0xff]  }
 0x238   : > { %v1800_v63 = vrot.slane %v1799_v14, 4  ;;  %v19829_v28 = vsel %vm18675_vm7, %v4912_v21, %v4913_v20  ;;  %v4708_v37 = vor.u32 %v23787_v53, %v23786_v50  ;;  %v14776_v24 = vcombine.low %v1781_v35, %v1791_v11  ;;  %v4871_v20 = vld [vmem:[#allocation2 + $0x84] sm:$0xe]  ;;  %6704 = vmatprep.subr.bf16.mxu0 %v19446_v5  ;;  %v19848_v35 = vld [vmem:[#allocation2 + $0x8c] sm:$0x1]  ;;  %3799 = vmatpush1.bf16.msra.mxu1 %v19801_v2 }
 0x239   : > { %v15037_v51 = vcombine.low %v19813_v32, %v19829_v28  ;;  %v1809_v14 = vor.u32 %v1808_v13, %v1804_v12  ;;  %v19843_v55 = vld [vmem:[#allocation5 + $0x394] ss:$8 sps:$4 sm:$0xff]   ;;  %v1814_v47 = vrot.slane %v1812_v49, 5  ;;  %v4711_v31 = vshll.u32 %v23781_v25, 16  ;;  %3800 = vmatprep.subr.bf16.mxu1 %v19822_v52 }
 0x23a   : > { %v1805_v6 = vsel %vm18665_vm4, %v1800_v63, %v1804_v12  ;;  %v4709_v21 = vrot.slane %v4708_v37, 4  ;;  %v23788_v60 = vshrl.u32 %v23781_v25, 16  ;;  %v4721_v63 = vshll.u32 %v19777_v57, 16  ;;  %v23789_v12 = vld [vmem:[#allocation42_spill] sm:$0xff] }
 0x23b   : > { %v1810_v11 = vrot.slane %v1809_v14, 4  ;;  %v14730_v13 = vrot.slane %v1870_v15, 9  ;;  %v1940_v53 = vrot.slane %v23789_v12, 5  ;;  %v23790_v5 = vcombine.low %v19718_v34, %v19736_v56  ;;  %6705 = vmatpush1.bf16.msra.mxu0 %v19467_v42  ;;  %v19863_v15 = vld [vmem:[#allocation5 + $0x390] ss:$8 sps:$4 sm:$0xff]   ;;  %3744 = vmatmul.mubr.bf16.gmra.mrb[16].mxu1 %v14776_v24 }
 0x23c   : > { %v4717_v50 = vrot.slane %v23788_v60, 4  ;;  %v4713_v49 = vrot.slane %v4711_v31, 5  ;;  %v1943_v25 = vrot.slane %v19833_v45, 5  ;;  %v14982_v37 = vrot.slane %v4871_v20, 9  ;;  %6706 = vmatprep.subr.bf16.mxu0 %v19492_v44  ;;  %v19870_v20 = vld [vmem:[#allocation5 + $0x3a4] ss:$8 sps:$4 sm:$0xff]   ;;  %3801 = vmatpush1.bf16.msra.mxu1 %v19836_v33 }
 0x23d   : > { %6666 = vmatmul.mubr.bf16.gmra.mrb[60].mxu0 %v23790_v5  ;;  %v4917_v60 = vrot.slane %v19346_v29, 5  ;;  %v23791_v57 = vcombine.low %v19756_v36, %v19767_v48  ;;  %v1815_v34 = vsel %vm18665_vm4, %v1810_v11, %v1814_v47  ;;  %v4723_v56 = vrot.slane %v4721_v63, 5  ;;  %3753 = vmatprep.mubr.bf16.mxu1 %v14785_v54  ;;  %v23792_v24 = vld [vmem:[#allocation45_spill] sm:$0xff]  ;;  %v23793_v63 = vld [vmem:[#allocation46_spill] sm:$0xff] }
 0x23e   : > { %v1941_v14 = vsel %vm18675_vm7, %v14730_v13, %v1940_v53  ;;  %v1942_v31 = vrot.slane %v1940_v53, 4  ;;  %v14777_v42 = vcombine.low %v1805_v6, %v1815_v34  ;;  %v4714_v36 = vsel %vm18665_vm4, %v4709_v21, %v4713_v49  ;;  %3802 = vmatprep.subr.bf16.mxu1 %v19843_v55 }
 0x23f   : > { %6708 = vmatprep.mubr.bf16.mxu0 %v23791_v57  ;;  %v4718_v48 = vor.u32 %v4717_v50, %v4713_v49  ;;  %v4919_v5 = vrot.slane %v4917_v60, 4  ;;  %v19879_v11 = vsel %vm18675_vm7, %v14982_v37, %v4917_v60  ;;  %v4920_v44 = vrot.slane %v19848_v35, 5  ;;  %v19888_v49 = vld [vmem:[#allocation2 + $0x68] sm:$0x1]  ;;  %v4872_v57 = vld [vmem:[#allocation2 + $0x90] sm:$0xe]  ;;  %6707 = vmatpush1.bf16.msra.mxu0 %v19503_v62 }
 0x240   : > { %v1944_v47 = vsel %vm18675_vm7, %v1942_v31, %v1943_v25  ;;  %v1823_v6 = vor.u32 %v23793_v63, %v23792_v24  ;;  %v1826_v13 = vshll.u32 %v23789_v12, 16  ;;  %v23794_v54 = vshrl.u32 %v23789_v12, 16  ;;  %v1871_v25 = vld [vmem:[#allocation2 + $0x60] sm:$0xe]  ;;  %v19891_v37 = vld [vmem:[#allocation5 + $0x3a0] ss:$8 sps:$4 sm:$0xff]   ;;  %6789 = vmatprep.subr.bf16.mxu0 %v19523_v59  ;;  %3803 = vmatpush1.bf16.msra.mxu1 %v19863_v15 }
 0x241   : > { %v4719_v21 = vrot.slane %v4718_v48, 4  ;;  %v14786_v50 = vcombine.low %v1941_v14, %v1944_v47  ;;  %v19895_v60 = vsel %vm18675_vm7, %v4919_v5, %v4920_v44  ;;  %v1836_v14 = vshll.u32 %v19833_v45, 16  ;;  %v19903_v48 = vld [vmem:[#allocation5 + $0x3b4] ss:$8 sps:$4 sm:$0xff]   ;;  %3804 = vmatprep.subr.bf16.mxu1 %v19870_v20 }
 0x242   : > { %v1832_v53 = vrot.slane %v23794_v54, 4  ;;  %v1824_v34 = vrot.slane %v1823_v6, 4  ;;  %v4732_v31 = vor.u32 %v19392_v41, %v19384_v22  ;;  %v15038_v62 = vcombine.low %v19879_v11, %v19895_v60  ;;  %v4873_v60 = vld [vmem:[#allocation2 + $0x9c] sm:$0xe] }
 0x243   : > { %v4724_v12 = vsel %vm18665_vm4, %v4719_v21, %v4723_v56  ;;  %v1828_v47 = vrot.slane %v1826_v13, 5  ;;  %v4735_v5 = vshll.u32 %v19346_v29, 16  ;;  %v1838_v45 = vrot.slane %v1836_v14, 5  ;;  %v19916_v21 = vld [vmem:[#allocation2 + $0x98] sm:$0x1]  ;;  %3754 = vmatmul.mubr.bf16.gmra.mrb[20].mxu1 %v14777_v42 }
 0x244   : > { %v15029_v44 = vcombine.low %v4714_v36, %v4724_v12  ;;  %v4733_v24 = vrot.slane %v4732_v31, 4  ;;  %v23795_v22 = vshrl.u32 %v19346_v29, 16  ;;  %v4745_v6 = vshll.u32 %v19848_v35, 16  ;;  %v19922_v29 = vld [vmem:[#allocation5 + $0x3b0] ss:$8 sps:$4 sm:$0xff]   ;;  %v23796_v36 = vld [vmem:[#allocation47_spill] sm:$0xff]  ;;  %3805 = vmatpush1.bf16.msra.mxu1 %v19891_v37  ;;  %3763 = vmatprep.mubr.bf16.mxu1 %v14786_v50 }
 0x245   : > { %6709 = vmatmul.mubr.bf16.vlgmr.msra.gmra.mrb[32].mxu0 %v19784_v26  ;;  %v1829_v59 = vsel %vm18665_vm4, %v1824_v34, %v1828_v47  ;;  %v1833_v56 = vor.u32 %v1832_v53, %v1828_v47  ;;  %v4737_v63 = vrot.slane %v4735_v5, 5  ;;  %v14731_v26 = vrot.slane %v1871_v25, 9  ;;  %v19927_v35 = vld [vmem:[#allocation5 + $0x3c4] ss:$8 sps:$4 sm:$0xff]   ;;  %3806 = vmatprep.subr.bf16.mxu1 %v19903_v48  ;;  %v23798_v12 = vld [vmem:[#allocation49_spill] sm:$0xff] }
 0x246   : > { %v4741_v41 = vrot.slane %v23795_v22, 4  ;;  %6790 = vmatpush1.bf16.msra.mxu0 %v19578_v38  ;;  %6718 = vmatprep.mubr.bf16.mxu0 %v15037_v51  ;;  %v1947_v13 = vrot.slane %v23796_v36, 5  ;;  %v1950_v54 = vrot.slane %v19888_v49, 5  ;;  %v14983_v34 = vrot.slane %v4872_v57, 9  ;;  %v23797_v31 = vld [vmem:[#allocation48_spill] sm:$0xff] }
 0x247   : > { %6791 = vmatprep.subr.bf16.mxu0 %v19580_v4  ;;  %v1834_v53 = vrot.slane %v1833_v56, 4  ;;  %v4738_v38 = vsel %vm18665_vm4, %v4733_v24, %v4737_v63  ;;  %v4747_v32 = vrot.slane %v4745_v6, 5  ;;  %v4924_v25 = vrot.slane %v19406_v30, 5  ;;  %v18202_v5 = vld [vmem:[#allocation2 + $0x64] sm:$0xf] }
 0x248   : > { %v4742_v14 = vor.u32 %v4741_v41, %v4737_v63  ;;  %v1948_v28 = vsel %vm18675_vm7, %v14731_v26, %v1947_v13  ;;  %v1949_v51 = vrot.slane %v1947_v13, 4  ;;  %v4927_v4 = vrot.slane %v19916_v21, 5  ;;  %v19948_v63 = vld [vmem:[#allocation2 + $0x18] sm:$0xf]  ;;  %v19955_v13 = vld [vmem:[#allocation2 + $0x1c] sm:$0xf]  ;;  %3807 = vmatpush1.bf16.msra.mxu1 %v19922_v29 }
 0x249   : > { %v1839_v42 = vsel %vm18665_vm4, %v1834_v53, %v1838_v45  ;;  %v1847_v47 = vor.u32 %v23798_v12, %v23797_v31  ;;  %v1850_v24 = vshll.u32 %v18202_v5, 16  ;;  %v19946_v41 = vsel %vm18675_vm7, %v14983_v34, %v4924_v25  ;;  %v19951_v45 = vld [vmem:[#allocation5 + $0x3c0] ss:$8 sps:$4 sm:$0xff]   ;;  %3808 = vmatprep.subr.bf16.mxu1 %v19927_v35 }
 0x24a   : > { %v4743_v57 = vrot.slane %v4742_v14, 4  ;;  %6792 = vmatpush1.bf16.msra.mxu0 %v19601_v7  ;;  %v14778_v50 = vcombine.low %v1829_v59, %v1839_v42  ;;  %v1951_v22 = vsel %vm18675_vm7, %v1949_v51, %v1950_v54  ;;  %v4926_v56 = vrot.slane %v4924_v25, 4  ;;  %v23800_v51 = vld [vmem:[#allocation50_spill] sm:$0xff] }
 0x24b   : > { %6793 = vmatprep.subr.bf16.mxu0 %v19630_v40  ;;  %v14787_v26 = vcombine.low %v1948_v28, %v1951_v22  ;;  %v1848_v7 = vrot.slane %v1847_v47, 4  ;;  %v1852_v59 = vrot.slane %v1850_v24, 5  ;;  %v23799_v53 = vshrl.u32 %v23796_v36, 16  ;;  %v19974_v36 = vld [vmem:[#allocation2 + $0x20] sm:$0x1] }
 0x24c   : > { %v4748_v6 = vsel %vm18665_vm4, %v4743_v57, %v4747_v32  ;;  %v19960_v34 = vsel %vm18675_vm7, %v4926_v56, %v4927_v4  ;;  %v1860_v14 = vshll.u32 %v19888_v49, 16  ;;  %v19966_v32 = vld [vmem:[#allocation5 + $0x3d4] ss:$8 sps:$4 sm:$0xff]   ;;  %v4756_v25 = vor.u32 %v23800_v51, %v19442_v39  ;;  %v18203_v4 = vld [vmem:[#allocation2 + $0x94] sm:$0xf]  ;;  %3764 = vmatmul.mubr.bf16.gmra.mrb[24].mxu1 %v14778_v50 }
 0x24d   : > { %v15030_v54 = vcombine.low %v4738_v38, %v4748_v6  ;;  %v1856_v40 = vrot.slane %v23799_v53, 4  ;;  %6719 = vmatmul.mubr.bf16.gmra.mrb[36].mxu0 %v15029_v44  ;;  %v15039_v28 = vcombine.low %v19946_v41, %v19960_v34  ;;  %v1853_v38 = vsel %vm18665_vm4, %v1848_v7, %v1852_v59  ;;  %v19980_v49 = vld [vmem:[#allocation5 + $0x3d0] ss:$8 sps:$4 sm:$0xff]   ;;  %v19986_v39 = vld [vmem:[#allocation5 + $0x3e4] ss:$8 sps:$4 sm:$0xff]   ;;  %3809 = vmatpush1.bf16.msra.mxu1 %v19951_v45 }
 0x24e   : > { %v4759_v42 = vshll.u32 %v18203_v4, 16  ;;  %6794 = vmatpush1.bf16.msra.mxu0 %v19636_v10  ;;  %6728 = vmatprep.mubr.bf16.mxu0 %v15038_v62  ;;  %v1862_v57 = vrot.slane %v1860_v14, 5  ;;  %v23801_v31 = vshrl.u32 %v19406_v30, 16  ;;  %v4769_v47 = vshll.u32 %v19916_v21, 16  ;;  %v19997_v7 = vld [vmem:[#allocation5 + $0x3e0] ss:$8 sps:$4 sm:$0xff]  }
 0x24f   : > { %v1857_v44 = vor.u32 %v1856_v40, %v1852_v59  ;;  %6795 = vmatprep.subr.bf16.mxu0 %v19643_v43  ;;  %v4757_v5 = vrot.slane %v4756_v25, 4  ;;  %v1978_v24 = vshrl.u32 %v19948_v63, 16  ;;  %v1981_v11 = vshll.u32 %v19948_v63, 16  ;;  %3773 = vmatprep.mubr.bf16.mxu1 %v14787_v26  ;;  %v4673_v43 = vld [vmem:[#allocation2 + $0xa4] sm:$0x1] }
 0x250   : > { %v4765_v12 = vrot.slane %v23801_v31, 4  ;;  %v4761_v10 = vrot.slane %v4759_v42, 5  ;;  %v4771_v30 = vrot.slane %v4769_v47, 5  ;;  %v1987_v22 = vshll.u32 %v19955_v13, 16  ;;  %3810 = vmatprep.subr.bf16.mxu1 %v19966_v32  ;;  %v20004_v4 = vld [vmem:[#allocation5 + $0x3f4] ss:$8 sps:$4 sm:$0xff]  }
 0x251   : > { %v1858_v62 = vrot.slane %v1857_v44, 4  ;;  %v1991_v21 = vshrl.u32 %v19955_v13, 16  ;;  %v1980_v56 = vrot.slane %v1978_v24, 4  ;;  %v1983_v6 = vrot.slane %v1981_v11, 5  ;;  %v20006_v42 = vld [vmem:[#allocation2 + $0x24] sm:$0xf]  ;;  %3811 = vmatpush1.bf16.msra.mxu1 %v19980_v49 }
 0x252   : > { %v4762_v50 = vsel %vm18665_vm4, %v4757_v5, %v4761_v10  ;;  %v4766_v41 = vor.u32 %v4765_v12, %v4761_v10  ;;  %6796 = vmatpush1.bf16.msra.mxu0 %v19670_v27  ;;  %v1989_v59 = vrot.slane %v1987_v22, 5  ;;  %v1997_v53 = vshll.u32 %v19974_v36, 16  ;;  %v18204_v31 = vld [vmem:[#allocation2 + $0xa0] sm:$0xf]  ;;  %3812 = vmatprep.subr.bf16.mxu1 %v19986_v39  ;;  %v20014_v10 = vld [vmem:[#allocation2 + $0x28] sm:$0xf] }
 0x253   : > { %v1863_v26 = vsel %vm18665_vm4, %v1858_v62, %v1862_v57  ;;  %v1993_v34 = vrot.slane %v1991_v21, 4  ;;  %6797 = vmatprep.subr.bf16.mxu0 %v19682_v19  ;;  %v1984_v51 = vor.u32 %v1983_v6, %v1980_v56  ;;  %v2206_v25 = vrot.slane %v19974_v36, 5  ;;  %v1970_v22 = vld [vmem:[#allocation2 + $0x2c] sm:$0x1]  ;;  %v4874_v6 = vld [vmem:[#allocation2 + $0xa8] sm:$0xe] }
 0x254   : > { %v14779_v40 = vcombine.low %v1853_v38, %v1863_v26  ;;  %v4767_v14 = vrot.slane %v4766_v41, 4  ;;  %v1999_v44 = vrot.slane %v1997_v53, 5  ;;  %v14984_v57 = vrot.slane %v4873_v60, 9  ;;  %v20017_v60 = vld [vmem:[#allocation5 + $0x3f0] ss:$8 sps:$4 sm:$0xff]  }
 0x255   : > { %v1994_v27 = vor.u32 %v1993_v34, %v1989_v59  ;;  %v4931_v12 = vrot.slane %v18204_v31, 5  ;;  %6729 = vmatmul.mubr.bf16.gmra.mrb[40].mxu0 %v15030_v54  ;;  %v1985_v38 = vrot.slane %v1984_v51, 4  ;;  %v4934_v47 = vrot.slane %v4673_v43, 5  ;;  %v20024_v21 = vld [vmem:[#allocation5 + $0x404] ss:$8 sps:$4 sm:$0xff]   ;;  %3813 = vmatpush1.bf16.msra.mxu1 %v19997_v7 }
 0x256   : > { %v4772_v19 = vsel %vm18665_vm4, %v4767_v14, %v4771_v30  ;;  %v14788_v5 = vcombine.low %v19948_v63, %v19955_v13  ;;  %6798 = vmatpush1.bf16.msra.mxu0 %v19710_v61  ;;  %6738 = vmatprep.mubr.bf16.mxu0 %v15039_v28  ;;  %v4780_v61 = vor.u32 %v19496_v1, %v19494_v8  ;;  %v4783_v28 = vshll.u32 %v18204_v31, 16  ;;  %v20038_v14 = vld [vmem:[#allocation5 + $0x400] ss:$8 sps:$4 sm:$0xff]  }
 0x257   : > { %v15031_v24 = vcombine.low %v4762_v50, %v4772_v19  ;;  %v1995_v11 = vrot.slane %v1994_v27, 4  ;;  %v4932_v54 = vsel %vm18675_vm7, %v14984_v57, %v4931_v12  ;;  %v4933_v62 = vrot.slane %v4931_v12, 4  ;;  %6799 = vmatprep.subr.bf16.mxu0 %v19712_v9  ;;  %3774 = vmatmul.mubr.bf16.gmra.mrb[28].mxu1 %v14779_v40  ;;  %v23802_v50 = vld [vmem:[#allocation51_spill] sm:$0xff]  ;;  %v4674_v31 = vld [vmem:[#allocation2 + $0xb0] sm:$0x1] }
 0x258   : > { %v1990_v30 = vsel %vm18665_vm4, %v1985_v38, %v1989_v59  ;;  %v23803_v41 = vshrl.u32 %v23802_v50, 16  ;;  %v4793_v34 = vshll.u32 %v4673_v43, 16  ;;  %v2002_v59 = vshrl.u32 %v20006_v42, 16  ;;  %3814 = vmatprep.subr.bf16.mxu1 %v20004_v4 }
 0x259   : > { %v2000_v26 = vsel %vm18665_vm4, %v1995_v11, %v1999_v44  ;;  %v4935_v9 = vsel %vm18675_vm7, %v4933_v62, %v4934_v47  ;;  %v4781_v1 = vrot.slane %v4780_v61, 4  ;;  %v4785_v40 = vrot.slane %v4783_v28, 5  ;;  %3815 = vmatpush1.bf16.msra.mxu1 %v20017_v60  ;;  %v20048_v28 = vld [vmem:[#allocation5 + $0x414] ss:$8 sps:$4 sm:$0xff]  }
 0x25a   : > { %v4789_v56 = vrot.slane %v23803_v41, 4  ;;  %v14796_v53 = vcombine.low %v1990_v30, %v2000_v26  ;;  %v15040_v8 = vcombine.low %v4932_v54, %v4935_v9  ;;  %6800 = vmatpush1.bf16.msra.mxu0 %v19732_v58  ;;  %v4795_v51 = vrot.slane %v4793_v34, 5  ;;  %v18205_v54 = vld [vmem:[#allocation2 + $0xac] sm:$0xf]  ;;  %3897 = vmatprep.subr.bf16.mxu1 %v20024_v21  ;;  %v20050_v41 = vld [vmem:[#allocation2 + $0x30] sm:$0xf] }
 0x25b   : > { %v2004_v27 = vrot.slane %v2002_v59, 4  ;;  %v2005_v44 = vshll.u32 %v20006_v42, 16  ;;  %v2011_v57 = vshll.u32 %v20014_v10, 16  ;;  %6801 = vmatprep.subr.bf16.mxu0 %v19740_v18  ;;  %v4786_v43 = vsel %vm18665_vm4, %v4781_v1, %v4785_v40  ;;  %v20059_v9 = vld [vmem:[#allocation2 + $0x34] sm:$0xf]  ;;  %v23804_v59 = vld [vmem:[#allocation53_spill] sm:$0xff] }
 0x25c   : > { %3816 = vmatprep.mubr.bf16.mxu1 %v14796_v53  ;;  %v4790_v12 = vor.u32 %v4789_v56, %v4785_v40  ;;  %v2015_v19 = vshrl.u32 %v20014_v10, 16  ;;  %v2021_v38 = vshll.u32 %v1970_v22, 16  ;;  %v14985_v11 = vrot.slane %v4874_v6, 9  ;;  %v20053_v56 = vld [vmem:[#allocation5 + $0x410] ss:$8 sps:$4 sm:$0xff]  }
 0x25d   : > { %v2007_v58 = vrot.slane %v2005_v44, 5  ;;  %v2013_v47 = vrot.slane %v2011_v57, 5  ;;  %v4938_v62 = vrot.slane %v18205_v54, 5  ;;  %6739 = vmatmul.mubr.bf16.gmra.mrb[44].mxu0 %v15031_v24  ;;  %v4941_v50 = vrot.slane %v4674_v31, 5  ;;  %v23805_v53 = vld [vmem:[#allocation54_spill] sm:$0xff] }
 0x25e   : > { %v4791_v30 = vrot.slane %v4790_v12, 4  ;;  %v2017_v18 = vrot.slane %v2015_v19, 4  ;;  %v2023_v61 = vrot.slane %v2021_v38, 5  ;;  %6802 = vmatpush1.bf16.msra.mxu0 %v19763_v0  ;;  %6748 = vmatprep.mubr.bf16.mxu0 %v15040_v8  ;;  %v14789_v26 = vcombine.low %v20006_v42, %v20014_v10  ;;  %v20069_v40 = vld [vmem:[#allocation5 + $0x424] ss:$8 sps:$4 sm:$0xff]  }
 0x25f   : > { %v2008_v22 = vor.u32 %v2007_v58, %v2004_v27  ;;  %v4939_v6 = vsel %vm18675_vm7, %v14985_v11, %v4938_v62  ;;  %v4940_v24 = vrot.slane %v4938_v62, 4  ;;  %6803 = vmatprep.subr.bf16.mxu0 %v19780_v16  ;;  %3817 = vmatmul.mubr.bf16.vlgmr.msra.gmra.mrb[0].mxu1 %v14788_v5  ;;  %v4804_v8 = vor.u32 %v23805_v53, %v23804_v59  ;;  %v23806_v27 = vld [vmem:[#allocation52_spill] sm:$0xff]  ;;  %v1971_v5 = vld [vmem:[#allocation2 + $0x38] sm:$0x1]  ;;  %v20077_v19 = vld [vmem:[#allocation2 + $0xbc] sm:$0x1] }
 0x260   : > { %v4796_v0 = vsel %vm18665_vm4, %v4791_v30, %v4795_v51  ;;  %v2018_v34 = vor.u32 %v2017_v18, %v2013_v47  ;;  %v4807_v1 = vshll.u32 %v18205_v54, 16  ;;  %3898 = vmatpush1.bf16.msra.mxu1 %v20038_v14  ;;  %v23807_v63 = vshrl.u32 %v23806_v27, 16  ;;  %v4875_v54 = vld [vmem:[#allocation2 + $0xb4] sm:$0xe]  ;;  %v20097_v59 = vld [vmem:[#allocation2 + $0x3c] sm:$0xf] }
 0x261   : > { %v15032_v42 = vcombine.low %v4786_v43, %v4796_v0  ;;  %v2009_v10 = vrot.slane %v2008_v22, 4  ;;  %v4942_v16 = vsel %vm18675_vm7, %v4940_v24, %v4941_v50  ;;  %3899 = vmatprep.subr.bf16.mxu1 %v20048_v28  ;;  %v4805_v57 = vrot.slane %v4804_v8, 4  ;;  %v20090_v50 = vld [vmem:[#allocation5 + $0x420] ss:$8 sps:$4 sm:$0xff]   ;;  %v20093_v24 = vld [vmem:[#allocation5 + $0x434] ss:$8 sps:$4 sm:$0xff]  }
 0x262   : > { %v4813_v13 = vrot.slane %v23807_v63, 4  ;;  %v2019_v44 = vrot.slane %v2018_v34, 4  ;;  %v15041_v51 = vcombine.low %v4939_v6, %v4942_v16  ;;  %v4809_v12 = vrot.slane %v4807_v1, 5  ;;  %6804 = vmatpush1.bf16.msra.mxu0 %v19801_v2  ;;  %v18206_v1 = vld [vmem:[#allocation2 + $0xb8] sm:$0xf] }
 0x263   : > { %v2014_v43 = vsel %vm18665_vm4, %v2009_v10, %v2013_v47  ;;  %v4817_v38 = vshll.u32 %v4674_v31, 16  ;;  %v2026_v58 = vshrl.u32 %v20050_v41, 16  ;;  %v2029_v11 = vshll.u32 %v20050_v41, 16  ;;  %6805 = vmatprep.subr.bf16.mxu0 %v19822_v52 }
 0x264   : > { %v2024_v62 = vsel %vm18665_vm4, %v2019_v44, %v2023_v61  ;;  %v4810_v30 = vsel %vm18665_vm4, %v4805_v57, %v4809_v12  ;;  %v4814_v18 = vor.u32 %v4813_v13, %v4809_v12  ;;  %v2035_v2 = vshll.u32 %v20059_v9, 16  ;;  %3900 = vmatpush1.bf16.msra.mxu1 %v20053_v56 }
 0x265   : > { %v14797_v47 = vcombine.low %v2014_v43, %v2024_v62  ;;  %v4819_v31 = vrot.slane %v4817_v38, 5  ;;  %v2028_v22 = vrot.slane %v2026_v58, 4  ;;  %v2031_v6 = vrot.slane %v2029_v11, 5  ;;  %6749 = vmatmul.mubr.bf16.gmra.mrb[48].mxu0 %v15032_v42  ;;  %3901 = vmatprep.subr.bf16.mxu1 %v20069_v40  ;;  %v23808_v43 = vld [vmem:[#allocation18_spill] sm:$0xff]  ;;  %v23809_v38 = vld [vmem:[#allocation19_spill] sm:$0xff] }
 0x266   : > { %v4815_v52 = vrot.slane %v4814_v18, 4  ;;  %v2037_v0 = vrot.slane %v2035_v2, 5  ;;  %v2039_v61 = vshrl.u32 %v20059_v9, 16  ;;  %v2045_v34 = vshll.u32 %v1971_v5, 16  ;;  %6806 = vmatpush1.bf16.msra.mxu0 %v19836_v33  ;;  %6758 = vmatprep.mubr.bf16.mxu0 %v15041_v51  ;;  %v20106_v5 = vld [vmem:[#allocation2 + $0x40] sm:$0xf] }
 0x267   : > { %3826 = vmatprep.mubr.bf16.mxu1 %v14797_v47  ;;  %v2032_v53 = vor.u32 %v2031_v6, %v2028_v22  ;;  %v14986_v8 = vrot.slane %v4875_v54, 9  ;;  %v4945_v10 = vrot.slane %v18206_v1, 5  ;;  %v4948_v16 = vrot.slane %v20077_v19, 5  ;;  %6807 = vmatprep.subr.bf16.mxu0 %v19843_v55  ;;  %v20108_v33 = vld [vmem:[#allocation5 + $0x430] ss:$8 sps:$4 sm:$0xff]  }
 0x268   : > { %v4820_v42 = vsel %vm18665_vm4, %v4815_v52, %v4819_v31  ;;  %v2041_v27 = vrot.slane %v2039_v61, 4  ;;  %v2047_v63 = vrot.slane %v2045_v34, 5  ;;  %v14790_v13 = vcombine.low %v20050_v41, %v20059_v9  ;;  %3827 = vmatmul.mubr.bf16.gmra.mrb[4].mxu1 %v14789_v26  ;;  %v20117_v54 = vld [vmem:[#allocation2 + $0x44] sm:$0x1]  ;;  %v4876_v2 = vld [vmem:[#allocation2 + $0xc0] sm:$0xe] }
 0x269   : > { %v15033_v44 = vcombine.low %v4810_v30, %v4820_v42  ;;  %v2033_v57 = vrot.slane %v2032_v53, 4  ;;  %v4946_v12 = vsel %vm18675_vm7, %v14986_v8, %v4945_v10  ;;  %v4947_v55 = vrot.slane %v4945_v10, 4  ;;  %3902 = vmatpush1.bf16.msra.mxu1 %v20090_v50  ;;  %v20127_v47 = vld [vmem:[#allocation5 + $0x444] ss:$8 sps:$4 sm:$0xff]   ;;  %v4676_v6 = vld [vmem:[#allocation2 + $0xc8] sm:$0x1] }
 0x26a   : > { %v2042_v51 = vor.u32 %v2041_v27, %v2037_v0  ;;  %v4828_v58 = vor.u32 %v23809_v38, %v23808_v43  ;;  %v4831_v11 = vshll.u32 %v18206_v1, 16  ;;  %v23810_v41 = vshrl.u32 %v19576_v46, 16  ;;  %6808 = vmatpush1.bf16.msra.mxu0 %v19863_v15  ;;  %3903 = vmatprep.subr.bf16.mxu1 %v20093_v24  ;;  %v20132_v34 = vld [vmem:[#allocation5 + $0x440] ss:$8 sps:$4 sm:$0xff]   ;;  %v20140_v10 = vld [vmem:[#allocation5 + $0x454] ss:$8 sps:$4 sm:$0xff]  }
 0x26b   : > { %v2038_v26 = vsel %vm18665_vm4, %v2033_v57, %v2037_v0  ;;  %v4949_v62 = vsel %vm18675_vm7, %v4947_v55, %v4948_v16  ;;  %v4841_v30 = vshll.u32 %v20077_v19, 16  ;;  %v2050_v18 = vshrl.u32 %v20097_v59, 16  ;;  %6809 = vmatprep.subr.bf16.mxu0 %v19870_v20  ;;  %v18207_v55 = vld [vmem:[#allocation2 + $0xc4] sm:$0xf] }
 0x26c   : > { %v4837_v9 = vrot.slane %v23810_v41, 4  ;;  %v2043_v46 = vrot.slane %v2042_v51, 4  ;;  %v15042_v31 = vcombine.low %v4946_v12, %v4949_v62  ;;  %v4829_v15 = vrot.slane %v4828_v58, 4  ;;  %v20154_v62 = vld [vmem:[#allocation2 + $0x4c] sm:$0xf] }
 0x26d   : > { %v4833_v22 = vrot.slane %v4831_v11, 5  ;;  %v4843_v52 = vrot.slane %v4841_v30, 5  ;;  %v2052_v0 = vrot.slane %v2050_v18, 4  ;;  %v2053_v61 = vshll.u32 %v20097_v59, 16  ;;  %6759 = vmatmul.mubr.bf16.gmra.mrb[52].mxu0 %v15033_v44  ;;  %3904 = vmatpush1.bf16.msra.mxu1 %v20108_v33  ;;  %v20148_v11 = vld [vmem:[#allocation2 + $0x48] sm:$0xf] }
 0x26e   : > { %v2059_v19 = vshll.u32 %v20106_v5, 16  ;;  %v2048_v53 = vsel %vm18665_vm4, %v2043_v46, %v2047_v63  ;;  %v2063_v1 = vshrl.u32 %v20106_v5, 16  ;;  %6810 = vmatpush1.bf16.msra.mxu0 %v19891_v37  ;;  %6768 = vmatprep.mubr.bf16.mxu0 %v15042_v31  ;;  %v2069_v44 = vshll.u32 %v20117_v54, 16  ;;  %v20156_v30 = vld [vmem:[#allocation5 + $0x450] ss:$8 sps:$4 sm:$0xff]  }
 0x26f   : > { %v4834_v20 = vsel %vm18665_vm4, %v4829_v15, %v4833_v22  ;;  %v4838_v8 = vor.u32 %v4837_v9, %v4833_v22  ;;  %v14798_v16 = vcombine.low %v2038_v26, %v2048_v53  ;;  %v2055_v42 = vrot.slane %v2053_v61, 5  ;;  %6811 = vmatprep.subr.bf16.mxu0 %v19903_v48  ;;  %3905 = vmatprep.subr.bf16.mxu1 %v20127_v47  ;;  %v23812_v46 = vld [vmem:[#allocation22_spill] sm:$0xff]  ;;  %v20161_v15 = vld [vmem:[#allocation2 + $0x50] sm:$0x1]  ;;  %v20164_v22 = vld [vmem:[#allocation5 + $0x464] ss:$8 sps:$4 sm:$0xff]  }
 0x270   : > { %v2061_v27 = vrot.slane %v2059_v19, 5  ;;  %v2065_v57 = vrot.slane %v2063_v1, 4  ;;  %v14987_v12 = vrot.slane %v4876_v2, 9  ;;  %v4952_v51 = vrot.slane %v18207_v55, 5  ;;  %v20171_v53 = vld [vmem:[#allocation2 + $0x78] sm:$0xf] }
 0x271   : > { %v4839_v63 = vrot.slane %v4838_v8, 4  ;;  %3836 = vmatprep.mubr.bf16.mxu1 %v14798_v16  ;;  %v2056_v43 = vor.u32 %v2055_v42, %v2052_v0  ;;  %v2071_v38 = vrot.slane %v2069_v44, 5  ;;  %v4955_v58 = vrot.slane %v4676_v6, 5  ;;  %3906 = vmatpush1.bf16.msra.mxu1 %v20132_v34  ;;  %v20176_v42 = vld [vmem:[#allocation2 + $0x7c] sm:$0xf] }
 0x272   : > { %v14791_v37 = vcombine.low %v20097_v59, %v20106_v5  ;;  %3837 = vmatmul.mubr.bf16.gmra.mrb[8].mxu1 %v14790_v13  ;;  %v2066_v41 = vor.u32 %v2065_v57, %v2061_v27  ;;  %v4953_v9 = vsel %vm18675_vm7, %v14987_v12, %v4952_v51  ;;  %v4954_v26 = vrot.slane %v4952_v51, 4  ;;  %6812 = vmatpush1.bf16.msra.mxu0 %v19922_v29  ;;  %v23811_v59 = vld [vmem:[#allocation20_spill] sm:$0xff]  ;;  %v20188_v51 = vld [vmem:[#allocation5 + $0x474] ss:$8 sps:$4 sm:$0xff]  }
 0x273   : > { %v4844_v48 = vsel %vm18665_vm4, %v4839_v63, %v4843_v52  ;;  %v2057_v2 = vrot.slane %v2056_v43, 4  ;;  %v4852_v31 = vor.u32 %v23812_v46, %v23811_v59  ;;  %v4855_v13 = vshll.u32 %v18207_v55, 16  ;;  %6813 = vmatprep.subr.bf16.mxu0 %v19927_v35  ;;  %3907 = vmatprep.subr.bf16.mxu1 %v20140_v10  ;;  %v20182_v63 = vld [vmem:[#allocation5 + $0x460] ss:$8 sps:$4 sm:$0xff]  }
 0x274   : > { %v15034_v18 = vcombine.low %v4834_v20, %v4844_v48  ;;  %v2067_v52 = vrot.slane %v2066_v41, 4  ;;  %v4956_v0 = vsel %vm18675_vm7, %v4954_v26, %v4955_v58  ;;  %v23813_v29 = vshrl.u32 %v19647_v23, 16  ;;  %v20193_v41 = vld [vmem:[#allocation2 + $0x80] sm:$0x1] }
 0x275   : > { %v4865_v19 = vshll.u32 %v4676_v6, 16  ;;  %v2062_v20 = vsel %vm18665_vm4, %v2057_v2, %v2061_v27  ;;  %v15043_v8 = vcombine.low %v4953_v9, %v4956_v0  ;;  %v4853_v1 = vrot.slane %v4852_v31, 4  ;;  %3908 = vmatpush1.bf16.msra.mxu1 %v20156_v30  ;;  %v20200_v31 = vld [vmem:[#allocation2 + $0x54] sm:$0xf] }
 0x276   : > { %v4861_v61 = vrot.slane %v23813_v29, 4  ;;  %v4857_v16 = vrot.slane %v4855_v13, 5  ;;  %6769 = vmatmul.mubr.bf16.gmra.mrb[56].mxu0 %v15034_v18  ;;  %v2072_v35 = vsel %vm18665_vm4, %v2067_v52, %v2071_v38  ;;  %v2074_v23 = vshrl.u32 %v20148_v11, 16  ;;  %3909 = vmatprep.subr.bf16.mxu1 %v20164_v22 }
 0x277   : > { %v4867_v44 = vrot.slane %v4865_v19, 5  ;;  %v2077_v6 = vshll.u32 %v20148_v11, 16  ;;  %v14799_v57 = vcombine.low %v2062_v20, %v2072_v35  ;;  %6814 = vmatpush1.bf16.msra.mxu0 %v19951_v45  ;;  %6778 = vmatprep.mubr.bf16.mxu0 %v15043_v8  ;;  %v2083_v55 = vshll.u32 %v20154_v62, 16  ;;  %v20208_v19 = vld [vmem:[#allocation5 + $0x470] ss:$8 sps:$4 sm:$0xff]  }
 0x278   : > { %v4858_v27 = vsel %vm18665_vm4, %v4853_v1, %v4857_v16  ;;  %v4862_v12 = vor.u32 %v4861_v61, %v4857_v16  ;;  %6815 = vmatprep.subr.bf16.mxu0 %v19966_v32  ;;  %v2076_v43 = vrot.slane %v2074_v23, 4  ;;  %v2087_v58 = vshrl.u32 %v20154_v62, 16  ;;  %v20206_v61 = vld [vmem:[#allocation2 + $0x58] sm:$0xf]  ;;  %v20214_v23 = vld [vmem:[#allocation2 + $0x5c] sm:$0x1] }
 0x279   : > { %v2079_v38 = vrot.slane %v2077_v6, 5  ;;  %v2093_v48 = vshll.u32 %v20161_v15, 16  ;;  %3846 = vmatprep.mubr.bf16.mxu1 %v14799_v57  ;;  %v2085_v9 = vrot.slane %v2083_v55, 5  ;;  %v4983_v26 = vshrl.u32 %v20171_v53, 16  ;;  %3910 = vmatpush1.bf16.msra.mxu1 %v20182_v63  ;;  %v20225_v55 = vld [vmem:[#allocation2 + $0x88] sm:$0xf] }
 0x27a   : > { %v4863_v45 = vrot.slane %v4862_v12, 4  ;;  %v4986_v18 = vshll.u32 %v20171_v53, 16  ;;  %3847 = vmatmul.mubr.bf16.gmra.mrb[12].mxu1 %v14791_v37  ;;  %v2089_v2 = vrot.slane %v2087_v58, 4  ;;  %v4992_v46 = vshll.u32 %v20176_v42, 16  ;;  %3911 = vmatprep.subr.bf16.mxu1 %v20188_v51  ;;  %v20223_v12 = vld [vmem:[#allocation2 + $0x84] sm:$0xf] }
 0x27b   : > { %v2080_v32 = vor.u32 %v2079_v38, %v2076_v43  ;;  %v2095_v59 = vrot.slane %v2093_v48, 5  ;;  %6816 = vmatpush1.bf16.msra.mxu0 %v19980_v49  ;;  %v4985_v52 = vrot.slane %v4983_v26, 4  ;;  %v4996_v29 = vshrl.u32 %v20176_v42, 16 }
 0x27c   : > { %v4868_v13 = vsel %vm18665_vm4, %v4863_v45, %v4867_v44  ;;  %v4988_v0 = vrot.slane %v4986_v18, 5  ;;  %6817 = vmatprep.subr.bf16.mxu0 %v19986_v39  ;;  %v2090_v8 = vor.u32 %v2089_v2, %v2085_v9  ;;  %v4994_v1 = vrot.slane %v4992_v46, 5 }
 0x27d   : > { %v15035_v37 = vcombine.low %v4858_v27, %v4868_v13  ;;  %v2081_v20 = vrot.slane %v2080_v32, 4  ;;  %v4998_v16 = vrot.slane %v4996_v29, 4  ;;  %v5002_v35 = vshll.u32 %v20193_v41, 16  ;;  %3912 = vmatpush1.bf16.msra.mxu1 %v20208_v19 }
 0x27e   : > { %v4989_v49 = vor.u32 %v4988_v0, %v4985_v52  ;;  %v5211_v44 = vrot.slane %v20193_v41, 5  ;;  %v2091_v39 = vrot.slane %v2090_v8, 4  ;;  %v14792_v57 = vcombine.low %v20148_v11, %v20154_v62  ;;  %v20242_v0 = vld [vmem:[#allocation2 + $0x8c] sm:$0x1] }
 0x27f   : > { %6779 = vmatmul.mubr.bf16.gmra.mrb[60].mxu0 %v15035_v37  ;;  %v2086_v6 = vsel %vm18665_vm4, %v2081_v20, %v2085_v9  ;;  %v15044_v27 = vcombine.low %v20171_v53, %v20176_v42  ;;  %v4999_v38 = vor.u32 %v4998_v16, %v4994_v1  ;;  %v5004_v58 = vrot.slane %v5002_v35, 5  ;;  %v20247_v35 = vld [vmem:[#allocation2 + $0x60] sm:$0xf] }
 0x280   : > { %6818 = vmatpush1.bf16.msra.mxu0 %v19997_v7  ;;  %v4990_v43 = vrot.slane %v4989_v49, 4  ;;  %v2098_v48 = vshrl.u32 %v20200_v31, 16  ;;  %v2096_v45 = vsel %vm18665_vm4, %v2091_v39, %v2095_v59  ;;  %v2101_v11 = vshll.u32 %v20200_v31, 16 }
 0x281   : > { %6819 = vmatprep.subr.bf16.mxu0 %v20004_v4  ;;  %v2107_v53 = vshll.u32 %v20206_v61, 16  ;;  %v2111_v9 = vshrl.u32 %v20206_v61, 16  ;;  %v14800_v26 = vcombine.low %v2086_v6, %v2096_v45  ;;  %v5000_v18 = vrot.slane %v4999_v38, 4  ;;  %v17809_v4 = vld [vmem:[#allocation8 + $0x40] sm:$0xff]  }
 0x282   : > { %v4995_v7 = vsel %vm18665_vm4, %v4990_v43, %v4994_v1  ;;  %v2100_v32 = vrot.slane %v2098_v48, 4  ;;  %v2103_v2 = vrot.slane %v2101_v11, 5  ;;  %v2117_v59 = vshll.u32 %v20214_v23, 16  ;;  %15948 = vmatprep.subr.bf16.mxu1 %v17809_v4  ;;  %v20269_v4 = vld [vmem:[#allocation2 + $0x94] sm:$0xf] }
 0x283   : > { %v2109_v46 = vrot.slane %v2107_v53, 5  ;;  %v2113_v13 = vrot.slane %v2111_v9, 4  ;;  %3856 = vmatprep.mubr.bf16.mxu1 %v14800_v26  ;;  %v5005_v52 = vsel %vm18665_vm4, %v5000_v18, %v5004_v58  ;;  %v5007_v29 = vshrl.u32 %v20223_v12, 16  ;;  %v20256_v53 = vld [vmem:[#allocation2 + $0x64] sm:$0xf] }
 0x284   : > { %6820 = vmatpush1.bf16.msra.mxu0 %v20017_v60  ;;  %v5010_v37 = vshll.u32 %v20223_v12, 16  ;;  %v5016_v20 = vshll.u32 %v20225_v55, 16  ;;  %v15052_v8 = vcombine.low %v4995_v7, %v5005_v52  ;;  %3857 = vmatmul.mubr.bf16.gmra.mrb[16].mxu1 %v14792_v57  ;;  %v2104_v1 = vor.u32 %v2103_v2, %v2100_v32  ;;  %v20258_v9 = vld [vmem:[#allocation2 + $0x68] sm:$0x1] }
 0x285   : > { %v2114_v49 = vor.u32 %v2113_v13, %v2109_v46  ;;  %v2119_v16 = vrot.slane %v2117_v59, 5  ;;  %6902 = vmatprep.subr.bf16.mxu0 %v20024_v21  ;;  %v5009_v6 = vrot.slane %v5007_v29, 4  ;;  %v5020_v43 = vshrl.u32 %v20225_v55, 16 }
 0x286   : > { %v5012_v39 = vrot.slane %v5010_v37, 5  ;;  %v5018_v60 = vrot.slane %v5016_v20, 5  ;;  %6821 = vmatprep.mubr.bf16.mxu0 %v15052_v8  ;;  %v2105_v38 = vrot.slane %v2104_v1, 4  ;;  %v5026_v48 = vshll.u32 %v20242_v0, 16  ;;  %v20275_v20 = vld [vmem:[#allocation2 + $0x98] sm:$0x1] }
 0x287   : > { %v2115_v58 = vrot.slane %v2114_v49, 4  ;;  %v14793_v57 = vcombine.low %v20200_v31, %v20206_v61  ;;  %6822 = vmatmul.mubr.bf16.vlgmr.msra.gmra.mrb[32].mxu0 %v15044_v27  ;;  %v5022_v11 = vrot.slane %v5020_v43, 4  ;;  %v15045_v21 = vcombine.low %v20223_v12, %v20225_v55  ;;  %v20266_v27 = vld [vmem:[#allocation2 + $0x90] sm:$0xf]  ;;  %v20281_v43 = vld [vmem:[#allocation2 + $0x6c] sm:$0xf] }
 0x288   : > { %v5013_v45 = vor.u32 %v5012_v39, %v5009_v6  ;;  %v2122_v26 = vshrl.u32 %v20247_v35, 16  ;;  %v2110_v7 = vsel %vm18665_vm4, %v2105_v38, %v2109_v46  ;;  %v5028_v32 = vrot.slane %v5026_v48, 5  ;;  %6903 = vmatpush1.bf16.msra.mxu0 %v20038_v14 }
 0x289   : > { %v2120_v18 = vsel %vm18665_vm4, %v2115_v58, %v2119_v16  ;;  %v2125_v31 = vshll.u32 %v20247_v35, 16  ;;  %v5023_v13 = vor.u32 %v5022_v11, %v5018_v60  ;;  %6904 = vmatprep.subr.bf16.mxu0 %v20048_v28  ;;  %v2131_v46 = vshll.u32 %v20256_v53, 16 }
 0x28a   : > { %v14801_v12 = vcombine.low %v2110_v7, %v2120_v18  ;;  %v5014_v2 = vrot.slane %v5013_v45, 4  ;;  %v2124_v59 = vrot.slane %v2122_v26, 4  ;;  %v2135_v29 = vshrl.u32 %v20256_v53, 16  ;;  %v20287_v45 = vld [vmem:[#allocation2 + $0x70] sm:$0xf] }
 0x28b   : > { %v2127_v52 = vrot.slane %v2125_v31, 5  ;;  %v2141_v37 = vshll.u32 %v20258_v9, 16  ;;  %v5024_v8 = vrot.slane %v5023_v13, 4  ;;  %v5031_v1 = vshrl.u32 %v20266_v27, 16 }
 0x28c   : > { %3866 = vmatprep.mubr.bf16.mxu1 %v14801_v12  ;;  %v5019_v14 = vsel %vm18665_vm4, %v5014_v2, %v5018_v60  ;;  %v5034_v49 = vshll.u32 %v20266_v27, 16  ;;  %v2133_v16 = vrot.slane %v2131_v46, 5  ;;  %v2137_v6 = vrot.slane %v2135_v29, 4  ;;  %6905 = vmatpush1.bf16.msra.mxu0 %v20053_v56  ;;  %v20294_v12 = vld [vmem:[#allocation2 + $0x74] sm:$0x1] }
 0x28d   : > { %3867 = vmatmul.mubr.bf16.gmra.mrb[20].mxu1 %v14793_v57  ;;  %v2128_v28 = vor.u32 %v2127_v52, %v2124_v59  ;;  %v2143_v39 = vrot.slane %v2141_v37, 5  ;;  %v5029_v38 = vsel %vm18665_vm4, %v5024_v8, %v5028_v32  ;;  %v5033_v58 = vrot.slane %v5031_v1, 4  ;;  %6906 = vmatprep.subr.bf16.mxu0 %v20069_v40  ;;  %v20300_v52 = vld [vmem:[#allocation2 + $0x9c] sm:$0xf]  ;;  %v20302_v46 = vld [vmem:[#allocation2 + $0xa0] sm:$0xf] }
 0x28e   : > { %v5036_v48 = vrot.slane %v5034_v49, 5  ;;  %v5040_v60 = vshll.u32 %v20269_v4, 16  ;;  %v15053_v57 = vcombine.low %v5019_v14, %v5029_v38  ;;  %v2138_v26 = vor.u32 %v2137_v6, %v2133_v16  ;;  %v20314_v6 = vld [vmem:[#allocation2 + $0xa4] sm:$0x1] }
 0x28f   : > { %v2129_v11 = vrot.slane %v2128_v28, 4  ;;  %v5044_v7 = vshrl.u32 %v20269_v4, 16  ;;  %v5050_v56 = vshll.u32 %v20275_v20, 16  ;;  %v14794_v32 = vcombine.low %v20247_v35, %v20256_v53 }
 0x290   : > { %v5037_v18 = vor.u32 %v5036_v48, %v5033_v58  ;;  %v5042_v31 = vrot.slane %v5040_v60, 5  ;;  %6831 = vmatprep.mubr.bf16.mxu0 %v15053_v57  ;;  %v2139_v13 = vrot.slane %v2138_v26, 4  ;;  %v15046_v59 = vcombine.low %v20266_v27, %v20269_v4  ;;  %6907 = vmatpush1.bf16.msra.mxu0 %v20090_v50  ;;  %v20321_v26 = vld [vmem:[#allocation2 + $0xa8] sm:$0xf] }
 0x291   : > { %v2134_v2 = vsel %vm18665_vm4, %v2129_v11, %v2133_v16  ;;  %v5046_v40 = vrot.slane %v5044_v7, 4  ;;  %6832 = vmatmul.mubr.bf16.gmra.mrb[36].mxu0 %v15045_v21  ;;  %v5052_v35 = vrot.slane %v5050_v56, 5  ;;  %v2146_v37 = vshrl.u32 %v20281_v43, 16  ;;  %6908 = vmatprep.subr.bf16.mxu0 %v20093_v24  ;;  %v20327_v56 = vld [vmem:[#allocation2 + $0xac] sm:$0xf] }
 0x292   : > { %v5038_v29 = vrot.slane %v5037_v18, 4  ;;  %v2149_v14 = vshll.u32 %v20281_v43, 16  ;;  %v2144_v8 = vsel %vm18665_vm4, %v2139_v13, %v2143_v39  ;;  %v2155_v27 = vshll.u32 %v20287_v45, 16 }
 0x293   : > { %v5047_v1 = vor.u32 %v5046_v40, %v5042_v31  ;;  %v2159_v49 = vshrl.u32 %v20287_v45, 16  ;;  %v14802_v28 = vcombine.low %v2134_v2, %v2144_v8  ;;  %v2148_v21 = vrot.slane %v2146_v37, 4  ;;  %v20329_v37 = vld [vmem:[#allocation2 + $0xb0] sm:$0x1] }
 0x294   : > { %v5043_v50 = vsel %vm18665_vm4, %v5038_v29, %v5042_v31  ;;  %v2151_v16 = vrot.slane %v2149_v14, 5  ;;  %v2157_v58 = vrot.slane %v2155_v27, 5  ;;  %v2165_v24 = vshll.u32 %v20294_v12, 16  ;;  %6909 = vmatpush1.bf16.msra.mxu0 %v20108_v33  ;;  %v2169_v27 = vld [vmem:[#allocation2 + $0x18] sm:$0xe] }
 0x295   : > { %v5048_v38 = vrot.slane %v5047_v1, 4  ;;  %v2161_v48 = vrot.slane %v2159_v49, 4  ;;  %3876 = vmatprep.mubr.bf16.mxu1 %v14802_v28  ;;  %v5055_v60 = vshrl.u32 %v20300_v52, 16  ;;  %v5058_v57 = vshll.u32 %v20300_v52, 16  ;;  %6910 = vmatprep.subr.bf16.mxu0 %v20127_v47 }
 0x296   : > { %v2152_v39 = vor.u32 %v2151_v16, %v2148_v21  ;;  %v5064_v11 = vshll.u32 %v20302_v46, 16  ;;  %3877 = vmatmul.mubr.bf16.gmra.mrb[24].mxu1 %v14794_v32  ;;  %v2167_v31 = vrot.slane %v2165_v24, 5  ;;  %v5068_v33 = vshrl.u32 %v20302_v46, 16 }
 0x297   : > { %v5053_v7 = vsel %vm18665_vm4, %v5048_v38, %v5052_v35  ;;  %v2162_v18 = vor.u32 %v2161_v48, %v2157_v58  ;;  %v5057_v40 = vrot.slane %v5055_v60, 4  ;;  %v5060_v29 = vrot.slane %v5058_v57, 5  ;;  %v20349_v57 = vld [vmem:[#allocation2 + $0xb8] sm:$0xf] }
 0x298   : > { %v15054_v2 = vcombine.low %v5043_v50, %v5053_v7  ;;  %v2153_v13 = vrot.slane %v2152_v39, 4  ;;  %v5066_v8 = vrot.slane %v5064_v11, 5  ;;  %v5070_v1 = vrot.slane %v5068_v33, 4  ;;  %6911 = vmatpush1.bf16.msra.mxu0 %v20132_v34  ;;  %v20342_v34 = vld [vmem:[#allocation2 + $0xb4] sm:$0xf] }
 0x299   : > { %v2163_v14 = vrot.slane %v2162_v18, 4  ;;  %v5074_v47 = vshll.u32 %v20314_v6, 16  ;;  %v5061_v35 = vor.u32 %v5060_v29, %v5057_v40  ;;  %v14795_v49 = vcombine.low %v20281_v43, %v20287_v45  ;;  %6912 = vmatprep.subr.bf16.mxu0 %v20140_v10  ;;  %v18208_v40 = vld [vmem:[#allocation2 + $0x1c] sm:$0xf] }
 0x29a   : > { %6841 = vmatprep.mubr.bf16.mxu0 %v15054_v2  ;;  %v2158_v32 = vsel %vm18665_vm4, %v2153_v13, %v2157_v58  ;;  %v15047_v28 = vcombine.low %v20300_v52, %v20302_v46  ;;  %v5071_v21 = vor.u32 %v5070_v1, %v5066_v8  ;;  %v5079_v38 = vshrl.u32 %v20321_v26, 16  ;;  %v20359_v1 = vld [vmem:[#allocation3] sm:$0xff] }
 0x29b   : > { %6842 = vmatmul.mubr.bf16.gmra.mrb[40].mxu0 %v15046_v59  ;;  %v2168_v50 = vsel %vm18665_vm4, %v2163_v14, %v2167_v31  ;;  %v5076_v16 = vrot.slane %v5074_v47, 5  ;;  %v5062_v48 = vrot.slane %v5061_v35, 4  ;;  %v5082_v24 = vshll.u32 %v20321_v26, 16  ;;  %v20354_v31 = vld [vmem:[#allocation2 + $0xbc] sm:$0x1] }
 0x29c   : > { %v14803_v58 = vcombine.low %v2158_v32, %v2168_v50  ;;  %v5088_v43 = vshll.u32 %v20327_v56, 16  ;;  %v5072_v39 = vrot.slane %v5071_v21, 4  ;;  %v5081_v52 = vrot.slane %v5079_v38, 4  ;;  %6913 = vmatpush1.bf16.msra.mxu0 %v20156_v30 }
 0x29d   : > { %v5092_v59 = vshrl.u32 %v20327_v56, 16  ;;  %v5098_v60 = vshll.u32 %v20329_v37, 16  ;;  %v5067_v10 = vsel %vm18665_vm4, %v5062_v48, %v5066_v8  ;;  %v5084_v11 = vrot.slane %v5082_v24, 5  ;;  %6914 = vmatprep.subr.bf16.mxu0 %v20164_v22  ;;  %v2170_v22 = vld [vmem:[#allocation2 + $0x24] sm:$0xe] }
 0x29e   : > { %3886 = vmatprep.mubr.bf16.mxu1 %v14803_v58  ;;  %v5090_v7 = vrot.slane %v5088_v43, 5  ;;  %v14732_v18 = vrot.slane %v2169_v27, 9  ;;  %v5077_v33 = vsel %vm18665_vm4, %v5072_v39, %v5076_v16  ;;  %v2203_v29 = vrot.slane %v18208_v40, 5  ;;  %v17811_v27 = vld [vmem:[#allocation8 + $0xc0] sm:$0xff]  }
 0x29f   : > { %3887 = vmatmul.mubr.bf16.gmra.mrb[28].mxu1 %v14795_v49  ;;  %v5094_v2 = vrot.slane %v5092_v59, 4  ;;  %v5100_v13 = vrot.slane %v5098_v60, 5  ;;  %v15055_v30 = vcombine.low %v5067_v10, %v5077_v33  ;;  %v5085_v14 = vor.u32 %v5084_v11, %v5081_v52  ;;  %v20379_v10 = vld [vmem:[#allocation2 + $0xc0] sm:$0xf]  ;;  %v18210_v40 = vld [vmem:[#allocation2 + $0x28] sm:$0xf] }
 0x2a0   : > { %3929 = vmatprep.mubr.bf16.mxu1 %v20359_v1  ;;  %v15048_v8 = vcombine.low %v20321_v26, %v20327_v56  ;;  %v5103_v47 = vshrl.u32 %v20342_v34, 16  ;;  %v2204_v35 = vsel %vm18675_vm7, %v14732_v18, %v2203_v29  ;;  %v2205_v49 = vrot.slane %v2203_v29, 4  ;;  %6915 = vmatpush1.bf16.msra.mxu0 %v20182_v63  ;;  %v20383_v18 = vld [vmem:[#allocation2 + $0xc4] sm:$0xf]  ;;  %v18211_v29 = vld [vmem:[#allocation2 + $0x2c] sm:$0x1] }
 0x2a1   : > { %v5095_v32 = vor.u32 %v5094_v2, %v5090_v7  ;;  %v5106_v50 = vshll.u32 %v20342_v34, 16  ;;  %6851 = vmatprep.mubr.bf16.mxu0 %v15055_v30  ;;  %v5086_v21 = vrot.slane %v5085_v14, 4  ;;  %v5112_v38 = vshll.u32 %v20349_v57, 16  ;;  %6916 = vmatprep.subr.bf16.mxu0 %v20188_v51  ;;  %v17813_v14 = vld [vmem:[#allocation8 + $0x48] sm:$0xff]  }
 0x2a2   : > { %v5105_v16 = vrot.slane %v5103_v47, 4  ;;  %v5116_v58 = vshrl.u32 %v20349_v57, 16  ;;  %v2207_v24 = vsel %vm18675_vm7, %v2205_v49, %v2206_v25  ;;  %v5122_v39 = vshll.u32 %v20354_v31, 16  ;;  %v17810_v25 = vld [vmem:[#allocation8] sm:$0xff]   ;;  %v20413_v26 = vld [vmem:[#allocation2 + $0xd4] sm:$0x1] }
 0x2a3   : > { %6852 = vmatmul.mubr.bf16.gmra.mrb[44].mxu0 %v15047_v28  ;;  %v5096_v48 = vrot.slane %v5095_v32, 4  ;;  %v5108_v43 = vrot.slane %v5106_v50, 5  ;;  %v5091_v63 = vsel %vm18665_vm4, %v5086_v21, %v5090_v7  ;;  %v14804_v52 = vcombine.low %v2204_v35, %v2207_v24  ;;  %v20388_v32 = vld [vmem:[#allocation2 + $0xc8] sm:$0x1]  ;;  %v17814_v24 = vld [vmem:[#allocation8 + $0x8] sm:$0xff]  }
 0x2a4   : > { %v5114_v59 = vrot.slane %v5112_v38, 5  ;;  %v5118_v60 = vrot.slane %v5116_v58, 4  ;;  %v5124_v11 = vrot.slane %v5122_v39, 5  ;;  %v14733_v36 = vrot.slane %v2170_v22, 9  ;;  %6917 = vmatpush1.bf16.msra.mxu0 %v20208_v19 }
 0x2a5   : > { %v5101_v51 = vsel %vm18665_vm4, %v5096_v48, %v5100_v13  ;;  %v5109_v28 = vor.u32 %v5108_v43, %v5105_v16  ;;  %v2210_v7 = vrot.slane %v18210_v40, 5  ;;  %v2213_v30 = vrot.slane %v18211_v29, 5  ;;  %16012 = vmatprep.subr.bf16.mxu0 %v17811_v27  ;;  %v2171_v48 = vld [vmem:[#allocation2 + $0x30] sm:$0xe]  ;;  %v18212_v40 = vld [vmem:[#allocation2 + $0x34] sm:$0xf] }
 0x2a6   : > { %v15056_v33 = vcombine.low %v5091_v63, %v5101_v51  ;;  %v5119_v2 = vor.u32 %v5118_v60, %v5114_v59  ;;  %v15049_v13 = vcombine.low %v20342_v34, %v20349_v57  ;;  %v5127_v22 = vshrl.u32 %v20379_v10, 16  ;;  %v20404_v60 = vld [vmem:[#allocation2 + $0xcc] sm:$0xf]  ;;  %v18213_v29 = vld [vmem:[#allocation2 + $0x38] sm:$0x1] }
 0x2a7   : > { %3930 = vmatmul.mubr.bf16.vlgmr.msra.gmra.mrb[0].mxu1 %v14804_v52  ;;  %v5110_v47 = vrot.slane %v5109_v28, 4  ;;  %v5130_v19 = vshll.u32 %v20379_v10, 16  ;;  %v2211_v49 = vsel %vm18675_vm7, %v14733_v36, %v2210_v7  ;;  %v2212_v27 = vrot.slane %v2210_v7, 4 }
 0x2a8   : > { %6861 = vmatprep.mubr.bf16.mxu0 %v15056_v33  ;;  %v5120_v35 = vrot.slane %v5119_v2, 4  ;;  %3939 = vmatprep.mubr.bf16.mxu1 %v20359_v1  ;;  %v5136_v50 = vshll.u32 %v20383_v18, 16  ;;  %v5129_v16 = vrot.slane %v5127_v22, 4  ;;  %v5140_v58 = vshrl.u32 %v20383_v18, 16  ;;  %v20409_v33 = vld [vmem:[#allocation2 + $0xd0] sm:$0xf] }
 0x2a9   : > { %v5115_v21 = vsel %vm18665_vm4, %v5110_v47, %v5114_v59  ;;  %v5132_v38 = vrot.slane %v5130_v19, 5  ;;  %15949 = vmatpush3.bf16.msra.mxu1 %v17810_v25  ;;  %v2214_v39 = vsel %vm18675_vm7, %v2212_v27, %v2213_v30  ;;  %v5146_v52 = vshll.u32 %v20388_v32, 16  ;;  %v17817_v59 = vld [vmem:[#allocation8 + $0x50] sm:$0xff]  }
 0x2aa   : > { %v5125_v43 = vsel %vm18665_vm4, %v5120_v35, %v5124_v11  ;;  %v5138_v63 = vrot.slane %v5136_v50, 5  ;;  %15950 = vmatprep.subr.bf16.mxu1 %v17813_v14  ;;  %v14805_v28 = vcombine.low %v2211_v49, %v2214_v39  ;;  %v5142_v25 = vrot.slane %v5140_v58, 4  ;;  %v17818_v19 = vld [vmem:[#allocation8 + $0x10] sm:$0xff]  }
 0x2ab   : > { %6862 = vmatmul.mubr.bf16.gmra.mrb[48].mxu0 %v15048_v8  ;;  %v15057_v51 = vcombine.low %v5115_v21, %v5125_v43  ;;  %v5133_v36 = vor.u32 %v5132_v38, %v5129_v16  ;;  %v5148_v11 = vrot.slane %v5146_v52, 5  ;;  %v14734_v2 = vrot.slane %v2171_v48, 9  ;;  %v2172_v21 = vld [vmem:[#allocation2 + $0x3c] sm:$0xe]  ;;  %v17821_v16 = vld [vmem:[#allocation8 + $0x58] sm:$0xff]  }
 0x2ac   : > { %v2217_v7 = vrot.slane %v18212_v40, 5  ;;  %v2220_v30 = vrot.slane %v18213_v29, 5  ;;  %v5143_v14 = vor.u32 %v5142_v25, %v5138_v63  ;;  %v15050_v22 = vcombine.low %v20379_v10, %v20383_v18 }
 0x2ad   : > { %6871 = vmatprep.mubr.bf16.mxu0 %v15057_v51  ;;  %v5134_v47 = vrot.slane %v5133_v36, 4  ;;  %v5151_v8 = vshrl.u32 %v20404_v60, 16  ;;  %15951 = vmatpush3.bf16.msra.mxu1 %v17814_v24  ;;  %v5154_v27 = vshll.u32 %v20404_v60, 16  ;;  %v5160_v50 = vshll.u32 %v20409_v33, 16  ;;  %v2173_v36 = vld [vmem:[#allocation2 + $0x48] sm:$0xe] }
 0x2ae   : > { %v2218_v35 = vsel %vm18675_vm7, %v14734_v2, %v2217_v7  ;;  %v2219_v49 = vrot.slane %v2217_v7, 4  ;;  %15952 = vmatprep.subr.bf16.mxu1 %v17817_v59  ;;  %v5144_v58 = vrot.slane %v5143_v14, 4  ;;  %v5164_v24 = vshrl.u32 %v20409_v33, 16  ;;  %v17822_v2 = vld [vmem:[#allocation8 + $0x18] sm:$0xff]   ;;  %v5174_v14 = vld [vmem:[#allocation2 + $0x78] sm:$0xe] }
 0x2af   : > { %3940 = vmatmul.mubr.bf16.gmra.mrb[4].mxu1 %v14805_v28  ;;  %v5139_v38 = vsel %vm18665_vm4, %v5134_v47, %v5138_v63  ;;  %v5153_v48 = vrot.slane %v5151_v8, 4  ;;  %v5156_v39 = vrot.slane %v5154_v27, 5  ;;  %v5162_v52 = vrot.slane %v5160_v50, 5 }
 0x2b0   : > { %3949 = vmatprep.mubr.bf16.mxu1 %v20359_v1  ;;  %v2221_v43 = vsel %vm18675_vm7, %v2219_v49, %v2220_v30  ;;  %v5170_v51 = vshll.u32 %v20413_v26, 16  ;;  %v5149_v59 = vsel %vm18665_vm4, %v5144_v58, %v5148_v11  ;;  %v5166_v25 = vrot.slane %v5164_v24, 4  ;;  %v17825_v30 = vld [vmem:[#allocation8 + $0x60] sm:$0xff]  }
 0x2b1   : > { %v14806_v28 = vcombine.low %v2218_v35, %v2221_v43  ;;  %v14735_v63 = vrot.slane %v2172_v21, 9  ;;  %15953 = vmatpush3.bf16.msra.mxu1 %v17818_v19  ;;  %v15058_v40 = vcombine.low %v5139_v38, %v5149_v59  ;;  %v5157_v7 = vor.u32 %v5156_v39, %v5153_v48  ;;  %v2174_v21 = vld [vmem:[#allocation2 + $0x54] sm:$0xe]  ;;  %v5175_v43 = vld [vmem:[#allocation2 + $0x84] sm:$0xe] }
 0x2b2   : > { %v5172_v29 = vrot.slane %v5170_v51, 5  ;;  %v2224_v47 = vrot.slane %v20106_v5, 5  ;;  %15954 = vmatprep.subr.bf16.mxu1 %v17821_v16  ;;  %v5167_v8 = vor.u32 %v5166_v25, %v5162_v52  ;;  %v2227_v11 = vrot.slane %v20117_v54, 5  ;;  %v17826_v54 = vld [vmem:[#allocation8 + $0x20] sm:$0xff]  }
 0x2b3   : > { %6872 = vmatmul.mubr.bf16.gmra.mrb[52].mxu0 %v15049_v13  ;;  %v15051_v35 = vcombine.low %v20404_v60, %v20409_v33  ;;  %v14736_v19 = vrot.slane %v2173_v36, 9  ;;  %v5158_v49 = vrot.slane %v5157_v7, 4  ;;  %v2231_v50 = vrot.slane %v20154_v62, 5 }
 0x2b4   : > { %6881 = vmatprep.mubr.bf16.mxu0 %v15058_v40  ;;  %v2225_v27 = vsel %vm18675_vm7, %v14735_v63, %v2224_v47  ;;  %v2226_v5 = vrot.slane %v2224_v47, 4  ;;  %v5168_v16 = vrot.slane %v5167_v8, 4  ;;  %v2234_v34 = vrot.slane %v20161_v15, 5 }
 0x2b5   : > { %v14988_v13 = vrot.slane %v5174_v14, 9  ;;  %v5208_v38 = vrot.slane %v20176_v42, 5  ;;  %15955 = vmatpush3.bf16.msra.mxu1 %v17822_v2  ;;  %v5163_v58 = vsel %vm18665_vm4, %v5158_v49, %v5162_v52  ;;  %v20447_v24 = vsel %vm18675_vm7, %v14736_v19, %v2231_v50 }
 0x2b6   : > { %v2228_v48 = vsel %vm18675_vm7, %v2226_v5, %v2227_v11  ;;  %v2233_v62 = vrot.slane %v2231_v50, 4  ;;  %15956 = vmatprep.subr.bf16.mxu1 %v17825_v30  ;;  %v5173_v15 = vsel %vm18665_vm4, %v5168_v16, %v5172_v29  ;;  %v14737_v59 = vrot.slane %v2174_v21, 9  ;;  %v5176_v29 = vld [vmem:[#allocation2 + $0x90] sm:$0xe]  ;;  %v2176_v11 = vld [vmem:[#allocation2 + $0x6c] sm:$0xe] }
 0x2b7   : > { %3950 = vmatmul.mubr.bf16.gmra.mrb[8].mxu1 %v14806_v28  ;;  %v14807_v42 = vcombine.low %v2225_v27, %v2228_v48  ;;  %v20453_v39 = vsel %vm18675_vm7, %v14988_v13, %v5208_v38  ;;  %v5210_v52 = vrot.slane %v5208_v38, 4  ;;  %v15059_v51 = vcombine.low %v5163_v58, %v5173_v15  ;;  %v2175_v28 = vld [vmem:[#allocation2 + $0x60] sm:$0xe]  ;;  %v5177_v16 = vld [vmem:[#allocation2 + $0x9c] sm:$0xe] }
 0x2b8   : > { %3959 = vmatprep.mubr.bf16.mxu1 %v20359_v1  ;;  %v20458_v36 = vsel %vm18675_vm7, %v2233_v62, %v2234_v34  ;;  %v2238_v25 = vrot.slane %v20206_v61, 5  ;;  %v2241_v40 = vrot.slane %v20214_v23, 5  ;;  %v14989_v7 = vrot.slane %v5175_v43, 9 }
 0x2b9   : > { %v14808_v63 = vcombine.low %v20447_v24, %v20458_v36  ;;  %v20467_v2 = vsel %vm18675_vm7, %v5210_v52, %v5211_v44  ;;  %15957 = vmatpush3.bf16.msra.mxu1 %v17826_v54  ;;  %v5215_v30 = vrot.slane %v20225_v55, 5  ;;  %v5218_v41 = vrot.slane %v20242_v0, 5  ;;  %v5178_v54 = vld [vmem:[#allocation2 + $0xa8] sm:$0xe]  ;;  %v5179_v52 = vld [vmem:[#allocation2 + $0xb4] sm:$0xe] }
 0x2ba   : > { %v15060_v47 = vcombine.low %v20453_v39, %v20467_v2  ;;  %v20474_v61 = vsel %vm18675_vm7, %v14737_v59, %v2238_v25  ;;  %v2240_v14 = vrot.slane %v2238_v25, 4  ;;  %v14738_v44 = vrot.slane %v2175_v28, 9  ;;  %v5180_v28 = vld [vmem:[#allocation2 + $0xc0] sm:$0xe] }
 0x2bb   : > { %6882 = vmatmul.mubr.bf16.gmra.mrb[56].mxu0 %v15050_v22  ;;  %v2245_v23 = vrot.slane %v20256_v53, 5  ;;  %v2248_v8 = vrot.slane %v20258_v9, 5  ;;  %v20489_v55 = vsel %vm18675_vm7, %v14989_v7, %v5215_v30  ;;  %v5217_v49 = vrot.slane %v5215_v30, 4  ;;  %v17823_v39 = vld [vmem:[#allocation8 + $0xd8] sm:$0xff]  }
 0x2bc   : > { %6891 = vmatprep.mubr.bf16.mxu0 %v15059_v51  ;;  %v20485_v19 = vsel %vm18675_vm7, %v2240_v14, %v2241_v40  ;;  %v14990_v10 = vrot.slane %v5176_v29, 9  ;;  %v5222_v22 = vrot.slane %v20269_v4, 5  ;;  %v5225_v5 = vrot.slane %v20275_v20, 5  ;;  %v17824_v2 = vld [vmem:[#allocation8 + $0x98] sm:$0xff]  }
 0x2bd   : > { %v14809_v0 = vcombine.low %v20474_v61, %v20485_v19  ;;  %v20495_v53 = vsel %vm18675_vm7, %v14738_v44, %v2245_v23  ;;  %v2247_v9 = vrot.slane %v2245_v23, 4  ;;  %v20500_v27 = vsel %vm18675_vm7, %v5217_v49, %v5218_v41  ;;  %v5181_v23 = vld [vmem:[#allocation2 + $0xcc] sm:$0xe]  ;;  %v17829_v19 = vld [vmem:[#allocation8 + $0x68] sm:$0xff]  }
 0x2be   : > { %v14739_v50 = vrot.slane %v2176_v11, 9  ;;  %v2252_v21 = vrot.slane %v20287_v45, 5  ;;  %v15061_v34 = vcombine.low %v20489_v55, %v20500_v27  ;;  %v20512_v4 = vsel %vm18675_vm7, %v14990_v10, %v5222_v22  ;;  %v17828_v61 = vld [vmem:[#allocation8 + $0xa0] sm:$0xff]   ;;  %15958 = vmatprep.subr.bf16.mxu1 %v17829_v19  ;;  %v17830_v55 = vld [vmem:[#allocation8 + $0x28] sm:$0xff]   ;;  %v17833_v27 = vld [vmem:[#allocation8 + $0x70] sm:$0xff]  }
 0x2bf   : > { %3960 = vmatmul.mubr.bf16.gmra.mrb[12].mxu1 %v14807_v42  ;;  %v20508_v13 = vsel %vm18675_vm7, %v2247_v9, %v2248_v8  ;;  %v5224_v38 = vrot.slane %v5222_v22, 4  ;;  %v2255_v48 = vrot.slane %v20294_v12, 5  ;;  %v14991_v43 = vrot.slane %v5177_v16, 9  ;;  %v17868_v19 = vld [vmem:[#allocation8 + $0x1b0] sm:$0xff]  }
 0x2c0   : > { %3969 = vmatprep.mubr.bf16.mxu1 %v20359_v1  ;;  %v14810_v20 = vcombine.low %v20495_v53, %v20508_v13  ;;  %v20519_v45 = vsel %vm18675_vm7, %v14739_v50, %v2252_v21  ;;  %v2254_v58 = vrot.slane %v2252_v21, 4  ;;  %v5229_v15 = vrot.slane %v20302_v46, 5  ;;  %v17812_v21 = vld [vmem:[#allocation8 + $0x80] sm:$0xff]   ;;  %v17832_v53 = vld [vmem:[#allocation8 + $0xa8] sm:$0xff]   ;;  %15959 = vmatpush3.bf16.msra.mxu1 %v17830_v55  ;;  %v17835_v13 = vld [vmem:[#allocation8 + $0xf0] sm:$0xff]  }
 0x2c1   : > { %v20524_v62 = vsel %vm18675_vm7, %v5224_v38, %v5225_v5  ;;  %v5232_v42 = vrot.slane %v20314_v6, 5  ;;  %v14992_v25 = vrot.slane %v5178_v54, 9  ;;  %v5236_v12 = vrot.slane %v20327_v56, 5  ;;  %15960 = vmatprep.subr.bf16.mxu1 %v17833_v27  ;;  %v17869_v55 = vld [vmem:[#allocation8 + $0x178] sm:$0xff]  }
 0x2c2   : > { %v15062_v51 = vcombine.low %v20512_v4, %v20524_v62  ;;  %v20532_v59 = vsel %vm18675_vm7, %v2254_v58, %v2255_v48  ;;  %v20542_v6 = vsel %vm18675_vm7, %v14991_v43, %v5229_v15  ;;  %v5231_v40 = vrot.slane %v5229_v15, 4  ;;  %v17820_v58 = vld [vmem:[#allocation8 + $0x90] sm:$0xff]   ;;  %v17838_v48 = vld [vmem:[#allocation8 + $0x38] sm:$0xff]  }
 0x2c3   : > { %6892 = vmatmul.mubr.bf16.gmra.mrb[60].mxu0 %v15051_v35  ;;  %v14811_v46 = vcombine.low %v20519_v45, %v20532_v59  ;;  %v5239_v7 = vrot.slane %v20329_v37, 5  ;;  %v5237_v56 = vsel %vm18675_vm7, %v14992_v25, %v5236_v12  ;;  %v5238_v29 = vrot.slane %v5236_v12, 4  ;;  %v17819_v45 = vld [vmem:[#allocation8 + $0xd0] sm:$0xff]   ;;  %v17839_v15 = vld [vmem:[#allocation8 + $0xf8] sm:$0xff]   ;;  %v20605_v59 = vld [vmem:[#allocation3 + $0x10] sm:$0x11] }
 0x2c4   : > { %6934 = vmatprep.mubr.bf16.mxu0 %v20359_v1  ;;  %v14993_v14 = vrot.slane %v5179_v52, 9  ;;  %v5243_v60 = vrot.slane %v20349_v57, 5  ;;  %v5233_v35 = vsel %vm18675_vm7, %v5231_v40, %v5232_v42  ;;  %v5246_v30 = vrot.slane %v20354_v31, 5  ;;  %v17836_v4 = vld [vmem:[#allocation8 + $0xb0] sm:$0xff]   ;;  %v17840_v42 = vld [vmem:[#allocation8 + $0xb8] sm:$0xff]  }
 0x2c5   : > { %v14994_v41 = vrot.slane %v5180_v28, 9  ;;  %v5250_v44 = vrot.slane %v20383_v18, 5  ;;  %v15063_v37 = vcombine.low %v20542_v6, %v5233_v35  ;;  %v5240_v8 = vsel %vm18675_vm7, %v5238_v29, %v5239_v7  ;;  %v17841_v28 = vld [vmem:[#allocation8 + $0x140] sm:$0xff]  }
 0x2c6   : > { %v5244_v11 = vsel %vm18675_vm7, %v14993_v14, %v5243_v60  ;;  %v5245_v49 = vrot.slane %v5243_v60, 4  ;;  %v15064_v57 = vcombine.low %v5237_v56, %v5240_v8  ;;  %v5253_v18 = vrot.slane %v20388_v32, 5  ;;  %v17842_v7 = vld [vmem:[#allocation8 + $0x100] sm:$0xff]   ;;  %v17848_v8 = vld [vmem:[#allocation8 + $0x188] sm:$0xff]  }
 0x2c7   : > { %3970 = vmatmul.mubr.bf16.gmra.mrb[16].mxu1 %v14808_v63  ;;  %v5251_v31 = vsel %vm18675_vm7, %v14994_v41, %v5250_v44  ;;  %v5252_v10 = vrot.slane %v5250_v44, 4  ;;  %v14995_v22 = vrot.slane %v5181_v23, 9  ;;  %v5257_v5 = vrot.slane %v20409_v33, 5  ;;  %v17815_v63 = vld [vmem:[#allocation8 + $0xc8] sm:$0xff]   ;;  %v17843_v56 = vld [vmem:[#allocation8 + $0x1c0] sm:$0xff]  }
 0x2c8   : > { %3979 = vmatprep.mubr.bf16.mxu1 %v20359_v1  ;;  %v5247_v9 = vsel %vm18675_vm7, %v5245_v49, %v5246_v30  ;;  %v5260_v50 = vrot.slane %v20413_v26, 5  ;;  %v17816_v26 = vld [vmem:[#allocation8 + $0x88] sm:$0xff]   ;;  %v15253_v62 = vcombine.high %v20359_v1, %v20359_v1  ;;  %v15252_v43 = vcombine.low %v20359_v1, %v20359_v1  ;;  %v17844_v41 = vld [vmem:[#allocation8 + $0x180] sm:$0xff]   ;;  %v17850_v49 = vld [vmem:[#allocation8 + $0x110] sm:$0xff]  }
 0x2c9   : > { %v15065_v24 = vcombine.low %v5244_v11, %v5247_v9  ;;  %v5254_v36 = vsel %vm18675_vm7, %v5252_v10, %v5253_v18  ;;  %v5258_v32 = vsel %vm18675_vm7, %v14995_v22, %v5257_v5  ;;  %v5259_v38 = vrot.slane %v5257_v5, 4  ;;  %v17845_v44 = vld [vmem:[#allocation8 + $0x148] sm:$0xff]   ;;  %v17849_v11 = vld [vmem:[#allocation8 + $0x150] sm:$0xff]   ;;  %v17853_v10 = vld [vmem:[#allocation8 + $0x158] sm:$0xff]  }
 0x2ca   : > { %v15066_v16 = vcombine.low %v5251_v31, %v5254_v36  ;;  %v7369_v52 = vshrl.u32 %v20359_v1, 16  ;;  %v17846_v23 = vld [vmem:[#allocation8 + $0x108] sm:$0xff]   ;;  %v17852_v31 = vld [vmem:[#allocation8 + $0x190] sm:$0xff]   ;;  %v17854_v18 = vld [vmem:[#allocation8 + $0x118] sm:$0xff]  }
 0x2cb   : > { %6935 = vmatmul.mubr.bf16.vlgmr.msra.gmra.mrb[32].mxu0 %v15060_v47  ;;  %v5261_v33 = vsel %vm18675_vm7, %v5259_v38, %v5260_v50  ;;  %v17827_v47 = vld [vmem:[#allocation8 + $0xe0] sm:$0xff]   ;;  %v17855_v9 = vld [vmem:[#allocation8 + $0x1d8] sm:$0xff]   ;;  %v17861_v36 = vld [vmem:[#allocation8 + $0x168] sm:$0xff]  }
 0x2cc   : > { %6944 = vmatprep.mubr.bf16.mxu0 %v20359_v1  ;;  %16013 = vmatpush3.bf16.msra.mxu0 %v17812_v21  ;;  %v15067_v54 = vcombine.low %v5258_v32, %v5261_v33  ;;  %v7371_v25 = vrot.slane %v7369_v52, 4  ;;  %v17856_v22 = vld [vmem:[#allocation8 + $0x198] sm:$0xff]   ;;  %v17857_v5 = vld [vmem:[#allocation8 + $0x160] sm:$0xff]   ;;  %v17863_v32 = vld [vmem:[#allocation8 + $0x1e8] sm:$0xff]   ;;  %v7594_v52 = vrot.slane %v20359_v1, 5 }
 0x2cd   : > { %16014 = vmatprep.subr.bf16.mxu0 %v17815_v63  ;;  %v17858_v50 = vld [vmem:[#allocation8 + $0x120] sm:$0xff]   ;;  %v17862_v63 = vld [vmem:[#allocation8 + $0x128] sm:$0xff]  }
 0x2ce   : > { %v17859_v21 = vld [vmem:[#allocation8 + $0x1e0] sm:$0xff]   ;;  %v17864_v38 = vld [vmem:[#allocation8 + $0x1a8] sm:$0xff]  }
 0x2cf   : > { %3980 = vmatmul.mubr.bf16.gmra.mrb[20].mxu1 %v14809_v0  ;;  %v17831_v0 = vld [vmem:[#allocation8 + $0xe8] sm:$0xff]  }
 0x2d0   : > { %3989 = vmatprep.mubr.bf16.mxu1 %v20359_v1  ;;  %16015 = vmatpush3.bf16.msra.mxu0 %v17816_v26  ;;  %v17865_v26 = vld [vmem:[#allocation8 + $0x170] sm:$0xff]  }
 0x2d1   : > { %16016 = vmatprep.subr.bf16.mxu0 %v17819_v45 }
 0x2d3   : > { %6945 = vmatmul.mubr.bf16.gmra.mrb[36].mxu0 %v15061_v34  ;;  %v17834_v34 = vld [vmem:[#allocation8 + $0x30] sm:$0xff]  }
 0x2d4   : > { %6954 = vmatprep.mubr.bf16.mxu0 %v20359_v1  ;;  %16017 = vmatpush3.bf16.msra.mxu0 %v17820_v58  ;;  %v2713_v58 = vld [vmem:[%s23575_s4] sm:$0x3] }
 0x2d5   : > { %16018 = vmatprep.subr.bf16.mxu0 %v17823_v39  ;;  %15961 = vmatpush3.bf16.msra.mxu1 %v17834_v34  ;;  %v17870_v34 = vld [vmem:[#allocation8 + $0x138] sm:$0xff]  }
 0x2d7   : > { %3990 = vmatmul.mubr.bf16.gmra.mrb[24].mxu1 %v14810_v20  ;;  %v17837_v20 = vld [vmem:[#allocation8 + $0x78] sm:$0xff]  }
 0x2d8   : > { %3999 = vmatprep.mubr.bf16.mxu1 %v20359_v1  ;;  %16019 = vmatpush3.bf16.msra.mxu0 %v17824_v2 }
 0x2d9   : > { %16020 = vmatprep.subr.bf16.mxu0 %v17827_v47  ;;  %15962 = vmatprep.subr.bf16.mxu1 %v17837_v20  ;;  %v17867_v47 = vld [vmem:[#allocation8 + $0x1f0] sm:$0xff]  }
 0x2da   : > { %15963 = vmatpush3.bf16.msra.mxu1 %v17838_v48 }
 0x2db   : > { %6955 = vmatmul.mubr.bf16.gmra.mrb[40].mxu0 %v15062_v51  ;;  %v7372_v51 = vshll.u32 %v20359_v1, 16  ;;  %16076 = vmatprep.subr.bf16.mxu1 %v17841_v28 }
 0x2dc   : > { %6964 = vmatprep.mubr.bf16.mxu0 %v20359_v1  ;;  %16021 = vmatpush3.bf16.msra.mxu0 %v17828_v61 }
 0x2dd   : > { %16022 = vmatprep.subr.bf16.mxu0 %v17831_v0  ;;  %v7374_v12 = vrot.slane %v7372_v51, 5 }
 0x2df   : > { %4000 = vmatmul.mubr.bf16.gmra.mrb[28].mxu1 %v14811_v46  ;;  %v7388_v46 = vshll.u32 %v20605_v59, 16  ;;  %v7375_v6 = vor.u32 %v7374_v12, %v7371_v25 }
 0x2e0   : > { %16023 = vmatpush3.bf16.msra.mxu0 %v17832_v53  ;;  %10048 = vmatprep.mubr.bf16.mxu1 %v15253_v62 }
 0x2e1   : > { %16024 = vmatprep.subr.bf16.mxu0 %v17835_v13  ;;  %v7390_v40 = vrot.slane %v7388_v46, 5  ;;  %v7376_v29 = vrot.slane %v7375_v6, 4  ;;  %v7596_v6 = vrot.slane %v7594_v52, 4 }
 0x2e3   : > { %6965 = vmatmul.mubr.bf16.gmra.mrb[44].mxu0 %v15063_v37  ;;  %v7381_v14 = vsel %vm18665_vm4, %v7376_v29, %v7374_v12  ;;  %v7391_v60 = vsel %vm18665_vm4, %v7376_v29, %v7390_v40  ;;  %v17847_v37 = vld [vmem:[#allocation8 + $0x1c8] sm:$0xff]   ;;  %v17871_v12 = vld [vmem:[#allocation8 + $0x1f8] sm:$0xff]   ;;  %v7597_v40 = vrot.slane %v20605_v59, 5 }
 0x2e4   : > { %6974 = vmatprep.mubr.bf16.mxu0 %v20359_v1  ;;  %16025 = vmatpush3.bf16.msra.mxu0 %v17836_v4  ;;  %v15268_v35 = vcombine.low %v7381_v14, %v7391_v60  ;;  %v15269_v30 = vcombine.high %v7381_v14, %v7391_v60 }
 0x2e5   : > { %16026 = vmatprep.subr.bf16.mxu0 %v17839_v15 }
 0x2e7   : > { %10049 = vmatmul.mubr.bf16.vlgmr.msra.gmra.mrb[32].mxu1 %v15252_v43 }
 0x2e8   : > { %16027 = vmatpush3.bf16.msra.mxu0 %v17840_v42  ;;  %16077 = vmatpush3.bf16.msra.mxu1 %v17842_v7  ;;  %v7560_v42 = vld [vmem:[#allocation3] sm:$0xee]  ;;  %v17872_v7 = vld [vmem:[#allocation8 + $0x1b8] sm:$0xff]  }
 0x2e9   : > { %16140 = vmatprep.subr.bf16.mxu0 %v17843_v56  ;;  %16078 = vmatprep.subr.bf16.mxu1 %v17845_v44  ;;  %v15228_v25 = vrot.slane %v7560_v42, 9 }
 0x2eb   : > { %6975 = vmatmul.mubr.bf16.gmra.mrb[48].mxu0 %v15064_v57  ;;  %v17851_v57 = vld [vmem:[#allocation8 + $0x1d0] sm:$0xff]   ;;  %v20639_v44 = vsel %vm18675_vm7, %v15228_v25, %v7594_v52 }
 0x2ec   : > { %6984 = vmatprep.mubr.bf16.mxu0 %v20359_v1  ;;  %16079 = vmatpush3.bf16.msra.mxu1 %v17846_v23 }
 0x2ed   : > { %16080 = vmatprep.subr.bf16.mxu1 %v17849_v11 }
 0x2f0   : > { %16081 = vmatpush3.bf16.msra.mxu1 %v17850_v49 }
 0x2f1   : > { %16082 = vmatprep.subr.bf16.mxu1 %v17853_v10  ;;  %v17888_v10 = vld [vmem:[#allocation8 + $0x2d0] sm:$0xff]  }
 0x2f3   : > { %6985 = vmatmul.mubr.bf16.gmra.mrb[52].mxu0 %v15065_v24  ;;  %v17860_v24 = vld [vmem:[#allocation8 + $0x1a0] sm:$0xff]  }
 0x2f4   : > { %6994 = vmatprep.mubr.bf16.mxu0 %v20359_v1  ;;  %16083 = vmatpush3.bf16.msra.mxu1 %v17854_v18 }
 0x2f5   : > { %16084 = vmatprep.subr.bf16.mxu1 %v17857_v5 }
 0x2f8   : > { %16085 = vmatpush3.bf16.msra.mxu1 %v17858_v50 }
 0x2f9   : > { %16086 = vmatprep.subr.bf16.mxu1 %v17861_v36 }
 0x2fb   : > { %6995 = vmatmul.mubr.bf16.gmra.mrb[56].mxu0 %v15066_v16  ;;  %v2715_v16 = vlaneseq }
 0x2fc   : > { %7004 = vmatprep.mubr.bf16.mxu0 %v20359_v1  ;;  %16087 = vmatpush3.bf16.msra.mxu1 %v17862_v63 }
 0x2fd   : > { %v20612_v33 = vshrl.u32 %v2715_v16, 7  ;;  %16088 = vmatprep.subr.bf16.mxu1 %v17865_v26 }
 0x2ff   : > { %v2717_v45 = vsub.s32 0, %v20612_v33  ;;  %v2721_v39 = vsub.s32 1, %v20612_v33  ;;  %v4295_v33 = vld [vmem:[#allocation3 + $0x28] sm:$0x11] }
 0x301   : > { %v20619_v2 = vrot.slane %v2713_v58, %v2717_v45  ;;  %v20621_v61 = vrot.slane %v2713_v58, %v2721_v39 }
 0x303   : > { %7005 = vmatmul.mubr.bf16.gmra.mrb[60].mxu0 %v15067_v54  ;;  %v17866_v54 = vld [vmem:[#allocation8 + $0x130] sm:$0xff]  }
 0x304   : > { %10145 = vmatprep.mubr.bf16.mxu0 %v15269_v30  ;;  %16089 = vmatpush3.bf16.msra.mxu1 %v17866_v54 }
 0x305   : > { %16090 = vmatprep.subr.bf16.mxu1 %v17869_v55 }
 0x308   : > { %16091 = vmatpush3.bf16.msra.mxu1 %v17870_v34  ;;  %v17874_v34 = vld [vmem:[#allocation8 + $0x240] sm:$0xff]  }
 0x309   : > { %16204 = vmatprep.subr.bf16.mxu1 %v17874_v34 }
 0x30b   : > { %10146 = vmatmul.mubr.bf16.vlgmr.msra.gmra.mrb[64].mxu0 %v15268_v35  ;;  %v5718_v35 = vld [vmem:[%s23575_s4] sm:$0x3] }
 0x30c   : > { %16141 = vmatpush3.bf16.msra.mxu0 %v17844_v41  ;;  %v20660_v5 = vrot.slane %v5718_v35, %v2717_v45  ;;  %v20662_v50 = vrot.slane %v5718_v35, %v2721_v39  ;;  %v17876_v35 = vld [vmem:[#allocation8 + $0x2c0] sm:$0xff]  }
 0x30d   : > { %16142 = vmatprep.subr.bf16.mxu0 %v17847_v37 }
 0x310   : > { %16143 = vmatpush3.bf16.msra.mxu0 %v17848_v8 }
 0x311   : > { %16144 = vmatprep.subr.bf16.mxu0 %v17851_v57  ;;  %v20649_v57 = vsel %vm18675_vm7, %v7596_v6, %v7597_v40 }
 0x312   : > { %v15284_v45 = vcombine.low %v20639_v44, %v20649_v57 }
 0x314   : > { %16145 = vmatpush3.bf16.msra.mxu0 %v17852_v31 }
 0x315   : > { %16146 = vmatprep.subr.bf16.mxu0 %v17855_v9 }
 0x318   : > { %16147 = vmatpush3.bf16.msra.mxu0 %v17856_v22 }
 0x319   : > { %16148 = vmatprep.subr.bf16.mxu0 %v17859_v21 }
 0x31c   : > { %16149 = vmatpush3.bf16.msra.mxu0 %v17860_v24 }
 0x31d   : > { %16150 = vmatprep.subr.bf16.mxu0 %v17863_v32 }
 0x320   : > { %16151 = vmatpush3.bf16.msra.mxu0 %v17864_v38 }
 0x321   : > { %16152 = vmatprep.subr.bf16.mxu0 %v17867_v47 }
 0x324   : > { %16153 = vmatpush3.bf16.msra.mxu0 %v17868_v19 }
 0x325   : > { %16154 = vmatprep.subr.bf16.mxu0 %v17871_v12 }
 0x328   : > { %16155 = vmatpush3.bf16.msra.mxu0 %v17872_v7 }
 0x329   : > { %16268 = vmatprep.subr.bf16.mxu0 %v17876_v35 }
 0x37a   : > { %v3931_v0 = vpop.f32.mrb[0].mxu1 }
 0x37b   : > { %v17138_v53 = vadd.f32 %v3931_v0, %v20619_v2  ;;  %v3933_v27 = vpop.f32.mrb[1].mxu1 }
 0x37c   : > { %v17139_v13 = vadd.f32 %v3933_v27, %v20621_v61  ;;  %v3935_v4 = vpop.f32.mrb[2].mxu1  ;;  %v15285_v27 = vcombine.high %v20639_v44, %v20649_v57 }
 0x37d   : > { %v4010_v20 = vmax.f32 %v17138_v53, 0.0  ;;  %v17140_v48 = vadd.f32 %v3935_v4, %v20619_v2  ;;  %v3937_v62 = vpop.f32.mrb[3].mxu1 }
 0x37e   : > { %v4011_v43 = vmax.f32 %v17139_v13, 0.0  ;;  %v17141_v15 = vadd.f32 %v3937_v62, %v20621_v61 }
 0x37f   : > { %v4012_v51 = vmax.f32 %v17140_v48, 0.0 }
 0x380   : > { %v15896_v28 = vpack.c.bf16 %v4011_v43, %v4010_v20  ;;  %v4013_v46 = vmax.f32 %v17141_v15, 0.0 }
 0x382   : > { %v4123_v56 = vshrl.u32 %v15896_v28, 16  ;;  %v15897_v14 = vpack.c.bf16 %v4013_v46, %v4012_v51  ;;  %v3941_v60 = vpop.f32.mrb[4].mxu1  ;;  %v4126_v30 = vshll.u32 %v15896_v28, 16 }
 0x383   : > { %v17142_v41 = vadd.f32 %v3941_v60, %v20619_v2  ;;  %v3943_v59 = vpop.f32.mrb[5].mxu1 }
 0x384   : > { %v4125_v23 = vrot.slane %v4123_v56, 7  ;;  %v4131_v37 = vshrl.u32 %v15897_v14, 16  ;;  %v17143_v11 = vadd.f32 %v3943_v59, %v20621_v61  ;;  %v3945_v49 = vpop.f32.mrb[6].mxu1  ;;  %v4134_v36 = vshll.u32 %v15897_v14, 16 }
 0x385   : > { %v4014_v18 = vmax.f32 %v17142_v41, 0.0  ;;  %v17144_v9 = vadd.f32 %v3945_v49, %v20619_v2  ;;  %v3947_v22 = vpop.f32.mrb[7].mxu1 }
 0x386   : > { %v4128_v21 = vor.u32 %v4126_v30, %v4125_v23  ;;  %v4133_v24 = vrot.slane %v4131_v37, 7  ;;  %v4015_v63 = vmax.f32 %v17143_v11, 0.0  ;;  %v4129_v16 = vrot.slane %v4125_v23, 4 }
 0x387   : > { %v4016_v26 = vmax.f32 %v17144_v9, 0.0  ;;  %v17145_v54 = vadd.f32 %v3947_v22, %v20621_v61 }
 0x388   : > { %v4288_v58 = vsel %vm20655_vm8, %v4128_v21, %v20359_v1  ;;  %v4136_v39 = vor.u32 %v4134_v36, %v4133_v24  ;;  %v4138_v47 = vrot.slane %v4133_v24, 4  ;;  %v15898_v19 = vpack.c.bf16 %v4015_v63, %v4014_v18  ;;  %v4302_v18 = vld [vmem:[#allocation3 + $0x40] sm:$0x11] }
 0x389   : > { %4289 = vst [vmem:[#allocation3 + $0x18] sm:$0xff] %v4288_v58  ;;  %v4017_v55 = vmax.f32 %v17145_v54, 0.0  ;;  %v7393_v0 = vshrl.u32 %v4288_v58, 16  ;;  %v7396_v53 = vshll.u32 %v4288_v58, 16 }
 0x38a   : > { %v20682_v4 = vsel %vm18704_vm14, %v4129_v16, %v4136_v39  ;;  %v4296_v20 = vsel %vm20668_vm9, %v4138_v47, %v4295_v33  ;;  %v4140_v48 = vshrl.u32 %v15898_v19, 16  ;;  %v4143_v62 = vshll.u32 %v15898_v19, 16  ;;  %v3951_v43 = vpop.f32.mrb[8].mxu1 }
 0x38b   : > { %4290 = vst [vmem:[#allocation3 + $0x20] sm:$0xff] %v20682_v4  ;;  %4297 = vst [vmem:[#allocation3 + $0x28] sm:$0x11] %v4296_v20  ;;  %v15899_v15 = vpack.c.bf16 %v4017_v55, %v4016_v26  ;;  %v17146_v42 = vadd.f32 %v3951_v43, %v20619_v2  ;;  %v3953_v52 = vpop.f32.mrb[9].mxu1  ;;  %v15255_v51 = vcombine.high %v4288_v58, %v20682_v4  ;;  %v7395_v6 = vrot.slane %v7393_v0, 4 }
 0x38c   : > { %v15254_v25 = vcombine.low %v4288_v58, %v20682_v4  ;;  %v4142_v12 = vrot.slane %v4140_v48, 7  ;;  %v17147_v28 = vadd.f32 %v3953_v52, %v20621_v61  ;;  %v3955_v46 = vpop.f32.mrb[10].mxu1  ;;  %v7398_v40 = vrot.slane %v7396_v53, 5 }
 0x38d   : > { %v4148_v7 = vshrl.u32 %v15899_v15, 16  ;;  %v4151_v56 = vshll.u32 %v15899_v15, 16  ;;  %v4018_v29 = vmax.f32 %v17146_v42, 0.0  ;;  %v17148_v14 = vadd.f32 %v3955_v46, %v20619_v2  ;;  %v3957_v60 = vpop.f32.mrb[11].mxu1  ;;  %10056 = vmatprep.mubr.bf16.mxu1 %v15255_v51  ;;  %v4309_v46 = vld [vmem:[#allocation3 + $0x58] sm:$0x11] }
 0x38e   : > { %v4145_v30 = vor.u32 %v4143_v62, %v4142_v12  ;;  %v4146_v41 = vrot.slane %v4142_v12, 4  ;;  %v4019_v59 = vmax.f32 %v17147_v28, 0.0  ;;  %v17149_v23 = vadd.f32 %v3957_v60, %v20621_v61  ;;  %10057 = vmatmul.mubr.bf16.gmra.mrb[36].mxu1 %v15254_v25 }
 0x38f   : > { %v4150_v37 = vrot.slane %v4148_v7, 7  ;;  %v4020_v8 = vmax.f32 %v17148_v14, 0.0  ;;  %v7399_v11 = vor.u32 %v7398_v40, %v7395_v6  ;;  %v7402_v49 = vshll.u32 %v20682_v4, 16 }
 0x390   : > { %v20697_v31 = vsel %vm20655_vm8, %v4145_v30, %v20359_v1  ;;  %v15900_v9 = vpack.c.bf16 %v4019_v59, %v4018_v29  ;;  %v4021_v22 = vmax.f32 %v17149_v23, 0.0  ;;  %v7406_v21 = vshrl.u32 %v20682_v4, 16  ;;  %v20722_v29 = vld [vmem:[#allocation3] sm:$0xff] }
 0x391   : > { %4300 = vst [vmem:[#allocation3 + $0x30] sm:$0xff] %v20697_v31  ;;  %v4153_v24 = vor.u32 %v4151_v56, %v4150_v37  ;;  %v4155_v36 = vrot.slane %v4150_v37, 4  ;;  %v7417_v63 = vshrl.u32 %v20697_v31, 16  ;;  %v7420_v16 = vshll.u32 %v20697_v31, 16 }
 0x392   : > { %v4157_v32 = vshrl.u32 %v15900_v9, 16  ;;  %v4160_v33 = vshll.u32 %v15900_v9, 16  ;;  %v15901_v26 = vpack.c.bf16 %v4021_v22, %v4020_v8  ;;  %v3961_v54 = vpop.f32.mrb[12].mxu1  ;;  %v7400_v58 = vrot.slane %v7399_v11, 4  ;;  %v7361_v28 = vld [vmem:[#allocation3 + $0x28] sm:$0x11] }
 0x393   : > { %v20705_v1 = vsel %vm18704_vm14, %v4146_v41, %v4153_v24  ;;  %v4303_v39 = vsel %vm20668_vm9, %v4155_v36, %v4302_v18  ;;  %v17150_v47 = vadd.f32 %v3961_v54, %v20619_v2  ;;  %v3963_v19 = vpop.f32.mrb[13].mxu1  ;;  %v7404_v55 = vrot.slane %v7402_v49, 5 }
 0x394   : > { %4301 = vst [vmem:[#allocation3 + $0x38] sm:$0xff] %v20705_v1  ;;  %4304 = vst [vmem:[#allocation3 + $0x40] sm:$0x11] %v4303_v39  ;;  %v4159_v0 = vrot.slane %v4157_v32, 7  ;;  %v4165_v53 = vshrl.u32 %v15901_v26, 16  ;;  %v4168_v34 = vshll.u32 %v15901_v26, 16  ;;  %v17151_v4 = vadd.f32 %v3963_v19, %v20621_v61 }
 0x395   : > { %v3965_v20 = vpop.f32.mrb[14].mxu1  ;;  %v4022_v48 = vmax.f32 %v17150_v47, 0.0  ;;  %v15257_v15 = vcombine.high %v20697_v31, %v20705_v1  ;;  %v15256_v42 = vcombine.low %v20697_v31, %v20705_v1  ;;  %v20720_v7 = vsel %vm18665_vm4, %v7400_v58, %v7404_v55 }
 0x396   : > { %v17152_v62 = vadd.f32 %v3965_v20, %v20619_v2  ;;  %v3967_v43 = vpop.f32.mrb[15].mxu1  ;;  %v4162_v52 = vor.u32 %v4160_v33, %v4159_v0  ;;  %v4163_v51 = vrot.slane %v4159_v0, 4  ;;  %v4167_v25 = vrot.slane %v4165_v53, 7 }
 0x397   : > { %v4023_v12 = vmax.f32 %v17151_v4, 0.0  ;;  %v17153_v40 = vadd.f32 %v3967_v43, %v20621_v61  ;;  %10064 = vmatprep.mubr.bf16.mxu1 %v15257_v15  ;;  %v7408_v56 = vrot.slane %v7406_v21, 4  ;;  %v7412_v23 = vshll.u32 %v7361_v28, 16 }
 0x398   : > { %v4024_v6 = vmax.f32 %v17152_v62, 0.0  ;;  %v20727_v14 = vsel %vm20655_vm8, %v4162_v52, %v20722_v29  ;;  %v4170_v60 = vor.u32 %v4168_v34, %v4167_v25  ;;  %v4172_v35 = vrot.slane %v4167_v25, 4  ;;  %10065 = vmatmul.mubr.bf16.gmra.mrb[40].mxu1 %v15256_v42 }
 0x399   : > { %v15902_v30 = vpack.c.bf16 %v4023_v12, %v4022_v48  ;;  %4307 = vst [vmem:[#allocation3 + $0x48] sm:$0xff] %v20727_v14  ;;  %v4025_v41 = vmax.f32 %v17153_v40, 0.0  ;;  %v7409_v59 = vor.u32 %v7408_v56, %v7404_v55  ;;  %v7441_v37 = vshrl.u32 %v20727_v14, 16  ;;  %v4316_v12 = vld [vmem:[#allocation3 + $0x70] sm:$0x11] }
 0x39a   : > { %v20733_v8 = vsel %vm18704_vm14, %v4163_v51, %v4170_v60  ;;  %v4310_v11 = vsel %vm20668_vm9, %v4172_v35, %v4309_v46  ;;  %v3971_v9 = vpop.f32.mrb[16].mxu1  ;;  %v7414_v32 = vrot.slane %v7412_v23, 5  ;;  %v7444_v58 = vshll.u32 %v20727_v14, 16 }
 0x39b   : > { %v4174_v49 = vshrl.u32 %v15902_v30, 16  ;;  %v4177_v18 = vshll.u32 %v15902_v30, 16  ;;  %4308 = vst [vmem:[#allocation3 + $0x50] sm:$0xff] %v20733_v8  ;;  %4311 = vst [vmem:[#allocation3 + $0x58] sm:$0x11] %v4310_v11  ;;  %v15903_v22 = vpack.c.bf16 %v4025_v41, %v4024_v6  ;;  %v17154_v21 = vadd.f32 %v3971_v9, %v20619_v2  ;;  %v3973_v24 = vpop.f32.mrb[17].mxu1 }
 0x39c   : > { %v7410_v36 = vrot.slane %v7409_v59, 4  ;;  %v17155_v26 = vadd.f32 %v3973_v24, %v20621_v61  ;;  %v3975_v54 = vpop.f32.mrb[18].mxu1  ;;  %v15259_v39 = vcombine.high %v20727_v14, %v20733_v8 }
 0x39d   : > { %v4176_v33 = vrot.slane %v4174_v49, 7  ;;  %v4182_v47 = vshrl.u32 %v15903_v22, 16  ;;  %v4185_v19 = vshll.u32 %v15903_v22, 16  ;;  %v4026_v55 = vmax.f32 %v17154_v21, 0.0  ;;  %v3977_v53 = vpop.f32.mrb[19].mxu1 }
 0x39e   : > { %v17156_v0 = vadd.f32 %v3975_v54, %v20619_v2  ;;  %v6936_v20 = vpop.f32.mrb[32].mxu0  ;;  %v4027_v48 = vmax.f32 %v17155_v26, 0.0  ;;  %v17157_v62 = vadd.f32 %v3977_v53, %v20621_v61  ;;  %10072 = vmatprep.mubr.bf16.mxu1 %v15259_v39  ;;  %v7415_v51 = vsel %vm18665_vm4, %v7410_v36, %v7414_v32 }
 0x39f   : > { %v4179_v34 = vor.u32 %v4177_v18, %v4176_v33  ;;  %v4180_v4 = vrot.slane %v4176_v33, 4  ;;  %v4184_v43 = vrot.slane %v4182_v47, 7  ;;  %v17170_v15 = vadd.f32 %v6936_v20, %v20660_v5  ;;  %v6938_v42 = vpop.f32.mrb[33].mxu0 }
 0x3a0   : > { %v4028_v52 = vmax.f32 %v17156_v0, 0.0  ;;  %v15904_v28 = vpack.c.bf16 %v4027_v48, %v4026_v55  ;;  %v17171_v46 = vadd.f32 %v6938_v42, %v20662_v50  ;;  %v6940_v6 = vpop.f32.mrb[34].mxu0  ;;  %v4029_v40 = vmax.f32 %v17157_v62, 0.0 }
 0x3a1   : > { %v20751_v25 = vsel %vm20655_vm8, %v4179_v34, %v20722_v29  ;;  %v4187_v56 = vor.u32 %v4185_v19, %v4184_v43  ;;  %v4189_v60 = vrot.slane %v4184_v43, 4  ;;  %v7015_v35 = vmax.f32 %v17170_v15, 0.0  ;;  %v6942_v41 = vpop.f32.mrb[35].mxu0 }
 0x3a2   : > { %4314 = vst [vmem:[#allocation3 + $0x60] sm:$0xff] %v20751_v25  ;;  %v17172_v30 = vadd.f32 %v6940_v6, %v20660_v5  ;;  %v4191_v59 = vshrl.u32 %v15904_v28, 16  ;;  %v4194_v23 = vshll.u32 %v15904_v28, 16  ;;  %v7016_v11 = vmax.f32 %v17171_v46, 0.0  ;;  %v3981_v18 = vpop.f32.mrb[20].mxu1 }
 0x3a3   : > { %v15905_v49 = vpack.c.bf16 %v4029_v40, %v4028_v52  ;;  %v20758_v9 = vsel %vm18704_vm14, %v4180_v4, %v4187_v56  ;;  %v4317_v22 = vsel %vm20668_vm9, %v4189_v60, %v4316_v12  ;;  %v17173_v24 = vadd.f32 %v6942_v41, %v20662_v50  ;;  %v3983_v36 = vpop.f32.mrb[21].mxu1 }
 0x3a4   : > { %v7017_v21 = vmax.f32 %v17172_v30, 0.0  ;;  %4315 = vst [vmem:[#allocation3 + $0x68] sm:$0xff] %v20758_v9  ;;  %4318 = vst [vmem:[#allocation3 + $0x70] sm:$0x11] %v4317_v22  ;;  %v4193_v32 = vrot.slane %v4191_v59, 7  ;;  %v15912_v33 = vpack.c.bf16 %v7016_v11, %v7015_v35  ;;  %v3985_v39 = vpop.f32.mrb[22].mxu1  ;;  %v15271_v19 = vcombine.high %v20720_v7, %v7415_v51 }
 0x3a5   : > { %v4199_v26 = vshrl.u32 %v15905_v49, 16  ;;  %v4202_v54 = vshll.u32 %v15905_v49, 16  ;;  %v7018_v47 = vmax.f32 %v17173_v24, 0.0  ;;  %v15270_v55 = vcombine.low %v20720_v7, %v7415_v51  ;;  %v3987_v53 = vpop.f32.mrb[23].mxu1  ;;  %v4323_v51 = vld [vmem:[#allocation3 + $0x88] sm:$0x11] }
 0x3a6   : > { %v17158_v0 = vadd.f32 %v3981_v18, %v20619_v2  ;;  %v4196_v34 = vor.u32 %v4194_v23, %v4193_v32  ;;  %v4197_v4 = vrot.slane %v4193_v32, 4  ;;  %v7128_v20 = vshrl.u32 %v15912_v33, 16  ;;  %v6946_v62 = vpop.f32.mrb[36].mxu0  ;;  %10153 = vmatprep.mubr.bf16.mxu0 %v15271_v19 }
 0x3a7   : > { %v7131_v48 = vshll.u32 %v15912_v33, 16  ;;  %v4201_v43 = vrot.slane %v4199_v26, 7  ;;  %v15913_v15 = vpack.c.bf16 %v7018_v47, %v7017_v21  ;;  %v17174_v52 = vadd.f32 %v6946_v62, %v20660_v5  ;;  %v6948_v12 = vpop.f32.mrb[37].mxu0  ;;  %10154 = vmatmul.mubr.bf16.gmra.mrb[68].mxu0 %v15270_v55  ;;  %v7292_v26 = vld [vmem:[#allocation3 + $0xe8] sm:$0x11] }
 0x3a8   : > { %v4030_v42 = vmax.f32 %v17158_v0, 0.0  ;;  %v20771_v28 = vsel %vm20655_vm8, %v4196_v34, %v20722_v29  ;;  %v7130_v7 = vrot.slane %v7128_v20, 7  ;;  %v17159_v46 = vadd.f32 %v3983_v36, %v20621_v61  ;;  %v6950_v40 = vpop.f32.mrb[38].mxu0 }
 0x3a9   : > { %v17175_v6 = vadd.f32 %v6948_v12, %v20662_v50  ;;  %4321 = vst [vmem:[#allocation3 + $0x78] sm:$0xff] %v20771_v28  ;;  %v4204_v56 = vor.u32 %v4202_v54, %v4201_v43  ;;  %v4206_v60 = vrot.slane %v4201_v43, 4  ;;  %v7136_v35 = vshrl.u32 %v15913_v15, 16  ;;  %v6952_v41 = vpop.f32.mrb[39].mxu0 }
 0x3aa   : > { %v7139_v30 = vshll.u32 %v15913_v15, 16  ;;  %v7133_v59 = vor.u32 %v7131_v48, %v7130_v7  ;;  %v7134_v23 = vrot.slane %v7130_v7, 4  ;;  %v7019_v11 = vmax.f32 %v17174_v52, 0.0  ;;  %v20776_v18 = vpop.f32.mrb[24].mxu1 }
 0x3ab   : > { %v4031_v49 = vmax.f32 %v17159_v46, 0.0  ;;  %v20780_v22 = vsel %vm18704_vm14, %v4197_v4, %v4204_v56  ;;  %v4324_v21 = vsel %vm20668_vm9, %v4206_v60, %v4323_v51  ;;  %v7138_v24 = vrot.slane %v7136_v35, 7  ;;  %v20784_v32 = vpop.f32.mrb[25].mxu1 }
 0x3ac   : > { %v7020_v36 = vmax.f32 %v17175_v6, 0.0  ;;  %v7289_v33 = vsel %vm20655_vm8, %v7133_v59, %v20722_v29  ;;  %4322 = vst [vmem:[#allocation3 + $0x80] sm:$0xff] %v20780_v22  ;;  %4325 = vst [vmem:[#allocation3 + $0x88] sm:$0x11] %v4324_v21  ;;  %v17160_v47 = vadd.f32 %v3985_v39, %v20619_v2  ;;  %v17176_v19 = vadd.f32 %v6950_v40, %v20660_v5  ;;  %v20792_v55 = vpop.f32.mrb[26].mxu1 }
 0x3ad   : > { %v15906_v54 = vpack.c.bf16 %v4031_v49, %v4030_v42  ;;  %7290 = vst [vmem:[#allocation3 + $0xd8] sm:$0xff] %v7289_v33  ;;  %v7141_v0 = vor.u32 %v7139_v30, %v7138_v24  ;;  %v7143_v34 = vrot.slane %v7138_v24, 4  ;;  %v17161_v20 = vadd.f32 %v3987_v53, %v20621_v61  ;;  %v20795_v48 = vpop.f32.mrb[27].mxu1 }
 0x3ae   : > { %v15914_v4 = vpack.c.bf16 %v7020_v36, %v7019_v11  ;;  %v4032_v15 = vmax.f32 %v17160_v47, 0.0  ;;  %v7021_v52 = vmax.f32 %v17176_v19, 0.0  ;;  %v6956_v12 = vpop.f32.mrb[40].mxu0  ;;  %v17177_v40 = vadd.f32 %v6952_v41, %v20662_v50  ;;  %v20815_v36 = vld [vmem:[#allocation3 + $0x40] sm:$0x11] }
 0x3af   : > { %v4208_v62 = vshrl.u32 %v15906_v54, 16  ;;  %v4211_v43 = vshll.u32 %v15906_v54, 16  ;;  %v7142_v39 = vsel %vm18704_vm14, %v7134_v23, %v7141_v0  ;;  %v7293_v42 = vsel %vm20668_vm9, %v7143_v34, %v7292_v26  ;;  %v6958_v46 = vpop.f32.mrb[41].mxu0 }
 0x3b0   : > { %v7145_v7 = vshrl.u32 %v15914_v4, 16  ;;  %v7148_v51 = vshll.u32 %v15914_v4, 16  ;;  %7291 = vst [vmem:[#allocation3 + $0xe0] sm:$0xff] %v7142_v39  ;;  %7294 = vst [vmem:[#allocation3 + $0xe8] sm:$0x11] %v7293_v42  ;;  %v4033_v53 = vmax.f32 %v17161_v20, 0.0  ;;  %v15258_v56 = vcombine.low %v20727_v14, %v20733_v8 }
 0x3b1   : > { %v4210_v6 = vrot.slane %v4208_v62, 7  ;;  %v20804_v60 = vpop.f32.mrb[42].mxu0  ;;  %v7419_v30 = vrot.slane %v7417_v63, 4  ;;  %v7422_v59 = vrot.slane %v7420_v16, 5  ;;  %v7426_v23 = vshll.u32 %v20705_v1, 16 }
 0x3b2   : > { %v20806_v35 = vrot.slane %v7145_v7, 7  ;;  %v20813_v11 = vpop.f32.mrb[43].mxu0  ;;  %v15907_v41 = vpack.c.bf16 %v4033_v53, %v4032_v15  ;;  %v7022_v24 = vmax.f32 %v17177_v40, 0.0  ;;  %10073 = vmatmul.mubr.bf16.gmra.mrb[44].mxu1 %v15258_v56  ;;  %v20817_v33 = vpop.f32.mrb[28].mxu1  ;;  %v7436_v15 = vshll.u32 %v20815_v36, 16 }
 0x3b3   : > { %v4213_v49 = vor.u32 %v4211_v43, %v4210_v6  ;;  %v4214_v21 = vrot.slane %v4210_v6, 4  ;;  %v7423_v54 = vor.u32 %v7422_v59, %v7419_v30  ;;  %v7428_v31 = vrot.slane %v7426_v23, 5  ;;  %v20821_v16 = vpop.f32.mrb[29].mxu1  ;;  %v4330_v53 = vld [vmem:[#allocation3 + $0xa0] sm:$0x11] }
 0x3b4   : > { %v7150_v26 = vor.u32 %v7148_v51, %v20806_v35  ;;  %v7151_v63 = vrot.slane %v20806_v35, 4  ;;  %v4216_v19 = vshrl.u32 %v15907_v41, 16  ;;  %v4219_v0 = vshll.u32 %v15907_v41, 16  ;;  %v20828_v4 = vpop.f32.mrb[30].mxu1 }
 0x3b5   : > { %v20826_v47 = vsel %vm20655_vm8, %v4213_v49, %v20722_v29  ;;  %v15915_v34 = vpack.c.bf16 %v7022_v24, %v7021_v52  ;;  %v7424_v62 = vrot.slane %v7423_v54, 4  ;;  %v7430_v43 = vshrl.u32 %v20705_v1, 16  ;;  %v20836_v39 = vpop.f32.mrb[31].mxu1 }
 0x3b6   : > { %4328 = vst [vmem:[#allocation3 + $0x90] sm:$0xff] %v20826_v47  ;;  %v7296_v20 = vsel %vm20655_vm8, %v7150_v26, %v20722_v29  ;;  %v4218_v42 = vrot.slane %v4216_v19, 7  ;;  %v17162_v52 = vadd.f32 %v20776_v18, %v20619_v2  ;;  %v20840_v6 = vpop.f32.mrb[44].mxu0  ;;  %v7438_v35 = vrot.slane %v7436_v15, 5  ;;  %v7299_v26 = vld [vmem:[#allocation3 + $0x100] sm:$0x11] }
 0x3b7   : > { %7297 = vst [vmem:[#allocation3 + $0xf0] sm:$0xff] %v7296_v20  ;;  %v7153_v7 = vshrl.u32 %v15915_v34, 16  ;;  %v7156_v51 = vshll.u32 %v15915_v34, 16  ;;  %v7429_v40 = vsel %vm18665_vm4, %v7424_v62, %v7428_v31  ;;  %v7432_v56 = vrot.slane %v7430_v43, 4  ;;  %v20845_v30 = vpop.f32.mrb[45].mxu0 }
 0x3b8   : > { %v17178_v1 = vadd.f32 %v6956_v12, %v20660_v5  ;;  %v4221_v59 = vor.u32 %v4219_v0, %v4218_v42  ;;  %v4223_v23 = vrot.slane %v4218_v42, 4  ;;  %v4034_v41 = vmax.f32 %v17162_v52, 0.0  ;;  %v20847_v24 = vpop.f32.mrb[46].mxu0 }
 0x3b9   : > { %v7155_v49 = vrot.slane %v7153_v7, 7  ;;  %v7433_v18 = vor.u32 %v7432_v56, %v7428_v31  ;;  %v17163_v19 = vadd.f32 %v20784_v32, %v20621_v61  ;;  %v17179_v34 = vadd.f32 %v6958_v46, %v20662_v50  ;;  %v20852_v20 = vpop.f32.mrb[47].mxu0 }
 0x3ba   : > { %v7023_v54 = vmax.f32 %v17178_v1, 0.0  ;;  %v20856_v12 = vsel %vm18704_vm14, %v4214_v21, %v4221_v59  ;;  %v4331_v0 = vsel %vm20668_vm9, %v4223_v23, %v4330_v53  ;;  %v17164_v32 = vadd.f32 %v20792_v55, %v20619_v2 }
 0x3bb   : > { %v7158_v62 = vor.u32 %v7156_v51, %v7155_v49  ;;  %v7160_v43 = vrot.slane %v7155_v49, 4  ;;  %4329 = vst [vmem:[#allocation3 + $0x98] sm:$0xff] %v20856_v12  ;;  %4332 = vst [vmem:[#allocation3 + $0xa0] sm:$0x11] %v4331_v0  ;;  %v7434_v31 = vrot.slane %v7433_v18, 4  ;;  %v4035_v15 = vmax.f32 %v17163_v19, 0.0 }
 0x3bc   : > { %v7024_v42 = vmax.f32 %v17179_v34, 0.0  ;;  %v17180_v7 = vadd.f32 %v20804_v60, %v20660_v5  ;;  %v17165_v51 = vadd.f32 %v20795_v48, %v20621_v61  ;;  %v4036_v55 = vmax.f32 %v17164_v32, 0.0 }
 0x3bd   : > { %v7159_v46 = vsel %vm18704_vm14, %v7151_v63, %v7158_v62  ;;  %v7300_v21 = vsel %vm20668_vm9, %v7160_v43, %v7299_v26  ;;  %v7439_v52 = vsel %vm18665_vm4, %v7434_v31, %v7438_v35  ;;  %v15908_v53 = vpack.c.bf16 %v4035_v15, %v4034_v41 }
 0x3be   : > { %7298 = vst [vmem:[#allocation3 + $0xf8] sm:$0xff] %v7159_v46  ;;  %7301 = vst [vmem:[#allocation3 + $0x100] sm:$0x11] %v7300_v21  ;;  %v15916_v56 = vpack.c.bf16 %v7024_v42, %v7023_v54  ;;  %v15273_v1 = vcombine.high %v7429_v40, %v7439_v52  ;;  %v15272_v59 = vcombine.low %v7429_v40, %v7439_v52  ;;  %v7025_v63 = vmax.f32 %v17180_v7, 0.0  ;;  %v20873_v49 = vpop.f32.mrb[48].mxu0 }
 0x3bf   : > { %v4037_v23 = vmax.f32 %v17165_v51, 0.0  ;;  %v4225_v26 = vshrl.u32 %v15908_v53, 16  ;;  %v4228_v18 = vshll.u32 %v15908_v53, 16  ;;  %v20875_v34 = vpop.f32.mrb[49].mxu0  ;;  %v17181_v35 = vadd.f32 %v20813_v11, %v20662_v50  ;;  %v20889_v46 = vld [vmem:[#allocation3 + $0x58] sm:$0x11] }
 0x3c0   : > { %v7162_v60 = vshrl.u32 %v15916_v56, 16  ;;  %v7165_v19 = vshll.u32 %v15916_v56, 16  ;;  %10161 = vmatprep.mubr.bf16.mxu0 %v15273_v1  ;;  %v7465_v41 = vshrl.u32 %v20751_v25, 16  ;;  %v7468_v54 = vshll.u32 %v20751_v25, 16  ;;  %v20881_v40 = vpop.f32.mrb[50].mxu0 }
 0x3c1   : > { %v15909_v48 = vpack.c.bf16 %v4037_v23, %v4036_v55  ;;  %10162 = vmatmul.mubr.bf16.gmra.mrb[72].mxu0 %v15272_v59  ;;  %v4227_v0 = vrot.slane %v4225_v26, 7  ;;  %v15261_v43 = vcombine.high %v20751_v25, %v20758_v9  ;;  %v15260_v31 = vcombine.low %v20751_v25, %v20758_v9  ;;  %v20887_v15 = vpop.f32.mrb[51].mxu0  ;;  %v4337_v26 = vld [vmem:[#allocation3 + $0xb8] sm:$0x11] }
 0x3c2   : > { %v7164_v62 = vrot.slane %v7162_v60, 7  ;;  %v7026_v11 = vmax.f32 %v17181_v35, 0.0  ;;  %v7443_v21 = vrot.slane %v7441_v37, 4  ;;  %v7446_v1 = vrot.slane %v7444_v58, 5 }
 0x3c3   : > { %v4233_v42 = vshrl.u32 %v15909_v48, 16  ;;  %v4236_v32 = vshll.u32 %v15909_v48, 16  ;;  %v4230_v7 = vor.u32 %v4228_v18, %v4227_v0  ;;  %v4231_v51 = vrot.slane %v4227_v0, 4  ;;  %10080 = vmatprep.mubr.bf16.mxu1 %v15261_v43 }
 0x3c4   : > { %v7167_v52 = vor.u32 %v7165_v19, %v7164_v62  ;;  %v7168_v53 = vrot.slane %v7164_v62, 4  ;;  %v15917_v55 = vpack.c.bf16 %v7026_v11, %v7025_v63  ;;  %10081 = vmatmul.mubr.bf16.gmra.mrb[48].mxu1 %v15260_v31  ;;  %v7450_v59 = vshll.u32 %v20733_v8, 16 }
 0x3c5   : > { %v4235_v56 = vrot.slane %v4233_v42, 7  ;;  %v20899_v23 = vsel %vm20655_vm8, %v4230_v7, %v20722_v29  ;;  %v7454_v18 = vshrl.u32 %v20733_v8, 16  ;;  %v7460_v63 = vshll.u32 %v20889_v46, 16 }
 0x3c6   : > { %v7303_v37 = vsel %vm20655_vm8, %v7167_v52, %v20722_v29  ;;  %4335 = vst [vmem:[#allocation3 + $0xa8] sm:$0xff] %v20899_v23  ;;  %v7170_v60 = vshrl.u32 %v15917_v55, 16  ;;  %v7173_v19 = vshll.u32 %v15917_v55, 16  ;;  %v20907_v48 = vpop.f32.mrb[52].mxu0  ;;  %v7447_v35 = vor.u32 %v7446_v1, %v7443_v21  ;;  %v7306_v21 = vld [vmem:[#allocation3 + $0x118] sm:$0x11] }
 0x3c7   : > { %7304 = vst [vmem:[#allocation3 + $0x108] sm:$0xff] %v7303_v37  ;;  %v4238_v14 = vor.u32 %v4236_v32, %v4235_v56  ;;  %v4240_v58 = vrot.slane %v4235_v56, 4  ;;  %v7452_v0 = vrot.slane %v7450_v59, 5  ;;  %v7456_v62 = vrot.slane %v7454_v18, 4  ;;  %v20909_v31 = vpop.f32.mrb[53].mxu0 }
 0x3c8   : > { %v7462_v43 = vrot.slane %v7460_v63, 5  ;;  %v7172_v11 = vrot.slane %v7170_v60, 7  ;;  %v17166_v32 = vadd.f32 %v20817_v33, %v20619_v2  ;;  %v20919_v7 = vpop.f32.mrb[54].mxu0  ;;  %v7448_v52 = vrot.slane %v7447_v35, 4 }
 0x3c9   : > { %v20913_v8 = vsel %vm18704_vm14, %v4231_v51, %v4238_v14  ;;  %v4338_v42 = vsel %vm20668_vm9, %v4240_v58, %v4337_v26  ;;  %v7457_v56 = vor.u32 %v7456_v62, %v7452_v0  ;;  %v17182_v55 = vadd.f32 %v20840_v6, %v20660_v5  ;;  %v20926_v1 = vpop.f32.mrb[55].mxu0 }
 0x3ca   : > { %4336 = vst [vmem:[#allocation3 + $0xb0] sm:$0xff] %v20913_v8  ;;  %4339 = vst [vmem:[#allocation3 + $0xb8] sm:$0x11] %v4338_v42  ;;  %v17167_v51 = vadd.f32 %v20821_v16, %v20621_v61  ;;  %v7175_v59 = vor.u32 %v7173_v19, %v7172_v11  ;;  %v7177_v37 = vrot.slane %v7172_v11, 4  ;;  %v4038_v26 = vmax.f32 %v17166_v32, 0.0 }
 0x3cb   : > { %v17183_v33 = vadd.f32 %v20845_v30, %v20662_v50  ;;  %v7453_v18 = vsel %vm18665_vm4, %v7448_v52, %v7452_v0  ;;  %v7458_v63 = vrot.slane %v7457_v56, 4  ;;  %v7027_v14 = vmax.f32 %v17182_v55, 0.0 }
 0x3cc   : > { %v4039_v58 = vmax.f32 %v17167_v51, 0.0  ;;  %v7176_v6 = vsel %vm18704_vm14, %v7168_v53, %v7175_v59  ;;  %v7307_v16 = vsel %vm20668_vm9, %v7177_v37, %v7306_v21  ;;  %v17168_v19 = vadd.f32 %v20828_v4, %v20619_v2 }
 0x3cd   : > { %v7028_v60 = vmax.f32 %v17183_v33, 0.0  ;;  %7305 = vst [vmem:[#allocation3 + $0x110] sm:$0xff] %v7176_v6  ;;  %7308 = vst [vmem:[#allocation3 + $0x118] sm:$0x11] %v7307_v16  ;;  %v7463_v30 = vsel %vm18665_vm4, %v7458_v63, %v7462_v43  ;;  %v17184_v0 = vadd.f32 %v20847_v24, %v20660_v5  ;;  %v17169_v62 = vadd.f32 %v20836_v39, %v20621_v61 }
 0x3ce   : > { %v15910_v35 = vpack.c.bf16 %v4039_v58, %v4038_v26  ;;  %v15275_v53 = vcombine.high %v7453_v18, %v7463_v30  ;;  %v15274_v42 = vcombine.low %v7453_v18, %v7463_v30  ;;  %v4040_v32 = vmax.f32 %v17168_v19, 0.0  ;;  %v20944_v21 = vpop.f32.mrb[56].mxu0 }
 0x3cf   : > { %v15918_v11 = vpack.c.bf16 %v7028_v60, %v7027_v14  ;;  %v7029_v4 = vmax.f32 %v17184_v0, 0.0  ;;  %v4041_v56 = vmax.f32 %v17169_v62, 0.0  ;;  %v20946_v55 = vpop.f32.mrb[57].mxu0  ;;  %v17185_v24 = vadd.f32 %v20852_v20, %v20662_v50 }
 0x3d0   : > { %v4242_v52 = vshrl.u32 %v15910_v35, 16  ;;  %v4245_v2 = vshll.u32 %v15910_v35, 16  ;;  %10169 = vmatprep.mubr.bf16.mxu0 %v15275_v53  ;;  %v7489_v61 = vshrl.u32 %v20771_v28, 16  ;;  %v20951_v39 = vpop.f32.mrb[58].mxu0  ;;  %v7492_v26 = vshll.u32 %v20771_v28, 16 }
 0x3d1   : > { %v7179_v43 = vshrl.u32 %v15918_v11, 16  ;;  %v7182_v51 = vshll.u32 %v15918_v11, 16  ;;  %10170 = vmatmul.mubr.bf16.gmra.mrb[76].mxu0 %v15274_v42  ;;  %v15911_v37 = vpack.c.bf16 %v4041_v56, %v4040_v32  ;;  %v15263_v33 = vcombine.high %v20771_v28, %v20780_v22  ;;  %v20956_v18 = vpop.f32.mrb[59].mxu0  ;;  %v20967_v11 = vld [vmem:[#allocation3 + $0x70] sm:$0x11] }
 0x3d2   : > { %v4244_v59 = vrot.slane %v4242_v52, 7  ;;  %v7030_v14 = vmax.f32 %v17185_v24, 0.0  ;;  %v15262_v58 = vcombine.low %v20771_v28, %v20780_v22  ;;  %v7467_v20 = vrot.slane %v7465_v41, 4 }
 0x3d3   : > { %v7181_v63 = vrot.slane %v7179_v43, 7  ;;  %v4250_v60 = vshrl.u32 %v15911_v37, 16  ;;  %v4253_v19 = vshll.u32 %v15911_v37, 16  ;;  %10088 = vmatprep.mubr.bf16.mxu1 %v15263_v33  ;;  %v7470_v62 = vrot.slane %v7468_v54, 5 }
 0x3d4   : > { %v4247_v6 = vor.u32 %v4245_v2, %v4244_v59  ;;  %v4248_v16 = vrot.slane %v4244_v59, 4  ;;  %v15919_v0 = vpack.c.bf16 %v7030_v14, %v7029_v4  ;;  %10089 = vmatmul.mubr.bf16.gmra.mrb[52].mxu1 %v15262_v58  ;;  %v7474_v41 = vshll.u32 %v20758_v9, 16  ;;  %v4344_v2 = vld [vmem:[#allocation3 + $0xd0] sm:$0x11] }
 0x3d5   : > { %v7184_v30 = vor.u32 %v7182_v51, %v7181_v63  ;;  %v7185_v35 = vrot.slane %v7181_v63, 4  ;;  %v4252_v42 = vrot.slane %v4250_v60, 7  ;;  %v7478_v32 = vshrl.u32 %v20758_v9, 16  ;;  %v7313_v60 = vld [vmem:[#allocation3 + $0x130] sm:$0x11] }
 0x3d6   : > { %v4341_v53 = vsel %vm20655_vm8, %v4247_v6, %v20722_v29  ;;  %v7187_v4 = vshrl.u32 %v15919_v0, 16  ;;  %v7190_v25 = vshll.u32 %v15919_v0, 16  ;;  %v7471_v54 = vor.u32 %v7470_v62, %v7467_v20  ;;  %v20974_v56 = vpop.f32.mrb[60].mxu0 }
 0x3d7   : > { %4342 = vst [vmem:[#allocation3 + $0xc0] sm:$0xff] %v4341_v53  ;;  %v7310_v52 = vsel %vm20655_vm8, %v7184_v30, %v20722_v29  ;;  %v4255_v43 = vor.u32 %v4253_v19, %v4252_v42  ;;  %v4257_v51 = vrot.slane %v4252_v42, 4  ;;  %v7476_v24 = vrot.slane %v7474_v41, 5  ;;  %v20976_v37 = vpop.f32.mrb[61].mxu0 }
 0x3d8   : > { %7311 = vst [vmem:[#allocation3 + $0x120] sm:$0xff] %v7310_v52  ;;  %v7480_v59 = vrot.slane %v7478_v32, 4  ;;  %v7189_v33 = vrot.slane %v7187_v4, 7  ;;  %v7472_v9 = vrot.slane %v7471_v54, 4  ;;  %v7484_v63 = vshll.u32 %v20967_v11, 16  ;;  %v20981_v58 = vpop.f32.mrb[62].mxu0 }
 0x3d9   : > { %v17186_v14 = vadd.f32 %v20873_v49, %v20660_v5  ;;  %v4256_v20 = vsel %vm18704_vm14, %v4248_v16, %v4255_v43  ;;  %v4345_v6 = vsel %vm20668_vm9, %v4257_v51, %v4344_v2  ;;  %v17187_v30 = vadd.f32 %v20875_v34, %v20662_v50  ;;  %v20989_v0 = vpop.f32.mrb[63].mxu0 }
 0x3da   : > { %v7481_v19 = vor.u32 %v7480_v59, %v7476_v24  ;;  %4343 = vst [vmem:[#allocation3 + $0xc8] sm:$0xff] %v4256_v20  ;;  %4346 = vst [vmem:[#allocation3 + $0xd0] sm:$0x11] %v4345_v6  ;;  %v7192_v62 = vor.u32 %v7190_v25, %v7189_v33  ;;  %v7194_v53 = vrot.slane %v7189_v33, 4  ;;  %v7477_v49 = vsel %vm18665_vm4, %v7472_v9, %v7476_v24  ;;  %v21007_v9 = vld [vmem:[#allocation3 + $0x88] sm:$0x11] }
 0x3db   : > { %v7486_v42 = vrot.slane %v7484_v63, 5  ;;  %v7031_v16 = vmax.f32 %v17186_v14, 0.0  ;;  %v7032_v32 = vmax.f32 %v17187_v30, 0.0  ;;  %v17188_v52 = vadd.f32 %v20881_v40, %v20660_v5 }
 0x3dc   : > { %v7482_v41 = vrot.slane %v7481_v19, 4  ;;  %v7193_v2 = vsel %vm18704_vm14, %v7185_v35, %v7192_v62  ;;  %v7314_v34 = vsel %vm20668_vm9, %v7194_v53, %v7313_v60  ;;  %v17189_v4 = vadd.f32 %v20887_v15, %v20662_v50 }
 0x3dd   : > { %v7513_v25 = vshrl.u32 %v20826_v47, 16  ;;  %7312 = vst [vmem:[#allocation3 + $0x128] sm:$0xff] %v7193_v2  ;;  %7315 = vst [vmem:[#allocation3 + $0x130] sm:$0x11] %v7314_v34  ;;  %v15920_v43 = vpack.c.bf16 %v7032_v32, %v7031_v16  ;;  %v7033_v51 = vmax.f32 %v17188_v52, 0.0  ;;  %v7516_v40 = vshll.u32 %v20826_v47, 16 }
 0x3de   : > { %v7487_v54 = vsel %vm18665_vm4, %v7482_v41, %v7486_v42  ;;  %v7034_v35 = vmax.f32 %v17189_v4, 0.0  ;;  %v15265_v33 = vcombine.high %v20826_v47, %v20856_v12  ;;  %v15264_v14 = vcombine.low %v20826_v47, %v20856_v12 }
 0x3df   : > { %v15277_v24 = vcombine.high %v7477_v49, %v7487_v54  ;;  %v15276_v59 = vcombine.low %v7477_v49, %v7487_v54  ;;  %v7196_v15 = vshrl.u32 %v15920_v43, 16  ;;  %v7199_v63 = vshll.u32 %v15920_v43, 16 }
 0x3e0   : > { %v7491_v20 = vrot.slane %v7489_v61, 4  ;;  %v15921_v6 = vpack.c.bf16 %v7034_v35, %v7033_v51  ;;  %10096 = vmatprep.mubr.bf16.mxu1 %v15265_v33  ;;  %v7494_v60 = vrot.slane %v7492_v26, 5  ;;  %v7498_v19 = vshll.u32 %v20780_v22, 16 }
 0x3e1   : > { %10177 = vmatprep.mubr.bf16.mxu0 %v15277_v24  ;;  %v7502_v30 = vshrl.u32 %v20780_v22, 16  ;;  %v7198_v62 = vrot.slane %v7196_v15, 7  ;;  %10097 = vmatmul.mubr.bf16.gmra.mrb[56].mxu1 %v15264_v14  ;;  %v7508_v53 = vshll.u32 %v21007_v9, 16  ;;  %v17190_v49 = vadd.f32 %v20907_v48, %v20660_v5  ;;  %v7320_v48 = vld [vmem:[#allocation3 + $0x148] sm:$0x11] }
 0x3e2   : > { %10178 = vmatmul.mubr.bf16.gmra.mrb[80].mxu0 %v15276_v59  ;;  %v17191_v61 = vadd.f32 %v20909_v31, %v20662_v50  ;;  %v7204_v42 = vshrl.u32 %v15921_v6, 16  ;;  %v7207_v41 = vshll.u32 %v15921_v6, 16  ;;  %v7495_v16 = vor.u32 %v7494_v60, %v7491_v20 }
 0x3e3   : > { %v7500_v28 = vrot.slane %v7498_v19, 5  ;;  %v7201_v26 = vor.u32 %v7199_v63, %v7198_v62  ;;  %v7202_v32 = vrot.slane %v7198_v62, 4  ;;  %v7504_v52 = vrot.slane %v7502_v30, 4 }
 0x3e4   : > { %v7510_v2 = vrot.slane %v7508_v53, 5  ;;  %v7206_v22 = vrot.slane %v7204_v42, 7  ;;  %v7496_v34 = vrot.slane %v7495_v16, 4  ;;  %v7035_v4 = vmax.f32 %v17190_v49, 0.0 }
 0x3e5   : > { %v7036_v54 = vmax.f32 %v17191_v61, 0.0  ;;  %v7317_v43 = vsel %vm20655_vm8, %v7201_v26, %v20722_v29  ;;  %v7505_v51 = vor.u32 %v7504_v52, %v7500_v28  ;;  %v17192_v31 = vadd.f32 %v20919_v7, %v20660_v5 }
 0x3e6   : > { %v17193_v24 = vadd.f32 %v20926_v1, %v20662_v50  ;;  %7318 = vst [vmem:[#allocation3 + $0x138] sm:$0xff] %v7317_v43  ;;  %v7209_v59 = vor.u32 %v7207_v41, %v7206_v22  ;;  %v7211_v35 = vrot.slane %v7206_v22, 4  ;;  %v7501_v33 = vsel %vm18665_vm4, %v7496_v34, %v7500_v28  ;;  %v21043_v28 = vld [vmem:[#allocation3 + $0xa0] sm:$0x11] }
 0x3e7   : > { %v15922_v15 = vpack.c.bf16 %v7036_v54, %v7035_v4  ;;  %v7506_v63 = vrot.slane %v7505_v51, 4  ;;  %v7037_v14 = vmax.f32 %v17192_v31, 0.0  ;;  %v7537_v6 = vshrl.u32 %v20899_v23, 16 }
 0x3e8   : > { %v7038_v20 = vmax.f32 %v17193_v24, 0.0  ;;  %v7210_v60 = vsel %vm18704_vm14, %v7202_v32, %v7209_v59  ;;  %v7321_v7 = vsel %vm20668_vm9, %v7211_v35, %v7320_v48  ;;  %v7540_v53 = vshll.u32 %v20899_v23, 16 }
 0x3e9   : > { %v7213_v19 = vshrl.u32 %v15922_v15, 16  ;;  %v7216_v1 = vshll.u32 %v15922_v15, 16  ;;  %7319 = vst [vmem:[#allocation3 + $0x140] sm:$0xff] %v7210_v60  ;;  %7322 = vst [vmem:[#allocation3 + $0x148] sm:$0x11] %v7321_v7  ;;  %v7511_v30 = vsel %vm18665_vm4, %v7506_v63, %v7510_v2  ;;  %v15267_v49 = vcombine.high %v20899_v23, %v20913_v8  ;;  %v17875_v7 = vld [vmem:[#allocation8 + $0x200] sm:$0xff]  }
 0x3ea   : > { %v15923_v62 = vpack.c.bf16 %v7038_v20, %v7037_v14  ;;  %v15279_v61 = vcombine.high %v7501_v33, %v7511_v30  ;;  %v15278_v42 = vcombine.low %v7501_v33, %v7511_v30  ;;  %v15266_v16 = vcombine.low %v20899_v23, %v20913_v8  ;;  %v21070_v60 = vld [vmem:[#allocation3 + $0xb8] sm:$0x11] }
 0x3eb   : > { %v7215_v41 = vrot.slane %v7213_v19, 7  ;;  %10104 = vmatprep.mubr.bf16.mxu1 %v15267_v49  ;;  %v7515_v52 = vrot.slane %v7513_v25, 4  ;;  %v7518_v2 = vrot.slane %v7516_v40, 5  ;;  %v7522_v4 = vshll.u32 %v20856_v12, 16  ;;  %v7327_v25 = vld [vmem:[#allocation3 + $0x160] sm:$0x11] }
 0x3ec   : > { %v7221_v26 = vshrl.u32 %v15923_v62, 16  ;;  %v7224_v32 = vshll.u32 %v15923_v62, 16  ;;  %10185 = vmatprep.mubr.bf16.mxu0 %v15279_v61  ;;  %10105 = vmatmul.mubr.bf16.gmra.mrb[60].mxu1 %v15266_v16  ;;  %v7526_v54 = vshrl.u32 %v20856_v12, 16  ;;  %v7532_v48 = vshll.u32 %v21043_v28, 16  ;;  %v17880_v49 = vld [vmem:[#allocation8 + $0x248] sm:$0xff]  }
 0x3ed   : > { %v7218_v22 = vor.u32 %v7216_v1, %v7215_v41  ;;  %v7219_v34 = vrot.slane %v7215_v41, 4  ;;  %10186 = vmatmul.mubr.bf16.gmra.mrb[84].mxu0 %v15278_v42  ;;  %v7519_v43 = vor.u32 %v7518_v2, %v7515_v52  ;;  %v17194_v51 = vadd.f32 %v20944_v21, %v20660_v5  ;;  %10242 = vmatprep.mubr.bf16.mxu1 %v15285_v27 }
 0x3ee   : > { %v7223_v23 = vrot.slane %v7221_v26, 7  ;;  %v7524_v40 = vrot.slane %v7522_v4, 5  ;;  %v7528_v31 = vrot.slane %v7526_v54, 4  ;;  %v17195_v24 = vadd.f32 %v20946_v55, %v20662_v50 }
 0x3ef   : > { %v7324_v47 = vsel %vm20655_vm8, %v7218_v22, %v20722_v29  ;;  %v7520_v33 = vrot.slane %v7519_v43, 4  ;;  %v7534_v15 = vrot.slane %v7532_v48, 5  ;;  %v7039_v63 = vmax.f32 %v17194_v51, 0.0  ;;  %v17886_v48 = vld [vmem:[#allocation8 + $0x250] sm:$0xff]  }
 0x3f0   : > { %7325 = vst [vmem:[#allocation3 + $0x150] sm:$0xff] %v7324_v47  ;;  %v7226_v59 = vor.u32 %v7224_v32, %v7223_v23  ;;  %v7228_v35 = vrot.slane %v7223_v23, 4  ;;  %v7529_v21 = vor.u32 %v7528_v31, %v7524_v40  ;;  %v7040_v14 = vmax.f32 %v17195_v24, 0.0  ;;  %v21082_v24 = vld [vmem:[#allocation3 + $0x20] sm:$0xff] }
 0x3f1   : > { %v17196_v27 = vadd.f32 %v20951_v39, %v20660_v5  ;;  %v17197_v55 = vadd.f32 %v20956_v18, %v20662_v50  ;;  %v7539_v62 = vrot.slane %v7537_v6, 4  ;;  %v7542_v61 = vrot.slane %v7540_v53, 5  ;;  %v7561_v6 = vld [vmem:[#allocation3 + $0x18] sm:$0xee] }
 0x3f2   : > { %v7227_v29 = vsel %vm18704_vm14, %v7219_v34, %v7226_v59  ;;  %v7328_v20 = vsel %vm20668_vm9, %v7228_v35, %v7327_v25  ;;  %v7530_v19 = vrot.slane %v7529_v21, 4  ;;  %v15924_v1 = vpack.c.bf16 %v7040_v14, %v7039_v63  ;;  %v17881_v34 = vld [vmem:[#allocation8 + $0x208] sm:$0xff]   ;;  %v17887_v63 = vld [vmem:[#allocation8 + $0x210] sm:$0xff]  }
 0x3f3   : > { %7326 = vst [vmem:[#allocation3 + $0x158] sm:$0xff] %v7227_v29  ;;  %7329 = vst [vmem:[#allocation3 + $0x160] sm:$0x11] %v7328_v20  ;;  %v7041_v30 = vmax.f32 %v17196_v27, 0.0  ;;  %v7042_v39 = vmax.f32 %v17197_v55, 0.0  ;;  %v7546_v42 = vshll.u32 %v20913_v8, 16  ;;  %v7525_v16 = vsel %vm18665_vm4, %v7520_v33, %v7524_v40 }
 0x3f4   : > { %v7550_v41 = vshrl.u32 %v20913_v8, 16  ;;  %v7535_v18 = vsel %vm18665_vm4, %v7530_v19, %v7534_v15  ;;  %v7230_v26 = vshrl.u32 %v15924_v1, 16  ;;  %v7556_v32 = vshll.u32 %v21070_v60, 16  ;;  %10243 = vmatmul.mubr.bf16.vlgmr.msra.gmra.mrb[64].mxu1 %v15284_v45  ;;  %v18215_v40 = vld [vmem:[#allocation3 + $0x20] sm:$0xff]  ;;  %v18216_v15 = vld [vmem:[#allocation3 + $0x28] sm:$0x11] }
 0x3f5   : > { %v15281_v52 = vcombine.high %v7525_v16, %v7535_v18  ;;  %v15280_v53 = vcombine.low %v7525_v16, %v7535_v18  ;;  %v15925_v2 = vpack.c.bf16 %v7042_v39, %v7041_v30  ;;  %v7543_v22 = vor.u32 %v7542_v61, %v7539_v62  ;;  %16205 = vmatpush3.bf16.msra.mxu1 %v17875_v7  ;;  %v21084_v14 = vld [vmem:[#allocation3] sm:$0xff]  ;;  %v7334_v29 = vld [vmem:[#allocation3 + $0x178] sm:$0x11]  ;;  %v7562_v18 = vld [vmem:[#allocation3 + $0x30] sm:$0xee] }
 0x3f6   : > { %v7232_v4 = vrot.slane %v7230_v26, 7  ;;  %v7233_v54 = vshll.u32 %v15924_v1, 16  ;;  %v7548_v23 = vrot.slane %v7546_v42, 5  ;;  %v7552_v43 = vrot.slane %v7550_v41, 4  ;;  %16206 = vmatprep.subr.bf16.mxu1 %v17880_v49  ;;  %v21091_v19 = vld [vmem:[#allocation3 + $0x18] sm:$0xff]  ;;  %v17892_v1 = vld [vmem:[#allocation8 + $0x258] sm:$0xff]  }
 0x3f7   : > { %10193 = vmatprep.mubr.bf16.mxu0 %v15281_v52  ;;  %v7238_v51 = vshrl.u32 %v15925_v2, 16  ;;  %v7544_v47 = vrot.slane %v7543_v22, 4  ;;  %v15229_v25 = vrot.slane %v7561_v6, 9  ;;  %v7558_v45 = vrot.slane %v7556_v32, 5 }
 0x3f8   : > { %10194 = vmatmul.mubr.bf16.gmra.mrb[88].mxu0 %v15280_v53  ;;  %v7235_v44 = vor.u32 %v7233_v54, %v7232_v4  ;;  %v7553_v57 = vor.u32 %v7552_v43, %v7548_v23  ;;  %v7601_v31 = vrot.slane %v18215_v40, 5  ;;  %v7236_v59 = vrot.slane %v7232_v4, 4 }
 0x3f9   : > { %v7240_v35 = vrot.slane %v7238_v51, 7  ;;  %v7241_v33 = vshll.u32 %v15925_v2, 16  ;;  %v7604_v21 = vrot.slane %v18216_v15, 5  ;;  %16207 = vmatpush3.bf16.msra.mxu1 %v17881_v34  ;;  %v7549_v20 = vsel %vm18665_vm4, %v7544_v47, %v7548_v23  ;;  %v18218_v23 = vld [vmem:[#allocation3 + $0x38] sm:$0xff] }
 0x3fa   : > { %v7331_v27 = vsel %vm20655_vm8, %v7235_v44, %v21084_v14  ;;  %v7554_v55 = vrot.slane %v7553_v57, 4  ;;  %v7603_v7 = vrot.slane %v7601_v31, 4  ;;  %16208 = vmatprep.subr.bf16.mxu1 %v17886_v48  ;;  %v7602_v49 = vsel %vm18675_vm7, %v15229_v25, %v7601_v31  ;;  %v17898_v48 = vld [vmem:[#allocation8 + $0x260] sm:$0xff]  }
 0x3fb   : > { %7332 = vst [vmem:[#allocation3 + $0x168] sm:$0xff] %v7331_v27  ;;  %v7243_v30 = vor.u32 %v7241_v33, %v7240_v35  ;;  %v7245_v62 = vrot.slane %v7240_v35, 4  ;;  %v15301_v39 = vcombine.high %v21091_v19, %v21082_v24  ;;  %v17198_v41 = vadd.f32 %v20974_v56, %v20660_v5 }
 0x3fc   : > { %v7559_v61 = vsel %vm18665_vm4, %v7554_v55, %v7558_v45  ;;  %v7605_v42 = vsel %vm18675_vm7, %v7603_v7, %v7604_v21  ;;  %v17199_v16 = vadd.f32 %v20976_v37, %v20662_v50  ;;  %v17200_v56 = vadd.f32 %v20981_v58, %v20660_v5  ;;  %v17893_v37 = vld [vmem:[#allocation8 + $0x218] sm:$0xff]   ;;  %v21118_v21 = vld [vmem:[#allocation3 + $0x38] sm:$0xff] }
 0x3fd   : > { %v7244_v26 = vsel %vm18704_vm14, %v7236_v59, %v7243_v30  ;;  %v7335_v32 = vsel %vm20668_vm9, %v7245_v62, %v7334_v29  ;;  %v15283_v6 = vcombine.high %v7549_v20, %v7559_v61  ;;  %v15282_v52 = vcombine.low %v7549_v20, %v7559_v61  ;;  %16209 = vmatpush3.bf16.msra.mxu1 %v17887_v63  ;;  %v7563_v58 = vld [vmem:[#allocation3 + $0x48] sm:$0xee]  ;;  %v18219_v59 = vld [vmem:[#allocation3 + $0x50] sm:$0xff]  ;;  %v17882_v62 = vld [vmem:[#allocation8 + $0x2c8] sm:$0xff]  }
 0x3fe   : > { %7333 = vst [vmem:[#allocation3 + $0x170] sm:$0xff] %v7244_v26  ;;  %7336 = vst [vmem:[#allocation3 + $0x178] sm:$0x11] %v7335_v32  ;;  %v15287_v53 = vcombine.high %v7602_v49, %v7605_v42  ;;  %v7043_v2 = vmax.f32 %v17198_v41, 0.0  ;;  %v7044_v22 = vmax.f32 %v17199_v16, 0.0  ;;  %16210 = vmatprep.subr.bf16.mxu1 %v17892_v1  ;;  %v17201_v34 = vadd.f32 %v20989_v0, %v20662_v50  ;;  %v17899_v0 = vld [vmem:[#allocation8 + $0x220] sm:$0xff]  }
 0x3ff   : > { %10201 = vmatprep.mubr.bf16.mxu0 %v15283_v6  ;;  %v15286_v4 = vcombine.low %v7602_v49, %v7605_v42  ;;  %v15230_v54 = vrot.slane %v7562_v18, 9  ;;  %v7608_v43 = vrot.slane %v18218_v23, 5  ;;  %v7045_v47 = vmax.f32 %v17200_v56, 0.0  ;;  %v17878_v20 = vld [vmem:[#allocation8 + $0x280] sm:$0xff]   ;;  %v17905_v42 = vld [vmem:[#allocation8 + $0x228] sm:$0xff]   ;;  %v17910_v6 = vld [vmem:[#allocation8 + $0x270] sm:$0xff]  }
 0x400   : > { %10202 = vmatmul.mubr.bf16.gmra.mrb[92].mxu0 %v15282_v52  ;;  %10250 = vmatprep.mubr.bf16.mxu1 %v15287_v53  ;;  %v15926_v51 = vpack.c.bf16 %v7044_v22, %v7043_v2  ;;  %v7611_v25 = vrot.slane %v20815_v36, 5  ;;  %v7046_v44 = vmax.f32 %v17201_v34, 0.0  ;;  %v7615_v35 = vrot.slane %v18219_v59, 5  ;;  %v17904_v36 = vld [vmem:[#allocation8 + $0x268] sm:$0xff]   ;;  %v21123_v30 = vld [vmem:[#allocation3 + $0x30] sm:$0xff]  ;;  %v17911_v23 = vld [vmem:[#allocation8 + $0x230] sm:$0xff]  }
 0x401   : > { %10339 = vmatprep.mubr.bf16.mxu0 %v15301_v39  ;;  %10251 = vmatmul.mubr.bf16.gmra.mrb[68].mxu1 %v15286_v4  ;;  %v7610_v5 = vrot.slane %v7608_v43, 4  ;;  %v7609_v50 = vsel %vm18675_vm7, %v15230_v54, %v7608_v43  ;;  %v15231_v63 = vrot.slane %v7563_v58, 9  ;;  %v7618_v27 = vrot.slane %v20889_v46, 5  ;;  %v7341_v18 = vld [vmem:[#allocation3 + $0x190] sm:$0x11]  ;;  %v17884_v22 = vld [vmem:[#allocation8 + $0x288] sm:$0xff]  }
 0x402   : > { %v7247_v57 = vshrl.u32 %v15926_v51, 16  ;;  %16211 = vmatpush3.bf16.msra.mxu1 %v17893_v37  ;;  %v7250_v45 = vshll.u32 %v15926_v51, 16  ;;  %v15927_v40 = vpack.c.bf16 %v7046_v44, %v7045_v47  ;;  %v7617_v55 = vrot.slane %v7615_v35, 4  ;;  %v7564_v56 = vld [vmem:[#allocation3 + $0x60] sm:$0xee]  ;;  %v18220_v37 = vld [vmem:[#allocation3 + $0x68] sm:$0xff] }
 0x403   : > { %v7612_v31 = vsel %vm18675_vm7, %v7610_v5, %v7611_v25  ;;  %16212 = vmatprep.subr.bf16.mxu1 %v17898_v48  ;;  %v15300_v1 = vcombine.low %v21091_v19, %v21082_v24  ;;  %v15303_v61 = vcombine.high %v21123_v30, %v21118_v21  ;;  %v7616_v32 = vsel %vm18675_vm7, %v15231_v63, %v7615_v35  ;;  %v21139_v43 = vld [vmem:[#allocation3 + $0x50] sm:$0xff]  ;;  %v17916_v47 = vld [vmem:[#allocation8 + $0x278] sm:$0xff]   ;;  %v17890_v25 = vld [vmem:[#allocation8 + $0x290] sm:$0xff]  }
 0x404   : > { %v7249_v33 = vrot.slane %v7247_v57, 7  ;;  %v15289_v15 = vcombine.high %v7609_v50, %v7612_v31  ;;  %v7255_v29 = vshrl.u32 %v15927_v40, 16  ;;  %v7258_v39 = vshll.u32 %v15927_v40, 16  ;;  %v17894_v44 = vld [vmem:[#allocation8 + $0x2d8] sm:$0xff]   ;;  %v17921_v40 = vld [vmem:[#allocation8 + $0x340] sm:$0xff]  }
 0x405   : > { %v7619_v46 = vsel %vm18675_vm7, %v7617_v55, %v7618_v27  ;;  %v15288_v26 = vcombine.low %v7609_v50, %v7612_v31  ;;  %v7622_v34 = vrot.slane %v18220_v37, 5  ;;  %v15232_v48 = vrot.slane %v7564_v56, 9  ;;  %v17917_v58 = vld [vmem:[#allocation8 + $0x238] sm:$0xff]   ;;  %v7565_v59 = vld [vmem:[#allocation3 + $0x78] sm:$0xee]  ;;  %v21156_v27 = vpop.f32.mrb[64].mxu0 }
 0x406   : > { %v7252_v7 = vor.u32 %v7250_v45, %v7249_v33  ;;  %10258 = vmatprep.mubr.bf16.mxu1 %v15289_v15  ;;  %16213 = vmatpush3.bf16.msra.mxu1 %v17899_v0  ;;  %v7257_v49 = vrot.slane %v7255_v29, 7  ;;  %v7253_v41 = vrot.slane %v7249_v33, 4  ;;  %v15291_v2 = vcombine.high %v7616_v32, %v7619_v46  ;;  %v18221_v0 = vld [vmem:[#allocation3 + $0x80] sm:$0xff]  ;;  %v17896_v35 = vld [vmem:[#allocation8 + $0x298] sm:$0xff]   ;;  %v17900_v15 = vld [vmem:[#allocation8 + $0x2e0] sm:$0xff]  }
 0x407   : > { %16214 = vmatprep.subr.bf16.mxu1 %v17904_v36  ;;  %v7624_v51 = vrot.slane %v7622_v34, 4  ;;  %v15302_v13 = vcombine.low %v21123_v30, %v21118_v21  ;;  %v15290_v57 = vcombine.low %v7616_v32, %v7619_v46  ;;  %v7623_v50 = vsel %vm18675_vm7, %v15232_v48, %v7622_v34  ;;  %v21151_v36 = vpop.f32.mrb[32].mxu1  ;;  %v7566_v32 = vld [vmem:[#allocation3 + $0x90] sm:$0xee]  ;;  %v17914_v34 = vld [vmem:[#allocation8 + $0x2b0] sm:$0xff]  }
 0x408   : > { %v7338_v16 = vsel %vm20655_vm8, %v7252_v7, %v21084_v14  ;;  %10340 = vmatmul.mubr.bf16.vlgmr.msra.gmra.mrb[96].mxu0 %v15300_v1  ;;  %v7260_v52 = vor.u32 %v7258_v39, %v7257_v49  ;;  %v7262_v53 = vrot.slane %v7257_v49, 4  ;;  %v7625_v14 = vrot.slane %v20967_v11, 5  ;;  %v21143_v11 = vld [vmem:[#allocation3 + $0x48] sm:$0xff]  ;;  %v21154_v63 = vpop.f32.mrb[33].mxu1  ;;  %v17902_v1 = vld [vmem:[#allocation8 + $0x2a0] sm:$0xff]   ;;  %v17906_v39 = vld [vmem:[#allocation8 + $0x2e8] sm:$0xff]  }
 0x409   : > { %7339 = vst [vmem:[#allocation3 + $0x180] sm:$0xff] %v7338_v16  ;;  %16269 = vmatpush3.bf16.msra.mxu0 %v17878_v20  ;;  %10347 = vmatprep.mubr.bf16.mxu0 %v15303_v61  ;;  %v15305_v5 = vcombine.high %v21143_v11, %v21139_v43  ;;  %v7629_v45 = vrot.slane %v18221_v0, 5  ;;  %v7632_v33 = vrot.slane %v21007_v9, 5  ;;  %v21158_v29 = vpop.f32.mrb[34].mxu1  ;;  %v21160_v20 = vld [vmem:[#allocation3 + $0x68] sm:$0xff]  ;;  %v15233_v55 = vrot.slane %v7565_v59, 9 }
 0x40a   : > { %10259 = vmatmul.mubr.bf16.gmra.mrb[72].mxu1 %v15288_v26  ;;  %16270 = vmatprep.subr.bf16.mxu0 %v17882_v62  ;;  %v7261_v4 = vsel %vm18704_vm14, %v7253_v41, %v7260_v52  ;;  %v7342_v54 = vsel %vm20668_vm9, %v7262_v53, %v7341_v18  ;;  %v7626_v38 = vsel %vm18675_vm7, %v7624_v51, %v7625_v14  ;;  %v21164_v9 = vld [vmem:[#allocation3 + $0x60] sm:$0xff]  ;;  %v7636_v41 = vrot.slane %v20856_v12, 5  ;;  %v21173_v16 = vpop.f32.mrb[35].mxu1  ;;  %v21175_v18 = vpop.f32.mrb[65].mxu0  ;;  %v21186_v14 = vld [vmem:[#allocation3 + $0x78] sm:$0xff] }
 0x40b   : > { %10266 = vmatprep.mubr.bf16.mxu1 %v15291_v2  ;;  %16215 = vmatpush3.bf16.msra.mxu1 %v17905_v42  ;;  %7340 = vst [vmem:[#allocation3 + $0x188] sm:$0xff] %v7261_v4  ;;  %7343 = vst [vmem:[#allocation3 + $0x190] sm:$0x11] %v7342_v54  ;;  %v15293_v31 = vcombine.high %v7623_v50, %v7626_v38  ;;  %v7631_v7 = vrot.slane %v7629_v45, 4  ;;  %v15304_v62 = vcombine.low %v21143_v11, %v21139_v43  ;;  %v21177_v52 = vpop.f32.mrb[66].mxu0  ;;  %v17912_v2 = vld [vmem:[#allocation8 + $0x2f0] sm:$0xff]  }
 0x40c   : > { %16216 = vmatprep.subr.bf16.mxu1 %v17910_v6  ;;  %v15307_v61 = vcombine.high %v21164_v9, %v21160_v20  ;;  %v15292_v46 = vcombine.low %v7623_v50, %v7626_v38  ;;  %v7630_v42 = vsel %vm18675_vm7, %v15233_v55, %v7629_v45  ;;  %v17908_v6 = vld [vmem:[#allocation8 + $0x2a8] sm:$0xff]   ;;  %v7639_v53 = vrot.slane %v21043_v28, 5  ;;  %v21182_v12 = vld [vmem:[#allocation3 + $0x80] sm:$0xff]  ;;  %v17923_v45 = vld [vmem:[#allocation8 + $0x3c0] sm:$0xff]  }
 0x40d   : > { %16271 = vmatpush3.bf16.msra.mxu0 %v17884_v22  ;;  %v7633_v49 = vsel %vm18675_vm7, %v7631_v7, %v7632_v33  ;;  %v21180_v22 = vpop.f32.mrb[67].mxu0  ;;  %v15234_v56 = vrot.slane %v7566_v32, 9  ;;  %v7638_v37 = vrot.slane %v7636_v41, 4  ;;  %v7682_v28 = vshll.u32 %v21082_v24, 16  ;;  %v21204_v33 = vld [vmem:[#allocation3 + $0x28] sm:$0x11] }
 0x40e   : > { %16272 = vmatprep.subr.bf16.mxu0 %v17888_v10  ;;  %v15295_v26 = vcombine.high %v7630_v42, %v7633_v49  ;;  %v15306_v10 = vcombine.low %v21164_v9, %v21160_v20  ;;  %v7686_v54 = vshrl.u32 %v21082_v24, 16  ;;  %v7673_v48 = vshrl.u32 %v21091_v19, 16 }
 0x40f   : > { %16217 = vmatpush3.bf16.msra.mxu1 %v17911_v23  ;;  %v7640_v4 = vsel %vm18675_vm7, %v7638_v37, %v7639_v53  ;;  %v17918_v23 = vld [vmem:[#allocation8 + $0x2f8] sm:$0xff]   ;;  %v15309_v51 = vcombine.high %v21186_v14, %v21182_v12  ;;  %v7643_v38 = vrot.slane %v20913_v8, 5  ;;  %v7684_v50 = vrot.slane %v7682_v28, 5 }
 0x410   : > { %10348 = vmatmul.mubr.bf16.gmra.mrb[100].mxu0 %v15302_v13  ;;  %16218 = vmatprep.subr.bf16.mxu1 %v17916_v47  ;;  %v7676_v47 = vshll.u32 %v21091_v19, 16  ;;  %v7637_v13 = vsel %vm18675_vm7, %v15234_v56, %v7636_v41  ;;  %v7688_v0 = vrot.slane %v7686_v54, 4  ;;  %v21200_v19 = vld [vmem:[#allocation3 + $0x98] sm:$0xff]  ;;  %v7675_v59 = vrot.slane %v7673_v48, 4  ;;  %v21225_v28 = vld [vmem:[#allocation3 + $0xa8] sm:$0xff] }
 0x411   : > { %10355 = vmatprep.mubr.bf16.mxu0 %v15305_v5  ;;  %16273 = vmatpush3.bf16.msra.mxu0 %v17890_v25  ;;  %v15294_v25 = vcombine.low %v7630_v42, %v7633_v49  ;;  %v7567_v5 = vld [vmem:[#allocation3 + $0xa8] sm:$0xee]  ;;  %v15308_v8 = vcombine.low %v21186_v14, %v21182_v12  ;;  %v7706_v7 = vshll.u32 %v21118_v21, 16  ;;  %v7700_v49 = vshll.u32 %v21123_v30, 16 }
 0x412   : > { %10267 = vmatmul.mubr.bf16.gmra.mrb[76].mxu1 %v15290_v57  ;;  %16274 = vmatprep.subr.bf16.mxu0 %v17894_v44  ;;  %v15297_v44 = vcombine.high %v7637_v13, %v7640_v4  ;;  %v7646_v57 = vrot.slane %v21070_v60, 5  ;;  %v7689_v55 = vor.u32 %v7688_v0, %v7684_v50  ;;  %v7692_v41 = vshll.u32 %v21204_v33, 16 }
 0x413   : > { %10274 = vmatprep.mubr.bf16.mxu1 %v15293_v31  ;;  %16219 = vmatpush3.bf16.msra.mxu1 %v17917_v58  ;;  %v17920_v58 = vld [vmem:[#allocation8 + $0x2b8] sm:$0xff]   ;;  %v7645_v31 = vrot.slane %v7643_v38, 4  ;;  %v7730_v48 = vshll.u32 %v21139_v43, 16 }
 0x414   : > { %16332 = vmatprep.subr.bf16.mxu1 %v17921_v40  ;;  %v15235_v40 = vrot.slane %v7567_v5, 9  ;;  %v7690_v32 = vrot.slane %v7689_v55, 4  ;;  %v7694_v56 = vrot.slane %v7692_v41, 5  ;;  %v21245_v55 = vld [vmem:[#allocation3 + $0x58] sm:$0x11]  ;;  %v17922_v41 = vld [vmem:[#allocation8 + $0x300] sm:$0xff]  }
 0x415   : > { %16275 = vmatpush3.bf16.msra.mxu0 %v17896_v35  ;;  %v7678_v35 = vrot.slane %v7676_v47, 5  ;;  %v7647_v60 = vsel %vm18675_vm7, %v7645_v31, %v7646_v57  ;;  %v7721_v47 = vshrl.u32 %v21143_v11, 16  ;;  %v21241_v31 = vld [vmem:[#allocation3 + $0xc8] sm:$0xff] }
 0x416   : > { %16276 = vmatprep.subr.bf16.mxu0 %v17900_v15  ;;  %v21206_v15 = vld [vmem:[#allocation3 + $0x90] sm:$0xff]  ;;  %v7695_v54 = vsel %vm18665_vm4, %v7690_v32, %v7694_v56  ;;  %v7740_v56 = vshll.u32 %v21245_v55, 16 }
 0x417   : > { %v7679_v42 = vor.u32 %v7678_v35, %v7675_v59 }
 0x418   : > { %10356 = vmatmul.mubr.bf16.gmra.mrb[104].mxu0 %v15304_v62  ;;  %v7697_v62 = vshrl.u32 %v21123_v30, 16 }
 0x419   : > { %10363 = vmatprep.mubr.bf16.mxu0 %v15307_v61  ;;  %16277 = vmatpush3.bf16.msra.mxu0 %v17902_v1  ;;  %v7710_v1 = vshrl.u32 %v21118_v21, 16  ;;  %v15296_v61 = vcombine.low %v7637_v13, %v7640_v4  ;;  %v7680_v30 = vrot.slane %v7679_v42, 4  ;;  %v21223_v4 = vld [vmem:[#allocation3 + $0x40] sm:$0x11] }
 0x41a   : > { %10275 = vmatmul.mubr.bf16.gmra.mrb[80].mxu1 %v15292_v46  ;;  %16278 = vmatprep.subr.bf16.mxu0 %v17906_v39  ;;  %v15311_v39 = vcombine.high %v21206_v15, %v21200_v19  ;;  %v7644_v46 = vsel %vm18675_vm7, %v15235_v40, %v7643_v38  ;;  %v7699_v37 = vrot.slane %v7697_v62, 4 }
 0x41b   : > { %10282 = vmatprep.mubr.bf16.mxu1 %v15295_v26  ;;  %v15299_v26 = vcombine.high %v7644_v46, %v7647_v60  ;;  %v7712_v53 = vrot.slane %v7710_v1, 4  ;;  %v15298_v38 = vcombine.low %v7644_v46, %v7647_v60 }
 0x41d   : > { %16279 = vmatpush3.bf16.msra.mxu0 %v17908_v6  ;;  %v7708_v6 = vrot.slane %v7706_v7, 5  ;;  %v21247_v7 = vld [vmem:[#allocation3 + $0xc0] sm:$0xff] }
 0x41e   : > { %16280 = vmatprep.subr.bf16.mxu0 %v17912_v2  ;;  %v21219_v2 = vld [vmem:[#allocation3 + $0xb0] sm:$0xff]  ;;  %v15315_v46 = vcombine.high %v21247_v7, %v21241_v31 }
 0x41f   : > { %v15313_v13 = vcombine.high %v21225_v28, %v21219_v2 }
 0x420   : > { %10364 = vmatmul.mubr.bf16.gmra.mrb[108].mxu0 %v15306_v10  ;;  %v15310_v10 = vcombine.low %v21206_v15, %v21200_v19 }
 0x421   : > { %10371 = vmatprep.mubr.bf16.mxu0 %v15309_v51  ;;  %16281 = vmatpush3.bf16.msra.mxu0 %v17914_v34  ;;  %v7702_v34 = vrot.slane %v7700_v49, 5  ;;  %v7734_v51 = vshrl.u32 %v21139_v43, 16  ;;  %v7758_v49 = vshrl.u32 %v21160_v20, 16 }
 0x422   : > { %10283 = vmatmul.mubr.bf16.gmra.mrb[84].mxu1 %v15294_v25  ;;  %16282 = vmatprep.subr.bf16.mxu0 %v17918_v23  ;;  %v7713_v23 = vor.u32 %v7712_v53, %v7708_v6  ;;  %v7724_v25 = vshll.u32 %v21143_v11, 16  ;;  %v7898_v11 = vrot.slane %v21082_v24, 5  ;;  %v7754_v24 = vshll.u32 %v21160_v20, 16  ;;  %v7864_v53 = vld [vmem:[#allocation3 + $0x18] sm:$0xee] }
 0x423   : > { %10290 = vmatprep.mubr.bf16.mxu1 %v15297_v44  ;;  %v7685_v44 = vsel %vm18665_vm4, %v7680_v30, %v7684_v50  ;;  %v7703_v5 = vor.u32 %v7702_v34, %v7699_v37  ;;  %v7736_v40 = vrot.slane %v7734_v51, 4  ;;  %v15312_v50 = vcombine.low %v21225_v28, %v21219_v2  ;;  %v17925_v37 = vld [vmem:[#allocation8 + $0x348] sm:$0xff]  }
 0x424   : > { %v15317_v57 = vcombine.high %v7685_v44, %v7695_v54  ;;  %v7714_v0 = vrot.slane %v7713_v23, 4  ;;  %v7726_v60 = vrot.slane %v7724_v25, 5  ;;  %v7900_v42 = vrot.slane %v7898_v11, 4 }
 0x425   : > { %16283 = vmatpush3.bf16.msra.mxu0 %v17920_v58  ;;  %v7716_v58 = vshll.u32 %v21223_v4, 16  ;;  %v7704_v59 = vrot.slane %v7703_v5, 4  ;;  %v21262_v23 = vrot.slane %v7754_v24, 5  ;;  %v15236_v51 = vrot.slane %v7864_v53, 9 }
 0x426   : > { %16396 = vmatprep.subr.bf16.mxu0 %v17923_v45  ;;  %v21238_v45 = vrot.slane %v7730_v48, 5  ;;  %v7760_v48 = vrot.slane %v7758_v49, 4  ;;  %v15314_v5 = vcombine.low %v21247_v7, %v21241_v31  ;;  %v7865_v49 = vld [vmem:[#allocation3 + $0x30] sm:$0xee]  ;;  %v7912_v53 = vrot.slane %v21139_v43, 5 }
 0x427   : > { %v7718_v35 = vrot.slane %v7716_v58, 5  ;;  %v7709_v32 = vsel %vm18665_vm4, %v7704_v59, %v7708_v6  ;;  %v7905_v6 = vrot.slane %v21118_v21, 5  ;;  %v7899_v58 = vsel %vm18675_vm7, %v15236_v51, %v7898_v11  ;;  %v17930_v11 = vld [vmem:[#allocation8 + $0x310] sm:$0xff]  }
 0x428   : > { %10372 = vmatmul.mubr.bf16.gmra.mrb[112].mxu0 %v15308_v8  ;;  %v7723_v8 = vrot.slane %v7721_v47, 4  ;;  %v7737_v62 = vor.u32 %v7736_v40, %v21238_v45  ;;  %v17926_v47 = vld [vmem:[#allocation8 + $0x308] sm:$0xff]   ;;  %v7761_v21 = vor.u32 %v7760_v48, %v21262_v23  ;;  %v7778_v40 = vshll.u32 %v21182_v12, 16  ;;  %v17924_v48 = vld [vmem:[#allocation8 + $0x380] sm:$0xff]  }
 0x429   : > { %10379 = vmatprep.mubr.bf16.mxu0 %v15311_v39  ;;  %v7719_v1 = vsel %vm18665_vm4, %v7714_v0, %v7718_v35  ;;  %v7745_v39 = vshrl.u32 %v21164_v9, 16  ;;  %v7782_v59 = vshrl.u32 %v21182_v12, 16  ;;  %v7769_v35 = vshrl.u32 %v21186_v14, 16 }
 0x42a   : > { %10291 = vmatmul.mubr.bf16.gmra.mrb[88].mxu1 %v15296_v61  ;;  %v7748_v61 = vshll.u32 %v21164_v9, 16  ;;  %v7727_v30 = vor.u32 %v7726_v60, %v7723_v8  ;;  %v15319_v34 = vcombine.high %v7709_v32, %v7719_v1  ;;  %v7738_v9 = vrot.slane %v7737_v62, 4 }
 0x42b   : > { %10298 = vmatprep.mubr.bf16.mxu1 %v15299_v26  ;;  %v15316_v26 = vcombine.low %v7685_v44, %v7695_v54  ;;  %v17929_v44 = vld [vmem:[#allocation8 + $0x350] sm:$0xff]   ;;  %v7772_v8 = vshll.u32 %v21186_v14, 16  ;;  %v15318_v62 = vcombine.low %v7709_v32, %v7719_v1  ;;  %v7784_v1 = vrot.slane %v7782_v59, 4  ;;  %v7866_v59 = vld [vmem:[#allocation3 + $0x48] sm:$0xee] }
 0x42c   : > { %v7728_v25 = vrot.slane %v7727_v30, 4  ;;  %v15237_v32 = vrot.slane %v7865_v49, 9  ;;  %v17934_v30 = vld [vmem:[#allocation8 + $0x318] sm:$0xff]   ;;  %v15238_v49 = vrot.slane %v7866_v59, 9  ;;  %v17939_v59 = vld [vmem:[#allocation8 + $0x3e0] sm:$0xff]  }
 0x42e   : > { %v7733_v24 = vsel %vm18665_vm4, %v7728_v25, %v21238_v45  ;;  %v7906_v51 = vsel %vm18675_vm7, %v15237_v32, %v7905_v6  ;;  %v17927_v25 = vld [vmem:[#allocation8 + $0x3c8] sm:$0xff]   ;;  %v17945_v32 = vld [vmem:[#allocation8 + $0x370] sm:$0xff]  }
 0x430   : > { %10380 = vmatmul.mubr.bf16.gmra.mrb[116].mxu0 %v15310_v10  ;;  %v7901_v10 = vrot.slane %v21204_v33, 5  ;;  %v7750_v33 = vrot.slane %v7748_v61, 5 }
 0x431   : > { %10387 = vmatprep.mubr.bf16.mxu0 %v15313_v13  ;;  %v7742_v13 = vrot.slane %v7740_v56, 5 }
 0x432   : > { %10299 = vmatmul.mubr.bf16.gmra.mrb[92].mxu1 %v15298_v38  ;;  %v21266_v54 = vsel %vm18675_vm7, %v7900_v42, %v7901_v10  ;;  %v7747_v38 = vrot.slane %v7745_v39, 4  ;;  %v7908_v42 = vrot.slane %v21223_v4, 5  ;;  %v7774_v10 = vrot.slane %v7772_v8, 5  ;;  %v17937_v4 = vld [vmem:[#allocation8 + $0x360] sm:$0xff]  }
 0x433   : > { %10436 = vmatprep.mubr.bf16.mxu1 %v15317_v57  ;;  %v21273_v57 = vld [vmem:[#allocation3 + $0x70] sm:$0x11]  ;;  %v21277_v0 = vsel %vm18665_vm4, %v7738_v9, %v7742_v13  ;;  %v15333_v60 = vcombine.high %v7899_v58, %v21266_v54  ;;  %v15332_v9 = vcombine.low %v7899_v58, %v21266_v54  ;;  %v7796_v54 = vshll.u32 %v21206_v15, 16 }
 0x434   : > { %v7751_v39 = vor.u32 %v7750_v33, %v7747_v38  ;;  %v7764_v61 = vshll.u32 %v21273_v57, 16  ;;  %v15321_v14 = vcombine.high %v7733_v24, %v21277_v0  ;;  %v7802_v38 = vshll.u32 %v21200_v19, 16  ;;  %v17938_v58 = vld [vmem:[#allocation8 + $0x320] sm:$0xff]  }
 0x435   : > { %v7806_v33 = vshrl.u32 %v21200_v19, 16 }
 0x436   : > { %v7752_v56 = vrot.slane %v7751_v39, 4 }
 0x438   : > { %10388 = vmatmul.mubr.bf16.gmra.mrb[120].mxu0 %v15312_v50  ;;  %v7907_v50 = vrot.slane %v7905_v6, 4  ;;  %v7914_v6 = vrot.slane %v7912_v53, 4 }
 0x439   : > { %10395 = vmatprep.mubr.bf16.mxu0 %v15315_v46  ;;  %v17933_v46 = vld [vmem:[#allocation8 + $0x358] sm:$0xff]  }
 0x43a   : > { %10437 = vmatmul.mubr.bf16.vlgmr.msra.gmra.mrb[96].mxu1 %v15316_v26  ;;  %v21291_v26 = vrot.slane %v7778_v40, 5  ;;  %v21295_v45 = vsel %vm18675_vm7, %v7907_v50, %v7908_v42  ;;  %v7757_v40 = vsel %vm18665_vm4, %v7752_v56, %v21262_v23  ;;  %v17928_v50 = vld [vmem:[#allocation8 + $0x388] sm:$0xff]   ;;  %v7808_v23 = vrot.slane %v7806_v33, 4 }
 0x43b   : > { %10444 = vmatprep.mubr.bf16.mxu1 %v15319_v34  ;;  %16333 = vmatpush3.bf16.msra.mxu1 %v17922_v41  ;;  %v7762_v41 = vrot.slane %v7761_v21, 4  ;;  %v7771_v34 = vrot.slane %v7769_v35, 4  ;;  %v15320_v21 = vcombine.low %v7733_v24, %v21277_v0  ;;  %v17931_v0 = vld [vmem:[#allocation8 + $0x3d0] sm:$0xff]   ;;  %v21320_v24 = vrot.slane %v7802_v38, 5 }
 0x43c   : > { %16334 = vmatprep.subr.bf16.mxu1 %v17925_v37  ;;  %v7766_v37 = vrot.slane %v7764_v61, 5  ;;  %v7785_v13 = vor.u32 %v7784_v1, %v21291_v26  ;;  %v7919_v61 = vrot.slane %v21160_v20, 5  ;;  %v7798_v1 = vrot.slane %v7796_v54, 5 }
 0x43d   : > { %v7775_v35 = vor.u32 %v7774_v10, %v7771_v34  ;;  %v21332_v56 = vsel %vm18675_vm7, %v15238_v49, %v7912_v53  ;;  %v17935_v34 = vld [vmem:[#allocation8 + $0x3d8] sm:$0xff]   ;;  %v7809_v10 = vor.u32 %v7808_v23, %v21320_v24  ;;  %v7841_v23 = vshrl.u32 %v21247_v7, 16 }
 0x43e   : > { %v21305_v43 = vsel %vm18665_vm4, %v7762_v41, %v7766_v37  ;;  %v17932_v37 = vld [vmem:[#allocation8 + $0x390] sm:$0xff]   ;;  %v7921_v53 = vrot.slane %v7919_v61, 4  ;;  %v7844_v49 = vshll.u32 %v21247_v7, 16  ;;  %v7854_v7 = vshrl.u32 %v21241_v31, 16 }
 0x43f   : > { %16335 = vmatpush3.bf16.msra.mxu1 %v17926_v47  ;;  %v21301_v47 = vld [vmem:[#allocation3 + $0x88] sm:$0x11]  ;;  %v15322_v38 = vcombine.low %v7757_v40, %v21305_v43 }
 0x440   : > { %10396 = vmatmul.mubr.bf16.gmra.mrb[124].mxu0 %v15314_v5  ;;  %16336 = vmatprep.subr.bf16.mxu1 %v17929_v44  ;;  %v7793_v44 = vshrl.u32 %v21206_v15, 16  ;;  %v15335_v5 = vcombine.high %v7906_v51, %v21295_v45  ;;  %v7788_v8 = vshll.u32 %v21301_v47, 16  ;;  %v15323_v15 = vcombine.high %v7757_v40, %v21305_v43 }
 0x441   : > { %10533 = vmatprep.mubr.bf16.mxu0 %v15333_v60  ;;  %v17941_v60 = vld [vmem:[#allocation8 + $0x368] sm:$0xff]  }
 0x442   : > { %10445 = vmatmul.mubr.bf16.gmra.mrb[100].mxu1 %v15318_v62  ;;  %v7786_v62 = vrot.slane %v7785_v13, 4  ;;  %v7790_v42 = vrot.slane %v7788_v8, 5  ;;  %v7795_v41 = vrot.slane %v7793_v44, 4  ;;  %v7820_v13 = vshll.u32 %v21225_v28, 16  ;;  %v7867_v44 = vld [vmem:[#allocation3 + $0x60] sm:$0xee] }
 0x443   : > { %10452 = vmatprep.mubr.bf16.mxu1 %v15321_v14  ;;  %16337 = vmatpush3.bf16.msra.mxu1 %v17930_v11  ;;  %v7915_v11 = vrot.slane %v21245_v55, 5  ;;  %v17942_v14 = vld [vmem:[#allocation8 + $0x328] sm:$0xff]   ;;  %v7776_v55 = vrot.slane %v7775_v35, 4 }
 0x444   : > { %16338 = vmatprep.subr.bf16.mxu1 %v17933_v46  ;;  %v21327_v46 = vld [vmem:[#allocation3 + $0xa0] sm:$0x11]  ;;  %v21336_v20 = vsel %vm18665_vm4, %v7786_v62, %v7790_v42  ;;  %v7799_v54 = vor.u32 %v7798_v1, %v7795_v41  ;;  %v21361_v62 = vadd.f32 %v21154_v63, %v21151_v36  ;;  %v17940_v42 = vld [vmem:[#allocation8 + $0x3a0] sm:$0xff]   ;;  %v17943_v63 = vld [vmem:[#allocation8 + $0x3e8] sm:$0xff]   ;;  %v7850_v1 = vshll.u32 %v21241_v31, 16 }
 0x445   : > { %v21324_v39 = vsel %vm18675_vm7, %v7914_v6, %v7915_v11  ;;  %v7781_v33 = vsel %vm18665_vm4, %v7776_v55, %v21291_v26  ;;  %v15239_v26 = vrot.slane %v7867_v44, 9  ;;  %v7822_v11 = vrot.slane %v7820_v13, 5  ;;  %v21369_v55 = vld [vmem:[#allocation3 + $0xb8] sm:$0x11] }
 0x446   : > { %v15325_v6 = vcombine.high %v7781_v33, %v21336_v20  ;;  %v7843_v13 = vrot.slane %v7841_v23, 4 }
 0x447   : > { %16339 = vmatpush3.bf16.msra.mxu1 %v17934_v30  ;;  %v15334_v30 = vcombine.low %v7906_v51, %v21295_v45  ;;  %v7817_v45 = vshrl.u32 %v21225_v28, 16  ;;  %v7812_v51 = vshll.u32 %v21327_v46, 16  ;;  %v7810_v28 = vrot.slane %v7809_v10, 4 }
 0x448   : > { %10534 = vmatmul.mubr.bf16.vlgmr.msra.gmra.mrb[128].mxu0 %v15332_v9  ;;  %16340 = vmatprep.subr.bf16.mxu1 %v17937_v4  ;;  %v7826_v4 = vshll.u32 %v21219_v2, 16  ;;  %v7830_v9 = vshrl.u32 %v21219_v2, 16 }
 0x449   : > { %16397 = vmatpush3.bf16.msra.mxu0 %v17924_v48  ;;  %10541 = vmatprep.mubr.bf16.mxu0 %v15335_v5  ;;  %v15337_v48 = vcombine.high %v21332_v56, %v21324_v39  ;;  %v17950_v5 = vld [vmem:[#allocation8 + $0x378] sm:$0xff]   ;;  %v7814_v8 = vrot.slane %v7812_v51, 5  ;;  %v7933_v51 = vrot.slane %v21200_v19, 5 }
 0x44a   : > { %10453 = vmatmul.mubr.bf16.gmra.mrb[104].mxu1 %v15320_v21  ;;  %16398 = vmatprep.subr.bf16.mxu0 %v17927_v25  ;;  %v17946_v25 = vld [vmem:[#allocation8 + $0x330] sm:$0xff]   ;;  %v17936_v21 = vld [vmem:[#allocation8 + $0x398] sm:$0xff]   ;;  %v21352_v43 = vrot.slane %v7826_v4, 5  ;;  %v7832_v40 = vrot.slane %v7830_v9, 4  ;;  %v7836_v4 = vshll.u32 %v21369_v55, 16 }
 0x44b   : > { %10460 = vmatprep.mubr.bf16.mxu1 %v15323_v15  ;;  %16341 = vmatpush3.bf16.msra.mxu1 %v17938_v58  ;;  %v7922_v58 = vrot.slane %v21273_v57, 5  ;;  %v17951_v15 = vld [vmem:[#allocation8 + $0x338] sm:$0xff]   ;;  %v7800_v57 = vrot.slane %v7799_v54, 4  ;;  %v7815_v41 = vsel %vm18665_vm4, %v7810_v28, %v7814_v8  ;;  %v7869_v28 = vld [vmem:[#allocation3 + $0x90] sm:$0xee] }
 0x44c   : > { %16342 = vmatprep.subr.bf16.mxu1 %v17941_v60  ;;  %v7926_v60 = vrot.slane %v21182_v12, 5  ;;  %v7920_v12 = vsel %vm18675_vm7, %v15239_v26, %v7919_v61  ;;  %v7833_v36 = vor.u32 %v7832_v40, %v21352_v43  ;;  %v21379_v61 = vadd.f32 %v21173_v16, %v21158_v29  ;;  %v17944_v16 = vld [vmem:[#allocation8 + $0x3a8] sm:$0xff]   ;;  %v17955_v8 = vld [vmem:[#allocation8 + $0x3b8] sm:$0xff]  }
 0x44d   : > { %16399 = vmatpush3.bf16.msra.mxu0 %v17928_v50  ;;  %v21356_v35 = vsel %vm18675_vm7, %v7921_v53, %v7922_v58  ;;  %v7819_v50 = vrot.slane %v7817_v45, 4  ;;  %v7929_v29 = vrot.slane %v21301_v47, 5  ;;  %v17947_v45 = vld [vmem:[#allocation8 + $0x3f0] sm:$0xff]  }
 0x44e   : > { %16400 = vmatprep.subr.bf16.mxu0 %v17931_v0  ;;  %v17956_v0 = vld [vmem:[#allocation8 + $0x440] sm:$0xff]  }
 0x44f   : > { %16343 = vmatpush3.bf16.msra.mxu1 %v17942_v14  ;;  %v15336_v14 = vcombine.low %v21332_v56, %v21324_v39  ;;  %v15339_v39 = vcombine.high %v7920_v12, %v21356_v35  ;;  %v15324_v56 = vcombine.low %v7781_v33, %v21336_v20  ;;  %v7823_v10 = vor.u32 %v7822_v11, %v7819_v50  ;;  %v21398_v33 = vld [vmem:[#allocation3 + $0xd0] sm:$0x11] }
 0x450   : > { %10542 = vmatmul.mubr.bf16.gmra.mrb[132].mxu0 %v15334_v30  ;;  %16344 = vmatprep.subr.bf16.mxu1 %v17945_v32  ;;  %v7928_v32 = vrot.slane %v7926_v60, 4  ;;  %v21383_v30 = vadd.f32 %v21175_v18, %v21156_v27  ;;  %v21393_v27 = vadd.f32 %v21180_v22, %v21177_v52  ;;  %v7834_v18 = vrot.slane %v7833_v36, 4  ;;  %v17949_v52 = vld [vmem:[#allocation8 + $0x3b0] sm:$0xff]   ;;  %v17959_v50 = vld [vmem:[#allocation8 + $0x40] sm:$0xff]   ;;  %v21415_v36 = vld [vmem:[#allocation3 + $0x38] sm:$0xff] }
 0x451   : > { %10549 = vmatprep.mubr.bf16.mxu0 %v15337_v48  ;;  %16401 = vmatpush3.bf16.msra.mxu0 %v17932_v37  ;;  %v7805_v37 = vsel %vm18665_vm4, %v7800_v57, %v21320_v24  ;;  %v7852_v20 = vrot.slane %v7850_v1, 5  ;;  %v7856_v24 = vrot.slane %v7854_v7, 4  ;;  %v7824_v47 = vrot.slane %v7823_v10, 4 }
 0x452   : > { %10461 = vmatmul.mubr.bf16.gmra.mrb[108].mxu1 %v15322_v38  ;;  %16402 = vmatprep.subr.bf16.mxu0 %v17935_v34  ;;  %v7868_v34 = vld [vmem:[#allocation3 + $0x78] sm:$0xee]  ;;  %v15327_v9 = vcombine.high %v7805_v37, %v7815_v41  ;;  %v7930_v53 = vsel %vm18675_vm7, %v7928_v32, %v7929_v29  ;;  %v7846_v38 = vrot.slane %v7844_v49, 5  ;;  %v15338_v22 = vcombine.low %v7920_v12, %v21356_v35 }
 0x453   : > { %10468 = vmatprep.mubr.bf16.mxu1 %v15325_v6  ;;  %16345 = vmatpush3.bf16.msra.mxu1 %v17946_v25  ;;  %v15240_v48 = vrot.slane %v7868_v34, 9  ;;  %v7838_v25 = vrot.slane %v7836_v4, 5  ;;  %v17953_v6 = vld [vmem:[#allocation8 + $0x3f8] sm:$0xff]   ;;  %v15326_v58 = vcombine.low %v7805_v37, %v7815_v41  ;;  %v7860_v26 = vshll.u32 %v21398_v33, 16 }
 0x454   : > { %16346 = vmatprep.subr.bf16.mxu1 %v17950_v5  ;;  %v7857_v5 = vor.u32 %v7856_v24, %v7852_v20  ;;  %v7847_v40 = vor.u32 %v7846_v38, %v7843_v13  ;;  %v7870_v37 = vld [vmem:[#allocation3 + $0xa8] sm:$0xee]  ;;  %v7987_v10 = vshll.u32 %v21415_v36, 16  ;;  %v7991_v4 = vshrl.u32 %v21415_v36, 16 }
 0x455   : > { %16403 = vmatpush3.bf16.msra.mxu0 %v17936_v21  ;;  %v7927_v44 = vsel %vm18675_vm7, %v15240_v48, %v7926_v60  ;;  %v7839_v54 = vsel %vm18665_vm4, %v7834_v18, %v7838_v25  ;;  %v7829_v21 = vsel %vm18665_vm4, %v7824_v47, %v21352_v43  ;;  %v7862_v12 = vrot.slane %v7860_v26, 5  ;;  %v21437_v25 = vld [vmem:[#allocation3 + $0x40] sm:$0x11] }
 0x456   : > { %16404 = vmatprep.subr.bf16.mxu0 %v17939_v59  ;;  %v15341_v19 = vcombine.high %v7927_v44, %v7930_v53  ;;  %v7935_v59 = vrot.slane %v7933_v51, 4  ;;  %v15329_v35 = vcombine.high %v7829_v21, %v7839_v54  ;;  %v7858_v57 = vrot.slane %v7857_v5, 4  ;;  %v21445_v5 = vld [vmem:[#allocation3 + $0x50] sm:$0xff] }
 0x457   : > { %16347 = vmatpush3.bf16.msra.mxu1 %v17951_v15  ;;  %v7936_v15 = vrot.slane %v21327_v46, 5  ;;  %v7943_v18 = vrot.slane %v21369_v55, 5  ;;  %v15242_v24 = vrot.slane %v7870_v37, 9  ;;  %v7947_v48 = vrot.slane %v21241_v31, 5 }
 0x458   : > { %10550 = vmatmul.mubr.bf16.gmra.mrb[136].mxu0 %v15336_v14  ;;  %16460 = vmatprep.subr.bf16.mxu1 %v17956_v0  ;;  %v15241_v0 = vrot.slane %v7869_v28, 9  ;;  %v7848_v14 = vrot.slane %v7847_v40, 4  ;;  %v7863_v7 = vsel %vm18665_vm4, %v7858_v57, %v7862_v12  ;;  %v7997_v26 = vshll.u32 %v21437_v25, 16 }
 0x459   : > { %10557 = vmatprep.mubr.bf16.mxu0 %v15339_v39  ;;  %16405 = vmatpush3.bf16.msra.mxu0 %v17940_v42  ;;  %v7937_v49 = vsel %vm18675_vm7, %v7935_v59, %v7936_v15  ;;  %v7940_v42 = vrot.slane %v21219_v2, 5  ;;  %v21423_v39 = vld [vmem:[#allocation3 + $0x30] sm:$0xff]  ;;  %v7949_v59 = vrot.slane %v7947_v48, 4  ;;  %v8015_v15 = vshrl.u32 %v21445_v5, 16 }
 0x45a   : > { %10469 = vmatmul.mubr.bf16.gmra.mrb[112].mxu1 %v15324_v56  ;;  %16406 = vmatprep.subr.bf16.mxu0 %v17943_v63  ;;  %v15340_v63 = vcombine.low %v7927_v44, %v7930_v53  ;;  %v7934_v1 = vsel %vm18675_vm7, %v15241_v0, %v7933_v51  ;;  %v15328_v56 = vcombine.low %v7829_v21, %v7839_v54  ;;  %v7978_v29 = vshrl.u32 %v21423_v39, 16  ;;  %v21443_v54 = vld [vmem:[#allocation3 + $0x48] sm:$0xff] }
 0x45b   : > { %10476 = vmatprep.mubr.bf16.mxu1 %v15327_v9  ;;  %v15343_v32 = vcombine.high %v7934_v1, %v7937_v49  ;;  %v7853_v2 = vsel %vm18665_vm4, %v7848_v14, %v7852_v20  ;;  %v7942_v34 = vrot.slane %v7940_v42, 4  ;;  %v21435_v53 = vrot.slane %v7987_v10, 5 }
 0x45c   : > { %v15331_v9 = vcombine.high %v7853_v2, %v7863_v7  ;;  %v7993_v51 = vrot.slane %v7991_v4, 4  ;;  %v7980_v13 = vrot.slane %v7978_v29, 4  ;;  %v15342_v55 = vcombine.low %v7934_v1, %v7937_v49  ;;  %v21460_v49 = vld [vmem:[#allocation3 + $0x58] sm:$0x11]  ;;  %v17957_v29 = vld [vmem:[#allocation8 + $0x400] sm:$0xff]  }
 0x45d   : > { %16407 = vmatpush3.bf16.msra.mxu0 %v17944_v16  ;;  %v7981_v16 = vshll.u32 %v21423_v39, 16  ;;  %v7944_v20 = vsel %vm18675_vm7, %v7942_v34, %v7943_v18  ;;  %v7941_v44 = vsel %vm18675_vm7, %v15242_v24, %v7940_v42  ;;  %v15330_v28 = vcombine.low %v7853_v2, %v7863_v7 }
 0x45e   : > { %16408 = vmatprep.subr.bf16.mxu0 %v17947_v45  ;;  %v7994_v40 = vor.u32 %v7993_v51, %v21435_v53  ;;  %v15344_v0 = vcombine.low %v7941_v44, %v7944_v20  ;;  %v8021_v37 = vshll.u32 %v21460_v49, 16 }
 0x45f   : > { %v7983_v38 = vrot.slane %v7981_v16, 5 }
 0x460   : > { %10558 = vmatmul.mubr.bf16.gmra.mrb[140].mxu0 %v15338_v22  ;;  %v7995_v42 = vrot.slane %v7994_v40, 4 }
 0x461   : > { %10565 = vmatprep.mubr.bf16.mxu0 %v15341_v19  ;;  %16409 = vmatpush3.bf16.msra.mxu0 %v17949_v52  ;;  %v15970_v60 = vpop.f32.mrb[36].mxu1  ;;  %v15349_v19 = vcombine.high %v21423_v39, %v21415_v36 }
 0x462   : > { %10477 = vmatmul.mubr.bf16.gmra.mrb[116].mxu1 %v15326_v58  ;;  %16410 = vmatprep.subr.bf16.mxu0 %v17953_v6  ;;  %v15971_v11 = vpop.f32.mrb[37].mxu1  ;;  %v15345_v6 = vcombine.high %v7941_v44, %v7944_v20  ;;  %v7871_v58 = vld [vmem:[#allocation3 + $0xc0] sm:$0xee]  ;;  %v17962_v20 = vld [vmem:[#allocation8 + $0x448] sm:$0xff]   ;;  %v21521_v44 = vrot.slane %v8021_v37, 5 }
 0x463   : > { %10484 = vmatprep.mubr.bf16.mxu1 %v15329_v35  ;;  %v21410_v43 = vadd.f32 %v15971_v11, %v15970_v60  ;;  %v15973_v23 = vpop.f32.mrb[38].mxu1  ;;  %v8002_v35 = vshrl.u32 %v21443_v54, 16  ;;  %v8011_v60 = vshll.u32 %v21445_v5, 16  ;;  %v15243_v57 = vrot.slane %v7871_v58, 9 }
 0x464   : > { %v15974_v41 = vpop.f32.mrb[39].mxu1  ;;  %v8005_v11 = vshll.u32 %v21443_v54, 16 }
 0x465   : > { %16411 = vmatpush3.bf16.msra.mxu0 %v17955_v8  ;;  %v21417_v46 = vadd.f32 %v15974_v41, %v15973_v23  ;;  %v7984_v8 = vor.u32 %v7983_v38, %v7980_v13  ;;  %v15348_v23 = vcombine.low %v21423_v39, %v21415_v36  ;;  %v21464_v14 = vsel %vm18675_vm7, %v15243_v57, %v7947_v48  ;;  %v21515_v38 = vld [vmem:[#allocation3 + $0xc0] sm:$0xff] }
 0x466   : > { %16524 = vmatprep.subr.bf16.mxu0 %v17959_v50  ;;  %v7950_v50 = vrot.slane %v21398_v33, 5  ;;  %v7999_v41 = vrot.slane %v7997_v26, 5  ;;  %v21470_v33 = vld [vmem:[#allocation3 + $0x60] sm:$0xff]  ;;  %v21474_v7 = vrot.slane %v8002_v35, 4  ;;  %v21476_v39 = vrot.slane %v8011_v60, 5  ;;  %v21536_v26 = vld [vmem:[#allocation3 + $0xd8] sm:$0xff] }
 0x467   : > { %v7985_v1 = vrot.slane %v7984_v8, 4  ;;  %v21483_v2 = vrot.slane %v8005_v11, 5  ;;  %v8026_v16 = vshrl.u32 %v21470_v33, 16  ;;  %v8029_v18 = vshll.u32 %v21470_v33, 16  ;;  %v21538_v35 = vld [vmem:[#allocation3 + $0xe0] sm:$0xff] }
 0x468   : > { %10566 = vmatmul.mubr.bf16.gmra.mrb[144].mxu0 %v15340_v63  ;;  %v21468_v12 = vsel %vm18675_vm7, %v7949_v59, %v7950_v50  ;;  %v21472_v63 = vld [vmem:[#allocation3 + $0x68] sm:$0xff]  ;;  %v8122_v8 = vshrl.u32 %v21515_v38, 16  ;;  %v8125_v60 = vshll.u32 %v21515_v38, 16  ;;  %v21544_v11 = vld [vmem:[#allocation3 + $0x70] sm:$0x11] }
 0x469   : > { %10573 = vmatprep.mubr.bf16.mxu0 %v15343_v32  ;;  %v8017_v32 = vrot.slane %v8015_v15, 4  ;;  %v15347_v4 = vcombine.high %v21464_v14, %v21468_v12  ;;  %v15346_v24 = vcombine.low %v21464_v14, %v21468_v12  ;;  %v21509_v48 = vsel %vm18665_vm4, %v7985_v1, %v21435_v53 }
 0x46a   : > { %10485 = vmatmul.mubr.bf16.gmra.mrb[120].mxu1 %v15328_v56  ;;  %v21481_v56 = vld [vmem:[%s23577_s6] ss:$0 sm:$0xff]  ;;  %v8035_v13 = vshll.u32 %v21472_v63, 16  ;;  %v21531_v58 = vrot.slane %v8026_v16, 4  ;;  %v8039_v59 = vshrl.u32 %v21472_v63, 16  ;;  %v8149_v1 = vshll.u32 %v21536_v26, 16 }
 0x46b   : > { %10492 = vmatprep.mubr.bf16.mxu1 %v15331_v9  ;;  %v15976_v45 = vpop.f32.mrb[40].mxu1  ;;  %v10051_v34 = vadd.f32 %v21361_v62, %v21481_v56  ;;  %v10054_v10 = vadd.f32 %v21379_v61, %v21481_v56  ;;  %v15351_v9 = vcombine.high %v21443_v54, %v21445_v5  ;;  %v21500_v62 = vsel %vm18665_vm4, %v7995_v42, %v7999_v41 }
 0x46c   : > { %v15977_v47 = vpop.f32.mrb[41].mxu1  ;;  %v15350_v61 = vcombine.low %v21443_v54, %v21445_v5  ;;  %v8018_v51 = vor.u32 %v8017_v32, %v21476_v39  ;;  %v8146_v41 = vshrl.u32 %v21536_v26, 16  ;;  %v8159_v32 = vshrl.u32 %v21538_v35, 16 }
 0x46d   : > { %v21439_v52 = vadd.f32 %v15977_v47, %v15976_v45  ;;  %v15979_v22 = vpop.f32.mrb[42].mxu1  ;;  %v15353_v45 = vcombine.high %v21470_v33, %v21472_v63  ;;  %v15352_v47 = vcombine.low %v21470_v33, %v21472_v63  ;;  %v21524_v53 = vadd.f32 %v21383_v30, %v10051_v34  ;;  %v17968_v30 = vld [vmem:[#allocation8 + $0x450] sm:$0xff]  }
 0x46e   : > { %v15980_v31 = vpop.f32.mrb[43].mxu1  ;;  %v8019_v50 = vrot.slane %v8018_v51, 4  ;;  %v8041_v37 = vrot.slane %v8039_v59, 4  ;;  %v17969_v34 = vld [vmem:[#allocation8 + $0x410] sm:$0xff]   ;;  %v8124_v16 = vrot.slane %v8122_v8, 4 }
 0x46f   : > { %v21449_v21 = vadd.f32 %v15980_v31, %v15979_v22  ;;  %v21517_v22 = vld [vmem:[#allocation3 + $0xc8] sm:$0xff]  ;;  %v17963_v31 = vld [vmem:[#allocation8 + $0x408] sm:$0xff]  }
 0x470   : > { %10574 = vmatmul.mubr.bf16.gmra.mrb[148].mxu0 %v15342_v55  ;;  %v8008_v55 = vor.u32 %v21483_v2, %v21474_v7  ;;  %v8131_v15 = vshll.u32 %v21517_v22, 16  ;;  %v8135_v57 = vshrl.u32 %v21517_v22, 16  ;;  %v8155_v7 = vshll.u32 %v21538_v35, 16  ;;  %v21554_v2 = vld [vmem:[#allocation3 + $0x78] sm:$0xff] }
 0x471   : > { %10581 = vmatprep.mubr.bf16.mxu0 %v15345_v6  ;;  %v21527_v6 = vadd.f32 %v21393_v27, %v10054_v10  ;;  %v10062_v10 = vadd.f32 %v21417_v46, %v21481_v56  ;;  %v8045_v46 = vshll.u32 %v21544_v11, 16  ;;  %v21586_v8 = vsel %vm18665_vm4, %v8019_v50, %v21521_v44 }
 0x472   : > { %10493 = vmatmul.mubr.bf16.gmra.mrb[124].mxu1 %v15330_v28  ;;  %v21533_v28 = vrot.slane %v8029_v18, 5  ;;  %v8127_v18 = vrot.slane %v8125_v60, 5  ;;  %v8137_v51 = vrot.slane %v8135_v57, 4 }
 0x473   : > { %10630 = vmatprep.mubr.bf16.mxu1 %v15349_v19  ;;  %v15365_v19 = vcombine.high %v21509_v48, %v21500_v62  ;;  %v8047_v50 = vrot.slane %v8045_v46, 5  ;;  %v17986_v46 = vld [vmem:[#allocation8 + $0x468] sm:$0xff]  }
 0x478   : > { %10582 = vmatmul.mubr.bf16.gmra.mrb[152].mxu0 %v15344_v0  ;;  %v21546_v0 = vrot.slane %v8035_v13, 5  ;;  %v8009_v13 = vrot.slane %v8008_v55, 4  ;;  %v8050_v55 = vshrl.u32 %v21554_v2, 16 }
 0x479   : > { %10589 = vmatprep.mubr.bf16.mxu0 %v15347_v4 }
 0x47a   : > { %10631 = vmatmul.mubr.bf16.vlgmr.msra.gmra.mrb[128].mxu1 %v15348_v23  ;;  %v16034_v40 = vpop.f32.mrb[68].mxu0  ;;  %v10059_v23 = vadd.f32 %v21410_v43, %v21481_v56 }
 0x47b   : > { %10638 = vmatprep.mubr.bf16.mxu1 %v15351_v9  ;;  %16461 = vmatpush3.bf16.msra.mxu1 %v17957_v29  ;;  %v16035_v27 = vpop.f32.mrb[69].mxu0  ;;  %v21560_v9 = vld [vmem:[#allocation3 + $0x80] sm:$0xff]  ;;  %v17974_v29 = vld [vmem:[#allocation8 + $0x458] sm:$0xff]  }
 0x47c   : > { %16462 = vmatprep.subr.bf16.mxu1 %v17962_v20  ;;  %v16036_v14 = vadd.f32 %v16035_v27, %v16034_v40  ;;  %v16037_v12 = vpop.f32.mrb[70].mxu0  ;;  %v21562_v20 = vrot.slane %v8131_v15, 5  ;;  %v8151_v40 = vrot.slane %v8149_v1, 5  ;;  %v8161_v27 = vrot.slane %v8159_v32, 4  ;;  %v17965_v1 = vld [vmem:[#allocation8 + $0x48] sm:$0xff]  }
 0x47d   : > { %v16038_v42 = vpop.f32.mrb[71].mxu0  ;;  %v8059_v54 = vshll.u32 %v21560_v9, 16  ;;  %v8063_v60 = vshrl.u32 %v21560_v9, 16  ;;  %v8128_v15 = vor.u32 %v8127_v18, %v8124_v16  ;;  %v15355_v44 = vcombine.high %v21554_v2, %v21560_v9  ;;  %v21599_v32 = vld [vmem:[#allocation3 + $0x98] sm:$0xff] }
 0x47e   : > { %v16039_v43 = vadd.f32 %v16038_v42, %v16037_v12  ;;  %v21558_v4 = vadd.f32 %v16036_v14, %v10059_v23  ;;  %v8138_v57 = vor.u32 %v8137_v51, %v21562_v20  ;;  %v15364_v23 = vcombine.low %v21509_v48, %v21500_v62  ;;  %v17961_v14 = vld [vmem:[#allocation8] sm:$0xff]   ;;  %v10962_v51 = vld [vmem:[#allocation3 + $0xe8] sm:$0x11] }
 0x47f   : > { %16463 = vmatpush3.bf16.msra.mxu1 %v17963_v31  ;;  %v8032_v31 = vor.u32 %v21533_v28, %v21531_v58  ;;  %v8042_v58 = vor.u32 %v8041_v37, %v21546_v0  ;;  %v21580_v28 = vld [vmem:[#allocation3 + $0x90] sm:$0xff]  ;;  %v21595_v12 = vsel %vm18665_vm4, %v8009_v13, %v21476_v39  ;;  %v8065_v13 = vrot.slane %v8063_v60, 4  ;;  %v17971_v60 = vld [vmem:[#allocation8 + $0x50] sm:$0xff]  }
 0x480   : > { %10590 = vmatmul.mubr.bf16.gmra.mrb[156].mxu0 %v15346_v24  ;;  %16464 = vmatprep.subr.bf16.mxu1 %v17968_v30  ;;  %v21567_v59 = vadd.f32 %v16039_v43, %v10062_v10  ;;  %v8148_v24 = vrot.slane %v8146_v41, 4  ;;  %v21572_v30 = vrot.slane %v8155_v7, 5  ;;  %v10961_v41 = vld [vmem:[#allocation3 + $0xd0] sm:$0x11]  ;;  %v15367_v39 = vcombine.high %v21595_v12, %v21586_v8 }
 0x481   : > { %10727 = vmatprep.mubr.bf16.mxu0 %v15365_v19  ;;  %v8053_v19 = vshll.u32 %v21554_v2, 16  ;;  %v8033_v7 = vrot.slane %v8032_v31, 4  ;;  %v8043_v10 = vrot.slane %v8042_v58, 4  ;;  %v21605_v43 = vrot.slane %v8059_v54, 5  ;;  %v17967_v58 = vld [vmem:[#allocation8 + $0x8] sm:$0xff]  }
 0x482   : > { %10639 = vmatmul.mubr.bf16.gmra.mrb[132].mxu1 %v15350_v61  ;;  %v17975_v61 = vld [vmem:[#allocation8 + $0x418] sm:$0xff]   ;;  %v8152_v62 = vor.u32 %v8151_v40, %v8148_v24  ;;  %v8162_v48 = vor.u32 %v8161_v27, %v21572_v30  ;;  %v8129_v24 = vrot.slane %v8128_v15, 4  ;;  %v21609_v40 = vrot.slane %v8138_v57, 4 }
 0x483   : > { %10646 = vmatprep.mubr.bf16.mxu1 %v15353_v45  ;;  %16465 = vmatpush3.bf16.msra.mxu1 %v17969_v34  ;;  %v17980_v45 = vld [vmem:[#allocation8 + $0x460] sm:$0xff]   ;;  %v10989_v27 = vshll.u32 %v10961_v41, 16  ;;  %v8077_v54 = vshll.u32 %v21580_v28, 16  ;;  %v8055_v37 = vrot.slane %v8053_v19, 5  ;;  %v21625_v19 = vld [vmem:[#allocation3 + $0x88] sm:$0x11] }
 0x484   : > { %16466 = vmatprep.subr.bf16.mxu1 %v17974_v29  ;;  %v17981_v29 = vld [vmem:[#allocation8 + $0x420] sm:$0xff]   ;;  %v21617_v15 = vrot.slane %v8162_v48, 4  ;;  %v8083_v33 = vshll.u32 %v21599_v32, 16  ;;  %v17987_v41 = vld [vmem:[#allocation8 + $0x428] sm:$0xff]  }
 0x485   : > { %v15982_v42 = vpop.f32.mrb[44].mxu1  ;;  %v10991_v57 = vrot.slane %v10989_v27, 5  ;;  %v21670_v27 = vld [vmem:[#allocation3 + $0xb0] sm:$0xff] }
 0x486   : > { %v15983_v34 = vpop.f32.mrb[45].mxu1 }
 0x487   : > { %16467 = vmatpush3.bf16.msra.mxu1 %v17975_v61  ;;  %v21607_v16 = vadd.f32 %v15983_v34, %v15982_v42  ;;  %v15985_v18 = vpop.f32.mrb[46].mxu1  ;;  %v8052_v61 = vrot.slane %v8050_v55, 4  ;;  %v21623_v55 = vsel %vm18665_vm4, %v8043_v10, %v8047_v50  ;;  %v21643_v34 = vsel %vm18665_vm4, %v8033_v7, %v21546_v0 }
 0x488   : > { %10728 = vmatmul.mubr.bf16.vlgmr.msra.gmra.mrb[160].mxu0 %v15364_v23  ;;  %16468 = vmatprep.subr.bf16.mxu1 %v17980_v45  ;;  %v15986_v31 = vpop.f32.mrb[47].mxu1  ;;  %v8153_v45 = vrot.slane %v8152_v62, 4  ;;  %v11013_v23 = vshll.u32 %v10962_v51, 16  ;;  %v17973_v62 = vld [vmem:[#allocation8 + $0x10] sm:$0xff]   ;;  %v15369_v10 = vcombine.high %v21643_v34, %v21623_v55 }
 0x489   : > { %16525 = vmatpush3.bf16.msra.mxu0 %v17961_v14  ;;  %10735 = vmatprep.mubr.bf16.mxu0 %v15367_v39  ;;  %v21612_v42 = vadd.f32 %v15986_v31, %v15985_v18  ;;  %v15366_v14 = vcombine.low %v21595_v12, %v21586_v8  ;;  %v17992_v8 = vld [vmem:[#allocation8 + $0x470] sm:$0xff]   ;;  %v21638_v12 = vsel %vm18665_vm4, %v21609_v40, %v10991_v57  ;;  %v17977_v18 = vld [vmem:[#allocation8 + $0x58] sm:$0xff]  }
 0x48a   : > { %10647 = vmatmul.mubr.bf16.gmra.mrb[136].mxu1 %v15352_v47  ;;  %16526 = vmatprep.subr.bf16.mxu0 %v17965_v1  ;;  %v8087_v47 = vshrl.u32 %v21599_v32, 16  ;;  %v8066_v1 = vor.u32 %v8065_v13, %v21605_v43  ;;  %v11015_v50 = vrot.slane %v11013_v23, 5  ;;  %v8056_v48 = vor.u32 %v8055_v37, %v8052_v61  ;;  %v17993_v13 = vld [vmem:[#allocation8 + $0x430] sm:$0xff]   ;;  %v21674_v23 = vld [vmem:[#allocation3 + $0xa8] sm:$0xff] }
 0x48b   : > { %10654 = vmatprep.mubr.bf16.mxu1 %v15355_v44  ;;  %16469 = vmatpush3.bf16.msra.mxu1 %v17981_v29  ;;  %v21633_v44 = vsel %vm18665_vm4, %v8129_v24, %v21562_v20  ;;  %v8069_v29 = vshll.u32 %v21625_v19, 16  ;;  %v21655_v0 = vsel %vm18665_vm4, %v8153_v45, %v21572_v30  ;;  %v21662_v37 = vrot.slane %v8083_v33, 5  ;;  %v17979_v45 = vld [vmem:[#allocation8 + $0x18] sm:$0xff]  }
 0x48c   : > { %16470 = vmatprep.subr.bf16.mxu1 %v17986_v46  ;;  %v21660_v7 = vsel %vm18665_vm4, %v21617_v15, %v11015_v50  ;;  %v8089_v51 = vrot.slane %v8087_v47, 4  ;;  %v15354_v30 = vcombine.low %v21554_v2, %v21560_v9  ;;  %v8067_v24 = vrot.slane %v8066_v1, 4  ;;  %v17983_v47 = vld [vmem:[#allocation8 + $0x60] sm:$0xff]   ;;  %v17998_v50 = vld [vmem:[#allocation8 + $0x438] sm:$0xff]  }
 0x48d   : > { %16527 = vmatpush3.bf16.msra.mxu0 %v17967_v58  ;;  %v17997_v58 = vld [vmem:[#allocation8 + $0x478] sm:$0xff]   ;;  %v15357_v61 = vcombine.high %v21580_v28, %v21599_v32  ;;  %v8071_v57 = vrot.slane %v8069_v29, 5  ;;  %v8079_v33 = vrot.slane %v8077_v54, 5  ;;  %v18001_v29 = vld [vmem:[#allocation8 + $0xc0] sm:$0xff]   ;;  %v15368_v54 = vcombine.low %v21643_v34, %v21623_v55  ;;  %v17989_v34 = vld [vmem:[#allocation8 + $0x68] sm:$0xff]  }
 0x48e   : > { %16528 = vmatprep.subr.bf16.mxu0 %v17971_v60  ;;  %v8057_v60 = vrot.slane %v8056_v48, 4  ;;  %v8090_v1 = vor.u32 %v8089_v51, %v21662_v37  ;;  %v8111_v48 = vshrl.u32 %v21670_v27, 16  ;;  %v8098_v51 = vshrl.u32 %v21674_v23, 16 }
 0x48f   : > { %16471 = vmatpush3.bf16.msra.mxu1 %v17987_v41  ;;  %v21678_v41 = vld [vmem:[#allocation3 + $0xa0] sm:$0x11] }
 0x490   : > { %10736 = vmatmul.mubr.bf16.gmra.mrb[164].mxu0 %v15366_v14  ;;  %16472 = vmatprep.subr.bf16.mxu1 %v17992_v8  ;;  %v23825_v14 = vshrl.u32 %v21580_v28, 16  ;;  %v8107_v8 = vshll.u32 %v21670_v27, 16 }
 0x491   : > { %10743 = vmatprep.mubr.bf16.mxu0 %v15369_v10  ;;  %16529 = vmatpush3.bf16.msra.mxu0 %v17973_v62  ;;  %v8072_v62 = vsel %vm18665_vm4, %v8067_v24, %v8071_v57  ;;  %v8093_v57 = vshll.u32 %v21678_v41, 16 }
 0x492   : > { %10655 = vmatmul.mubr.bf16.gmra.mrb[140].mxu1 %v15354_v30  ;;  %16530 = vmatprep.subr.bf16.mxu0 %v17977_v18  ;;  %v8076_v2 = vrot.slane %v23825_v14, 4  ;;  %v8062_v18 = vsel %vm18665_vm4, %v8057_v60, %v21605_v43  ;;  %v17985_v30 = vld [vmem:[#allocation8 + $0x20] sm:$0xff]   ;;  %v15356_v43 = vcombine.low %v21580_v28, %v21599_v32  ;;  %v8091_v60 = vrot.slane %v8090_v1, 4 }
 0x493   : > { %10662 = vmatprep.mubr.bf16.mxu1 %v15357_v61  ;;  %16473 = vmatpush3.bf16.msra.mxu1 %v17993_v13  ;;  %v8101_v13 = vshll.u32 %v21674_v23, 16  ;;  %v15371_v46 = vcombine.high %v8062_v18, %v8072_v62  ;;  %v8109_v31 = vrot.slane %v8107_v8, 5  ;;  %v8100_v28 = vrot.slane %v8098_v51, 4  ;;  %v17991_v8 = vld [vmem:[#allocation8 + $0x28] sm:$0xff]  }
 0x494   : > { %v16040_v10 = vpop.f32.mrb[72].mxu0  ;;  %16474 = vmatprep.subr.bf16.mxu1 %v17997_v58  ;;  %v8080_v24 = vor.u32 %v8079_v33, %v8076_v2  ;;  %v10067_v58 = vadd.f32 %v21439_v52, %v21481_v56  ;;  %v10070_v2 = vadd.f32 %v21449_v21, %v21481_v56  ;;  %v8113_v33 = vrot.slane %v8111_v48, 4  ;;  %v17995_v48 = vld [vmem:[#allocation8 + $0x70] sm:$0xff]  }
 0x495   : > { %16531 = vmatpush3.bf16.msra.mxu0 %v17979_v45  ;;  %v16041_v61 = vpop.f32.mrb[73].mxu0  ;;  %v8103_v1 = vrot.slane %v8101_v13, 5  ;;  %v8095_v21 = vrot.slane %v8093_v57, 5  ;;  %v17999_v57 = vld [vmem:[#allocation8 + $0x78] sm:$0xff]  }
 0x496   : > { %16532 = vmatprep.subr.bf16.mxu0 %v17983_v47  ;;  %v16042_v14 = vadd.f32 %v16041_v61, %v16040_v10  ;;  %v16043_v55 = vpop.f32.mrb[74].mxu0  ;;  %v15359_v10 = vcombine.high %v21674_v23, %v21670_v27  ;;  %v8114_v13 = vor.u32 %v8113_v33, %v8109_v31  ;;  %v21724_v33 = vld [vmem:[#allocation3 + $0xd0] sm:$0x11] }
 0x497   : > { %v16044_v39 = vpop.f32.mrb[75].mxu0  ;;  %v15988_v45 = vpop.f32.mrb[48].mxu1  ;;  %16475 = vmatpush3.bf16.msra.mxu1 %v17998_v50  ;;  %v8096_v51 = vsel %vm18665_vm4, %v8091_v60, %v8095_v21  ;;  %v21721_v60 = vcombine.high %v21515_v38, %v21517_v22 }
 0x498   : > { %10744 = vmatmul.mubr.bf16.gmra.mrb[168].mxu0 %v15368_v54  ;;  %v16045_v20 = vadd.f32 %v16044_v39, %v16043_v55  ;;  %v15989_v52 = vpop.f32.mrb[49].mxu1  ;;  %16588 = vmatprep.subr.bf16.mxu1 %v18001_v29  ;;  %v21699_v47 = vadd.f32 %v16042_v14, %v10067_v58  ;;  %v8081_v54 = vrot.slane %v8080_v24, 4  ;;  %v17996_v14 = vld [vmem:[#allocation8 + $0x30] sm:$0xff]   ;;  %v15370_v55 = vcombine.low %v8062_v18, %v8072_v62  ;;  %v18000_v18 = vld [vmem:[#allocation8 + $0x38] sm:$0xff]  }
 0x499   : > { %10751 = vmatprep.mubr.bf16.mxu0 %v15371_v46  ;;  %16533 = vmatpush3.bf16.msra.mxu0 %v17985_v30  ;;  %v21703_v61 = vadd.f32 %v15989_v52, %v15988_v45  ;;  %v15991_v50 = vpop.f32.mrb[50].mxu1  ;;  %v21707_v46 = vld [vmem:[#allocation3 + $0xb8] sm:$0x11]  ;;  %v8104_v30 = vor.u32 %v8103_v1, %v8100_v28  ;;  %v8115_v45 = vrot.slane %v8114_v13, 4 }
 0x49a   : > { %10663 = vmatmul.mubr.bf16.gmra.mrb[144].mxu1 %v15356_v43  ;;  %16534 = vmatprep.subr.bf16.mxu0 %v17989_v34  ;;  %v15992_v39 = vpop.f32.mrb[51].mxu1  ;;  %v21705_v29 = vadd.f32 %v16045_v20, %v10070_v2  ;;  %v8086_v24 = vsel %vm18665_vm4, %v8081_v54, %v21662_v37  ;;  %v8117_v20 = vshll.u32 %v21707_v46, 16  ;;  %v15358_v43 = vcombine.low %v21674_v23, %v21670_v27  ;;  %v18003_v2 = vld [vmem:[#allocation8 + $0x140] sm:$0xff]  }
 0x49b   : > { %10670 = vmatprep.mubr.bf16.mxu1 %v15359_v10  ;;  %v21709_v58 = vadd.f32 %v15992_v39, %v15991_v50  ;;  %v15373_v34 = vcombine.high %v8086_v24, %v8096_v51  ;;  %v8105_v62 = vrot.slane %v8104_v30, 4  ;;  %v15372_v10 = vcombine.low %v8086_v24, %v8096_v51 }
 0x49c   : > { %v8119_v37 = vrot.slane %v8117_v20, 5  ;;  %v8141_v50 = vshll.u32 %v21724_v33, 16  ;;  %v8203_v39 = vrot.slane %v21415_v36, 5  ;;  %v10078_v51 = vadd.f32 %v21612_v42, %v21481_v56  ;;  %v8169_v42 = vld [vmem:[#allocation3 + $0x30] sm:$0xee] }
 0x49d   : > { %16535 = vmatpush3.bf16.msra.mxu0 %v17991_v8  ;;  %v8110_v28 = vsel %vm18665_vm4, %v8105_v62, %v8109_v31  ;;  %v10075_v8 = vadd.f32 %v21607_v16, %v21481_v56  ;;  %v21738_v31 = vcombine.low %v21515_v38, %v21517_v22  ;;  %v21744_v36 = vcombine.high %v21536_v26, %v21538_v35 }
 0x49e   : > { %16536 = vmatprep.subr.bf16.mxu0 %v17995_v48  ;;  %v8120_v23 = vsel %vm18665_vm4, %v8115_v45, %v8119_v37  ;;  %v21752_v45 = vld [vmem:[#allocation3 + $0xe8] sm:$0x11]  ;;  %v8206_v37 = vrot.slane %v21437_v25, 5 }
 0x49f   : > { %v15375_v48 = vcombine.high %v8110_v28, %v8120_v23 }
 0x4a0   : > { %10752 = vmatmul.mubr.bf16.gmra.mrb[172].mxu0 %v15370_v55 }
 0x4a1   : > { %10759 = vmatprep.mubr.bf16.mxu0 %v15373_v34  ;;  %16537 = vmatpush3.bf16.msra.mxu0 %v17996_v14  ;;  %v8205_v34 = vrot.slane %v8203_v39, 4 }
 0x4a2   : > { %10671 = vmatmul.mubr.bf16.gmra.mrb[148].mxu1 %v15358_v43  ;;  %16538 = vmatprep.subr.bf16.mxu0 %v17999_v57  ;;  %v8143_v57 = vrot.slane %v8141_v50, 5 }
 0x4a3   : > { %10678 = vmatprep.mubr.bf16.mxu1 %v21721_v60 }
 0x4a4   : > { %v16046_v52 = vpop.f32.mrb[76].mxu0 }
 0x4a5   : > { %v16047_v1 = vpop.f32.mrb[77].mxu0  ;;  %16539 = vmatpush3.bf16.msra.mxu0 %v18000_v18  ;;  %v8144_v18 = vsel %vm18665_vm4, %v21609_v40, %v8143_v57 }
 0x4a6   : > { %v16048_v54 = vadd.f32 %v16047_v1, %v16046_v52  ;;  %v16049_v21 = vpop.f32.mrb[78].mxu0  ;;  %16652 = vmatprep.subr.bf16.mxu0 %v18003_v2  ;;  %v15244_v2 = vrot.slane %v8169_v42, 9  ;;  %v15374_v52 = vcombine.low %v8110_v28, %v8120_v23  ;;  %v8165_v1 = vshll.u32 %v21752_v45, 16  ;;  %v8170_v28 = vld [vmem:[#allocation3 + $0x48] sm:$0xee] }
 0x4a7   : > { %v16050_v13 = vpop.f32.mrb[79].mxu0  ;;  %v15994_v30 = vpop.f32.mrb[52].mxu1  ;;  %v15377_v50 = vcombine.high %v21633_v44, %v8144_v18 }
 0x4a8   : > { %10760 = vmatmul.mubr.bf16.gmra.mrb[176].mxu0 %v15372_v10  ;;  %v16051_v14 = vadd.f32 %v16050_v13, %v16049_v21  ;;  %v15995_v16 = vpop.f32.mrb[53].mxu1  ;;  %v21740_v55 = vadd.f32 %v16048_v54, %v10075_v8  ;;  %v8207_v10 = vsel %vm18675_vm7, %v8205_v34, %v8206_v37  ;;  %v8210_v8 = vrot.slane %v21445_v5, 5 }
 0x4a9   : > { %10767 = vmatprep.mubr.bf16.mxu0 %v15375_v48  ;;  %v21746_v24 = vadd.f32 %v15995_v16, %v15994_v30  ;;  %v15997_v20 = vpop.f32.mrb[54].mxu1  ;;  %v21767_v54 = vcombine.low %v21536_v26, %v21538_v35  ;;  %v8204_v40 = vsel %vm18675_vm7, %v15244_v2, %v8203_v39  ;;  %v8167_v23 = vrot.slane %v8165_v1, 5 }
 0x4aa   : > { %10679 = vmatmul.mubr.bf16.gmra.mrb[152].mxu1 %v21738_v31  ;;  %v15998_v43 = vpop.f32.mrb[55].mxu1  ;;  %v21749_v38 = vadd.f32 %v16051_v14, %v10078_v51  ;;  %v15381_v25 = vcombine.high %v8204_v40, %v8207_v10  ;;  %v8212_v21 = vrot.slane %v8210_v8, 4  ;;  %v8213_v13 = vrot.slane %v21460_v49, 5 }
 0x4ab   : > { %10686 = vmatprep.mubr.bf16.mxu1 %v21744_v36  ;;  %v21754_v62 = vadd.f32 %v15998_v43, %v15997_v20  ;;  %v8168_v5 = vsel %vm18665_vm4, %v21617_v15, %v8167_v23  ;;  %v15376_v30 = vcombine.low %v21633_v44, %v8144_v18  ;;  %v15245_v39 = vrot.slane %v8170_v28, 9 }
 0x4ac   : > { %v8217_v16 = vrot.slane %v21472_v63, 5  ;;  %v10083_v20 = vadd.f32 %v21703_v61, %v21481_v56  ;;  %v8214_v34 = vsel %vm18675_vm7, %v8212_v21, %v8213_v13  ;;  %v15380_v49 = vcombine.low %v8204_v40, %v8207_v10  ;;  %v18002_v63 = vld [vmem:[#allocation8 + $0x80] sm:$0xff]   ;;  %v18006_v21 = vld [vmem:[#allocation8 + $0x88] sm:$0xff]  }
 0x4ad   : > { %v15379_v37 = vcombine.high %v21655_v0, %v8168_v5  ;;  %v8211_v2 = vsel %vm18675_vm7, %v15245_v39, %v8210_v8  ;;  %v10086_v61 = vadd.f32 %v21709_v58, %v21481_v56  ;;  %v8171_v8 = vld [vmem:[#allocation3 + $0x60] sm:$0xee]  ;;  %v15378_v13 = vcombine.low %v21655_v0, %v8168_v5 }
 0x4ae   : > { %v15383_v10 = vcombine.high %v8211_v2, %v8214_v34  ;;  %v8219_v40 = vrot.slane %v8217_v16, 4  ;;  %v18010_v58 = vld [vmem:[#allocation8 + $0xd0] sm:$0xff]  }
 0x4b0   : > { %10768 = vmatmul.mubr.bf16.gmra.mrb[180].mxu0 %v15374_v52 }
 0x4b1   : > { %10775 = vmatprep.mubr.bf16.mxu0 %v15377_v50 }
 0x4b2   : > { %10687 = vmatmul.mubr.bf16.gmra.mrb[156].mxu1 %v21767_v54 }
 0x4b3   : > { %10824 = vmatprep.mubr.bf16.mxu1 %v15381_v25  ;;  %v18005_v25 = vld [vmem:[#allocation8 + $0xc8] sm:$0xff]  }
 0x4b4   : > { %v16000_v26 = vpop.f32.mrb[56].mxu1 }
 0x4b5   : > { %v16052_v48 = vpop.f32.mrb[80].mxu0  ;;  %v16001_v14 = vpop.f32.mrb[57].mxu1 }
 0x4b6   : > { %v16053_v51 = vpop.f32.mrb[81].mxu0  ;;  %v21782_v15 = vadd.f32 %v16001_v14, %v16000_v26  ;;  %v16003_v43 = vpop.f32.mrb[58].mxu1  ;;  %v15246_v26 = vrot.slane %v8171_v8, 9  ;;  %v18011_v14 = vld [vmem:[#allocation8 + $0x90] sm:$0xff]  }
 0x4b7   : > { %v16054_v57 = vadd.f32 %v16053_v51, %v16052_v48  ;;  %v16055_v42 = vpop.f32.mrb[82].mxu0  ;;  %v16004_v52 = vpop.f32.mrb[59].mxu1  ;;  %v8220_v48 = vrot.slane %v21544_v11, 5  ;;  %v8224_v51 = vrot.slane %v21560_v9, 5  ;;  %v10091_v9 = vadd.f32 %v21746_v24, %v21481_v56  ;;  %v18022_v24 = vld [vmem:[#allocation8 + $0xe0] sm:$0xff]  }
 0x4b8   : > { %v16056_v18 = vpop.f32.mrb[83].mxu0  ;;  %10776 = vmatmul.mubr.bf16.gmra.mrb[184].mxu0 %v15376_v30  ;;  %v21789_v50 = vadd.f32 %v16004_v52, %v16003_v43  ;;  %v18016_v43 = vld [vmem:[#allocation8 + $0xd8] sm:$0xff]  }
 0x4b9   : > { %v16057_v1 = vadd.f32 %v16056_v18, %v16055_v42  ;;  %v21791_v23 = vadd.f32 %v16054_v57, %v10083_v20  ;;  %10783 = vmatprep.mubr.bf16.mxu0 %v15379_v37  ;;  %v8221_v30 = vsel %vm18675_vm7, %v8219_v40, %v8220_v48  ;;  %v15382_v57 = vcombine.low %v8211_v2, %v8214_v34  ;;  %v18007_v48 = vld [vmem:[#allocation8 + $0x148] sm:$0xff]  }
 0x4ba   : > { %10825 = vmatmul.mubr.bf16.vlgmr.msra.gmra.mrb[160].mxu1 %v15380_v49  ;;  %v8218_v42 = vsel %vm18675_vm7, %v15246_v26, %v8217_v16  ;;  %v8226_v2 = vrot.slane %v8224_v51, 4  ;;  %v8227_v40 = vrot.slane %v21625_v19, 5  ;;  %v8231_v26 = vrot.slane %v21599_v32, 5  ;;  %v18008_v32 = vld [vmem:[#allocation8 + $0x108] sm:$0xff]  }
 0x4bb   : > { %v21793_v28 = vadd.f32 %v16057_v1, %v10086_v61  ;;  %10832 = vmatprep.mubr.bf16.mxu1 %v15383_v10  ;;  %16589 = vmatpush3.bf16.msra.mxu1 %v18002_v63  ;;  %v15385_v49 = vcombine.high %v8218_v42, %v8221_v30  ;;  %v8172_v1 = vld [vmem:[#allocation3 + $0x78] sm:$0xee]  ;;  %v15384_v19 = vcombine.low %v8218_v42, %v8221_v30 }
 0x4bc   : > { %16590 = vmatprep.subr.bf16.mxu1 %v18005_v25  ;;  %v10094_v25 = vadd.f32 %v21754_v62, %v21481_v56  ;;  %v18023_v62 = vld [vmem:[#allocation8 + $0xa0] sm:$0xff]  }
 0x4bf   : > { %v16006_v39 = vpop.f32.mrb[60].mxu1  ;;  %16591 = vmatpush3.bf16.msra.mxu1 %v18006_v21  ;;  %v18004_v21 = vld [vmem:[#allocation8 + $0x100] sm:$0xff]  }
 0x4c0   : > { %10784 = vmatmul.mubr.bf16.gmra.mrb[188].mxu0 %v15378_v13  ;;  %v16058_v20 = vpop.f32.mrb[84].mxu0  ;;  %v16007_v11 = vpop.f32.mrb[61].mxu1  ;;  %16592 = vmatprep.subr.bf16.mxu1 %v18010_v58  ;;  %v15247_v58 = vrot.slane %v8172_v1, 9  ;;  %v21816_v13 = vsel %vm18675_vm7, %v8226_v2, %v8227_v40  ;;  %v8234_v2 = vrot.slane %v21678_v41, 5  ;;  %v10099_v1 = vadd.f32 %v21782_v15, %v21481_v56 }
 0x4c1   : > { %13649 = vmatprep.mubr.bf16.mxu0 %v21721_v60  ;;  %v16059_v5 = vpop.f32.mrb[85].mxu0  ;;  %v21803_v37 = vadd.f32 %v16007_v11, %v16006_v39  ;;  %v16009_v18 = vpop.f32.mrb[62].mxu1  ;;  %v18017_v60 = vld [vmem:[#allocation8 + $0x98] sm:$0xff]   ;;  %v18028_v11 = vld [vmem:[#allocation8 + $0xe8] sm:$0xff]   ;;  %v10102_v15 = vadd.f32 %v21789_v50, %v21481_v56 }
 0x4c2   : > { %v16060_v52 = vadd.f32 %v16059_v5, %v16058_v20  ;;  %v16061_v63 = vpop.f32.mrb[86].mxu0  ;;  %10833 = vmatmul.mubr.bf16.gmra.mrb[164].mxu1 %v15382_v57  ;;  %v16010_v34 = vpop.f32.mrb[63].mxu1  ;;  %v8225_v20 = vsel %vm18675_vm7, %v15247_v58, %v8224_v51  ;;  %v8238_v58 = vrot.slane %v21670_v27, 5  ;;  %v18040_v27 = vld [vmem:[#allocation8 + $0xf8] sm:$0xff]  }
 0x4c3   : > { %v16062_v61 = vpop.f32.mrb[87].mxu0  ;;  %10840 = vmatprep.mubr.bf16.mxu1 %v15385_v49  ;;  %v21807_v16 = vadd.f32 %v16010_v34, %v16009_v18  ;;  %16593 = vmatpush3.bf16.msra.mxu1 %v18011_v14  ;;  %v21829_v34 = vld [vmem:[#allocation3 + $0xf8] sm:$0xff] }
 0x4c4   : > { %v16063_v10 = vadd.f32 %v16062_v61, %v16061_v63  ;;  %16594 = vmatprep.subr.bf16.mxu1 %v18016_v43  ;;  %v21812_v8 = vadd.f32 %v16060_v52, %v10091_v9  ;;  %v15387_v43 = vcombine.high %v8225_v20, %v21816_v13  ;;  %v18012_v9 = vld [vmem:[#allocation8 + $0x150] sm:$0xff]   ;;  %v8173_v52 = vld [vmem:[#allocation3 + $0x90] sm:$0xee]  ;;  %v18029_v63 = vld [vmem:[#allocation8 + $0xa8] sm:$0xff]  }
 0x4c5   : > { %v18034_v61 = vld [vmem:[#allocation8 + $0xf0] sm:$0xff]  }
 0x4c6   : > { %v21819_v39 = vadd.f32 %v16063_v10, %v10094_v25  ;;  %v18014_v10 = vld [vmem:[#allocation8 + $0x110] sm:$0xff]  }
 0x4c7   : > { %v16092_v14 = vpop.f32.mrb[64].mxu1  ;;  %16595 = vmatpush3.bf16.msra.mxu1 %v18017_v60 }
 0x4c8   : > { %13650 = vmatmul.mubr.bf16.vlgmr.msra.gmra.mrb[192].mxu0 %v21738_v31  ;;  %v16093_v57 = vpop.f32.mrb[65].mxu1  ;;  %16596 = vmatprep.subr.bf16.mxu1 %v18022_v24  ;;  %v8233_v31 = vrot.slane %v8231_v26, 4  ;;  %v21837_v24 = vld [vmem:[#allocation3 + $0xf0] sm:$0xff] }
 0x4c9   : > { %16653 = vmatpush3.bf16.msra.mxu0 %v18004_v21  ;;  %13657 = vmatprep.mubr.bf16.mxu0 %v21744_v36  ;;  %v16094_v5 = vadd.f32 %v16093_v57, %v16092_v14  ;;  %v16095_v49 = vpop.f32.mrb[66].mxu1  ;;  %v15248_v21 = vrot.slane %v8173_v52, 9  ;;  %v15386_v57 = vcombine.low %v8225_v20, %v21816_v13  ;;  %v8174_v13 = vld [vmem:[#allocation3 + $0xa8] sm:$0xee] }
 0x4ca   : > { %10841 = vmatmul.mubr.bf16.gmra.mrb[168].mxu1 %v15384_v19  ;;  %16654 = vmatprep.subr.bf16.mxu0 %v18007_v48  ;;  %v16096_v18 = vpop.f32.mrb[67].mxu1  ;;  %v21841_v41 = vsel %vm18675_vm7, %v8233_v31, %v8234_v2  ;;  %v18018_v48 = vld [vmem:[#allocation8 + $0x158] sm:$0xff]   ;;  %v8241_v31 = vrot.slane %v21707_v46, 5 }
 0x4cb   : > { %v16064_v30 = vpop.f32.mrb[88].mxu0  ;;  %10848 = vmatprep.mubr.bf16.mxu1 %v15387_v43  ;;  %v21827_v51 = vadd.f32 %v16094_v5, %v21524_v53  ;;  %v16097_v42 = vadd.f32 %v16096_v18, %v16095_v49  ;;  %16597 = vmatpush3.bf16.msra.mxu1 %v18023_v62  ;;  %v18035_v62 = vld [vmem:[#allocation8 + $0xb0] sm:$0xff]   ;;  %v18020_v43 = vld [vmem:[#allocation8 + $0x118] sm:$0xff]   ;;  %v8240_v5 = vrot.slane %v8238_v58, 4  ;;  %v18024_v49 = vld [vmem:[#allocation8 + $0x160] sm:$0xff]  }
 0x4cc   : > { %v16065_v36 = vpop.f32.mrb[89].mxu0  ;;  %16598 = vmatprep.subr.bf16.mxu1 %v18028_v11  ;;  %v8232_v11 = vsel %vm18675_vm7, %v15248_v21, %v8231_v26  ;;  %v18041_v26 = vld [vmem:[#allocation8 + $0xb8] sm:$0xff]  }
 0x4cd   : > { %v16066_v60 = vadd.f32 %v16065_v36, %v16064_v30  ;;  %v16067_v25 = vpop.f32.mrb[90].mxu0  ;;  %16655 = vmatpush3.bf16.msra.mxu0 %v18008_v32  ;;  %v21835_v53 = vadd.f32 %v16097_v42, %v21527_v6  ;;  %v15570_v6 = vcombine.high %v21837_v24, %v21829_v34  ;;  %v15389_v50 = vcombine.high %v8232_v11, %v21841_v41  ;;  %v18045_v30 = vld [vmem:[#allocation8 + $0x1c0] sm:$0xff]   ;;  %v21864_v2 = vld [vmem:[#allocation3 + $0x108] sm:$0xff] }
 0x4ce   : > { %v16068_v40 = vpop.f32.mrb[91].mxu0  ;;  %16656 = vmatprep.subr.bf16.mxu0 %v18012_v9  ;;  %v10107_v42 = vadd.f32 %v21803_v37, %v21481_v56  ;;  %v15569_v36 = vcombine.low %v21837_v24, %v21829_v34  ;;  %v15249_v37 = vrot.slane %v8174_v13, 9  ;;  %v21873_v21 = vsel %vm18675_vm7, %v8240_v5, %v8241_v31  ;;  %v18036_v5 = vld [vmem:[#allocation8 + $0x170] sm:$0xff]   ;;  %v21898_v13 = vld [vmem:[#allocation3 + $0x128] sm:$0xff] }
 0x4cf   : > { %v16069_v14 = vadd.f32 %v16068_v40, %v16067_v25  ;;  %16599 = vmatpush3.bf16.msra.mxu1 %v18029_v63  ;;  %v21848_v19 = vadd.f32 %v16066_v60, %v10099_v1  ;;  %v21867_v1 = vrot.slane %v21517_v22, 5  ;;  %v18026_v60 = vld [vmem:[#allocation8 + $0x120] sm:$0xff]  }
 0x4d0   : > { %13658 = vmatmul.mubr.bf16.gmra.mrb[196].mxu0 %v21767_v54  ;;  %16600 = vmatprep.subr.bf16.mxu1 %v18034_v61  ;;  %v21857_v54 = vld [vmem:[#allocation3 + $0x110] sm:$0xff] }
 0x4d1   : > { %13665 = vmatprep.mubr.bf16.mxu0 %v15570_v6  ;;  %16657 = vmatpush3.bf16.msra.mxu0 %v18014_v10  ;;  %v21855_v32 = vadd.f32 %v16069_v14, %v10102_v15  ;;  %v15572_v46 = vcombine.high %v21864_v2, %v21857_v54  ;;  %v10110_v15 = vadd.f32 %v21807_v16, %v21481_v56  ;;  %v8247_v16 = vrot.slane %v21867_v1, 4 }
 0x4d2   : > { %10849 = vmatmul.mubr.bf16.gmra.mrb[172].mxu1 %v15386_v57  ;;  %16658 = vmatprep.subr.bf16.mxu0 %v18018_v48  ;;  %v18030_v48 = vld [vmem:[#allocation8 + $0x168] sm:$0xff]   ;;  %v15388_v6 = vcombine.low %v8232_v11, %v21841_v41 }
 0x4d3   : > { %v16070_v18 = vpop.f32.mrb[92].mxu0  ;;  %10856 = vmatprep.mubr.bf16.mxu1 %v15389_v50  ;;  %16601 = vmatpush3.bf16.msra.mxu1 %v18035_v62  ;;  %v21885_v50 = vsel %vm18675_vm7, %v15249_v37, %v8238_v58  ;;  %v18032_v41 = vld [vmem:[#allocation8 + $0x128] sm:$0xff]   ;;  %v11018_v58 = vshrl.u32 %v21837_v24, 16 }
 0x4d4   : > { %v16071_v20 = vpop.f32.mrb[93].mxu0  ;;  %v16098_v9 = vpop.f32.mrb[68].mxu1  ;;  %16602 = vmatprep.subr.bf16.mxu1 %v18040_v27  ;;  %v15391_v56 = vcombine.high %v21885_v50, %v21873_v21 }
 0x4d5   : > { %v16072_v52 = vadd.f32 %v16071_v20, %v16070_v18  ;;  %v16073_v63 = vpop.f32.mrb[94].mxu0  ;;  %v16099_v61 = vpop.f32.mrb[69].mxu1  ;;  %16659 = vmatpush3.bf16.msra.mxu0 %v18020_v43  ;;  %v21896_v18 = vld [vmem:[#allocation3 + $0x120] sm:$0xff]  ;;  %v11021_v20 = vshll.u32 %v21837_v24, 16 }
 0x4d6   : > { %v16074_v25 = vpop.f32.mrb[95].mxu0  ;;  %v16100_v10 = vadd.f32 %v16099_v61, %v16098_v9  ;;  %v16101_v40 = vpop.f32.mrb[70].mxu1  ;;  %16660 = vmatprep.subr.bf16.mxu0 %v18024_v49  ;;  %v11042_v9 = vshrl.u32 %v21864_v2, 16  ;;  %v15574_v37 = vcombine.high %v21896_v18, %v21898_v13 }
 0x4d7   : > { %v16075_v14 = vadd.f32 %v16074_v25, %v16073_v63  ;;  %v16102_v22 = vpop.f32.mrb[71].mxu1  ;;  %16603 = vmatpush3.bf16.msra.mxu1 %v18041_v26  ;;  %v21878_v62 = vadd.f32 %v16072_v52, %v10107_v42  ;;  %v8248_v26 = vrot.slane %v21724_v33, 5  ;;  %v21912_v33 = vld [vmem:[#allocation3 + $0x138] sm:$0xff]  ;;  %v18038_v25 = vld [vmem:[#allocation8 + $0x130] sm:$0xff]  }
 0x4d8   : > { %13666 = vmatmul.mubr.bf16.gmra.mrb[200].mxu0 %v15569_v36  ;;  %v21881_v57 = vadd.f32 %v16100_v10, %v21558_v4  ;;  %v16103_v27 = vadd.f32 %v16102_v22, %v16101_v40  ;;  %16716 = vmatprep.subr.bf16.mxu1 %v18045_v30  ;;  %v8175_v4 = vld [vmem:[#allocation3 + $0xc0] sm:$0xee]  ;;  %v15571_v30 = vcombine.low %v21864_v2, %v21857_v54  ;;  %v11051_v10 = vshll.u32 %v21857_v54, 16 }
 0x4d9   : > { %13673 = vmatprep.mubr.bf16.mxu0 %v15572_v46  ;;  %16661 = vmatpush3.bf16.msra.mxu0 %v18026_v60  ;;  %v21890_v11 = vadd.f32 %v16075_v14, %v10110_v15  ;;  %v15250_v36 = vrot.slane %v8175_v4, 9  ;;  %v21910_v61 = vsel %vm18675_vm7, %v8247_v16, %v8248_v26  ;;  %v21915_v60 = vrot.slane %v21538_v35, 5  ;;  %v18042_v14 = vld [vmem:[#allocation8 + $0x178] sm:$0xff]   ;;  %v8176_v4 = vld [vmem:[#allocation3 + $0xd8] sm:$0xee]  ;;  %v21939_v26 = vld [vmem:[#allocation3 + $0x150] sm:$0xff] }
 0x4da   : > { %v21893_v43 = vadd.f32 %v16103_v27, %v21567_v59  ;;  %10857 = vmatmul.mubr.bf16.gmra.mrb[176].mxu1 %v15388_v6  ;;  %16662 = vmatprep.subr.bf16.mxu0 %v18030_v48  ;;  %v15390_v15 = vcombine.low %v21885_v50, %v21873_v21  ;;  %v18222_v59 = vld [vmem:[#allocation3 + $0xd0] sm:$0x11] }
 0x4db   : > { %v16156_v49 = vpop.f32.mrb[96].mxu0  ;;  %10864 = vmatprep.mubr.bf16.mxu1 %v15391_v56  ;;  %v21929_v56 = vsel %vm18675_vm7, %v15250_v36, %v21867_v1  ;;  %v18044_v36 = vld [vmem:[#allocation8 + $0x138] sm:$0xff]  }
 0x4dc   : > { %v16157_v31 = vpop.f32.mrb[97].mxu0  ;;  %v15393_v21 = vcombine.high %v21929_v56, %v21910_v61 }
 0x4dd   : > { %v16158_v42 = vadd.f32 %v16157_v31, %v16156_v49  ;;  %v16159_v52 = vpop.f32.mrb[98].mxu0  ;;  %v16104_v63 = vpop.f32.mrb[72].mxu1  ;;  %16663 = vmatpush3.bf16.msra.mxu0 %v18032_v41  ;;  %v21931_v41 = vld [vmem:[#allocation3 + $0x140] sm:$0xff] }
 0x4de   : > { %v16160_v46 = vpop.f32.mrb[99].mxu0  ;;  %v16105_v48 = vpop.f32.mrb[73].mxu1  ;;  %16664 = vmatprep.subr.bf16.mxu0 %v18036_v5  ;;  %v18047_v5 = vld [vmem:[#allocation8 + $0x240] sm:$0xff]   ;;  %v23829_v24 = vcombine.low %v21912_v33, %v21931_v41 }
 0x4df   : > { %v21924_v22 = vadd.f32 %v16158_v42, %v21827_v51  ;;  %v16161_v35 = vadd.f32 %v16160_v46, %v16159_v52  ;;  %v16106_v6 = vadd.f32 %v16105_v48, %v16104_v63  ;;  %v16107_v27 = vpop.f32.mrb[74].mxu1  ;;  %v15573_v51 = vcombine.low %v21896_v18, %v21898_v13  ;;  %v21948_v63 = vld [vmem:[#allocation3 + $0x158] sm:$0xff] }
 0x4e0   : > { %13674 = vmatmul.mubr.bf16.gmra.mrb[204].mxu0 %v15571_v30  ;;  %v16108_v49 = vpop.f32.mrb[75].mxu1  ;;  %v23611_v52 = vrot.slane %v21915_v60, 4  ;;  %v15576_v46 = vcombine.high %v21912_v33, %v21931_v41  ;;  %v15251_v48 = vrot.slane %v8176_v4, 9 }
 0x4e1   : > { %v21942_v31 = vadd.f32 %v16161_v35, %v21835_v53  ;;  %13681 = vmatprep.mubr.bf16.mxu0 %v15574_v37  ;;  %v21945_v42 = vadd.f32 %v16106_v6, %v21699_v47  ;;  %v16109_v30 = vadd.f32 %v16108_v49, %v16107_v27  ;;  %16665 = vmatpush3.bf16.msra.mxu0 %v18038_v25  ;;  %v11027_v53 = vshll.u32 %v21829_v34, 16 }
 0x4e2   : > { %10865 = vmatmul.mubr.bf16.gmra.mrb[180].mxu1 %v15390_v15  ;;  %16666 = vmatprep.subr.bf16.mxu0 %v18042_v14  ;;  %v11031_v37 = vshrl.u32 %v21829_v34, 16  ;;  %v8255_v6 = vrot.slane %v21752_v45, 5  ;;  %v15392_v14 = vcombine.low %v21929_v56, %v21910_v61  ;;  %v21966_v4 = vsel %vm18675_vm7, %v15251_v48, %v21915_v60  ;;  %v11161_v45 = vld [vmem:[#allocation3 + $0xc0] sm:$0xee]  ;;  %v21977_v61 = vld [vmem:[#allocation3 + $0x170] sm:$0xff] }
 0x4e3   : > { %v16162_v47 = vpop.f32.mrb[100].mxu0  ;;  %v21955_v35 = vadd.f32 %v16109_v30, %v21705_v29  ;;  %10872 = vmatprep.mubr.bf16.mxu1 %v15393_v21  ;;  %v11020_v56 = vrot.slane %v11018_v58, 4  ;;  %v11023_v48 = vrot.slane %v11021_v20, 5  ;;  %v21992_v58 = vld [vmem:[#allocation3 + $0x168] sm:$0xff] }
 0x4e4   : > { %v16163_v27 = vpop.f32.mrb[101].mxu0  ;;  %v21975_v15 = vsel %vm18675_vm7, %v23611_v52, %v8255_v6  ;;  %v11055_v6 = vshrl.u32 %v21857_v54, 16 }
 0x4e5   : > { %v16164_v21 = vadd.f32 %v16163_v27, %v16162_v47  ;;  %v16165_v30 = vpop.f32.mrb[102].mxu0  ;;  %v16110_v50 = vpop.f32.mrb[76].mxu1  ;;  %16667 = vmatpush3.bf16.msra.mxu0 %v18044_v36  ;;  %v21983_v47 = vrot.slane %v11027_v53, 5  ;;  %v11033_v27 = vrot.slane %v11031_v37, 4  ;;  %v15541_v37 = vrot.slane %v11161_v45, 9 }
 0x4e6   : > { %v16166_v29 = vpop.f32.mrb[103].mxu0  ;;  %v16111_v40 = vpop.f32.mrb[77].mxu1  ;;  %16780 = vmatprep.subr.bf16.mxu0 %v18047_v5  ;;  %v15395_v5 = vcombine.high %v21966_v4, %v21975_v15  ;;  %v22013_v45 = vrot.slane %v11051_v10, 5  ;;  %v15394_v10 = vcombine.low %v21966_v4, %v21975_v15  ;;  %v22036_v15 = vld [vmem:[#allocation3 + $0x118] sm:$0x11] }
 0x4e7   : > { %v21988_v49 = vadd.f32 %v16164_v21, %v21881_v57  ;;  %v16167_v36 = vadd.f32 %v16166_v29, %v16165_v30  ;;  %v16112_v25 = vadd.f32 %v16111_v40, %v16110_v50  ;;  %v16113_v52 = vpop.f32.mrb[78].mxu1  ;;  %v11198_v57 = vrot.slane %v18222_v59, 5  ;;  %v22004_v21 = vld [vmem:[#allocation3 + $0x100] sm:$0x11] }
 0x4e8   : > { %13682 = vmatmul.mubr.bf16.gmra.mrb[208].mxu0 %v15573_v51  ;;  %v16114_v20 = vpop.f32.mrb[79].mxu1  ;;  %v11024_v51 = vor.u32 %v11023_v48, %v11020_v56  ;;  %v11034_v59 = vor.u32 %v11033_v27, %v21983_v47  ;;  %v11037_v27 = vshll.u32 %v22004_v21, 16 }
 0x4e9   : > { %v21999_v29 = vadd.f32 %v16167_v36, %v21893_v43  ;;  %13689 = vmatprep.mubr.bf16.mxu0 %v15576_v46  ;;  %v22002_v40 = vadd.f32 %v16112_v25, %v21740_v55  ;;  %v16115_v50 = vadd.f32 %v16114_v20, %v16113_v52  ;;  %v22010_v30 = vsel %vm18675_vm7, %v8247_v16, %v11198_v57  ;;  %v11162_v25 = vld [vmem:[#allocation3 + $0xd8] sm:$0xee] }
 0x4ea   : > { %10873 = vmatmul.mubr.bf16.gmra.mrb[184].mxu1 %v15392_v14  ;;  %v11057_v43 = vrot.slane %v11055_v6, 4  ;;  %v11044_v14 = vrot.slane %v11042_v9, 4  ;;  %v23826_v16 = vshll.u32 %v21864_v2, 16  ;;  %v18223_v6 = vld [vmem:[#allocation3 + $0xe8] sm:$0x11]  ;;  %v23827_v52 = vrot.slane %v21915_v60, 4 }
 0x4eb   : > { %v16168_v46 = vpop.f32.mrb[104].mxu0  ;;  %v22016_v55 = vadd.f32 %v16115_v50, %v21749_v38  ;;  %10880 = vmatprep.mubr.bf16.mxu1 %v15395_v5  ;;  %v22029_v38 = vsel %vm18675_vm7, %v15541_v37, %v21867_v1  ;;  %v11205_v36 = vrot.slane %v18223_v6, 5  ;;  %v11025_v50 = vrot.slane %v11024_v51, 4 }
 0x4ec   : > { %v11047_v56 = vrot.slane %v23826_v16, 5  ;;  %v16169_v48 = vpop.f32.mrb[105].mxu0  ;;  %v11035_v1 = vrot.slane %v11034_v59, 4  ;;  %v15542_v37 = vrot.slane %v11162_v25, 9  ;;  %v11039_v25 = vrot.slane %v11037_v27, 5 }
 0x4ed   : > { %v16170_v20 = vadd.f32 %v16169_v48, %v16168_v46  ;;  %v16171_v5 = vpop.f32.mrb[106].mxu0  ;;  %v16116_v57 = vpop.f32.mrb[80].mxu1  ;;  %v22042_v46 = vsel %vm18675_vm7, %v23827_v52, %v11205_v36  ;;  %v11058_v48 = vor.u32 %v11057_v43, %v22013_v45  ;;  %v11061_v43 = vshll.u32 %v22036_v15, 16 }
 0x4ee   : > { %v16172_v4 = vpop.f32.mrb[107].mxu0  ;;  %v16117_v16 = vpop.f32.mrb[81].mxu1  ;;  %v11048_v53 = vor.u32 %v11047_v56, %v11044_v14  ;;  %v22054_v52 = vsel %vm18675_vm7, %v15542_v37, %v21915_v60  ;;  %v23831_v14 = vcombine.high %v21939_v26, %v21948_v63  ;;  %v22070_v60 = vsel %vm18665_vm4, %v11025_v50, %v21983_v47 }
 0x4ef   : > { %v22046_v6 = vadd.f32 %v16170_v20, %v21945_v42  ;;  %v16173_v2 = vadd.f32 %v16172_v4, %v16171_v5  ;;  %v16118_v9 = vadd.f32 %v16117_v16, %v16116_v57  ;;  %v16119_v51 = vpop.f32.mrb[82].mxu1  ;;  %v11209_v42 = vrot.slane %v21829_v34, 5  ;;  %v11163_v20 = vld [vmem:[#allocation3 + $0xf0] sm:$0xee] }
 0x4f0   : > { %13690 = vmatmul.mubr.bf16.gmra.mrb[212].mxu0 %v23829_v24  ;;  %v16120_v59 = vpop.f32.mrb[83].mxu1  ;;  %v22074_v34 = vsel %vm18665_vm4, %v11035_v1, %v11039_v25  ;;  %v11059_v27 = vrot.slane %v11058_v48, 4  ;;  %v11075_v5 = vshll.u32 %v21898_v13, 16  ;;  %v23832_v47 = vcombine.high %v21633_v44, %v21638_v12 }
 0x4f1   : > { %23828 = vst [vmem:[#allocation24_spill] sm:$0xff] %v22046_v6  ;;  %v22059_v36 = vadd.f32 %v16173_v2, %v21955_v35  ;;  %13697 = vmatprep.mubr.bf16.mxu0 %v23831_v14  ;;  %v22065_v24 = vadd.f32 %v16118_v9, %v21791_v23  ;;  %v16121_v56 = vadd.f32 %v16120_v59, %v16119_v51  ;;  %v11079_v9 = vshrl.u32 %v21898_v13, 16 }
 0x4f2   : > { %10881 = vmatmul.mubr.bf16.gmra.mrb[188].mxu1 %v15394_v10  ;;  %v11049_v10 = vrot.slane %v11048_v53, 4  ;;  %v11063_v4 = vrot.slane %v11061_v43, 5  ;;  %v11211_v16 = vrot.slane %v11209_v42, 4  ;;  %v23833_v1 = vshrl.u32 %v21896_v18, 16  ;;  %v18046_v53 = vld [vmem:[#allocation8 + $0x180] sm:$0xff]  }
 0x4f3   : > { %23830 = vst [vmem:[#allocation21_spill] sm:$0xff] %v22059_v36  ;;  %v16174_v23 = vpop.f32.mrb[108].mxu0  ;;  %v22080_v57 = vadd.f32 %v16121_v56, %v21793_v28  ;;  %13746 = vmatprep.mubr.bf16.mxu1 %v23832_v47  ;;  %v23834_v48 = vshll.u32 %v21896_v18, 16  ;;  %v15543_v56 = vrot.slane %v11163_v20, 9  ;;  %v22096_v47 = vld [vmem:[#allocation3 + $0x130] sm:$0x11]  ;;  %v23836_v6 = vcombine.low %v21939_v26, %v21948_v63 }
 0x4f4   : > { %v16175_v50 = vpop.f32.mrb[109].mxu0  ;;  %v11068_v37 = vrot.slane %v23833_v1, 4  ;;  %v22100_v1 = vsel %vm18665_vm4, %v11059_v27, %v11063_v4  ;;  %v11212_v18 = vrot.slane %v22004_v21, 5  ;;  %v11081_v36 = vrot.slane %v11079_v9, 4  ;;  %v18049_v4 = vld [vmem:[#allocation8 + $0x1c8] sm:$0xff]  }
 0x4f5   : > { %v11071_v28 = vrot.slane %v23834_v48, 5  ;;  %v16176_v51 = vadd.f32 %v16175_v50, %v16174_v23  ;;  %v16177_v59 = vpop.f32.mrb[110].mxu0  ;;  %v16122_v25 = vpop.f32.mrb[84].mxu1  ;;  %v22103_v23 = vrot.slane %v11075_v5, 5  ;;  %v11216_v50 = vrot.slane %v21857_v54, 5 }
 0x4f6   : > { %v16178_v43 = vpop.f32.mrb[111].mxu0  ;;  %v16123_v2 = vpop.f32.mrb[85].mxu1  ;;  %v22115_v21 = vsel %vm18665_vm4, %v11049_v10, %v22013_v45  ;;  %v22119_v54 = vsel %vm18675_vm7, %v15543_v56, %v11209_v42  ;;  %v11085_v10 = vshll.u32 %v22096_v47, 16  ;;  %v11164_v42 = vld [vmem:[#allocation3 + $0x108] sm:$0xee] }
 0x4f7   : > { %v22107_v48 = vadd.f32 %v16176_v51, %v22002_v40  ;;  %v16179_v35 = vadd.f32 %v16178_v43, %v16177_v59  ;;  %v16124_v14 = vadd.f32 %v16123_v2, %v16122_v25  ;;  %v16125_v20 = vpop.f32.mrb[86].mxu1  ;;  %v22123_v40 = vsel %vm18675_vm7, %v11211_v16, %v11212_v18  ;;  %v22165_v59 = vld [vmem:[#allocation3 + $0x108] sm:$0xff] }
 0x4f8   : > { %13698 = vmatmul.mubr.bf16.gmra.mrb[216].mxu0 %v23836_v6  ;;  %v16126_v27 = vpop.f32.mrb[87].mxu1  ;;  %v11072_v5 = vor.u32 %v11071_v28, %v11068_v37  ;;  %v23838_v6 = vcombine.high %v21992_v58, %v21977_v61  ;;  %v23839_v51 = vcombine.low %v21633_v44, %v21638_v12  ;;  %v23841_v28 = vshll.u32 %v21912_v33, 16  ;;  %v18050_v12 = vld [vmem:[#allocation8 + $0x188] sm:$0xff]   ;;  %23844 = vst [vmem:[#allocation26_spill] sm:$0xff] %v22165_v59 }
 0x4f9   : > { %23835 = vst [vmem:[#allocation23_spill] sm:$0xff] %v22107_v48  ;;  %v22126_v2 = vadd.f32 %v16179_v35, %v22016_v55  ;;  %v22132_v9 = vadd.f32 %v16124_v14, %v21812_v8  ;;  %v16127_v45 = vadd.f32 %v16126_v27, %v16125_v20  ;;  %v11218_v55 = vrot.slane %v11216_v50, 4  ;;  %v18053_v20 = vld [vmem:[#allocation8 + $0x1d0] sm:$0xff]  }
 0x4fa   : > { %13705 = vmatprep.mubr.bf16.mxu0 %v23838_v6  ;;  %13747 = vmatmul.mubr.bf16.vlgmr.msra.gmra.mrb[192].mxu1 %v23839_v51  ;;  %v23840_v35 = vshrl.u32 %v21912_v33, 16  ;;  %v22146_v8 = vrot.slane %v23841_v28, 5  ;;  %v23842_v44 = vcombine.high %v21655_v0, %v21660_v7  ;;  %v11082_v43 = vor.u32 %v11081_v36, %v22103_v23  ;;  %v22158_v33 = vld [vmem:[#allocation3 + $0x148] sm:$0x11] }
 0x4fb   : > { %23837 = vst [vmem:[#allocation33_spill] sm:$0xff] %v22126_v2  ;;  %v16180_v25 = vpop.f32.mrb[112].mxu0  ;;  %v22150_v14 = vadd.f32 %v16127_v45, %v21819_v39  ;;  %16717 = vmatpush3.bf16.msra.mxu1 %v18046_v53  ;;  %23843 = vst [vmem:[#allocation25_spill] sm:$0xff] %v22158_v33  ;;  %v15544_v27 = vrot.slane %v11164_v42, 9  ;;  %v11219_v39 = vrot.slane %v22036_v15, 5  ;;  %v11099_v6 = vshll.u32 %v21931_v41, 16 }
 0x4fc   : > { %v22142_v37 = vrot.slane %v23840_v35, 4  ;;  %13754 = vmatprep.mubr.bf16.mxu1 %v23842_v44  ;;  %v16181_v18 = vpop.f32.mrb[113].mxu0  ;;  %16718 = vmatprep.subr.bf16.mxu1 %v18049_v4  ;;  %v11103_v45 = vshrl.u32 %v21931_v41, 16  ;;  %v11073_v44 = vrot.slane %v11072_v5, 4  ;;  %v11087_v36 = vrot.slane %v11085_v10, 5  ;;  %v18054_v2 = vld [vmem:[#allocation8 + $0x190] sm:$0xff]  }
 0x4fd   : > { %v16182_v51 = vadd.f32 %v16181_v18, %v16180_v25  ;;  %v16183_v53 = vpop.f32.mrb[114].mxu0  ;;  %v16128_v35 = vpop.f32.mrb[88].mxu1  ;;  %v22169_v42 = vsel %vm18675_vm7, %v15544_v27, %v11216_v50  ;;  %v22173_v15 = vsel %vm18675_vm7, %v11218_v55, %v11219_v39  ;;  %v11109_v18 = vshll.u32 %v22158_v33, 16  ;;  %v11165_v50 = vld [vmem:[#allocation3 + $0x120] sm:$0xee]  ;;  %v18057_v39 = vld [vmem:[#allocation8 + $0x1d8] sm:$0xff]  }
 0x4fe   : > { %v16184_v56 = vpop.f32.mrb[115].mxu0  ;;  %v16129_v4 = vpop.f32.mrb[89].mxu1  ;;  %v11096_v25 = vor.u32 %v22146_v8, %v22142_v37  ;;  %v11083_v48 = vrot.slane %v11082_v43, 4  ;;  %v23845_v27 = vcombine.low %v21992_v58, %v21977_v61  ;;  %v11101_v37 = vrot.slane %v11099_v6, 5 }
 0x4ff   : > { %v22179_v5 = vadd.f32 %v16182_v51, %v22065_v24  ;;  %v16185_v10 = vadd.f32 %v16184_v56, %v16183_v53  ;;  %v16130_v28 = vadd.f32 %v16129_v4, %v16128_v35  ;;  %v16131_v16 = vpop.f32.mrb[90].mxu1  ;;  %16719 = vmatpush3.bf16.msra.mxu1 %v18050_v12  ;;  %v11105_v8 = vrot.slane %v11103_v45, 4  ;;  %v22208_v35 = vld [vmem:[#allocation3 + $0xf8] sm:$0xff]  ;;  %v22222_v4 = vld [vmem:[#allocation3 + $0x120] sm:$0xff] }
 0x500   : > { %13706 = vmatmul.mubr.bf16.gmra.mrb[220].mxu0 %v23845_v27  ;;  %v16132_v55 = vpop.f32.mrb[91].mxu1  ;;  %16720 = vmatprep.subr.bf16.mxu1 %v18053_v20  ;;  %v11322_v33 = vshrl.u32 %v22165_v59, 16  ;;  %v11325_v24 = vshll.u32 %v22165_v59, 16  ;;  %v23847_v12 = vcombine.high %v22029_v38, %v22010_v30  ;;  %v11223_v20 = vrot.slane %v21898_v13, 5  ;;  %23849 = vst [vmem:[#allocation28_spill] sm:$0xff] %v22208_v35  ;;  %v18061_v27 = vld [vmem:[#allocation8 + $0x1e0] sm:$0xff]  }
 0x501   : > { %v22187_v56 = vadd.f32 %v16185_v10, %v22080_v57  ;;  %v22193_v43 = vadd.f32 %v16130_v28, %v21848_v19  ;;  %v16133_v51 = vadd.f32 %v16132_v55, %v16131_v16  ;;  %v23848_v6 = vcombine.low %v21655_v0, %v21660_v7  ;;  %v18062_v57 = vld [vmem:[#allocation8 + $0x1a0] sm:$0xff]  }
 0x502   : > { %13843 = vmatprep.mubr.bf16.mxu0 %v23847_v12  ;;  %v22202_v45 = vsel %vm18665_vm4, %v11073_v44, %v22103_v23  ;;  %v15545_v19 = vrot.slane %v11165_v50, 9  ;;  %v23850_v0 = vcombine.high %v22070_v60, %v22074_v34  ;;  %v22218_v7 = vsel %vm18665_vm4, %v11083_v48, %v11087_v36  ;;  %v18058_v23 = vld [vmem:[#allocation8 + $0x198] sm:$0xff]   ;;  %v18048_v36 = vld [vmem:[#allocation8 + $0x200] sm:$0xff]  }
 0x503   : > { %23846 = vst [vmem:[#allocation27_spill] sm:$0xff] %v22187_v56  ;;  %13755 = vmatmul.mubr.bf16.gmra.mrb[196].mxu1 %v23848_v6  ;;  %v16186_v16 = vpop.f32.mrb[116].mxu0  ;;  %v22211_v13 = vadd.f32 %v16133_v51, %v21855_v32  ;;  %v11097_v28 = vrot.slane %v11096_v25, 4  ;;  %v22220_v44 = vrot.slane %v11109_v18, 5  ;;  %v11106_v50 = vor.u32 %v11105_v8, %v11101_v37  ;;  %v11571_v56 = vld [vmem:[#allocation3 + $0x118] sm:$0x11] }
 0x504   : > { %13762 = vmatprep.mubr.bf16.mxu1 %v23850_v0  ;;  %16721 = vmatpush3.bf16.msra.mxu1 %v18054_v2  ;;  %v16187_v10 = vpop.f32.mrb[117].mxu0  ;;  %v22226_v55 = vrot.slane %v11322_v33, 4  ;;  %v22228_v2 = vrot.slane %v11325_v24, 5  ;;  %v22232_v25 = vsel %vm18675_vm7, %v15545_v19, %v11223_v20  ;;  %v11225_v18 = vrot.slane %v11223_v20, 4  ;;  %v18051_v0 = vld [vmem:[#allocation8 + $0x248] sm:$0xff]  }
 0x505   : > { %16722 = vmatprep.subr.bf16.mxu1 %v18057_v39  ;;  %v16188_v12 = vadd.f32 %v16187_v10, %v16186_v16  ;;  %v16189_v48 = vpop.f32.mrb[118].mxu0  ;;  %v16134_v51 = vpop.f32.mrb[92].mxu1  ;;  %v22235_v39 = vrot.slane %v22208_v35, 5  ;;  %v11226_v24 = vrot.slane %v22096_v47, 5  ;;  %v11346_v16 = vshrl.u32 %v22222_v4, 16  ;;  %v18056_v10 = vld [vmem:[#allocation8 + $0x210] sm:$0xff]  }
 0x506   : > { %23851 = vst [vmem:[#allocation41_spill] sm:$0xff] %v22226_v55  ;;  %v16190_v8 = vpop.f32.mrb[119].mxu0  ;;  %v16135_v6 = vpop.f32.mrb[93].mxu1  ;;  %v11349_v59 = vshll.u32 %v22222_v4, 16  ;;  %v11770_v35 = vld [vmem:[#allocation3 + $0xf0] sm:$0xee]  ;;  %v23853_v33 = vcombine.low %v22029_v38, %v22010_v30  ;;  %v23854_v30 = vcombine.high %v22054_v52, %v22042_v46 }
 0x507   : > { %23852 = vst [vmem:[#allocation29_spill] sm:$0xff] %v22235_v39  ;;  %v22244_v19 = vadd.f32 %v16188_v12, %v22132_v9  ;;  %v16191_v20 = vadd.f32 %v16190_v8, %v16189_v48  ;;  %v16136_v32 = vadd.f32 %v16135_v6, %v16134_v51  ;;  %v16137_v53 = vpop.f32.mrb[94].mxu1  ;;  %v22254_v9 = vsel %vm18665_vm4, %v11097_v28, %v11101_v37  ;;  %v18065_v48 = vld [vmem:[#allocation8 + $0x1e8] sm:$0xff]   ;;  %v11570_v51 = vld [vmem:[#allocation3 + $0x100] sm:$0x11]  ;;  %v22266_v28 = vld [vmem:[#allocation3 + $0x110] sm:$0xff] }
 0x508   : > { %16723 = vmatpush3.bf16.msra.mxu1 %v18058_v23  ;;  %13844 = vmatmul.mubr.bf16.vlgmr.msra.gmra.mrb[224].mxu0 %v23853_v33  ;;  %v16138_v47 = vpop.f32.mrb[95].mxu1  ;;  %v11107_v12 = vrot.slane %v11106_v50, 4  ;;  %v11123_v23 = vshll.u32 %v21948_v63, 16  ;;  %v18052_v37 = vld [vmem:[#allocation8 + $0x208] sm:$0xff]   ;;  %v23617_v50 = vrot.slane %v22235_v39, 4  ;;  %v23856_v33 = vshrl.u32 %v21939_v26, 16 }
 0x509   : > { %16724 = vmatprep.subr.bf16.mxu1 %v18061_v27  ;;  %v22258_v8 = vadd.f32 %v16191_v20, %v22150_v14  ;;  %16781 = vmatpush3.bf16.msra.mxu0 %v18048_v36  ;;  %v22264_v38 = vadd.f32 %v16136_v32, %v21878_v62  ;;  %v16139_v6 = vadd.f32 %v16138_v47, %v16137_v53  ;;  %v18055_v14 = vld [vmem:[#allocation8 + $0x250] sm:$0xff]   ;;  %v11127_v53 = vshrl.u32 %v21948_v63, 16 }
 0x50a   : > { %13851 = vmatprep.mubr.bf16.mxu0 %v23854_v30  ;;  %v23855_v27 = vcombine.low %v22070_v60, %v22074_v34  ;;  %16782 = vmatprep.subr.bf16.mxu0 %v18051_v0  ;;  %v22274_v36 = vsel %vm18675_vm7, %v11225_v18, %v11226_v24  ;;  %v22278_v62 = vrot.slane %v23856_v33, 4  ;;  %v15557_v32 = vrot.slane %v11770_v35, 9  ;;  %v18066_v34 = vld [vmem:[#allocation8 + $0x1a8] sm:$0xff]  }
 0x50b   : > { %v16192_v20 = vpop.f32.mrb[120].mxu0  ;;  %v22282_v47 = vadd.f32 %v16139_v6, %v21890_v11  ;;  %v23857_v60 = vcombine.high %v22115_v21, %v22100_v1  ;;  %v22287_v0 = vld [vmem:[#allocation3 + $0x138] sm:$0xff]  ;;  %v11807_v18 = vrot.slane %v11570_v51, 5  ;;  %v22289_v24 = vrot.slane %v11346_v16, 4 }
 0x50c   : > { %13763 = vmatmul.mubr.bf16.gmra.mrb[200].mxu1 %v23855_v27  ;;  %v22291_v30 = vrot.slane %v11349_v59, 5  ;;  %v16193_v27 = vpop.f32.mrb[121].mxu0  ;;  %v22296_v35 = vsel %vm18665_vm4, %v11107_v12, %v22220_v44  ;;  %v23860_v11 = vshll.u32 %v21939_v26, 16  ;;  %v22302_v33 = vrot.slane %v11123_v23, 5 }
 0x50d   : > { %13770 = vmatprep.mubr.bf16.mxu1 %v23857_v60  ;;  %16725 = vmatpush3.bf16.msra.mxu1 %v18062_v57  ;;  %23858 = vst [vmem:[#allocation32_spill] sm:$0xff] %v22289_v24  ;;  %v18069_v57 = vld [vmem:[#allocation8 + $0x1f0] sm:$0xff]   ;;  %v22305_v51 = vrot.slane %v22266_v28, 5  ;;  %v16194_v16 = vadd.f32 %v16193_v27, %v16192_v20  ;;  %v16195_v59 = vpop.f32.mrb[122].mxu0  ;;  %v16220_v60 = vpop.f32.mrb[96].mxu1  ;;  %v22310_v44 = vsel %vm18675_vm7, %v15557_v32, %v22235_v39  ;;  %v22320_v20 = vrot.slane %v11127_v53, 4 }
 0x50e   : > { %23859 = vst [vmem:[#allocation30_spill] sm:$0xff] %v22291_v30  ;;  %v22300_v6 = vrot.slane %v23860_v11, 5  ;;  %16726 = vmatprep.subr.bf16.mxu1 %v18065_v48  ;;  %16783 = vmatpush3.bf16.msra.mxu0 %v18052_v37  ;;  %23862 = vst [vmem:[#allocation34_spill] sm:$0xff] %v22310_v44  ;;  %v22316_v26 = vsel %vm18675_vm7, %v23617_v50, %v11807_v18  ;;  %v16196_v23 = vpop.f32.mrb[123].mxu0  ;;  %v16221_v48 = vpop.f32.mrb[97].mxu1  ;;  %v18059_v37 = vld [vmem:[#allocation8 + $0x258] sm:$0xff]   ;;  %v23864_v30 = vcombine.low %v22054_v52, %v22042_v46 }
 0x50f   : > { %23861 = vst [vmem:[#allocation31_spill] sm:$0xff] %v22305_v51  ;;  %23863 = vst [vmem:[#allocation36_spill] sm:$0xff] %v22316_v26  ;;  %16784 = vmatprep.subr.bf16.mxu0 %v18055_v14  ;;  %v11370_v27 = vshrl.u32 %v22287_v0, 16  ;;  %v22328_v18 = vadd.f32 %v16194_v16, %v22193_v43  ;;  %v16197_v50 = vadd.f32 %v16196_v23, %v16195_v59  ;;  %v16223_v12 = vpop.f32.mrb[98].mxu1  ;;  %v18070_v24 = vld [vmem:[#allocation8 + $0x1b0] sm:$0xff]   ;;  %v11373_v14 = vshll.u32 %v22287_v0, 16 }
 0x510   : > { %v16222_v39 = vadd.f32 %v16221_v48, %v16220_v60  ;;  %v11771_v53 = vld [vmem:[#allocation3 + $0x108] sm:$0xee]  ;;  %13852 = vmatmul.mubr.bf16.gmra.mrb[228].mxu0 %v23864_v30  ;;  %v16224_v55 = vpop.f32.mrb[99].mxu1  ;;  %v11120_v16 = vor.u32 %v22300_v6, %v22278_v62  ;;  %v23623_v59 = vrot.slane %v22305_v51, 4  ;;  %v23865_v46 = vcombine.high %v22119_v54, %v22123_v40  ;;  %v22372_v11 = vld [vmem:[#allocation3 + $0x138] sm:$0xee] }
 0x511   : > { %16727 = vmatpush3.bf16.msra.mxu1 %v18066_v34  ;;  %v18074_v34 = vld [vmem:[#allocation8 + $0x1f8] sm:$0xff]   ;;  %v22343_v23 = vadd.f32 %v16197_v50, %v22211_v13  ;;  %v16225_v30 = vadd.f32 %v16224_v55, %v16223_v12  ;;  %v23866_v6 = vcombine.low %v22115_v21, %v22100_v1  ;;  %v22356_v13 = vld [vmem:[#allocation3 + $0x160] sm:$0x11]  ;;  %v11130_v50 = vor.u32 %v22320_v20, %v22302_v33  ;;  %v11572_v26 = vld [vmem:[#allocation3 + $0x130] sm:$0x11] }
 0x512   : > { %16728 = vmatprep.subr.bf16.mxu1 %v18069_v57  ;;  %13859 = vmatprep.mubr.bf16.mxu0 %v23865_v46  ;;  %v22349_v52 = vadd.f32 %v16222_v39, %v21924_v22  ;;  %v18060_v48 = vld [vmem:[#allocation8 + $0x218] sm:$0xff]   ;;  %v18063_v57 = vld [vmem:[#allocation8 + $0x260] sm:$0xff]   ;;  %v15558_v22 = vrot.slane %v11771_v53, 9  ;;  %v11814_v39 = vrot.slane %v11571_v56, 5  ;;  %v23867_v12 = vcombine.high %v22202_v45, %v22218_v7  ;;  %v11772_v44 = vld [vmem:[#allocation3 + $0x120] sm:$0xee] }
 0x513   : > { %16785 = vmatpush3.bf16.msra.mxu0 %v18056_v10  ;;  %v22351_v62 = vld [vmem:[#allocation3 + $0x128] sm:$0xff]  ;;  %v16198_v55 = vpop.f32.mrb[124].mxu0  ;;  %v22362_v10 = vadd.f32 %v16225_v30, %v21942_v31  ;;  %v11147_v1 = vshll.u32 %v21977_v61, 16  ;;  %v11151_v56 = vshrl.u32 %v21977_v61, 16  ;;  %v18080_v31 = vld [vmem:[#allocation8 + $0x2c0] sm:$0xff]  }
 0x514   : > { %13771 = vmatmul.mubr.bf16.gmra.mrb[204].mxu1 %v23866_v6  ;;  %16786 = vmatprep.subr.bf16.mxu0 %v18059_v37  ;;  %v18075_v21 = vld [vmem:[#allocation8 + $0x1b8] sm:$0xff]   ;;  %v22368_v37 = vrot.slane %v11370_v27, 4  ;;  %v22370_v6 = vrot.slane %v11373_v14, 5  ;;  %v16199_v20 = vpop.f32.mrb[125].mxu0  ;;  %v22376_v53 = vrot.slane %v22351_v62, 5  ;;  %v22381_v30 = vsel %vm18675_vm7, %v15558_v22, %v22305_v51 }
 0x515   : > { %13778 = vmatprep.mubr.bf16.mxu1 %v23867_v12  ;;  %16729 = vmatpush3.bf16.msra.mxu1 %v18070_v24  ;;  %23869 = vst [vmem:[#allocation35_spill] sm:$0xff] %v22381_v30  ;;  %v22387_v24 = vsel %vm18675_vm7, %v23623_v59, %v11814_v39  ;;  %v16200_v27 = vadd.f32 %v16199_v20, %v16198_v55  ;;  %v16201_v14 = vpop.f32.mrb[126].mxu0  ;;  %v16226_v12 = vpop.f32.mrb[100].mxu1  ;;  %v11121_v55 = vrot.slane %v11120_v16, 4  ;;  %v11133_v20 = vshll.u32 %v22356_v13, 16  ;;  %v18067_v59 = vld [vmem:[#allocation8 + $0x268] sm:$0xff]  }
 0x516   : > { %16730 = vmatprep.subr.bf16.mxu1 %v18074_v34  ;;  %23868 = vst [vmem:[#allocation38_spill] sm:$0xff] %v22376_v53  ;;  %23870 = vst [vmem:[#allocation37_spill] sm:$0xff] %v22387_v24  ;;  %v18064_v34 = vld [vmem:[#allocation8 + $0x220] sm:$0xff]   ;;  %v16202_v60 = vpop.f32.mrb[127].mxu0  ;;  %v16227_v46 = vpop.f32.mrb[101].mxu1  ;;  %v15546_v22 = vrot.slane %v22372_v11, 9  ;;  %v23871_v16 = vcombine.low %v22119_v54, %v22123_v40 }
 0x517   : > { %16787 = vmatpush3.bf16.msra.mxu0 %v18060_v48  ;;  %v22401_v43 = vadd.f32 %v16200_v27, %v22264_v38  ;;  %v16203_v32 = vadd.f32 %v16202_v60, %v16201_v14  ;;  %v16228_v24 = vadd.f32 %v16227_v46, %v16226_v12  ;;  %v16229_v30 = vpop.f32.mrb[102].mxu1  ;;  %v23872_v39 = vrot.slane %v21931_v41, 5  ;;  %v22411_v60 = vld [vmem:[#allocation3 + $0x140] sm:$0xff] }
 0x518   : > { %16788 = vmatprep.subr.bf16.mxu0 %v18063_v57  ;;  %13860 = vmatmul.mubr.bf16.gmra.mrb[232].mxu0 %v23871_v16  ;;  %v16230_v57 = vpop.f32.mrb[103].mxu1  ;;  %v22409_v51 = vrot.slane %v11147_v1, 5  ;;  %v11153_v38 = vrot.slane %v11151_v56, 4  ;;  %v23634_v46 = vrot.slane %v22376_v53, 4  ;;  %v11131_v27 = vrot.slane %v11130_v50, 4  ;;  %v18068_v1 = vld [vmem:[#allocation8 + $0x228] sm:$0xff]  }
 0x519   : > { %16731 = vmatpush3.bf16.msra.mxu1 %v18075_v21  ;;  %v11232_v48 = vrot.slane %v23872_v39, 4  ;;  %v22415_v11 = vadd.f32 %v16203_v32, %v22282_v47  ;;  %v23873_v21 = vcombine.high %v22169_v42, %v22173_v15  ;;  %v22421_v54 = vadd.f32 %v16228_v24, %v21988_v49  ;;  %v18071_v12 = vld [vmem:[#allocation8 + $0x270] sm:$0xff]  }
 0x51a   : > { %16844 = vmatprep.subr.bf16.mxu1 %v18080_v31  ;;  %v16231_v40 = vadd.f32 %v16230_v57, %v16229_v30  ;;  %v23874_v56 = vcombine.low %v22202_v45, %v22218_v7  ;;  %v23875_v31 = vshrl.u32 %v21992_v58, 16  ;;  %v23876_v32 = vshll.u32 %v21992_v58, 16 }
 0x51b   : > { %13867 = vmatprep.mubr.bf16.mxu0 %v23873_v21  ;;  %16789 = vmatpush3.bf16.msra.mxu0 %v18064_v34  ;;  %v15559_v39 = vrot.slane %v11772_v44, 9  ;;  %v11821_v16 = vrot.slane %v11572_v26, 5  ;;  %v16284_v49 = vpop.f32.mrb[128].mxu0  ;;  %v23877_v50 = vcombine.high %v22254_v9, %v22296_v35  ;;  %v22439_v45 = vsel %vm18665_vm4, %v11121_v55, %v22302_v33  ;;  %v23879_v26 = vld [vmem:[#allocation25_spill] sm:$0xff] }
 0x51c   : > { %13779 = vmatmul.mubr.bf16.gmra.mrb[208].mxu1 %v23874_v56  ;;  %16790 = vmatprep.subr.bf16.mxu0 %v18067_v59  ;;  %v11140_v47 = vrot.slane %v23875_v31, 4  ;;  %v11143_v14 = vrot.slane %v23876_v32, 5  ;;  %v22431_v30 = vadd.f32 %v16231_v40, %v21999_v29  ;;  %v11135_v7 = vrot.slane %v11133_v20, 5  ;;  %v22441_v59 = vld [vmem:[#allocation3 + $0x178] sm:$0x11]  ;;  %v16285_v44 = vpop.f32.mrb[129].mxu0 }
 0x51d   : > { %13786 = vmatprep.mubr.bf16.mxu1 %v23877_v50  ;;  %v22444_v58 = vrot.slane %v22411_v60, 5  ;;  %v11233_v24 = vrot.slane %v23879_v26, 5  ;;  %v11154_v29 = vor.u32 %v11153_v38, %v22409_v51  ;;  %v22451_v34 = vsel %vm18675_vm7, %v15559_v39, %v22376_v53  ;;  %v16287_v20 = vpop.f32.mrb[130].mxu0  ;;  %v16232_v57 = vpop.f32.mrb[104].mxu1  ;;  %v18073_v38 = vld [vmem:[#allocation8 + $0x230] sm:$0xff]  }
 0x51e   : > { %23880 = vst [vmem:[#allocation40_spill] sm:$0xff] %v22451_v34  ;;  %v22457_v33 = vsel %vm18675_vm7, %v23634_v46, %v11821_v16  ;;  %v16286_v55 = vadd.f32 %v16285_v44, %v16284_v49  ;;  %v22461_v21 = vsel %vm18665_vm4, %v11131_v27, %v11135_v7  ;;  %v11773_v31 = vld [vmem:[#allocation3 + $0x138] sm:$0xee]  ;;  %v16288_v32 = vpop.f32.mrb[131].mxu0  ;;  %v16233_v39 = vpop.f32.mrb[105].mxu1  ;;  %v23882_v16 = vrot.slane %v21931_v41, 5 }
 0x51f   : > { %23878 = vst [vmem:[#allocation39_spill] sm:$0xff] %v22444_v58  ;;  %23881 = vst [vmem:[#allocation43_spill] sm:$0xff] %v22457_v33  ;;  %16791 = vmatpush3.bf16.msra.mxu0 %v18068_v1  ;;  %v22475_v27 = vsel %vm18675_vm7, %v11232_v48, %v11233_v24  ;;  %v11144_v1 = vor.u32 %v11143_v14, %v11140_v47  ;;  %v11157_v50 = vshll.u32 %v22441_v59, 16  ;;  %v18077_v7 = vld [vmem:[#allocation8 + $0x278] sm:$0xff]   ;;  %v16235_v41 = vpop.f32.mrb[106].mxu1  ;;  %v22481_v33 = vld [vmem:[#allocation3 + $0x158] sm:$0xff] }
 0x520   : > { %v22471_v49 = vsel %vm18675_vm7, %v15546_v22, %v23882_v16  ;;  %16792 = vmatprep.subr.bf16.mxu0 %v18071_v12  ;;  %v11573_v44 = vld [vmem:[#allocation3 + $0x148] sm:$0x11]  ;;  %v22479_v26 = vadd.f32 %v16286_v55, %v22349_v52  ;;  %v16289_v40 = vadd.f32 %v16288_v32, %v16287_v20  ;;  %v16234_v56 = vadd.f32 %v16233_v39, %v16232_v57  ;;  %v11167_v46 = vld [vmem:[#allocation3 + $0x150] sm:$0xee]  ;;  %v16236_v47 = vpop.f32.mrb[107].mxu1  ;;  %v23885_v57 = vld [vmem:[#allocation24_spill] sm:$0xff] }
 0x521   : > { %v23637_v22 = vrot.slane %v22444_v58, 4  ;;  %v23883_v48 = vcombine.low %v22169_v42, %v22173_v15  ;;  %v15594_v14 = vcombine.high %v22439_v45, %v22461_v21  ;;  %v11155_v12 = vrot.slane %v11154_v29, 4  ;;  %v18079_v15 = vld [vmem:[#allocation8 + $0x238] sm:$0xff]   ;;  %v11776_v53 = vld [vmem:[#allocation3 + $0x180] sm:$0xee] }
 0x522   : > { %v11237_v52 = vrot.slane %v21948_v63, 5  ;;  %v15560_v24 = vrot.slane %v11773_v31, 9  ;;  %v22491_v55 = vadd.f32 %v16289_v40, %v22362_v10  ;;  %v23884_v20 = vcombine.high %v22232_v25, %v22274_v36  ;;  %v18083_v31 = vld [vmem:[#allocation8 + $0x340] sm:$0xff]  }
 0x523   : > { %13868 = vmatmul.mubr.bf16.gmra.mrb[236].mxu0 %v23883_v48  ;;  %v22497_v32 = vadd.f32 %v16234_v56, %v23885_v57  ;;  %v16237_v42 = vadd.f32 %v16236_v47, %v16235_v41  ;;  %v11828_v39 = vrot.slane %v11573_v44, 5  ;;  %v23886_v29 = vcombine.low %v22254_v9, %v22296_v35  ;;  %v16290_v56 = vpop.f32.mrb[132].mxu0  ;;  %v23888_v48 = vld [vmem:[#allocation21_spill] sm:$0xff]  ;;  %v22510_v44 = vld [vmem:[#allocation3 + $0xd8] sm:$0xff] }
 0x524   : > { %13875 = vmatprep.mubr.bf16.mxu0 %v23884_v20  ;;  %16793 = vmatpush3.bf16.msra.mxu0 %v18073_v38  ;;  %v15608_v63 = vcombine.high %v22471_v49, %v22475_v27  ;;  %v11145_v10 = vrot.slane %v11144_v1, 4  ;;  %v15547_v40 = vrot.slane %v11167_v46, 9  ;;  %v22505_v16 = vrot.slane %v22481_v33, 5  ;;  %v16291_v46 = vpop.f32.mrb[133].mxu0 }
 0x525   : > { %13787 = vmatmul.mubr.bf16.gmra.mrb[212].mxu1 %v23886_v29  ;;  %16794 = vmatprep.subr.bf16.mxu0 %v18077_v7  ;;  %v22508_v41 = vadd.f32 %v16237_v42, %v23888_v48  ;;  %v11159_v38 = vrot.slane %v11157_v50, 5  ;;  %v22515_v9 = vsel %vm18675_vm7, %v15560_v24, %v22444_v58  ;;  %v22521_v35 = vsel %vm18675_vm7, %v23637_v22, %v11828_v39  ;;  %v16293_v24 = vpop.f32.mrb[134].mxu0  ;;  %v16238_v20 = vpop.f32.mrb[108].mxu1  ;;  %v11774_v39 = vld [vmem:[#allocation3 + $0x150] sm:$0xee]  ;;  %v22552_v22 = vld [vmem:[#allocation3 + $0xe0] sm:$0xff] }
 0x526   : > { %23887 = vst [vmem:[#allocation44_spill] sm:$0xff] %v22505_v16  ;;  %13794 = vmatprep.mubr.bf16.mxu1 %v15594_v14  ;;  %23889 = vst [vmem:[#allocation42_spill] sm:$0xff] %v22515_v9  ;;  %v15593_v1 = vcombine.low %v22439_v45, %v22461_v21  ;;  %v11239_v7 = vrot.slane %v11237_v52, 4  ;;  %v16292_v14 = vadd.f32 %v16291_v46, %v16290_v56  ;;  %v11574_v21 = vld [vmem:[#allocation3 + $0x160] sm:$0x11]  ;;  %v16294_v29 = vpop.f32.mrb[135].mxu0 }
 0x527   : > { %23890 = vst [vmem:[#allocation45_spill] sm:$0xff] %v22521_v35  ;;  %v22531_v57 = vsel %vm18665_vm4, %v11155_v12, %v11159_v38  ;;  %v22537_v45 = vsel %vm18675_vm7, %v15547_v40, %v11237_v52  ;;  %v16239_v48 = vpop.f32.mrb[109].mxu1  ;;  %v22542_v56 = vsel %vm18665_vm4, %v11145_v10, %v22409_v51  ;;  %v11240_v12 = vrot.slane %v22356_v13, 5  ;;  %v22546_v46 = vld [vmem:[#allocation3 + $0x170] sm:$0xff] }
 0x528   : > { %16795 = vmatpush3.bf16.msra.mxu0 %v18079_v15  ;;  %v23638_v52 = vrot.slane %v22505_v16, 4  ;;  %v22550_v15 = vadd.f32 %v16292_v14, %v22421_v54  ;;  %v16295_v40 = vadd.f32 %v16294_v29, %v16293_v24  ;;  %v16240_v50 = vadd.f32 %v16239_v48, %v16238_v20  ;;  %v16241_v47 = vpop.f32.mrb[110].mxu1  ;;  %v11168_v54 = vld [vmem:[#allocation3 + $0x168] sm:$0xee]  ;;  %v22616_v58 = vld [vmem:[#allocation3 + $0xf0] sm:$0xff] }
 0x529   : > { %16908 = vmatprep.subr.bf16.mxu0 %v18083_v31  ;;  %v11244_v51 = vrot.slane %v21977_v61, 5  ;;  %v23891_v13 = vcombine.low %v22232_v25, %v22274_v36  ;;  %v16242_v10 = vpop.f32.mrb[111].mxu1  ;;  %v15596_v31 = vcombine.high %v22542_v56, %v22531_v57  ;;  %v22562_v38 = vsel %vm18675_vm7, %v11239_v7, %v11240_v12  ;;  %v23892_v61 = vld [vmem:[#allocation23_spill] sm:$0xff]  ;;  %v22570_v36 = vld [vmem:[#allocation3 + $0x188] sm:$0xff] }
 0x52a   : > { %v15561_v14 = vrot.slane %v11774_v39, 9  ;;  %v11835_v24 = vrot.slane %v11574_v21, 5  ;;  %v22565_v20 = vadd.f32 %v16295_v40, %v22431_v30  ;;  %v22568_v29 = vadd.f32 %v16240_v50, %v23892_v61  ;;  %23893 = vst [vmem:[#allocation46_spill] sm:$0xff] %v22570_v36 }
 0x52b   : > { %13876 = vmatmul.mubr.bf16.gmra.mrb[240].mxu0 %v23891_v13  ;;  %v16243_v25 = vadd.f32 %v16242_v10, %v16241_v47  ;;  %v22573_v48 = vrot.slane %v22546_v46, 5  ;;  %v11277_v7 = vshll.u32 %v22510_v44, 16  ;;  %v15614_v39 = vcombine.high %v22510_v44, %v22552_v22  ;;  %v16296_v50 = vpop.f32.mrb[136].mxu0  ;;  %v23897_v47 = vld [vmem:[#allocation33_spill] sm:$0xff]  ;;  %v11775_v13 = vld [vmem:[#allocation3 + $0x168] sm:$0xee] }
 0x52c   : > { %13883 = vmatprep.mubr.bf16.mxu0 %v15608_v63  ;;  %v22581_v30 = vsel %vm18675_vm7, %v15561_v14, %v22505_v16  ;;  %v22587_v63 = vsel %vm18675_vm7, %v23638_v52, %v11835_v24  ;;  %v16297_v10 = vpop.f32.mrb[137].mxu0  ;;  %v15610_v14 = vcombine.high %v22537_v45, %v22562_v38  ;;  %v11283_v24 = vshll.u32 %v22552_v22, 16 }
 0x52d   : > { %23894 = vst [vmem:[#allocation47_spill] sm:$0xff] %v22573_v48  ;;  %13795 = vmatmul.mubr.bf16.gmra.mrb[216].mxu1 %v15593_v1  ;;  %23895 = vst [vmem:[#allocation48_spill] sm:$0xff] %v22581_v30  ;;  %v22590_v21 = vadd.f32 %v16243_v25, %v23897_v47  ;;  %v15548_v1 = vrot.slane %v11168_v54, 9  ;;  %v11287_v61 = vshrl.u32 %v22552_v22, 16  ;;  %v22601_v25 = vrot.slane %v22570_v36, 5  ;;  %v16299_v47 = vpop.f32.mrb[138].mxu0 }
 0x52e   : > { %23896 = vst [vmem:[#allocation49_spill] sm:$0xff] %v22587_v63  ;;  %13802 = vmatprep.mubr.bf16.mxu1 %v15596_v31  ;;  %v11575_v31 = vld [vmem:[#allocation3 + $0x178] sm:$0x11]  ;;  %v16298_v54 = vadd.f32 %v16297_v10, %v16296_v50  ;;  %v16244_v52 = vpop.f32.mrb[112].mxu1  ;;  %v15609_v12 = vcombine.low %v22537_v45, %v22562_v38  ;;  %v16300_v63 = vpop.f32.mrb[139].mxu0  ;;  %v15595_v35 = vcombine.low %v22542_v56, %v22531_v57  ;;  %v11246_v9 = vrot.slane %v11244_v51, 4 }
 0x52f   : > { %23898 = vst [vmem:[#allocation50_spill] sm:$0xff] %v22601_v25  ;;  %v22607_v40 = vsel %vm18675_vm7, %v15548_v1, %v11244_v51  ;;  %v16245_v30 = vpop.f32.mrb[113].mxu1  ;;  %v11247_v34 = vrot.slane %v22441_v59, 5  ;;  %v15562_v50 = vrot.slane %v11775_v13, 9  ;;  %v16301_v16 = vadd.f32 %v16300_v63, %v16299_v47  ;;  %v11576_v51 = vld [vmem:[#allocation3 + $0x190] sm:$0x11] }
 0x530   : > { %v22614_v10 = vadd.f32 %v16298_v54, %v22497_v32  ;;  %v16246_v45 = vadd.f32 %v16245_v30, %v16244_v52  ;;  %v16247_v38 = vpop.f32.mrb[114].mxu1  ;;  %v11842_v1 = vrot.slane %v11575_v31, 5  ;;  %v23899_v42 = vcombine.low %v22471_v49, %v22475_v27  ;;  %v22651_v31 = vld [vmem:[#allocation3 + $0xe8] sm:$0x11] }
 0x531   : > { %v16248_v36 = vpop.f32.mrb[115].mxu1  ;;  %v22621_v57 = vrot.slane %v11283_v24, 5  ;;  %v11289_v56 = vrot.slane %v11287_v61, 4  ;;  %v23657_v59 = vrot.slane %v22601_v25, 4  ;;  %v22627_v32 = vsel %vm18675_vm7, %v15562_v50, %v22573_v48 }
 0x532   : > { %23900 = vst [vmem:[#allocation51_spill] sm:$0xff] %v22627_v32  ;;  %v22630_v52 = vadd.f32 %v16301_v16, %v22508_v41  ;;  %v22633_v30 = vadd.f32 %v16246_v45, %v22179_v5  ;;  %v16249_v49 = vadd.f32 %v16248_v36, %v16247_v38  ;;  %v23901_v27 = vrot.slane %v22573_v48, 4  ;;  %v23905_v45 = vld [vmem:[#allocation28_spill] sm:$0xff] }
 0x533   : > { %13884 = vmatmul.mubr.bf16.gmra.mrb[244].mxu0 %v23899_v42  ;;  %v23903_v63 = vshrl.u32 %v22510_v44, 16  ;;  %v11279_v24 = vrot.slane %v11277_v7, 5  ;;  %v16302_v5 = vpop.f32.mrb[140].mxu0  ;;  %v11298_v61 = vshrl.u32 %v22616_v58, 16  ;;  %v11849_v54 = vrot.slane %v11576_v51, 5 }
 0x534   : > { %13891 = vmatprep.mubr.bf16.mxu0 %v15610_v14  ;;  %v22639_v42 = vsel %vm18675_vm7, %v23901_v27, %v11842_v1  ;;  %v23904_v14 = vld [vmem:[#allocation27_spill] sm:$0xff]  ;;  %v16303_v47 = vpop.f32.mrb[141].mxu0  ;;  %v22655_v7 = vsel %vm18675_vm7, %v11246_v9, %v11247_v34  ;;  %v11290_v50 = vor.u32 %v11289_v56, %v22621_v57  ;;  %v11307_v38 = vshll.u32 %v23905_v45, 16 }
 0x535   : > { %23902 = vst [vmem:[#allocation53_spill] sm:$0xff] %v22639_v42  ;;  %13803 = vmatmul.mubr.bf16.gmra.mrb[220].mxu1 %v15595_v35  ;;  %v11276_v13 = vrot.slane %v23903_v63, 4  ;;  %v22648_v36 = vadd.f32 %v16249_v49, %v23904_v14  ;;  %v15563_v35 = vrot.slane %v11776_v53, 9  ;;  %v11311_v1 = vshrl.u32 %v23905_v45, 16  ;;  %v16305_v27 = vpop.f32.mrb[142].mxu0  ;;  %v18081_v42 = vld [vmem:[#allocation8 + $0x280] sm:$0xff]  }
 0x536   : > { %13940 = vmatprep.mubr.bf16.mxu1 %v15614_v39  ;;  %v16304_v49 = vadd.f32 %v16303_v47, %v16302_v5  ;;  %v16250_v39 = vpop.f32.mrb[116].mxu1  ;;  %v11301_v63 = vshll.u32 %v22616_v58, 16  ;;  %v22670_v34 = vsel %vm18675_vm7, %v23657_v59, %v11849_v54  ;;  %v16306_v9 = vpop.f32.mrb[143].mxu0  ;;  %v11293_v5 = vshll.u32 %v22651_v31, 16  ;;  %v18086_v47 = vld [vmem:[#allocation8 + $0x2c8] sm:$0xff]  }
 0x537   : > { %v22664_v53 = vsel %vm18675_vm7, %v15563_v35, %v22601_v25  ;;  %23907 = vst [vmem:[#allocation52_spill] sm:$0xff] %v22670_v34  ;;  %v16251_v56 = vpop.f32.mrb[117].mxu1  ;;  %v11280_v51 = vor.u32 %v11279_v24, %v11276_v13  ;;  %v16307_v16 = vadd.f32 %v16306_v9, %v16305_v27  ;;  %v15612_v41 = vcombine.high %v22607_v40, %v22655_v7  ;;  %v18093_v34 = vld [vmem:[#allocation8 + $0x290] sm:$0xff]  }
 0x538   : > { %23906 = vst [vmem:[#allocation54_spill] sm:$0xff] %v22664_v53  ;;  %v22678_v35 = vadd.f32 %v16304_v49, %v22568_v29  ;;  %v16252_v54 = vadd.f32 %v16251_v56, %v16250_v39  ;;  %v16253_v59 = vpop.f32.mrb[118].mxu1  ;;  %v15613_v24 = vcombine.low %v22510_v44, %v22552_v22  ;;  %v11291_v32 = vrot.slane %v11290_v50, 4 }
 0x539   : > { %v16254_v13 = vpop.f32.mrb[119].mxu1  ;;  %v22684_v14 = vrot.slane %v11307_v38, 5  ;;  %v11313_v25 = vrot.slane %v11311_v1, 4  ;;  %v22687_v29 = vadd.f32 %v16307_v16, %v22590_v21  ;;  %v11281_v39 = vrot.slane %v11280_v51, 4  ;;  %v22700_v21 = vld [vmem:[#allocation3 + $0x100] sm:$0x11] }
 0x53a   : > { %v22690_v49 = vadd.f32 %v16252_v54, %v22244_v19  ;;  %v16255_v27 = vadd.f32 %v16254_v13, %v16253_v59  ;;  %v11295_v44 = vrot.slane %v11293_v5, 5  ;;  %v11300_v50 = vrot.slane %v11298_v61, 4  ;;  %v18087_v19 = vld [vmem:[#allocation8 + $0x288] sm:$0xff]  }
 0x53b   : > { %13892 = vmatmul.mubr.bf16.gmra.mrb[248].mxu0 %v15609_v12  ;;  %v22694_v12 = vcombine.high %v22616_v58, %v23905_v45  ;;  %v11303_v38 = vrot.slane %v11301_v63, 5  ;;  %v16308_v9 = vpop.f32.mrb[144].mxu0  ;;  %v11331_v61 = vshll.u32 %v22266_v28, 16  ;;  %v11335_v63 = vshrl.u32 %v22266_v28, 16 }
 0x53c   : > { %13899 = vmatprep.mubr.bf16.mxu0 %v15612_v41  ;;  %v22697_v1 = vadd.f32 %v16255_v27, %v22258_v8  ;;  %v16309_v59 = vpop.f32.mrb[145].mxu0  ;;  %v22704_v16 = vsel %vm18665_vm4, %v11291_v32, %v11295_v44  ;;  %v11314_v41 = vor.u32 %v11313_v25, %v22684_v14  ;;  %v18092_v8 = vld [vmem:[#allocation8 + $0x2d0] sm:$0xff]   ;;  %v15611_v54 = vcombine.low %v22607_v40, %v22655_v7 }
 0x53d   : > { %13941 = vmatmul.mubr.bf16.vlgmr.msra.gmra.mrb[224].mxu1 %v15613_v24  ;;  %v16310_v56 = vadd.f32 %v16309_v59, %v16308_v9  ;;  %v16311_v51 = vpop.f32.mrb[146].mxu0  ;;  %v16256_v5 = vpop.f32.mrb[120].mxu1  ;;  %v11286_v32 = vsel %vm18665_vm4, %v11281_v39, %v22621_v57  ;;  %v11304_v24 = vor.u32 %v11303_v38, %v11300_v50  ;;  %v11317_v25 = vshll.u32 %v22700_v21, 16 }
 0x53e   : > { %13948 = vmatprep.mubr.bf16.mxu1 %v22694_v12  ;;  %16845 = vmatpush3.bf16.msra.mxu1 %v18081_v42  ;;  %v16312_v42 = vpop.f32.mrb[147].mxu0  ;;  %v16257_v13 = vpop.f32.mrb[121].mxu1  ;;  %v15630_v44 = vcombine.high %v11286_v32, %v22704_v16  ;;  %v22721_v7 = vcombine.low %v22616_v58, %v23905_v45  ;;  %v11315_v57 = vrot.slane %v11314_v41, 4  ;;  %v22723_v39 = vrot.slane %v11331_v61, 5 }
 0x53f   : > { %16846 = vmatprep.subr.bf16.mxu1 %v18086_v47  ;;  %v22716_v47 = vadd.f32 %v16310_v56, %v22633_v30  ;;  %v16313_v27 = vadd.f32 %v16312_v42, %v16311_v51  ;;  %v16258_v9 = vadd.f32 %v16257_v13, %v16256_v5  ;;  %v16259_v59 = vpop.f32.mrb[122].mxu1  ;;  %v11337_v50 = vrot.slane %v11335_v63, 4  ;;  %v18098_v30 = vld [vmem:[#allocation8 + $0x2d8] sm:$0xff]  }
 0x540   : > { %v16260_v40 = vpop.f32.mrb[123].mxu1  ;;  %v23908_v51 = vld [vmem:[#allocation26_spill] sm:$0xff]  ;;  %v22736_v58 = vrot.slane %v11304_v24, 4  ;;  %v11319_v45 = vrot.slane %v11317_v25, 5  ;;  %v11359_v13 = vshrl.u32 %v22351_v62, 16 }
 0x541   : > { %v22726_v38 = vadd.f32 %v16313_v27, %v22648_v36  ;;  %v22729_v56 = vadd.f32 %v16258_v9, %v22328_v18  ;;  %v22733_v5 = vcombine.high %v23908_v51, %v22266_v28  ;;  %v22742_v36 = vld [vmem:[#allocation3 + $0x118] sm:$0x11]  ;;  %v18099_v18 = vld [vmem:[#allocation8 + $0x298] sm:$0xff]   ;;  %v11338_v42 = vor.u32 %v11337_v50, %v22723_v39  ;;  %v18085_v27 = vld [vmem:[#allocation8 + $0x300] sm:$0xff]  }
 0x542   : > { %16847 = vmatpush3.bf16.msra.mxu1 %v18087_v19  ;;  %v16261_v19 = vadd.f32 %v16260_v40, %v16259_v59  ;;  %23909 = vst [vmem:[#allocation18_spill] sm:$0xff] %v22736_v58  ;;  %v15629_v9 = vcombine.low %v11286_v32, %v22704_v16  ;;  %v22760_v40 = vsel %vm18665_vm4, %v22736_v58, %v22684_v14  ;;  %v18089_v50 = vld [vmem:[#allocation8 + $0x348] sm:$0xff]   ;;  %v18105_v32 = vld [vmem:[#allocation8 + $0x2a0] sm:$0xff]   ;;  %v11361_v58 = vrot.slane %v11359_v13, 4 }
 0x543   : > { %13900 = vmatmul.mubr.bf16.gmra.mrb[252].mxu0 %v15611_v54  ;;  %16848 = vmatprep.subr.bf16.mxu1 %v18092_v8  ;;  %v16314_v41 = vpop.f32.mrb[148].mxu0  ;;  %v22746_v8 = vsel %vm18665_vm4, %v11315_v57, %v11319_v45  ;;  %v11355_v54 = vshll.u32 %v22351_v62, 16  ;;  %v22770_v14 = vcombine.high %v22222_v4, %v22351_v62 }
 0x544   : > { %14037 = vmatprep.mubr.bf16.mxu0 %v15630_v44  ;;  %v22739_v61 = vadd.f32 %v16261_v19, %v22343_v23  ;;  %v16315_v63 = vpop.f32.mrb[149].mxu0  ;;  %v18104_v23 = vld [vmem:[#allocation8 + $0x2e0] sm:$0xff]  }
 0x545   : > { %13949 = vmatmul.mubr.bf16.gmra.mrb[228].mxu1 %v22721_v7  ;;  %v16316_v24 = vadd.f32 %v16315_v63, %v16314_v41  ;;  %v16317_v25 = vpop.f32.mrb[150].mxu0  ;;  %v16262_v44 = vpop.f32.mrb[124].mxu1  ;;  %23910 = vst [vmem:[#allocation19_spill] sm:$0xff] %v22770_v14  ;;  %v11339_v63 = vrot.slane %v11338_v42, 4  ;;  %v22772_v53 = vrot.slane %v11355_v54, 5  ;;  %v23911_v42 = vld [vmem:[#allocation41_spill] sm:$0xff] }
 0x546   : > { %13956 = vmatprep.mubr.bf16.mxu1 %v22733_v5  ;;  %16849 = vmatpush3.bf16.msra.mxu1 %v18093_v34  ;;  %v22753_v34 = vcombine.low %v23908_v51, %v22266_v28  ;;  %v16318_v59 = vpop.f32.mrb[151].mxu0  ;;  %v16263_v57 = vpop.f32.mrb[125].mxu1  ;;  %v15632_v28 = vcombine.high %v22760_v40, %v22746_v8  ;;  %v23912_v54 = vor.u32 %v22228_v2, %v23911_v42 }
 0x547   : > { %16850 = vmatprep.subr.bf16.mxu1 %v18098_v30  ;;  %v11341_v30 = vshll.u32 %v22742_v36, 16  ;;  %v22764_v19 = vadd.f32 %v16316_v24, %v22690_v49  ;;  %v16319_v45 = vadd.f32 %v16318_v59, %v16317_v25  ;;  %v16264_v51 = vadd.f32 %v16263_v57, %v16262_v44  ;;  %v16265_v16 = vpop.f32.mrb[126].mxu1  ;;  %v18110_v49 = vld [vmem:[#allocation8 + $0x2e8] sm:$0xff]  }
 0x548   : > { %v16266_v41 = vpop.f32.mrb[127].mxu1  ;;  %v18091_v44 = vld [vmem:[#allocation8 + $0x308] sm:$0xff]   ;;  %v11362_v2 = vor.u32 %v11361_v58, %v22772_v53 }
 0x549   : > { %v22775_v24 = vadd.f32 %v16319_v45, %v22697_v1  ;;  %v16267_v25 = vadd.f32 %v16266_v41, %v16265_v16  ;;  %v11343_v13 = vrot.slane %v11341_v30, 5  ;;  %v11379_v30 = vshll.u32 %v22411_v60, 16  ;;  %v18097_v41 = vld [vmem:[#allocation8 + $0x310] sm:$0xff]  }
 0x54a   : > { %16851 = vmatpush3.bf16.msra.mxu1 %v18099_v18  ;;  %v22778_v18 = vadd.f32 %v16264_v51, %v22401_v43  ;;  %v22790_v43 = vld [vmem:[#allocation3 + $0x130] sm:$0x11]  ;;  %v11383_v45 = vshrl.u32 %v22411_v60, 16 }
 0x54b   : > { %14038 = vmatmul.mubr.bf16.vlgmr.msra.gmra.mrb[0].mxu0 %v15629_v9  ;;  %16852 = vmatprep.subr.bf16.mxu1 %v18104_v23  ;;  %v22784_v9 = vrot.slane %v23912_v54, 4  ;;  %v18095_v23 = vld [vmem:[#allocation8 + $0x350] sm:$0xff]   ;;  %v16320_v59 = vpop.f32.mrb[152].mxu0  ;;  %v22787_v1 = vadd.f32 %v16267_v25, %v22415_v11 }
 0x54c   : > { %16909 = vmatpush3.bf16.msra.mxu0 %v18085_v27  ;;  %14045 = vmatprep.mubr.bf16.mxu0 %v15632_v28  ;;  %v18111_v27 = vld [vmem:[#allocation8 + $0x2a8] sm:$0xff]   ;;  %v16321_v57 = vpop.f32.mrb[153].mxu0  ;;  %v18116_v11 = vld [vmem:[#allocation8 + $0x2f0] sm:$0xff]   ;;  %v15631_v28 = vcombine.low %v22760_v40, %v22746_v8  ;;  %v11365_v8 = vshll.u32 %v22790_v43, 16  ;;  %v18101_v40 = vld [vmem:[#allocation8 + $0x358] sm:$0xff]  }
 0x54d   : > { %13957 = vmatmul.mubr.bf16.gmra.mrb[232].mxu1 %v22753_v34  ;;  %16910 = vmatprep.subr.bf16.mxu0 %v18089_v50  ;;  %23913 = vst [vmem:[#allocation20_spill] sm:$0xff] %v22784_v9  ;;  %v22794_v50 = vsel %vm18665_vm4, %v11339_v63, %v11343_v13  ;;  %v16322_v51 = vadd.f32 %v16321_v57, %v16320_v59  ;;  %v16323_v16 = vpop.f32.mrb[154].mxu0 }
 0x54e   : > { %13964 = vmatprep.mubr.bf16.mxu1 %v22770_v14  ;;  %16853 = vmatpush3.bf16.msra.mxu1 %v18105_v32  ;;  %v16348_v32 = vpop.f32.mrb[128].mxu1  ;;  %v16324_v25 = vpop.f32.mrb[155].mxu0  ;;  %v22805_v58 = vsel %vm18665_vm4, %v22784_v9, %v22723_v39  ;;  %v18117_v39 = vld [vmem:[#allocation8 + $0x2b0] sm:$0xff]   ;;  %v11385_v9 = vrot.slane %v11383_v45, 4  ;;  %v11367_v45 = vrot.slane %v11365_v8, 5 }
 0x54f   : > { %16854 = vmatprep.subr.bf16.mxu1 %v18110_v49  ;;  %v16349_v63 = vpop.f32.mrb[129].mxu1  ;;  %v22809_v49 = vcombine.low %v22222_v4, %v22351_v62  ;;  %v16325_v42 = vadd.f32 %v16324_v25, %v16323_v16  ;;  %v15634_v54 = vcombine.high %v22805_v58, %v22794_v50  ;;  %v22819_v4 = vcombine.high %v22287_v0, %v22411_v60  ;;  %v23917_v25 = vld [vmem:[#allocation32_spill] sm:$0xff] }
 0x550   : > { %16911 = vmatpush3.bf16.msra.mxu0 %v18091_v44  ;;  %v22813_v44 = vadd.f32 %v16322_v51, %v22729_v56  ;;  %v16350_v13 = vadd.f32 %v16349_v63, %v16348_v32  ;;  %v16351_v59 = vpop.f32.mrb[130].mxu1  ;;  %v11363_v62 = vrot.slane %v11362_v2, 4  ;;  %v18121_v56 = vld [vmem:[#allocation8 + $0x2f8] sm:$0xff]  }
 0x551   : > { %23914 = vst [vmem:[#allocation22_spill] sm:$0xff] %v22809_v49  ;;  %16912 = vmatprep.subr.bf16.mxu0 %v18095_v23  ;;  %v16352_v57 = vpop.f32.mrb[131].mxu1  ;;  %23915 = vst [vmem:[#allocation15_spill] sm:$0xff] %v22819_v4  ;;  %v22821_v23 = vrot.slane %v11379_v30, 5  ;;  %v22824_v51 = vadd.f32 %v16325_v42, %v22739_v61  ;;  %v23916_v32 = vld [vmem:[#allocation30_spill] sm:$0xff]  ;;  %v18107_v61 = vld [vmem:[#allocation8 + $0x360] sm:$0xff]  }
 0x552   : > { %16855 = vmatpush3.bf16.msra.mxu1 %v18111_v27  ;;  %v22827_v16 = vadd.f32 %v16350_v13, %v22479_v26  ;;  %v16353_v27 = vadd.f32 %v16352_v57, %v16351_v59  ;;  %v23918_v2 = vor.u32 %v23916_v32, %v23917_v25  ;;  %v22841_v26 = vld [vmem:[#allocation3 + $0x148] sm:$0x11]  ;;  %v22845_v13 = vsel %vm18665_vm4, %v11363_v62, %v11367_v45 }
 0x553   : > { %14046 = vmatmul.mubr.bf16.gmra.mrb[4].mxu0 %v15631_v28  ;;  %16856 = vmatprep.subr.bf16.mxu1 %v18116_v11  ;;  %v18103_v28 = vld [vmem:[#allocation8 + $0x318] sm:$0xff]   ;;  %v22835_v11 = vld [vmem:[#allocation3 + $0x150] sm:$0xff]  ;;  %v16326_v63 = vpop.f32.mrb[156].mxu0  ;;  %v11386_v8 = vor.u32 %v11385_v9, %v22821_v23  ;;  %v11407_v59 = vshrl.u32 %v22481_v33, 16  ;;  %v15633_v57 = vcombine.low %v22805_v58, %v22794_v50  ;;  %v22854_v25 = vcombine.low %v22287_v0, %v22411_v60 }
 0x554   : > { %14053 = vmatprep.mubr.bf16.mxu0 %v15634_v54  ;;  %16913 = vmatpush3.bf16.msra.mxu0 %v18097_v41  ;;  %v22833_v30 = vrot.slane %v23918_v2, 4  ;;  %v22838_v42 = vadd.f32 %v16353_v27, %v22491_v55  ;;  %v18122_v41 = vld [vmem:[#allocation8 + $0x2b8] sm:$0xff]   ;;  %v16327_v54 = vpop.f32.mrb[157].mxu0  ;;  %v18125_v55 = vld [vmem:[#allocation8 + $0x3c0] sm:$0xff]   ;;  %v11394_v62 = vshrl.u32 %v22835_v11, 16  ;;  %v11397_v50 = vshll.u32 %v22835_v11, 16 }
 0x555   : > { %13965 = vmatmul.mubr.bf16.gmra.mrb[236].mxu1 %v22809_v49  ;;  %16914 = vmatprep.subr.bf16.mxu0 %v18101_v40  ;;  %v11403_v40 = vshll.u32 %v22481_v33, 16  ;;  %v16328_v27 = vadd.f32 %v16327_v54, %v16326_v63  ;;  %v16329_v32 = vpop.f32.mrb[158].mxu0  ;;  %23920 = vst [vmem:[#allocation16_spill] sm:$0xff] %v22854_v25  ;;  %v18109_v9 = vld [vmem:[#allocation8 + $0x320] sm:$0xff]   ;;  %v11389_v58 = vshll.u32 %v22841_v26, 16  ;;  %v18113_v63 = vld [vmem:[#allocation8 + $0x368] sm:$0xff]  }
 0x556   : > { %23919 = vst [vmem:[#allocation17_spill] sm:$0xff] %v22833_v30  ;;  %13972 = vmatprep.mubr.bf16.mxu1 %v22819_v4  ;;  %16857 = vmatpush3.bf16.msra.mxu1 %v18117_v39  ;;  %v16354_v39 = vpop.f32.mrb[132].mxu1  ;;  %v16330_v2 = vpop.f32.mrb[159].mxu0  ;;  %v11387_v4 = vrot.slane %v11386_v8, 4  ;;  %v22874_v49 = vld [vmem:[#allocation3 + $0x168] sm:$0xff]  ;;  %v23922_v8 = vor.u32 %v22370_v6, %v22368_v37 }
 0x557   : > { %16858 = vmatprep.subr.bf16.mxu1 %v18121_v56  ;;  %v22861_v56 = vsel %vm18665_vm4, %v22833_v30, %v22772_v53  ;;  %v16355_v45 = vpop.f32.mrb[133].mxu1  ;;  %v22866_v0 = vadd.f32 %v16328_v27, %v22778_v18  ;;  %v16331_v60 = vadd.f32 %v16330_v2, %v16329_v32  ;;  %v22872_v30 = vcombine.high %v22835_v11, %v22481_v33 }
 0x558   : > { %16915 = vmatpush3.bf16.msra.mxu0 %v18103_v28  ;;  %v15636_v28 = vcombine.high %v22861_v56, %v22845_v13  ;;  %v16356_v54 = vadd.f32 %v16355_v45, %v16354_v39  ;;  %v16357_v48 = vpop.f32.mrb[134].mxu1  ;;  %v11409_v18 = vrot.slane %v11407_v59, 4  ;;  %v22888_v39 = vrot.slane %v23922_v8, 4 }
 0x559   : > { %16916 = vmatprep.subr.bf16.mxu0 %v18107_v61  ;;  %v16358_v53 = vpop.f32.mrb[135].mxu1  ;;  %23921 = vst [vmem:[#allocation25_spill] sm:$0xff] %v22872_v30  ;;  %v22876_v61 = vrot.slane %v11403_v40, 5  ;;  %v22879_v27 = vadd.f32 %v16331_v60, %v22787_v1  ;;  %v11391_v40 = vrot.slane %v11389_v58, 5  ;;  %v11396_v59 = vrot.slane %v11394_v62, 4  ;;  %v18119_v1 = vld [vmem:[#allocation8 + $0x370] sm:$0xff]  }
 0x55a   : > { %16859 = vmatpush3.bf16.msra.mxu1 %v18122_v41  ;;  %v22882_v32 = vadd.f32 %v16356_v54, %v22550_v15  ;;  %v16359_v41 = vadd.f32 %v16358_v53, %v16357_v48  ;;  %23923 = vst [vmem:[#allocation24_spill] sm:$0xff] %v22888_v39  ;;  %v11418_v15 = vshrl.u32 %v22874_v49, 16  ;;  %v22895_v48 = vld [vmem:[#allocation3 + $0x160] sm:$0x11]  ;;  %v11427_v62 = vshll.u32 %v22546_v46, 16 }
 0x55b   : > { %14054 = vmatmul.mubr.bf16.gmra.mrb[8].mxu0 %v15633_v57  ;;  %16972 = vmatprep.subr.bf16.mxu1 %v18125_v55  ;;  %v18115_v57 = vld [vmem:[#allocation8 + $0x328] sm:$0xff]   ;;  %v11399_v55 = vrot.slane %v11397_v50, 5  ;;  %v16412_v2 = vpop.f32.mrb[160].mxu0  ;;  %v22899_v37 = vsel %vm18665_vm4, %v11387_v4, %v11391_v40  ;;  %v11410_v6 = vor.u32 %v11409_v18, %v22876_v61  ;;  %v11431_v50 = vshrl.u32 %v22546_v46, 16  ;;  %v18120_v4 = vld [vmem:[#allocation8 + $0x330] sm:$0xff]  }
 0x55c   : > { %14061 = vmatprep.mubr.bf16.mxu0 %v15636_v28  ;;  %16917 = vmatpush3.bf16.msra.mxu0 %v18109_v9  ;;  %v22891_v45 = vadd.f32 %v16359_v41, %v22565_v20  ;;  %v16413_v9 = vpop.f32.mrb[161].mxu0  ;;  %v15635_v20 = vcombine.low %v22861_v56, %v22845_v13  ;;  %v22908_v28 = vcombine.low %v22835_v11, %v22481_v33  ;;  %v11421_v54 = vshll.u32 %v22874_v49, 16  ;;  %v18123_v33 = vld [vmem:[#allocation8 + $0x378] sm:$0xff]  }
 0x55d   : > { %13973 = vmatmul.mubr.bf16.gmra.mrb[240].mxu1 %v22854_v25  ;;  %16918 = vmatprep.subr.bf16.mxu0 %v18113_v63  ;;  %v16414_v58 = vadd.f32 %v16413_v9, %v16412_v2  ;;  %v16415_v63 = vpop.f32.mrb[162].mxu0  ;;  %v16360_v60 = vpop.f32.mrb[136].mxu1  ;;  %v11382_v18 = vsel %vm18665_vm4, %v22888_v39, %v22821_v23  ;;  %v22917_v13 = vcombine.high %v22874_v49, %v22546_v46  ;;  %v11413_v8 = vshll.u32 %v22895_v48, 16 }
 0x55e   : > { %13980 = vmatprep.mubr.bf16.mxu1 %v22872_v30  ;;  %v16416_v53 = vpop.f32.mrb[163].mxu0  ;;  %v16361_v41 = vpop.f32.mrb[137].mxu1  ;;  %v11400_v56 = vor.u32 %v11399_v55, %v11396_v59  ;;  %v15638_v40 = vcombine.high %v11382_v18, %v22899_v37  ;;  %v11411_v39 = vrot.slane %v11410_v6, 4  ;;  %v11420_v30 = vrot.slane %v11418_v15, 4  ;;  %v22935_v15 = vld [vmem:[#allocation3 + $0x180] sm:$0xff] }
 0x55f   : > { %v22921_v11 = vadd.f32 %v16414_v58, %v22827_v16  ;;  %v16362_v2 = vadd.f32 %v16361_v41, %v16360_v60  ;;  %v16363_v9 = vpop.f32.mrb[138].mxu1  ;;  %v22924_v25 = vrot.slane %v11427_v62, 5  ;;  %v11433_v14 = vrot.slane %v11431_v50, 4  ;;  %v18124_v58 = vld [vmem:[#allocation8 + $0x338] sm:$0xff]   ;;  %v18127_v62 = vld [vmem:[#allocation8 + $0x440] sm:$0xff]  }
 0x560   : > { %16919 = vmatpush3.bf16.msra.mxu0 %v18115_v57  ;;  %v16417_v57 = vadd.f32 %v16416_v53, %v16415_v63  ;;  %v16364_v23 = vpop.f32.mrb[139].mxu1  ;;  %v11415_v6 = vrot.slane %v11413_v8, 5  ;;  %v22945_v63 = vld [vmem:[#allocation3 + $0x178] sm:$0x11]  ;;  %v23924_v53 = vld [vmem:[#allocation46_spill] sm:$0xff] }
 0x561   : > { %16920 = vmatprep.subr.bf16.mxu0 %v18119_v1  ;;  %v22930_v55 = vadd.f32 %v16362_v2, %v22614_v10  ;;  %v16365_v16 = vadd.f32 %v16364_v23, %v16363_v9  ;;  %v11423_v1 = vrot.slane %v11421_v54, 5  ;;  %v22943_v10 = vcombine.low %v22874_v49, %v22546_v46 }
 0x562   : > { %v22927_v59 = vadd.f32 %v16417_v57, %v22838_v42  ;;  %v22949_v54 = vsel %vm18665_vm4, %v11411_v39, %v11415_v6  ;;  %v11451_v41 = vshll.u32 %v23924_v53, 16  ;;  %v11442_v57 = vshrl.u32 %v22935_v15, 16 }
 0x563   : > { %14062 = vmatmul.mubr.bf16.gmra.mrb[12].mxu0 %v15635_v20  ;;  %v22933_v20 = vrot.slane %v11400_v56, 4  ;;  %v16418_v50 = vpop.f32.mrb[164].mxu0  ;;  %v22938_v42 = vadd.f32 %v16365_v16, %v22630_v52  ;;  %v11455_v52 = vshrl.u32 %v23924_v53, 16  ;;  %v11445_v46 = vshll.u32 %v22935_v15, 16 }
 0x564   : > { %14069 = vmatprep.mubr.bf16.mxu0 %v15638_v40  ;;  %16921 = vmatpush3.bf16.msra.mxu0 %v18120_v4  ;;  %v16419_v60 = vpop.f32.mrb[165].mxu0  ;;  %v11434_v4 = vor.u32 %v11433_v14, %v22924_v25  ;;  %v11424_v49 = vor.u32 %v11423_v1, %v11420_v30  ;;  %v15637_v40 = vcombine.low %v11382_v18, %v22899_v37  ;;  %v11437_v9 = vshll.u32 %v22945_v63, 16 }
 0x565   : > { %13981 = vmatmul.mubr.bf16.gmra.mrb[244].mxu1 %v22908_v28  ;;  %16922 = vmatprep.subr.bf16.mxu0 %v18123_v33  ;;  %v16420_v56 = vadd.f32 %v16419_v60, %v16418_v50  ;;  %v16421_v8 = vpop.f32.mrb[166].mxu0  ;;  %v16366_v33 = vpop.f32.mrb[140].mxu1  ;;  %v11406_v14 = vsel %vm18665_vm4, %v22933_v20, %v22876_v61  ;;  %v11499_v23 = vrot.slane %v22552_v22, 5  ;;  %v22971_v50 = vrot.slane %v11451_v41, 5 }
 0x566   : > { %13988 = vmatprep.mubr.bf16.mxu1 %v22917_v13  ;;  %v16422_v2 = vpop.f32.mrb[167].mxu0  ;;  %v16367_v39 = vpop.f32.mrb[141].mxu1  ;;  %v15640_v30 = vcombine.high %v11406_v14, %v22949_v54  ;;  %v11435_v61 = vrot.slane %v11434_v4, 4  ;;  %v11457_v60 = vrot.slane %v11455_v52, 4  ;;  %v11447_v4 = vrot.slane %v11445_v46, 5 }
 0x567   : > { %v22964_v16 = vadd.f32 %v16420_v56, %v22882_v32  ;;  %v16423_v6 = vadd.f32 %v16422_v2, %v16421_v8  ;;  %v16368_v1 = vadd.f32 %v16367_v39, %v16366_v33  ;;  %v16369_v37 = vpop.f32.mrb[142].mxu1  ;;  %v22979_v56 = vrot.slane %v11424_v49, 4  ;;  %v11465_v33 = vld [vmem:[#allocation3 + $0xd8] sm:$0xee] }
 0x568   : > { %16923 = vmatpush3.bf16.msra.mxu0 %v18124_v58  ;;  %v16370_v18 = vpop.f32.mrb[143].mxu1  ;;  %v22969_v58 = vcombine.high %v22935_v15, %v23924_v53  ;;  %v11439_v8 = vrot.slane %v11437_v9, 5  ;;  %v11444_v2 = vrot.slane %v11442_v57, 4  ;;  %v11502_v39 = vrot.slane %v22651_v31, 5 }
 0x569   : > { %17036 = vmatprep.subr.bf16.mxu0 %v18127_v62  ;;  %v22974_v22 = vadd.f32 %v16423_v6, %v22891_v45  ;;  %v22977_v32 = vadd.f32 %v16368_v1, %v22678_v35  ;;  %v16371_v62 = vadd.f32 %v16370_v18, %v16369_v37  ;;  %v22986_v45 = vld [vmem:[#allocation3 + $0x190] sm:$0x11]  ;;  %v11458_v9 = vor.u32 %v11457_v60, %v22971_v50 }
 0x56a   : > { %v11440_v49 = vsel %vm18665_vm4, %v11435_v61, %v11439_v8  ;;  %v15639_v6 = vcombine.low %v11406_v14, %v22949_v54  ;;  %v15549_v1 = vrot.slane %v11465_v33, 9  ;;  %v11430_v37 = vsel %vm18665_vm4, %v22979_v56, %v22924_v25 }
 0x56b   : > { %14070 = vmatmul.mubr.bf16.gmra.mrb[16].mxu0 %v15637_v40  ;;  %v11501_v40 = vrot.slane %v11499_v23, 4  ;;  %v16424_v41 = vpop.f32.mrb[168].mxu0  ;;  %v22983_v52 = vadd.f32 %v16371_v62, %v22687_v29  ;;  %v11448_v62 = vor.u32 %v11447_v4, %v11444_v2  ;;  %v11461_v31 = vshll.u32 %v22986_v45, 16 }
 0x56c   : > { %14077 = vmatprep.mubr.bf16.mxu0 %v15640_v30  ;;  %v16425_v35 = vpop.f32.mrb[169].mxu0  ;;  %v15642_v14 = vcombine.high %v11430_v37, %v11440_v49  ;;  %v11500_v25 = vsel %vm18675_vm7, %v15549_v1, %v11499_v23 }
 0x56d   : > { %13989 = vmatmul.mubr.bf16.gmra.mrb[248].mxu1 %v22943_v10  ;;  %v16426_v57 = vadd.f32 %v16425_v35, %v16424_v41  ;;  %v16427_v46 = vpop.f32.mrb[170].mxu0  ;;  %v16372_v30 = vpop.f32.mrb[144].mxu1  ;;  %v11503_v61 = vsel %vm18675_vm7, %v11501_v40, %v11502_v39  ;;  %v23005_v35 = vcombine.low %v22935_v15, %v23924_v53  ;;  %v11459_v40 = vrot.slane %v11458_v9, 4  ;;  %v11466_v53 = vld [vmem:[#allocation3 + $0xf0] sm:$0xee] }
 0x56e   : > { %13996 = vmatprep.mubr.bf16.mxu1 %v22969_v58  ;;  %v16428_v29 = vpop.f32.mrb[171].mxu0  ;;  %v16373_v18 = vpop.f32.mrb[145].mxu1  ;;  %v15646_v39 = vcombine.high %v11500_v25, %v11503_v61  ;;  %v11509_v9 = vrot.slane %v22700_v21, 5 }
 0x56f   : > { %v23001_v60 = vadd.f32 %v16426_v57, %v22930_v55  ;;  %v16429_v54 = vadd.f32 %v16428_v29, %v16427_v46  ;;  %v16374_v8 = vadd.f32 %v16373_v18, %v16372_v30  ;;  %v16375_v33 = vpop.f32.mrb[146].mxu1  ;;  %v11463_v57 = vrot.slane %v11461_v31, 5 }
 0x570   : > { %v16376_v41 = vpop.f32.mrb[147].mxu1  ;;  %v15641_v29 = vcombine.low %v11430_v37, %v11440_v49  ;;  %v18126_v37 = vld [vmem:[#allocation8 + $0x380] sm:$0xff]  }
 0x571   : > { %v23010_v2 = vadd.f32 %v16429_v54, %v22938_v42  ;;  %v10665_v55 = vadd.f32 %v16374_v8, %v22716_v47  ;;  %v16377_v4 = vadd.f32 %v16376_v41, %v16375_v33  ;;  %v11464_v42 = vsel %vm18665_vm4, %v11459_v40, %v11463_v57  ;;  %v23925_v54 = vld [vmem:[#allocation29_spill] sm:$0xff]  ;;  %v18129_v57 = vld [vmem:[#allocation8 + $0x3c8] sm:$0xff]  }
 0x573   : > { %14078 = vmatmul.mubr.bf16.gmra.mrb[20].mxu0 %v15639_v6  ;;  %v23014_v6 = vrot.slane %v11448_v62, 4  ;;  %v16430_v46 = vpop.f32.mrb[172].mxu0  ;;  %v10668_v15 = vadd.f32 %v16377_v4, %v22726_v38  ;;  %v15550_v38 = vrot.slane %v11466_v53, 9  ;;  %v15645_v4 = vcombine.low %v11500_v25, %v11503_v61  ;;  %v11467_v61 = vld [vmem:[#allocation3 + $0x108] sm:$0xee]  ;;  %v18130_v25 = vld [vmem:[#allocation8 + $0x388] sm:$0xff]  }
 0x574   : > { %14085 = vmatprep.mubr.bf16.mxu0 %v15642_v14  ;;  %v16431_v23 = vpop.f32.mrb[173].mxu0  ;;  %v23926_v14 = vrot.slane %v23925_v54, 4 }
 0x575   : > { %13997 = vmatmul.mubr.bf16.gmra.mrb[252].mxu1 %v23005_v35  ;;  %v16432_v30 = vadd.f32 %v16431_v23, %v16430_v46  ;;  %v16433_v47 = vpop.f32.mrb[174].mxu0  ;;  %v16378_v1 = vpop.f32.mrb[148].mxu1  ;;  %v11454_v62 = vsel %vm18665_vm4, %v23014_v6, %v22971_v50  ;;  %v11507_v50 = vsel %vm18675_vm7, %v15550_v38, %v23925_v54 }
 0x576   : > { %14134 = vmatprep.mubr.bf16.mxu1 %v15646_v39  ;;  %v16434_v18 = vpop.f32.mrb[175].mxu0  ;;  %v16379_v31 = vpop.f32.mrb[149].mxu1  ;;  %v11510_v8 = vsel %vm18675_vm7, %v23926_v14, %v11509_v9  ;;  %v15644_v41 = vcombine.high %v11454_v62, %v11464_v42  ;;  %v15551_v14 = vrot.slane %v11467_v61, 9  ;;  %v11468_v61 = vld [vmem:[#allocation3 + $0x120] sm:$0xee] }
 0x577   : > { %v23029_v33 = vadd.f32 %v16432_v30, %v22977_v32  ;;  %v16435_v21 = vadd.f32 %v16434_v18, %v16433_v47  ;;  %v16380_v40 = vadd.f32 %v16379_v31, %v16378_v1  ;;  %v16381_v49 = vpop.f32.mrb[150].mxu1  ;;  %v15648_v23 = vcombine.high %v11507_v50, %v11510_v8 }
 0x578   : > { %v16382_v39 = vpop.f32.mrb[151].mxu1  ;;  %v11516_v1 = vrot.slane %v22742_v36, 5  ;;  %v18134_v36 = vld [vmem:[#allocation8 + $0x390] sm:$0xff]  }
 0x579   : > { %v23035_v46 = vadd.f32 %v16435_v21, %v22983_v52  ;;  %v10673_v32 = vadd.f32 %v16380_v40, %v22764_v19  ;;  %v16383_v53 = vadd.f32 %v16382_v39, %v16381_v49  ;;  %v18133_v52 = vld [vmem:[#allocation8 + $0x3d0] sm:$0xff]   ;;  %v15643_v19 = vcombine.low %v11454_v62, %v11464_v42  ;;  %v23927_v21 = vld [vmem:[#allocation31_spill] sm:$0xff]  ;;  %v18137_v62 = vld [vmem:[#allocation8 + $0x3d8] sm:$0xff]  }
 0x57a   : > { %v15647_v39 = vcombine.low %v11507_v50, %v11510_v8  ;;  %v11514_v42 = vsel %vm18675_vm7, %v15551_v14, %v23927_v21  ;;  %v11523_v50 = vrot.slane %v22790_v43, 5  ;;  %v18131_v14 = vld [vmem:[#allocation8 + $0x448] sm:$0xff]  }
 0x57b   : > { %14086 = vmatmul.mubr.bf16.gmra.mrb[24].mxu0 %v15641_v29  ;;  %v16436_v9 = vpop.f32.mrb[176].mxu0  ;;  %v23039_v30 = vadd.f32 %v16383_v53, %v22775_v24 }
 0x57c   : > { %14093 = vmatprep.mubr.bf16.mxu0 %v15644_v41  ;;  %v16437_v47 = vpop.f32.mrb[177].mxu0  ;;  %v23928_v41 = vrot.slane %v23927_v21, 4 }
 0x57d   : > { %14135 = vmatmul.mubr.bf16.vlgmr.msra.gmra.mrb[0].mxu1 %v15645_v4  ;;  %v16438_v29 = vadd.f32 %v16437_v47, %v16436_v9  ;;  %v16439_v18 = vpop.f32.mrb[178].mxu0  ;;  %v16384_v31 = vpop.f32.mrb[152].mxu1  ;;  %v18138_v47 = vld [vmem:[#allocation8 + $0x398] sm:$0xff]  }
 0x57e   : > { %14142 = vmatprep.mubr.bf16.mxu1 %v15648_v23  ;;  %16973 = vmatpush3.bf16.msra.mxu1 %v18126_v37  ;;  %v16440_v38 = vpop.f32.mrb[179].mxu0  ;;  %v16385_v54 = vpop.f32.mrb[153].mxu1  ;;  %v11517_v24 = vsel %vm18675_vm7, %v23928_v41, %v11516_v1  ;;  %v18141_v1 = vld [vmem:[#allocation8 + $0x3e0] sm:$0xff]  }
 0x57f   : > { %16974 = vmatprep.subr.bf16.mxu1 %v18129_v57  ;;  %v23046_v40 = vadd.f32 %v16438_v29, %v10665_v55  ;;  %v16441_v49 = vadd.f32 %v16440_v38, %v16439_v18  ;;  %v16386_v37 = vadd.f32 %v16385_v54, %v16384_v31  ;;  %v16387_v4 = vpop.f32.mrb[154].mxu1  ;;  %v15650_v9 = vcombine.high %v11514_v42, %v11517_v24  ;;  %v23929_v31 = vld [vmem:[#allocation38_spill] sm:$0xff] }
 0x580   : > { %v16388_v57 = vpop.f32.mrb[155].mxu1  ;;  %v15552_v18 = vrot.slane %v11468_v61, 9  ;;  %v18132_v61 = vld [vmem:[#allocation8 + $0x408] sm:$0xff]  }
 0x581   : > { %v23051_v53 = vadd.f32 %v16441_v49, %v10668_v15  ;;  %v23055_v55 = vadd.f32 %v16386_v37, %v22813_v44  ;;  %v16389_v23 = vadd.f32 %v16388_v57, %v16387_v4  ;;  %v18128_v44 = vld [vmem:[#allocation8 + $0x400] sm:$0xff]  }
 0x582   : > { %16975 = vmatpush3.bf16.msra.mxu1 %v18130_v25  ;;  %v11521_v37 = vsel %vm18675_vm7, %v15552_v18, %v23929_v31  ;;  %v18142_v4 = vld [vmem:[#allocation8 + $0x3a0] sm:$0xff]  }
 0x583   : > { %14094 = vmatmul.mubr.bf16.gmra.mrb[28].mxu0 %v15643_v19  ;;  %16976 = vmatprep.subr.bf16.mxu1 %v18133_v52  ;;  %v16442_v25 = vpop.f32.mrb[180].mxu0  ;;  %v23058_v8 = vadd.f32 %v16389_v23, %v22824_v51  ;;  %v23930_v19 = vrot.slane %v23929_v31, 4 }
 0x584   : > { %14231 = vmatprep.mubr.bf16.mxu0 %v22694_v12  ;;  %v16443_v15 = vpop.f32.mrb[181].mxu0 }
 0x585   : > { %14143 = vmatmul.mubr.bf16.gmra.mrb[4].mxu1 %v15647_v39  ;;  %v16444_v12 = vadd.f32 %v16443_v15, %v16442_v25  ;;  %v16445_v52 = vpop.f32.mrb[182].mxu0  ;;  %v16390_v29 = vpop.f32.mrb[156].mxu1  ;;  %v23065_v38 = vsel %vm18675_vm7, %v23930_v19, %v11523_v50  ;;  %v18146_v50 = vld [vmem:[#allocation8 + $0x3a8] sm:$0xff]  }
 0x586   : > { %14150 = vmatprep.mubr.bf16.mxu1 %v15650_v9  ;;  %16977 = vmatpush3.bf16.msra.mxu1 %v18134_v36  ;;  %v16446_v51 = vpop.f32.mrb[183].mxu0  ;;  %v16391_v54 = vpop.f32.mrb[157].mxu1  ;;  %v15649_v36 = vcombine.low %v11514_v42, %v11517_v24  ;;  %v15652_v57 = vcombine.high %v11521_v37, %v23065_v38  ;;  %v18135_v24 = vld [vmem:[#allocation8 + $0x450] sm:$0xff]  }
 0x587   : > { %16978 = vmatprep.subr.bf16.mxu1 %v18137_v62  ;;  %v23067_v43 = vadd.f32 %v16444_v12, %v10673_v32  ;;  %v16447_v21 = vadd.f32 %v16446_v51, %v16445_v52  ;;  %v16392_v41 = vadd.f32 %v16391_v54, %v16390_v29  ;;  %v16393_v49 = vpop.f32.mrb[158].mxu1  ;;  %v18145_v62 = vld [vmem:[#allocation8 + $0x3e8] sm:$0xff]   ;;  %v23931_v52 = vld [vmem:[#allocation39_spill] sm:$0xff] }
 0x588   : > { %v16394_v39 = vpop.f32.mrb[159].mxu1 }
 0x589   : > { %v23075_v32 = vadd.f32 %v16447_v21, %v23039_v30  ;;  %v23079_v23 = vadd.f32 %v16392_v41, %v22866_v0  ;;  %v16395_v9 = vadd.f32 %v16394_v39, %v16393_v49  ;;  %v11530_v30 = vrot.slane %v22841_v26, 5  ;;  %v18139_v26 = vld [vmem:[#allocation8 + $0x458] sm:$0xff]   ;;  %v18150_v41 = vld [vmem:[#allocation8 + $0x3b0] sm:$0xff]  }
 0x58a   : > { %16979 = vmatpush3.bf16.msra.mxu1 %v18138_v47  ;;  %v15651_v49 = vcombine.low %v11521_v37, %v23065_v38  ;;  %v18153_v39 = vld [vmem:[#allocation8 + $0x3f8] sm:$0xff]   ;;  %v11470_v38 = vld [vmem:[#allocation3 + $0x150] sm:$0xee] }
 0x58b   : > { %14232 = vmatmul.mubr.bf16.vlgmr.msra.gmra.mrb[32].mxu0 %v22721_v7  ;;  %16980 = vmatprep.subr.bf16.mxu1 %v18141_v1  ;;  %v11469_v7 = vld [vmem:[#allocation3 + $0x138] sm:$0xee]  ;;  %v16448_v42 = vpop.f32.mrb[184].mxu0  ;;  %v23082_v25 = vadd.f32 %v16395_v9, %v22879_v27  ;;  %v18136_v27 = vld [vmem:[#allocation8 + $0x410] sm:$0xff]   ;;  %v18143_v37 = vld [vmem:[#allocation8 + $0x460] sm:$0xff]  }
 0x58c   : > { %17037 = vmatpush3.bf16.msra.mxu0 %v18128_v44  ;;  %14239 = vmatprep.mubr.bf16.mxu0 %v22733_v5  ;;  %v16449_v47 = vpop.f32.mrb[185].mxu0  ;;  %v18149_v5 = vld [vmem:[#allocation8 + $0x3f0] sm:$0xff]   ;;  %v15553_v12 = vrot.slane %v11469_v7, 9  ;;  %v23932_v44 = vrot.slane %v23931_v52, 4  ;;  %v11537_v7 = vrot.slane %v22895_v48, 5  ;;  %v18147_v48 = vld [vmem:[#allocation8 + $0x468] sm:$0xff]  }
 0x58d   : > { %14151 = vmatmul.mubr.bf16.gmra.mrb[8].mxu1 %v15649_v36  ;;  %17038 = vmatprep.subr.bf16.mxu0 %v18131_v14  ;;  %v16450_v0 = vadd.f32 %v16449_v47, %v16448_v42  ;;  %v16451_v15 = vpop.f32.mrb[186].mxu0  ;;  %v16476_v1 = vpop.f32.mrb[160].mxu1  ;;  %v15554_v47 = vrot.slane %v11470_v38, 9 }
 0x58e   : > { %14158 = vmatprep.mubr.bf16.mxu1 %v15652_v57  ;;  %16981 = vmatpush3.bf16.msra.mxu1 %v18142_v4  ;;  %v23089_v29 = vsel %vm18675_vm7, %v23932_v44, %v11530_v30  ;;  %v16452_v18 = vpop.f32.mrb[187].mxu0  ;;  %v16477_v31 = vpop.f32.mrb[161].mxu1  ;;  %v11528_v21 = vsel %vm18675_vm7, %v15553_v12, %v23931_v52  ;;  %v23933_v57 = vld [vmem:[#allocation19_spill] sm:$0xff] }
 0x58f   : > { %16982 = vmatprep.subr.bf16.mxu1 %v18145_v62  ;;  %v23092_v19 = vadd.f32 %v16450_v0, %v23055_v55  ;;  %v16453_v51 = vadd.f32 %v16452_v18, %v16451_v15  ;;  %v16478_v54 = vadd.f32 %v16477_v31, %v16476_v1  ;;  %v16479_v14 = vpop.f32.mrb[162].mxu1  ;;  %v15654_v36 = vcombine.high %v11528_v21, %v23089_v29 }
 0x590   : > { %17039 = vmatpush3.bf16.msra.mxu0 %v18132_v61  ;;  %v16480_v4 = vpop.f32.mrb[163].mxu1  ;;  %v18140_v61 = vld [vmem:[#allocation8 + $0x418] sm:$0xff]  }
 0x591   : > { %17040 = vmatprep.subr.bf16.mxu0 %v18135_v24  ;;  %v23101_v55 = vadd.f32 %v16453_v51, %v23058_v8  ;;  %v10827_v62 = vadd.f32 %v16478_v54, %v22921_v11  ;;  %v16481_v9 = vadd.f32 %v16480_v4, %v16479_v14  ;;  %v18154_v8 = vld [vmem:[#allocation8 + $0x3b8] sm:$0xff]  }
 0x592   : > { %16983 = vmatpush3.bf16.msra.mxu1 %v18146_v50  ;;  %v23936_v51 = vld [vmem:[#allocation22_spill] sm:$0xff] }
 0x593   : > { %14240 = vmatmul.mubr.bf16.gmra.mrb[36].mxu0 %v22753_v34  ;;  %16984 = vmatprep.subr.bf16.mxu1 %v18149_v5  ;;  %v16454_v34 = vpop.f32.mrb[188].mxu0  ;;  %v23106_v24 = vadd.f32 %v16481_v9, %v22927_v59  ;;  %v23934_v5 = vld [vmem:[#allocation44_spill] sm:$0xff]  ;;  %v18144_v59 = vld [vmem:[#allocation8 + $0x420] sm:$0xff]  }
 0x594   : > { %14247 = vmatprep.mubr.bf16.mxu0 %v23933_v57  ;;  %17041 = vmatpush3.bf16.msra.mxu0 %v18136_v27  ;;  %v16455_v42 = vpop.f32.mrb[189].mxu0  ;;  %v23935_v0 = vrot.slane %v23934_v5, 4  ;;  %v11535_v31 = vsel %vm18675_vm7, %v15554_v47, %v23934_v5  ;;  %v10889_v57 = vmax.f32 %v10827_v62, 0.0  ;;  %v23938_v47 = vld [vmem:[#allocation47_spill] sm:$0xff] }
 0x595   : > { %14159 = vmatmul.mubr.bf16.gmra.mrb[12].mxu1 %v15651_v49  ;;  %17042 = vmatprep.subr.bf16.mxu0 %v18139_v26  ;;  %v16456_v30 = vadd.f32 %v16455_v42, %v16454_v34  ;;  %v16457_v11 = vpop.f32.mrb[190].mxu0  ;;  %v16482_v50 = vpop.f32.mrb[164].mxu1  ;;  %v15653_v26 = vcombine.low %v11528_v21, %v23089_v29 }
 0x596   : > { %14166 = vmatprep.mubr.bf16.mxu1 %v15654_v36  ;;  %16985 = vmatpush3.bf16.msra.mxu1 %v18150_v41  ;;  %v23113_v15 = vsel %vm18675_vm7, %v23935_v0, %v11537_v7  ;;  %v16458_v1 = vpop.f32.mrb[191].mxu0  ;;  %v16483_v12 = vpop.f32.mrb[165].mxu1  ;;  %v18148_v36 = vld [vmem:[#allocation8 + $0x428] sm:$0xff]  }
 0x597   : > { %16986 = vmatprep.subr.bf16.mxu1 %v18153_v39  ;;  %v23116_v52 = vadd.f32 %v16456_v30, %v23079_v23  ;;  %v16459_v44 = vadd.f32 %v16458_v1, %v16457_v11  ;;  %v16484_v27 = vadd.f32 %v16483_v12, %v16482_v50  ;;  %v16485_v18 = vpop.f32.mrb[166].mxu1  ;;  %v15656_v14 = vcombine.high %v11535_v31, %v23113_v15  ;;  %v23937_v23 = vld [vmem:[#allocation15_spill] sm:$0xff]  ;;  %v18151_v39 = vld [vmem:[#allocation8 + $0x470] sm:$0xff]  }
 0x598   : > { %17043 = vmatpush3.bf16.msra.mxu0 %v18140_v61  ;;  %v16486_v54 = vpop.f32.mrb[167].mxu1  ;;  %v11471_v61 = vld [vmem:[#allocation3 + $0x168] sm:$0xee]  ;;  %v18152_v30 = vld [vmem:[#allocation8 + $0x430] sm:$0xff]  }
 0x599   : > { %17044 = vmatprep.subr.bf16.mxu0 %v18143_v37  ;;  %v23125_v41 = vadd.f32 %v16459_v44, %v23082_v25  ;;  %v10835_v49 = vadd.f32 %v16484_v27, %v22964_v16  ;;  %v16487_v4 = vadd.f32 %v16486_v54, %v16485_v18  ;;  %v11544_v25 = vrot.slane %v22945_v63, 5  ;;  %v18224_v63 = vld [vmem:[#allocation3 + $0xf8] sm:$0xff]  ;;  %v23941_v54 = vld [vmem:[#allocation25_spill] sm:$0xff] }
 0x59a   : > { %16987 = vmatpush3.bf16.msra.mxu1 %v18154_v8  ;;  %v10890_v37 = vmax.f32 %v23106_v24, 0.0  ;;  %v15555_v50 = vrot.slane %v11471_v61, 9  ;;  %v11588_v0 = vshll.u32 %v18224_v63, 16  ;;  %v11592_v24 = vshrl.u32 %v18224_v63, 16  ;;  %v23940_v18 = vld [vmem:[#allocation16_spill] sm:$0xff] }
 0x59b   : > { %14248 = vmatmul.mubr.bf16.gmra.mrb[40].mxu0 %v23936_v51  ;;  %v10891_v29 = vmax.f32 %v10835_v49, 0.0  ;;  %v16540_v21 = vpop.f32.mrb[192].mxu0  ;;  %v10838_v9 = vadd.f32 %v16487_v4, %v22974_v22  ;;  %v23939_v22 = vrot.slane %v23938_v47, 4  ;;  %v15655_v27 = vcombine.low %v11535_v31, %v23113_v15  ;;  %v18156_v4 = vld [vmem:[#allocation8 + $0x438] sm:$0xff]  }
 0x59c   : > { %14255 = vmatprep.mubr.bf16.mxu0 %v23937_v23  ;;  %17045 = vmatpush3.bf16.msra.mxu0 %v18144_v59  ;;  %v16541_v38 = vpop.f32.mrb[193].mxu0  ;;  %v18155_v59 = vld [vmem:[#allocation8 + $0x478] sm:$0xff]   ;;  %v11542_v51 = vsel %vm18675_vm7, %v15555_v50, %v23938_v47  ;;  %v11594_v15 = vrot.slane %v11592_v24, 4 }
 0x59d   : > { %14167 = vmatmul.mubr.bf16.gmra.mrb[16].mxu1 %v15653_v26  ;;  %17046 = vmatprep.subr.bf16.mxu0 %v18147_v48  ;;  %v10905_v34 = vmax.f32 %v10889_v57, %v10891_v29  ;;  %v23132_v16 = vadd.f32 %v16541_v38, %v16540_v21  ;;  %v10892_v7 = vmax.f32 %v10838_v9, 0.0  ;;  %v16543_v8 = vpop.f32.mrb[194].mxu0  ;;  %v16488_v42 = vpop.f32.mrb[168].mxu1  ;;  %v11545_v5 = vsel %vm18675_vm7, %v23939_v22, %v11544_v25 }
 0x59e   : > { %14174 = vmatprep.mubr.bf16.mxu1 %v15656_v14  ;;  %v16544_v62 = vpop.f32.mrb[195].mxu0  ;;  %v16489_v11 = vpop.f32.mrb[169].mxu1  ;;  %v15658_v49 = vcombine.high %v11542_v51, %v11545_v5  ;;  %v11551_v21 = vrot.slane %v22986_v45, 5  ;;  %v15657_v47 = vcombine.low %v11542_v51, %v11545_v5 }
 0x59f   : > { %10913 = vst [vmem:[#allocation4] sm:$0xff] %v10905_v34  ;;  %v10906_v1 = vmax.f32 %v10890_v37, %v10892_v7  ;;  %v23138_v12 = vadd.f32 %v16544_v62, %v16543_v8  ;;  %v16490_v48 = vadd.f32 %v16489_v11, %v16488_v42  ;;  %v16491_v44 = vpop.f32.mrb[170].mxu1  ;;  %v23942_v34 = vld [vmem:[#allocation50_spill] sm:$0xff] }
 0x5a0   : > { %17047 = vmatpush3.bf16.msra.mxu0 %v18148_v36  ;;  %v16492_v26 = vpop.f32.mrb[171].mxu1  ;;  %v11472_v36 = vld [vmem:[#allocation3 + $0x180] sm:$0xee]  ;;  %v23943_v7 = vrot.slane %v23942_v34, 4 }
 0x5a1   : > { %17048 = vmatprep.subr.bf16.mxu0 %v18151_v39  ;;  %10914 = vst [vmem:[#allocation4 + $0x8] sm:$0xff] %v10906_v1  ;;  %v10843_v14 = vadd.f32 %v16490_v48, %v23001_v60  ;;  %v16493_v23 = vadd.f32 %v16492_v26, %v16491_v44  ;;  %v23147_v39 = vrot.slane %v11588_v0, 5  ;;  %v15556_v38 = vrot.slane %v11472_v36, 9  ;;  %v18226_v0 = vld [vmem:[#allocation3 + $0x100] sm:$0x11] }
 0x5a2   : > { %v11552_v8 = vsel %vm18675_vm7, %v23943_v7, %v11551_v21  ;;  %v11598_v24 = vshll.u32 %v18226_v0, 16 }
 0x5a3   : > { %14256 = vmatmul.mubr.bf16.gmra.mrb[44].mxu0 %v23940_v18  ;;  %v16546_v31 = vpop.f32.mrb[196].mxu0  ;;  %v10846_v57 = vadd.f32 %v16493_v23, %v23010_v2  ;;  %v11595_v42 = vor.u32 %v11594_v15, %v23147_v39  ;;  %v18225_v2 = vld [vmem:[#allocation3 + $0x110] sm:$0xff]  ;;  %v11549_v63 = vsel %vm18675_vm7, %v15556_v38, %v23942_v34  ;;  %v10893_v18 = vmax.f32 %v10843_v14, 0.0 }
 0x5a4   : > { %14263 = vmatprep.mubr.bf16.mxu0 %v23941_v54  ;;  %17049 = vmatpush3.bf16.msra.mxu0 %v18152_v30  ;;  %v16547_v29 = vpop.f32.mrb[197].mxu0  ;;  %v11612_v30 = vshll.u32 %v18225_v2, 16  ;;  %v11616_v62 = vshrl.u32 %v18225_v2, 16  ;;  %v15660_v48 = vcombine.high %v11549_v63, %v11552_v8  ;;  %v11600_v23 = vrot.slane %v11598_v24, 5 }
 0x5a5   : > { %14175 = vmatmul.mubr.bf16.gmra.mrb[20].mxu1 %v15655_v27  ;;  %17050 = vmatprep.subr.bf16.mxu0 %v18155_v59  ;;  %v23151_v9 = vadd.f32 %v16547_v29, %v16546_v31  ;;  %v16549_v60 = vpop.f32.mrb[198].mxu0  ;;  %v16494_v61 = vpop.f32.mrb[172].mxu1  ;;  %v11596_v44 = vrot.slane %v11595_v42, 4  ;;  %v15659_v34 = vcombine.low %v11549_v63, %v11552_v8  ;;  %v23944_v42 = vld [vmem:[#allocation18_spill] sm:$0xff] }
 0x5a6   : > { %14182 = vmatprep.mubr.bf16.mxu1 %v15658_v49  ;;  %v16550_v25 = vpop.f32.mrb[199].mxu0  ;;  %v16495_v37 = vpop.f32.mrb[173].mxu1  ;;  %v23166_v27 = vrot.slane %v11612_v30, 5  ;;  %v11618_v5 = vrot.slane %v11616_v62, 4  ;;  %v10894_v49 = vmax.f32 %v10846_v57, 0.0  ;;  %v11591_v2 = vsel %vm18665_vm4, %v23944_v42, %v23147_v39 }
 0x5a7   : > { %v23158_v11 = vadd.f32 %v16550_v25, %v16549_v60  ;;  %v16496_v45 = vadd.f32 %v16495_v37, %v16494_v61  ;;  %v16497_v50 = vpop.f32.mrb[174].mxu1  ;;  %v11601_v21 = vsel %vm18665_vm4, %v11596_v44, %v11600_v23  ;;  %v18227_v60 = vld [vmem:[#allocation3 + $0x128] sm:$0xff]  ;;  %v18228_v30 = vld [vmem:[#allocation3 + $0x118] sm:$0x11] }
 0x5a8   : > { %17051 = vmatpush3.bf16.msra.mxu0 %v18156_v4  ;;  %v16498_v22 = vpop.f32.mrb[175].mxu1  ;;  %v11619_v14 = vor.u32 %v11618_v5, %v23166_v27  ;;  %v11636_v61 = vshll.u32 %v18227_v60, 16  ;;  %v11622_v62 = vshll.u32 %v18228_v30, 16 }
 0x5a9   : > { %v10851_v59 = vadd.f32 %v16496_v45, %v23029_v33  ;;  %v16499_v1 = vadd.f32 %v16498_v22, %v16497_v50 }
 0x5aa   : > { %v11620_v22 = vrot.slane %v11619_v14, 4  ;;  %v23183_v8 = vrot.slane %v11636_v61, 5  ;;  %v11624_v39 = vrot.slane %v11622_v62, 5 }
 0x5ab   : > { %14264 = vmatmul.mubr.bf16.gmra.mrb[48].mxu0 %v22908_v28  ;;  %v10895_v28 = vmax.f32 %v10851_v59, 0.0  ;;  %v16552_v26 = vpop.f32.mrb[200].mxu0  ;;  %v10854_v51 = vadd.f32 %v16499_v1, %v23035_v46  ;;  %v11640_v46 = vshrl.u32 %v18227_v60, 16 }
 0x5ac   : > { %14271 = vmatprep.mubr.bf16.mxu0 %v22917_v13  ;;  %v16553_v54 = vpop.f32.mrb[201].mxu0 }
 0x5ad   : > { %14183 = vmatmul.mubr.bf16.gmra.mrb[24].mxu1 %v15657_v47  ;;  %v10907_v4 = vmax.f32 %v10893_v18, %v10895_v28  ;;  %v23169_v13 = vadd.f32 %v16553_v54, %v16552_v26  ;;  %v10896_v33 = vmax.f32 %v10854_v51, 0.0  ;;  %v16555_v36 = vpop.f32.mrb[202].mxu0  ;;  %v16500_v15 = vpop.f32.mrb[176].mxu1  ;;  %v15678_v47 = vcombine.high %v11591_v2, %v11601_v21 }
 0x5ae   : > { %14190 = vmatprep.mubr.bf16.mxu1 %v15660_v48  ;;  %v16556_v31 = vpop.f32.mrb[203].mxu0  ;;  %v16501_v29 = vpop.f32.mrb[177].mxu1  ;;  %v11625_v18 = vsel %vm18665_vm4, %v11620_v22, %v11624_v39 }
 0x5af   : > { %10915 = vst [vmem:[#allocation4 + $0x10] sm:$0xff] %v10907_v4  ;;  %v10908_v38 = vmax.f32 %v10894_v49, %v10896_v33  ;;  %v23174_v25 = vadd.f32 %v16556_v31, %v16555_v36  ;;  %v16502_v57 = vadd.f32 %v16501_v29, %v16500_v15  ;;  %v16503_v37 = vpop.f32.mrb[178].mxu1  ;;  %v15677_v4 = vcombine.low %v11591_v2, %v11601_v21  ;;  %v23945_v36 = vld [vmem:[#allocation20_spill] sm:$0xff]  ;;  %v18231_v31 = vld [vmem:[#allocation3 + $0x130] sm:$0x11] }
 0x5b0   : > { %v16504_v7 = vpop.f32.mrb[179].mxu1  ;;  %v11615_v15 = vsel %vm18665_vm4, %v23945_v36, %v23166_v27  ;;  %v11646_v29 = vshll.u32 %v18231_v31, 16 }
 0x5b1   : > { %10916 = vst [vmem:[#allocation4 + $0x18] sm:$0xff] %v10908_v38  ;;  %v10859_v45 = vadd.f32 %v16502_v57, %v23046_v40  ;;  %v16505_v50 = vadd.f32 %v16504_v7, %v16503_v37  ;;  %v15680_v61 = vcombine.high %v11615_v15, %v11625_v18 }
 0x5b2   : > { %v11648_v30 = vrot.slane %v11646_v29, 5 }
 0x5b3   : > { %14272 = vmatmul.mubr.bf16.gmra.mrb[52].mxu0 %v22943_v10  ;;  %v11642_v10 = vrot.slane %v11640_v46, 4  ;;  %v16558_v63 = vpop.f32.mrb[204].mxu0  ;;  %v10862_v0 = vadd.f32 %v16505_v50, %v23051_v53  ;;  %v18230_v53 = vld [vmem:[#allocation3 + $0x140] sm:$0xff]  ;;  %v10897_v37 = vmax.f32 %v10859_v45, 0.0 }
 0x5b4   : > { %14279 = vmatprep.mubr.bf16.mxu0 %v22969_v58  ;;  %v16559_v24 = vpop.f32.mrb[205].mxu0  ;;  %v23188_v58 = vld [vmem:[#allocation3] sm:$0xff]  ;;  %v11660_v26 = vshll.u32 %v18230_v53, 16  ;;  %v11664_v51 = vshrl.u32 %v18230_v53, 16 }
 0x5b5   : > { %14191 = vmatmul.mubr.bf16.gmra.mrb[28].mxu1 %v15659_v34  ;;  %v23186_v59 = vadd.f32 %v16559_v24, %v16558_v63  ;;  %v16561_v1 = vpop.f32.mrb[206].mxu0  ;;  %v16506_v48 = vpop.f32.mrb[180].mxu1  ;;  %v15676_v40 = vcombine.high %v23188_v58, %v23188_v58  ;;  %v11643_v28 = vor.u32 %v11642_v10, %v23183_v8  ;;  %v10898_v62 = vmax.f32 %v10862_v0, 0.0 }
 0x5b6   : > { %14328 = vmatprep.mubr.bf16.mxu1 %v15678_v47  ;;  %v16562_v44 = vpop.f32.mrb[207].mxu0  ;;  %v16507_v5 = vpop.f32.mrb[181].mxu1  ;;  %v23203_v38 = vrot.slane %v11660_v26, 5  ;;  %v11666_v57 = vrot.slane %v11664_v51, 4  ;;  %v23946_v26 = vld [vmem:[#allocation17_spill] sm:$0xff] }
 0x5b7   : > { %v23195_v54 = vadd.f32 %v16562_v44, %v16561_v1  ;;  %v16508_v23 = vadd.f32 %v16507_v5, %v16506_v48  ;;  %v16509_v49 = vpop.f32.mrb[182].mxu1  ;;  %v11644_v46 = vrot.slane %v11643_v28, 4  ;;  %v15679_v28 = vcombine.low %v11615_v15, %v11625_v18 }
 0x5b8   : > { %v16510_v33 = vpop.f32.mrb[183].mxu1  ;;  %v11639_v51 = vsel %vm18665_vm4, %v23946_v26, %v23183_v8 }
 0x5b9   : > { %v10867_v14 = vadd.f32 %v16508_v23, %v23067_v43  ;;  %v16511_v60 = vadd.f32 %v16510_v33, %v16509_v49  ;;  %v15675_v43 = vcombine.low %v23188_v58, %v23188_v58  ;;  %v11649_v39 = vsel %vm18665_vm4, %v11644_v46, %v11648_v30  ;;  %v18233_v23 = vld [vmem:[#allocation3 + $0x148] sm:$0x11]  ;;  %v23948_v33 = vld [vmem:[#allocation36_spill] sm:$0xff] }
 0x5ba   : > { %v11670_v49 = vshll.u32 %v18233_v23, 16 }
 0x5bb   : > { %14280 = vmatmul.mubr.bf16.gmra.mrb[56].mxu0 %v23005_v35  ;;  %v18232_v35 = vld [vmem:[#allocation3 + $0x158] sm:$0xff]  ;;  %v10899_v34 = vmax.f32 %v10867_v14, 0.0  ;;  %v16564_v7 = vpop.f32.mrb[208].mxu0  ;;  %v10870_v42 = vadd.f32 %v16511_v60, %v23075_v32  ;;  %v11667_v32 = vor.u32 %v11666_v57, %v23203_v38  ;;  %v15682_v14 = vcombine.high %v11639_v51, %v11649_v39  ;;  %v18234_v57 = vld [vmem:[#allocation3 + $0x170] sm:$0xff] }
 0x5bc   : > { %14287 = vmatprep.mubr.bf16.mxu0 %v15676_v40  ;;  %v11684_v21 = vshll.u32 %v18232_v35, 16  ;;  %v11688_v27 = vshrl.u32 %v18232_v35, 16  ;;  %v16565_v2 = vpop.f32.mrb[209].mxu0  ;;  %v11672_v46 = vrot.slane %v11670_v49, 5  ;;  %v11708_v35 = vshll.u32 %v18234_v57, 16 }
 0x5bd   : > { %14329 = vmatmul.mubr.bf16.vlgmr.msra.gmra.mrb[32].mxu1 %v15677_v4  ;;  %v10909_v50 = vmax.f32 %v10897_v37, %v10899_v34  ;;  %v23208_v47 = vadd.f32 %v16565_v2, %v16564_v7  ;;  %v10900_v22 = vmax.f32 %v10870_v42, 0.0  ;;  %v16567_v10 = vpop.f32.mrb[210].mxu0  ;;  %v16512_v63 = vpop.f32.mrb[184].mxu1  ;;  %v23947_v4 = vld [vmem:[#allocation34_spill] sm:$0xff]  ;;  %v11668_v60 = vrot.slane %v11667_v32, 4 }
 0x5be   : > { %14336 = vmatprep.mubr.bf16.mxu1 %v15680_v61  ;;  %v16568_v24 = vpop.f32.mrb[211].mxu0  ;;  %v16513_v45 = vpop.f32.mrb[185].mxu1  ;;  %v23213_v1 = vrot.slane %v11684_v21, 5  ;;  %v11690_v5 = vrot.slane %v11688_v27, 4  ;;  %v23949_v36 = vcombine.high %v23947_v4, %v23948_v33  ;;  %v11712_v21 = vshrl.u32 %v18234_v57, 16 }
 0x5bf   : > { %10917 = vst [vmem:[#allocation4 + $0x20] sm:$0xff] %v10909_v50  ;;  %v10910_v48 = vmax.f32 %v10898_v62, %v10900_v22  ;;  %v23215_v40 = vadd.f32 %v16568_v24, %v16567_v10  ;;  %v16514_v0 = vadd.f32 %v16513_v45, %v16512_v63  ;;  %v16515_v44 = vpop.f32.mrb[186].mxu1  ;;  %v15681_v2 = vcombine.low %v11639_v51, %v11649_v39  ;;  %v23950_v22 = vld [vmem:[#allocation24_spill] sm:$0xff] }
 0x5c0   : > { %v16516_v53 = vpop.f32.mrb[187].mxu1  ;;  %v11691_v61 = vor.u32 %v11690_v5, %v23213_v1  ;;  %v11663_v10 = vsel %vm18665_vm4, %v23950_v22, %v23203_v38  ;;  %v23951_v24 = vcombine.low %v23947_v4, %v23948_v33  ;;  %v23240_v39 = vrot.slane %v11708_v35, 5  ;;  %v23254_v33 = vld [vmem:[%s23577_s6] ss:$0 sm:$0xff] }
 0x5c1   : > { %10918 = vst [vmem:[#allocation4 + $0x28] sm:$0xff] %v10910_v48  ;;  %v10875_v31 = vadd.f32 %v16514_v0, %v23092_v19  ;;  %v16517_v29 = vadd.f32 %v16516_v53, %v16515_v44  ;;  %v18235_v19 = vld [vmem:[#allocation3 + $0x160] sm:$0x11]  ;;  %v11714_v32 = vrot.slane %v11712_v21, 4  ;;  %v23952_v48 = vld [vmem:[#allocation35_spill] sm:$0xff] }
 0x5c2   : > { %v11694_v42 = vshll.u32 %v18235_v19, 16  ;;  %v11692_v63 = vrot.slane %v11691_v61, 4  ;;  %v23953_v0 = vld [vmem:[#allocation37_spill] sm:$0xff] }
 0x5c3   : > { %14288 = vmatmul.mubr.bf16.gmra.mrb[60].mxu0 %v15675_v43  ;;  %v16570_v18 = vpop.f32.mrb[212].mxu0  ;;  %v10878_v15 = vadd.f32 %v16517_v29, %v23101_v55  ;;  %v11673_v55 = vsel %vm18665_vm4, %v11668_v60, %v11672_v46  ;;  %v23954_v44 = vcombine.high %v23952_v48, %v23953_v0  ;;  %v10901_v38 = vmax.f32 %v10875_v31, 0.0  ;;  %v18236_v29 = vld [vmem:[#allocation3 + $0x188] sm:$0xff] }
 0x5c4   : > { %14425 = vmatprep.mubr.bf16.mxu0 %v23949_v36  ;;  %v16571_v8 = vpop.f32.mrb[213].mxu0  ;;  %v15684_v53 = vcombine.high %v11663_v10, %v11673_v55  ;;  %v11696_v26 = vrot.slane %v11694_v42, 5  ;;  %v11715_v36 = vor.u32 %v11714_v32, %v23240_v39  ;;  %v11736_v31 = vshrl.u32 %v18236_v29, 16 }
 0x5c5   : > { %14337 = vmatmul.mubr.bf16.gmra.mrb[36].mxu1 %v15679_v28  ;;  %v23227_v37 = vadd.f32 %v16571_v8, %v16570_v18  ;;  %v16573_v34 = vpop.f32.mrb[214].mxu0  ;;  %v16518_v7 = vpop.f32.mrb[188].mxu1  ;;  %v10902_v60 = vmax.f32 %v10878_v15, 0.0  ;;  %v15683_v35 = vcombine.low %v11663_v10, %v11673_v55  ;;  %v13652_v42 = vadd.f32 %v23132_v16, %v23254_v33  ;;  %v23956_v16 = vld [vmem:[#allocation40_spill] sm:$0xff]  ;;  %v23957_v10 = vld [vmem:[#allocation43_spill] sm:$0xff] }
 0x5c6   : > { %14344 = vmatprep.mubr.bf16.mxu1 %v15682_v14  ;;  %v16574_v27 = vpop.f32.mrb[215].mxu0  ;;  %v16519_v43 = vpop.f32.mrb[189].mxu1  ;;  %v23249_v4 = vsel %vm18665_vm4, %v11692_v63, %v11696_v26  ;;  %v11732_v14 = vshll.u32 %v18236_v29, 16  ;;  %v23955_v55 = vcombine.low %v23952_v48, %v23953_v0  ;;  %v11716_v22 = vrot.slane %v11715_v36, 4 }
 0x5c7   : > { %v23231_v30 = vadd.f32 %v16574_v27, %v16573_v34  ;;  %v16520_v62 = vadd.f32 %v16519_v43, %v16518_v7  ;;  %v16521_v50 = vpop.f32.mrb[190].mxu1  ;;  %v11687_v34 = vsel %vm18665_vm4, %v22933_v20, %v23213_v1  ;;  %v18237_v7 = vld [vmem:[#allocation3 + $0x178] sm:$0x11]  ;;  %v13655_v1 = vadd.f32 %v23138_v12, %v23254_v33 }
 0x5c8   : > { %v16522_v45 = vpop.f32.mrb[191].mxu1  ;;  %v11718_v19 = vshll.u32 %v18237_v7, 16  ;;  %v11734_v20 = vrot.slane %v11732_v14, 5  ;;  %v23958_v63 = vcombine.high %v23956_v16, %v23957_v10  ;;  %v11738_v32 = vrot.slane %v11736_v31, 4 }
 0x5c9   : > { %v10883_v5 = vadd.f32 %v16520_v62, %v23116_v52  ;;  %v16523_v28 = vadd.f32 %v16522_v45, %v16521_v50  ;;  %v15686_v50 = vcombine.high %v11687_v34, %v23249_v4  ;;  %v11750_v48 = vshll.u32 %v23188_v58, 16 }
 0x5ca   : > { %v11711_v36 = vsel %vm18665_vm4, %v22979_v56, %v23240_v39  ;;  %v13660_v31 = vadd.f32 %v23151_v9, %v23254_v33  ;;  %v13663_v7 = vadd.f32 %v23158_v11, %v23254_v33  ;;  %v23960_v9 = vld [vmem:[#allocation42_spill] sm:$0xff] }
 0x5cb   : > { %14426 = vmatmul.mubr.bf16.vlgmr.msra.gmra.mrb[64].mxu0 %v23951_v24  ;;  %v10903_v51 = vmax.f32 %v10883_v5, 0.0  ;;  %v16576_v23 = vpop.f32.mrb[216].mxu0  ;;  %v10886_v49 = vadd.f32 %v16523_v28, %v23125_v41  ;;  %v11720_v28 = vrot.slane %v11718_v19, 5  ;;  %v11752_v14 = vrot.slane %v11750_v48, 5  ;;  %v23961_v19 = vld [vmem:[#allocation45_spill] sm:$0xff] }
 0x5cc   : > { %14433 = vmatprep.mubr.bf16.mxu0 %v23954_v44  ;;  %v16577_v52 = vpop.f32.mrb[217].mxu0  ;;  %v11747_v44 = vshrl.u32 %v23188_v58, 16 }
 0x5cd   : > { %14345 = vmatmul.mubr.bf16.gmra.mrb[40].mxu1 %v15681_v2  ;;  %v10911_v18 = vmax.f32 %v10901_v38, %v10903_v51  ;;  %v23257_v61 = vadd.f32 %v16577_v52, %v16576_v23  ;;  %v10904_v41 = vmax.f32 %v10886_v49, 0.0  ;;  %v16579_v8 = vpop.f32.mrb[218].mxu0  ;;  %v16604_v46 = vpop.f32.mrb[192].mxu1  ;;  %v11721_v51 = vsel %vm18665_vm4, %v11716_v22, %v11720_v28 }
 0x5ce   : > { %14352 = vmatprep.mubr.bf16.mxu1 %v15684_v53  ;;  %v16580_v57 = vpop.f32.mrb[219].mxu0  ;;  %v16605_v21 = vpop.f32.mrb[193].mxu1  ;;  %v11739_v23 = vor.u32 %v11738_v32, %v11734_v20  ;;  %v11749_v29 = vrot.slane %v11747_v44, 4  ;;  %v15688_v39 = vcombine.high %v11711_v36, %v11721_v51  ;;  %v11735_v32 = vsel %vm18665_vm4, %v23014_v6, %v11734_v20 }
 0x5cf   : > { %10919 = vst [vmem:[#allocation4 + $0x30] sm:$0xff] %v10911_v18  ;;  %v10912_v15 = vmax.f32 %v10902_v60, %v10904_v41  ;;  %v23265_v27 = vadd.f32 %v16580_v57, %v16579_v8  ;;  %v16606_v2 = vadd.f32 %v16605_v21, %v16604_v46  ;;  %v16607_v43 = vpop.f32.mrb[194].mxu1  ;;  %v18238_v8 = vld [vmem:[#allocation3 + $0x190] sm:$0x11]  ;;  %v23290_v57 = vld [vmem:[#allocation3 + $0x1a8] sm:$0x11]  ;;  %v23959_v21 = vcombine.low %v23956_v16, %v23957_v10 }
 0x5d0   : > { %v16608_v62 = vpop.f32.mrb[195].mxu1  ;;  %v11742_v46 = vshll.u32 %v18238_v8, 16  ;;  %v13671_v6 = vadd.f32 %v23174_v25, %v23254_v33 }
 0x5d1   : > { %10920 = vst [vmem:[#allocation4 + $0x38] sm:$0xff] %v10912_v15  ;;  %v13749_v24 = vadd.f32 %v16606_v2, %v13652_v42  ;;  %v16609_v45 = vadd.f32 %v16608_v62, %v16607_v43  ;;  %v23962_v42 = vcombine.high %v23960_v9, %v23961_v19  ;;  %v11740_v43 = vrot.slane %v11739_v23, 4 }
 0x5d2   : > { %v15687_v23 = vcombine.low %v11711_v36, %v11721_v51 }
 0x5d3   : > { %14434 = vmatmul.mubr.bf16.gmra.mrb[68].mxu0 %v23955_v55  ;;  %v16582_v0 = vpop.f32.mrb[220].mxu0  ;;  %v13752_v5 = vadd.f32 %v16609_v45, %v13655_v1  ;;  %v11753_v55 = vor.u32 %v11752_v14, %v11749_v29 }
 0x5d4   : > { %14441 = vmatprep.mubr.bf16.mxu0 %v23958_v63  ;;  %v16583_v53 = vpop.f32.mrb[221].mxu0 }
 0x5d5   : > { %14353 = vmatmul.mubr.bf16.gmra.mrb[44].mxu1 %v15683_v35  ;;  %v23278_v26 = vadd.f32 %v16583_v53, %v16582_v0  ;;  %v16585_v12 = vpop.f32.mrb[222].mxu0  ;;  %v15685_v35 = vcombine.low %v11687_v34, %v23249_v4  ;;  %v11766_v4 = vshll.u32 %v23290_v57, 16  ;;  %v11754_v44 = vrot.slane %v11753_v55, 4 }
 0x5d6   : > { %14360 = vmatprep.mubr.bf16.mxu1 %v15686_v50  ;;  %v16610_v38 = vpop.f32.mrb[196].mxu1  ;;  %v16586_v49 = vpop.f32.mrb[223].mxu0  ;;  %v11744_v50 = vrot.slane %v11742_v46, 5  ;;  %v13668_v0 = vadd.f32 %v23169_v13, %v23254_v33 }
 0x5d7   : > { %v16611_v52 = vpop.f32.mrb[197].mxu1  ;;  %v23288_v60 = vadd.f32 %v16586_v49, %v16585_v12  ;;  %v11768_v48 = vrot.slane %v11766_v4, 5  ;;  %v23963_v49 = vcombine.low %v23960_v9, %v23961_v19  ;;  %v11759_v36 = vsel %vm18665_vm4, %v11754_v44, %v11752_v14 }
 0x5d8   : > { %v16612_v18 = vadd.f32 %v16611_v52, %v16610_v38  ;;  %v16613_v41 = vpop.f32.mrb[198].mxu1  ;;  %v11745_v11 = vsel %vm18665_vm4, %v11740_v43, %v11744_v50  ;;  %v13676_v9 = vadd.f32 %v23186_v59, %v23254_v33  ;;  %v13679_v4 = vadd.f32 %v23195_v54, %v23254_v33  ;;  %v23968_v50 = vld [vmem:[#allocation51_spill] sm:$0xff] }
 0x5d9   : > { %v16614_v56 = vpop.f32.mrb[199].mxu1  ;;  %v15690_v29 = vcombine.high %v11735_v32, %v11745_v11  ;;  %v11769_v46 = vsel %vm18665_vm4, %v11754_v44, %v11768_v48  ;;  %v15689_v55 = vcombine.low %v11735_v32, %v11745_v11 }
 0x5da   : > { %v13757_v15 = vadd.f32 %v16612_v18, %v13660_v31  ;;  %v16615_v2 = vadd.f32 %v16614_v56, %v16613_v41  ;;  %v23964_v31 = vld [vmem:[#allocation48_spill] sm:$0xff]  ;;  %v23965_v18 = vld [vmem:[#allocation49_spill] sm:$0xff] }
 0x5db   : > { %14442 = vmatmul.mubr.bf16.gmra.mrb[72].mxu0 %v23959_v21  ;;  %v16668_v34 = vpop.f32.mrb[224].mxu0  ;;  %v23966_v13 = vcombine.high %v23964_v31, %v23965_v18  ;;  %v23967_v3 = vcombine.low %v23964_v31, %v23965_v18  ;;  %v13687_v18 = vadd.f32 %v23215_v40, %v23254_v33 }
 0x5dc   : > { %14449 = vmatprep.mubr.bf16.mxu0 %v23962_v42  ;;  %v13760_v62 = vadd.f32 %v16615_v2, %v13663_v7  ;;  %v16669_v22 = vpop.f32.mrb[225].mxu0  ;;  %v15692_v7 = vcombine.high %v11759_v36, %v11769_v46 }
 0x5dd   : > { %14361 = vmatmul.mubr.bf16.gmra.mrb[48].mxu1 %v15685_v35  ;;  %v16670_v1 = vadd.f32 %v16669_v22, %v16668_v34  ;;  %v16671_v16 = vpop.f32.mrb[226].mxu0  ;;  %v23969_v22 = vld [vmem:[#allocation53_spill] sm:$0xff] }
 0x5de   : > { %14368 = vmatprep.mubr.bf16.mxu1 %v15688_v39  ;;  %v16672_v63 = vpop.f32.mrb[227].mxu0 }
 0x5df   : > { %v16616_v10 = vpop.f32.mrb[200].mxu1  ;;  %v23309_v28 = vadd.f32 %v16670_v1, %v13749_v24  ;;  %v16673_v53 = vadd.f32 %v16672_v63, %v16671_v16  ;;  %v23970_v1 = vcombine.high %v23968_v50, %v23969_v22  ;;  %v11853_v16 = vrot.slane %v23188_v58, 5  ;;  %v11777_v63 = vld [vmem:[#allocation3 + $0x198] sm:$0xee] }
 0x5e0   : > { %v16617_v45 = vpop.f32.mrb[201].mxu1 }
 0x5e1   : > { %v16618_v12 = vadd.f32 %v16617_v45, %v16616_v10  ;;  %v16619_v38 = vpop.f32.mrb[202].mxu1  ;;  %v23316_v20 = vadd.f32 %v16673_v53, %v13752_v5  ;;  %v15564_v53 = vrot.slane %v11777_v63, 9 }
 0x5e2   : > { %v16620_v52 = vpop.f32.mrb[203].mxu1 }
 0x5e3   : > { %14450 = vmatmul.mubr.bf16.gmra.mrb[76].mxu0 %v23963_v49  ;;  %v13765_v24 = vadd.f32 %v16618_v12, %v13668_v0  ;;  %v16621_v41 = vadd.f32 %v16620_v52, %v16619_v38  ;;  %v16674_v8 = vpop.f32.mrb[228].mxu0  ;;  %v15691_v0 = vcombine.low %v11759_v36, %v11769_v46  ;;  %v11855_v12 = vrot.slane %v11853_v16, 4 }
 0x5e4   : > { %14457 = vmatprep.mubr.bf16.mxu0 %v23966_v13  ;;  %v16675_v35 = vpop.f32.mrb[229].mxu0  ;;  %v11856_v38 = vrot.slane %v23290_v57, 5  ;;  %v23973_v57 = vld [vmem:[#allocation52_spill] sm:$0xff]  ;;  %v11854_v36 = vsel %vm18675_vm7, %v15564_v53, %v11853_v16 }
 0x5e5   : > { %14369 = vmatmul.mubr.bf16.gmra.mrb[52].mxu1 %v15687_v23  ;;  %v13768_v51 = vadd.f32 %v16621_v41, %v13671_v6  ;;  %v16676_v25 = vadd.f32 %v16675_v35, %v16674_v8  ;;  %v16677_v5 = vpop.f32.mrb[230].mxu0  ;;  %v13684_v23 = vadd.f32 %v23208_v47, %v23254_v33  ;;  %v23971_v6 = vcombine.low %v23968_v50, %v23969_v22  ;;  %v23972_v41 = vld [vmem:[#allocation54_spill] sm:$0xff] }
 0x5e6   : > { %14376 = vmatprep.mubr.bf16.mxu1 %v15690_v29  ;;  %v16678_v56 = vpop.f32.mrb[231].mxu0  ;;  %v23974_v8 = vcombine.high %v23972_v41, %v23973_v57  ;;  %v11857_v46 = vsel %vm18675_vm7, %v11855_v12, %v11856_v38  ;;  %v23975_v17 = vcombine.low %v23972_v41, %v23973_v57  ;;  %v13708_v41 = vadd.f32 %v23278_v26, %v23254_v33 }
 0x5e7   : > { %v16622_v21 = vpop.f32.mrb[204].mxu1  ;;  %v23327_v19 = vadd.f32 %v16676_v25, %v13757_v15  ;;  %v16679_v42 = vadd.f32 %v16678_v56, %v16677_v5  ;;  %v15708_v56 = vcombine.high %v11854_v36, %v11857_v46 }
 0x5e8   : > { %v16623_v39 = vpop.f32.mrb[205].mxu1 }
 0x5e9   : > { %v16624_v2 = vadd.f32 %v16623_v39, %v16622_v21  ;;  %v16625_v43 = vpop.f32.mrb[206].mxu1  ;;  %v23334_v34 = vadd.f32 %v16679_v42, %v13760_v62 }
 0x5ea   : > { %v16626_v14 = vpop.f32.mrb[207].mxu1 }
 0x5eb   : > { %14458 = vmatmul.mubr.bf16.gmra.mrb[80].mxu0 %v23967_v3  ;;  %v13773_v59 = vadd.f32 %v16624_v2, %v13676_v9  ;;  %v16627_v15 = vadd.f32 %v16626_v14, %v16625_v43  ;;  %v16680_v10 = vpop.f32.mrb[232].mxu0  ;;  %v13692_v9 = vadd.f32 %v23227_v37, %v23254_v33  ;;  %v13695_v14 = vadd.f32 %v23231_v30, %v23254_v33 }
 0x5ec   : > { %14465 = vmatprep.mubr.bf16.mxu0 %v23970_v1  ;;  %v16681_v45 = vpop.f32.mrb[233].mxu0 }
 0x5ed   : > { %14377 = vmatmul.mubr.bf16.gmra.mrb[56].mxu1 %v15689_v55  ;;  %v13776_v11 = vadd.f32 %v16627_v15, %v13679_v4  ;;  %v16682_v32 = vadd.f32 %v16681_v45, %v16680_v10  ;;  %v16683_v44 = vpop.f32.mrb[234].mxu0  ;;  %v15707_v15 = vcombine.low %v11854_v36, %v11857_v46  ;;  %v13711_v36 = vadd.f32 %v23288_v60, %v23254_v33 }
 0x5ee   : > { %14384 = vmatprep.mubr.bf16.mxu1 %v15692_v7  ;;  %v16684_v54 = vpop.f32.mrb[235].mxu0 }
 0x5ef   : > { %v16628_v48 = vpop.f32.mrb[208].mxu1  ;;  %v23343_v49 = vadd.f32 %v16682_v32, %v13765_v24  ;;  %v16685_v58 = vadd.f32 %v16684_v54, %v16683_v44  ;;  %v13700_v44 = vadd.f32 %v23257_v61, %v23254_v33 }
 0x5f0   : > { %v16629_v62 = vpop.f32.mrb[209].mxu1 }
 0x5f1   : > { %v16630_v52 = vadd.f32 %v16629_v62, %v16628_v48  ;;  %v16631_v29 = vpop.f32.mrb[210].mxu1  ;;  %v23350_v13 = vadd.f32 %v16685_v58, %v13768_v51 }
 0x5f2   : > { %v16632_v31 = vpop.f32.mrb[211].mxu1 }
 0x5f3   : > { %14466 = vmatmul.mubr.bf16.gmra.mrb[84].mxu0 %v23971_v6  ;;  %v13781_v47 = vadd.f32 %v16630_v52, %v13684_v23  ;;  %v16633_v24 = vadd.f32 %v16632_v31, %v16631_v29 }
 0x5f4   : > { %14473 = vmatprep.mubr.bf16.mxu0 %v23974_v8 }
 0x5f5   : > { %14385 = vmatmul.mubr.bf16.gmra.mrb[60].mxu1 %v15691_v0  ;;  %v13784_v25 = vadd.f32 %v16633_v24, %v13687_v18  ;;  %v13703_v0 = vadd.f32 %v23265_v27, %v23254_v33 }
 0x5f6   : > { %v16686_v35 = vpop.f32.mrb[236].mxu0 }
 0x5f7   : > { %v16687_v5 = vpop.f32.mrb[237].mxu0 }
 0x5f8   : > { %v16688_v21 = vadd.f32 %v16687_v5, %v16686_v35  ;;  %v16689_v40 = vpop.f32.mrb[238].mxu0  ;;  %v16634_v51 = vpop.f32.mrb[212].mxu1 }
 0x5f9   : > { %v16690_v39 = vpop.f32.mrb[239].mxu0  ;;  %v16635_v7 = vpop.f32.mrb[213].mxu1 }
 0x5fa   : > { %v23361_v42 = vadd.f32 %v16688_v21, %v13773_v59  ;;  %v16691_v2 = vadd.f32 %v16690_v39, %v16689_v40  ;;  %v16636_v43 = vadd.f32 %v16635_v7, %v16634_v51  ;;  %v16637_v55 = vpop.f32.mrb[214].mxu1 }
 0x5fb   : > { %14474 = vmatmul.mubr.bf16.gmra.mrb[88].mxu0 %v23975_v17  ;;  %v16638_v3 = vpop.f32.mrb[215].mxu1 }
 0x5fc   : > { %v23368_v4 = vadd.f32 %v16691_v2, %v13776_v11  ;;  %v13789_v50 = vadd.f32 %v16636_v43, %v13692_v9  ;;  %v16639_v22 = vadd.f32 %v16638_v3, %v16637_v55  ;;  %14481 = vmatprep.mubr.bf16.mxu0 %v15708_v56 }
 0x5fe   : > { %v16692_v1 = vpop.f32.mrb[240].mxu0  ;;  %v13792_v37 = vadd.f32 %v16639_v22, %v13695_v14 }
 0x5ff   : > { %v16693_v59 = vpop.f32.mrb[241].mxu0 }
 0x600   : > { %v16694_v16 = vadd.f32 %v16693_v59, %v16692_v1  ;;  %v16695_v10 = vpop.f32.mrb[242].mxu0  ;;  %v16640_v63 = vpop.f32.mrb[216].mxu1 }
 0x601   : > { %v16696_v45 = vpop.f32.mrb[243].mxu0  ;;  %v16641_v32 = vpop.f32.mrb[217].mxu1 }
 0x602   : > { %v23372_v48 = vadd.f32 %v16694_v16, %v13781_v47  ;;  %v16697_v30 = vadd.f32 %v16696_v45, %v16695_v10  ;;  %v16642_v11 = vadd.f32 %v16641_v32, %v16640_v63  ;;  %v16643_v54 = vpop.f32.mrb[218].mxu1 }
 0x603   : > { %14482 = vmatmul.mubr.bf16.gmra.mrb[92].mxu0 %v15707_v15  ;;  %v16644_v62 = vpop.f32.mrb[219].mxu1 }
 0x604   : > { %v23376_v53 = vadd.f32 %v16697_v30, %v13784_v25  ;;  %v13797_v12 = vadd.f32 %v16642_v11, %v13700_v44  ;;  %v16645_v38 = vadd.f32 %v16644_v62, %v16643_v54 }
 0x606   : > { %v16698_v23 = vpop.f32.mrb[244].mxu0  ;;  %v13800_v58 = vadd.f32 %v16645_v38, %v13703_v0 }
 0x607   : > { %v16699_v52 = vpop.f32.mrb[245].mxu0 }
 0x608   : > { %v16700_v29 = vadd.f32 %v16699_v52, %v16698_v23  ;;  %v16701_v6 = vpop.f32.mrb[246].mxu0  ;;  %v16646_v61 = vpop.f32.mrb[220].mxu1 }
 0x609   : > { %v16702_v31 = vpop.f32.mrb[247].mxu0  ;;  %v16647_v18 = vpop.f32.mrb[221].mxu1 }
 0x60a   : > { %v23380_v57 = vadd.f32 %v16700_v29, %v13789_v50  ;;  %v16703_v8 = vadd.f32 %v16702_v31, %v16701_v6  ;;  %v16648_v47 = vadd.f32 %v16647_v18, %v16646_v61  ;;  %v16649_v27 = vpop.f32.mrb[222].mxu1 }
 0x60b   : > { %v16650_v24 = vpop.f32.mrb[223].mxu1 }
 0x60c   : > { %v23384_v46 = vadd.f32 %v16703_v8, %v13792_v37  ;;  %v13805_v35 = vadd.f32 %v16648_v47, %v13708_v41  ;;  %v16651_v25 = vadd.f32 %v16650_v24, %v16649_v27  ;;  %v10921_v47 = vld [vmem:[#allocation4] ss:$2 sm:$0xff]  ;;  %v10929_v27 = vld [vmem:[#allocation4 + $0x1] ss:$2 sm:$0xff] }
 0x60e   : > { %v16704_v5 = vpop.f32.mrb[248].mxu0  ;;  %v13808_v21 = vadd.f32 %v16651_v25, %v13711_v36  ;;  %v10936_v36 = vmax.f32 %v10921_v47, %v10929_v27 }
 0x60f   : > { %v16705_v40 = vpop.f32.mrb[249].mxu0 }
 0x610   : > { %v16706_v51 = vadd.f32 %v16705_v40, %v16704_v5  ;;  %v16707_v56 = vpop.f32.mrb[250].mxu0  ;;  %v16732_v39 = vpop.f32.mrb[224].mxu1  ;;  %10940 = vst [vmem:[%s23407_s15] sm:$0xff] %v10936_v36 }
 0x611   : > { %v16708_v26 = vpop.f32.mrb[251].mxu0  ;;  %v16733_v7 = vpop.f32.mrb[225].mxu1 }
 0x612   : > { %v23386_v9 = vadd.f32 %v16706_v51, %v13797_v12  ;;  %v16709_v2 = vadd.f32 %v16708_v26, %v16707_v56  ;;  %v16734_v43 = vadd.f32 %v16733_v7, %v16732_v39  ;;  %v16735_v55 = vpop.f32.mrb[226].mxu1 }
 0x613   : > { %v16736_v17 = vpop.f32.mrb[227].mxu1 }
 0x614   : > { %v23388_v3 = vadd.f32 %v16709_v2, %v13800_v58  ;;  %v13943_v33 = vadd.f32 %v16734_v43, %v23309_v28  ;;  %v16737_v60 = vadd.f32 %v16736_v17, %v16735_v55 }
 0x616   : > { %v16710_v14 = vpop.f32.mrb[252].mxu0  ;;  %v13946_v50 = vadd.f32 %v16737_v60, %v23316_v20 }
 0x617   : > { %v16711_v22 = vpop.f32.mrb[253].mxu0 }
 0x618   : > { %v16712_v1 = vadd.f32 %v16711_v22, %v16710_v14  ;;  %v16713_v37 = vpop.f32.mrb[254].mxu0  ;;  %v16738_v59 = vpop.f32.mrb[228].mxu1 }
 0x619   : > { %v16714_v15 = vpop.f32.mrb[255].mxu0  ;;  %v16739_v16 = vpop.f32.mrb[229].mxu1 }
 0x61a   : > { %v23392_v10 = vadd.f32 %v16712_v1, %v13805_v35  ;;  %v16715_v63 = vadd.f32 %v16714_v15, %v16713_v37  ;;  %v16740_v45 = vadd.f32 %v16739_v16, %v16738_v59  ;;  %v16741_v32 = vpop.f32.mrb[230].mxu1 }
 0x61b   : > { %v16742_v44 = vpop.f32.mrb[231].mxu1 }
 0x61c   : > { %v23394_v30 = vadd.f32 %v16715_v63, %v13808_v21  ;;  %v13951_v28 = vadd.f32 %v16740_v45, %v23327_v19  ;;  %v16743_v11 = vadd.f32 %v16742_v44, %v16741_v32 }
 0x61e   : > { %v16796_v54 = vpop.f32.mrb[0].mxu0  ;;  %v13954_v20 = vadd.f32 %v16743_v11, %v23334_v34 }
 0x61f   : > { %v16797_v62 = vpop.f32.mrb[1].mxu0 }
 0x620   : > { %v16798_v0 = vadd.f32 %v16797_v62, %v16796_v54  ;;  %v16799_v12 = vpop.f32.mrb[2].mxu0  ;;  %v16744_v38 = vpop.f32.mrb[232].mxu1 }
 0x621   : > { %v16800_v23 = vpop.f32.mrb[3].mxu0  ;;  %v16745_v58 = vpop.f32.mrb[233].mxu1 }
 0x622   : > { %v23398_v52 = vadd.f32 %v16798_v0, %v13943_v33  ;;  %v16801_v29 = vadd.f32 %v16800_v23, %v16799_v12  ;;  %v16746_v6 = vadd.f32 %v16745_v58, %v16744_v38  ;;  %v16747_v61 = vpop.f32.mrb[234].mxu1 }
 0x623   : > { %v16748_v31 = vpop.f32.mrb[235].mxu1 }
 0x624   : > { %v23400_v18 = vadd.f32 %v16801_v29, %v13946_v50  ;;  %v13959_v19 = vadd.f32 %v16746_v6, %v23343_v49  ;;  %v16749_v41 = vadd.f32 %v16748_v31, %v16747_v61  ;;  %v10923_v61 = vld [vmem:[#allocation4 + $0x10] ss:$2 sm:$0xff] }
 0x626   : > { %v16802_v34 = vpop.f32.mrb[4].mxu0  ;;  %v13962_v8 = vadd.f32 %v16749_v41, %v23350_v13 }
 0x627   : > { %v16803_v24 = vpop.f32.mrb[5].mxu0 }
 0x628   : > { %v16804_v35 = vadd.f32 %v16803_v24, %v16802_v34  ;;  %v16805_v25 = vpop.f32.mrb[6].mxu0  ;;  %v16750_v5 = vpop.f32.mrb[236].mxu1 }
 0x629   : > { %v16806_v21 = vpop.f32.mrb[7].mxu0  ;;  %v16751_v40 = vpop.f32.mrb[237].mxu1 }
 0x62a   : > { %v23410_v49 = vadd.f32 %v16804_v35, %v13951_v28  ;;  %v16807_v51 = vadd.f32 %v16806_v21, %v16805_v25  ;;  %v16752_v13 = vadd.f32 %v16751_v40, %v16750_v5  ;;  %v16753_v56 = vpop.f32.mrb[238].mxu1 }
 0x62b   : > { %v16754_v39 = vpop.f32.mrb[239].mxu1 }
 0x62c   : > { %v23412_v26 = vadd.f32 %v16807_v51, %v13954_v20  ;;  %v13967_v7 = vadd.f32 %v16752_v13, %v23361_v42  ;;  %v16755_v2 = vadd.f32 %v16754_v39, %v16753_v56 }
 0x62e   : > { %v16808_v43 = vpop.f32.mrb[8].mxu0  ;;  %v13970_v55 = vadd.f32 %v16755_v2, %v23368_v4 }
 0x62f   : > { %v16809_v17 = vpop.f32.mrb[9].mxu0 }
 0x630   : > { %v16810_v33 = vadd.f32 %v16809_v17, %v16808_v43  ;;  %v16811_v60 = vpop.f32.mrb[10].mxu0  ;;  %v16756_v14 = vpop.f32.mrb[240].mxu1 }
 0x631   : > { %v16812_v50 = vpop.f32.mrb[11].mxu0  ;;  %v16757_v22 = vpop.f32.mrb[241].mxu1 }
 0x632   : > { %v23416_v1 = vadd.f32 %v16810_v33, %v13959_v19  ;;  %v16813_v37 = vadd.f32 %v16812_v50, %v16811_v60  ;;  %v16758_v59 = vadd.f32 %v16757_v22, %v16756_v14  ;;  %v16759_v15 = vpop.f32.mrb[242].mxu1 }
 0x633   : > { %v16760_v16 = vpop.f32.mrb[243].mxu1 }
 0x634   : > { %v23418_v63 = vadd.f32 %v16813_v37, %v13962_v8  ;;  %v13975_v42 = vadd.f32 %v16758_v59, %v23372_v48  ;;  %v16761_v45 = vadd.f32 %v16760_v16, %v16759_v15  ;;  %v10925_v15 = vld [vmem:[#allocation4 + $0x20] ss:$2 sm:$0xff] }
 0x636   : > { %v16814_v32 = vpop.f32.mrb[12].mxu0  ;;  %v13978_v4 = vadd.f32 %v16761_v45, %v23376_v53  ;;  %v10931_v53 = vld [vmem:[#allocation4 + $0x11] ss:$2 sm:$0xff] }
 0x637   : > { %v16815_v44 = vpop.f32.mrb[13].mxu0  ;;  %v10937_v31 = vmax.f32 %v10923_v61, %v10931_v53 }
 0x638   : > { %v16816_v28 = vadd.f32 %v16815_v44, %v16814_v32  ;;  %v16817_v11 = vpop.f32.mrb[14].mxu0  ;;  %v16762_v54 = vpop.f32.mrb[244].mxu1 }
 0x639   : > { %v16818_v20 = vpop.f32.mrb[15].mxu0  ;;  %v16763_v62 = vpop.f32.mrb[245].mxu1  ;;  %10941 = vst [vmem:[%s23407_s15 + $0x8] sm:$0xff] %v10937_v31 }
 0x63a   : > { %v23422_v0 = vadd.f32 %v16816_v28, %v13967_v7  ;;  %v16819_v12 = vadd.f32 %v16818_v20, %v16817_v11  ;;  %v16764_v38 = vadd.f32 %v16763_v62, %v16762_v54  ;;  %v16765_v23 = vpop.f32.mrb[246].mxu1 }
 0x63b   : > { %v16766_v58 = vpop.f32.mrb[247].mxu1 }
 0x63c   : > { %v23424_v29 = vadd.f32 %v16819_v12, %v13970_v55  ;;  %v13983_v48 = vadd.f32 %v16764_v38, %v23380_v57  ;;  %v16767_v6 = vadd.f32 %v16766_v58, %v16765_v23 }
 0x63e   : > { %v16820_v19 = vpop.f32.mrb[16].mxu0  ;;  %v13986_v41 = vadd.f32 %v16767_v6, %v23384_v46 }
 0x63f   : > { %v16821_v34 = vpop.f32.mrb[17].mxu0 }
 0x640   : > { %v16822_v8 = vadd.f32 %v16821_v34, %v16820_v19  ;;  %v16823_v47 = vpop.f32.mrb[18].mxu0  ;;  %v16768_v27 = vpop.f32.mrb[248].mxu1 }
 0x641   : > { %v16824_v24 = vpop.f32.mrb[19].mxu0  ;;  %v16769_v36 = vpop.f32.mrb[249].mxu1 }
 0x642   : > { %v23429_v35 = vadd.f32 %v16822_v8, %v13975_v42  ;;  %v16825_v25 = vadd.f32 %v16824_v24, %v16823_v47  ;;  %v16770_v5 = vadd.f32 %v16769_v36, %v16768_v27  ;;  %v16771_v21 = vpop.f32.mrb[250].mxu1 }
 0x643   : > { %v16772_v57 = vpop.f32.mrb[251].mxu1 }
 0x644   : > { %v23431_v40 = vadd.f32 %v16825_v25, %v13978_v4  ;;  %v13991_v51 = vadd.f32 %v16770_v5, %v23386_v9  ;;  %v16773_v13 = vadd.f32 %v16772_v57, %v16771_v21  ;;  %v10927_v21 = vld [vmem:[#allocation4 + $0x30] ss:$2 sm:$0xff] }
 0x646   : > { %v16826_v56 = vpop.f32.mrb[20].mxu0  ;;  %v13994_v46 = vadd.f32 %v16773_v13, %v23388_v3  ;;  %v10933_v3 = vld [vmem:[#allocation4 + $0x21] ss:$2 sm:$0xff] }
 0x647   : > { %v16827_v39 = vpop.f32.mrb[21].mxu0  ;;  %v10938_v16 = vmax.f32 %v10925_v15, %v10933_v3 }
 0x648   : > { %v16828_v7 = vadd.f32 %v16827_v39, %v16826_v56  ;;  %v16829_v2 = vpop.f32.mrb[22].mxu0  ;;  %v16774_v43 = vpop.f32.mrb[252].mxu1 }
 0x649   : > { %v16830_v55 = vpop.f32.mrb[23].mxu0  ;;  %v16775_v17 = vpop.f32.mrb[253].mxu1  ;;  %10942 = vst [vmem:[%s23407_s15 + $0x10] sm:$0xff] %v10938_v16 }
 0x64a   : > { %v23435_v33 = vadd.f32 %v16828_v7, %v13983_v48  ;;  %v16831_v60 = vadd.f32 %v16830_v55, %v16829_v2  ;;  %v16776_v14 = vadd.f32 %v16775_v17, %v16774_v43  ;;  %v16777_v50 = vpop.f32.mrb[254].mxu1 }
 0x64b   : > { %v16778_v22 = vpop.f32.mrb[255].mxu1 }
 0x64c   : > { %v23437_v37 = vadd.f32 %v16831_v60, %v13986_v41  ;;  %v13999_v9 = vadd.f32 %v16776_v14, %v23392_v10  ;;  %v16779_v59 = vadd.f32 %v16778_v22, %v16777_v50 }
 0x64e   : > { %v16832_v42 = vpop.f32.mrb[24].mxu0  ;;  %v14002_v45 = vadd.f32 %v16779_v59, %v23394_v30 }
 0x64f   : > { %v16833_v32 = vpop.f32.mrb[25].mxu0 }
 0x650   : > { %v16834_v4 = vadd.f32 %v16833_v32, %v16832_v42  ;;  %v16835_v44 = vpop.f32.mrb[26].mxu0  ;;  %v16860_v28 = vpop.f32.mrb[0].mxu1 }
 0x651   : > { %v16836_v11 = vpop.f32.mrb[27].mxu0  ;;  %v16861_v54 = vpop.f32.mrb[1].mxu1 }
 0x652   : > { %v23442_v20 = vadd.f32 %v16834_v4, %v13991_v51  ;;  %v16837_v62 = vadd.f32 %v16836_v11, %v16835_v44  ;;  %v16862_v12 = vadd.f32 %v16861_v54, %v16860_v28  ;;  %v16863_v38 = vpop.f32.mrb[2].mxu1 }
 0x653   : > { %v16864_v10 = vpop.f32.mrb[3].mxu1 }
 0x654   : > { %v23444_v23 = vadd.f32 %v16837_v62, %v13994_v46  ;;  %v14137_v58 = vadd.f32 %v16862_v12, %v23398_v52  ;;  %v16865_v48 = vadd.f32 %v16864_v10, %v16863_v38 }
 0x656   : > { %v16838_v6 = vpop.f32.mrb[28].mxu0  ;;  %v14140_v30 = vadd.f32 %v16865_v48, %v23400_v18  ;;  %v10935_v18 = vld [vmem:[#allocation4 + $0x31] ss:$2 sm:$0xff] }
 0x657   : > { %v16839_v61 = vpop.f32.mrb[29].mxu0  ;;  %v10939_v57 = vmax.f32 %v10927_v21, %v10935_v18 }
 0x658   : > { %v16840_v53 = vadd.f32 %v16839_v61, %v16838_v6  ;;  %v16841_v31 = vpop.f32.mrb[30].mxu0  ;;  %v16866_v19 = vpop.f32.mrb[4].mxu1 }
 0x659   : > { %v16842_v41 = vpop.f32.mrb[31].mxu0  ;;  %v16867_v34 = vpop.f32.mrb[5].mxu1  ;;  %10943 = vst [vmem:[%s23407_s15 + $0x18] sm:$0xff] %v10939_v57 }
 0x65a   : > { %v23448_v8 = vadd.f32 %v16840_v53, %v13999_v9  ;;  %v16843_v47 = vadd.f32 %v16842_v41, %v16841_v31  ;;  %v16868_v27 = vadd.f32 %v16867_v34, %v16866_v19  ;;  %v16869_v24 = vpop.f32.mrb[6].mxu1 }
 0x65b   : > { %v16870_v36 = vpop.f32.mrb[7].mxu1 }
 0x65c   : > { %v23450_v25 = vadd.f32 %v16843_v47, %v14002_v45  ;;  %v14145_v52 = vadd.f32 %v16868_v27, %v23410_v49  ;;  %v16871_v5 = vadd.f32 %v16870_v36, %v16869_v24 }
 0x65e   : > { %v16924_v51 = vpop.f32.mrb[32].mxu0  ;;  %v14148_v13 = vadd.f32 %v16871_v5, %v23412_v26 }
 0x65f   : > { %v16925_v56 = vpop.f32.mrb[33].mxu0 }
 0x660   : > { %v16926_v46 = vadd.f32 %v16925_v56, %v16924_v51  ;;  %v16927_v39 = vpop.f32.mrb[34].mxu0  ;;  %v16872_v7 = vpop.f32.mrb[8].mxu1 }
 0x661   : > { %v16928_v2 = vpop.f32.mrb[35].mxu0  ;;  %v16873_v43 = vpop.f32.mrb[9].mxu1 }
 0x662   : > { %v23455_v55 = vadd.f32 %v16926_v46, %v14137_v58  ;;  %v16929_v17 = vadd.f32 %v16928_v2, %v16927_v39  ;;  %v16874_v60 = vadd.f32 %v16873_v43, %v16872_v7  ;;  %v16875_v14 = vpop.f32.mrb[10].mxu1 }
 0x663   : > { %v16876_v49 = vpop.f32.mrb[11].mxu1 }
 0x664   : > { %v23457_v50 = vadd.f32 %v16929_v17, %v14140_v30  ;;  %v14153_v22 = vadd.f32 %v16874_v60, %v23416_v1  ;;  %v16877_v9 = vadd.f32 %v16876_v49, %v16875_v14 }
 0x666   : > { %v16930_v59 = vpop.f32.mrb[36].mxu0  ;;  %v14156_v26 = vadd.f32 %v16877_v9, %v23418_v63 }
 0x667   : > { %v16931_v15 = vpop.f32.mrb[37].mxu0 }
 0x668   : > { %v16932_v3 = vadd.f32 %v16931_v15, %v16930_v59  ;;  %v16933_v16 = vpop.f32.mrb[38].mxu0  ;;  %v16878_v42 = vpop.f32.mrb[12].mxu1 }
 0x669   : > { %v16934_v45 = vpop.f32.mrb[39].mxu0  ;;  %v16879_v32 = vpop.f32.mrb[13].mxu1 }
 0x66a   : > { %v23461_v4 = vadd.f32 %v16932_v3, %v14145_v52  ;;  %v16935_v44 = vadd.f32 %v16934_v45, %v16933_v16  ;;  %v16880_v28 = vadd.f32 %v16879_v32, %v16878_v42  ;;  %v16881_v11 = vpop.f32.mrb[14].mxu1 }
 0x66b   : > { %v16882_v54 = vpop.f32.mrb[15].mxu1 }
 0x66c   : > { %v23463_v62 = vadd.f32 %v16935_v44, %v14148_v13  ;;  %v14161_v1 = vadd.f32 %v16880_v28, %v23422_v0  ;;  %v16883_v12 = vadd.f32 %v16882_v54, %v16881_v11 }
 0x66e   : > { %v16936_v38 = vpop.f32.mrb[40].mxu0  ;;  %v14164_v63 = vadd.f32 %v16883_v12, %v23424_v29 }
 0x66f   : > { %v16937_v10 = vpop.f32.mrb[41].mxu0 }
 0x670   : > { %v16938_v58 = vadd.f32 %v16937_v10, %v16936_v38  ;;  %v16939_v48 = vpop.f32.mrb[42].mxu0  ;;  %v16884_v6 = vpop.f32.mrb[16].mxu1 }
 0x671   : > { %v16940_v30 = vpop.f32.mrb[43].mxu0  ;;  %v16885_v61 = vpop.f32.mrb[17].mxu1 }
 0x672   : > { %v23467_v53 = vadd.f32 %v16938_v58, %v14153_v22  ;;  %v16941_v31 = vadd.f32 %v16940_v30, %v16939_v48  ;;  %v16886_v19 = vadd.f32 %v16885_v61, %v16884_v6  ;;  %v16887_v41 = vpop.f32.mrb[18].mxu1 }
 0x673   : > { %v16888_v34 = vpop.f32.mrb[19].mxu1 }
 0x674   : > { %v23469_v47 = vadd.f32 %v16941_v31, %v14156_v26  ;;  %v14169_v0 = vadd.f32 %v16886_v19, %v23429_v35  ;;  %v16889_v27 = vadd.f32 %v16888_v34, %v16887_v41 }
 0x676   : > { %v16942_v24 = vpop.f32.mrb[44].mxu0  ;;  %v14172_v29 = vadd.f32 %v16889_v27, %v23431_v40 }
 0x677   : > { %v16943_v36 = vpop.f32.mrb[45].mxu0 }
 0x678   : > { %v16944_v52 = vadd.f32 %v16943_v36, %v16942_v24  ;;  %v16945_v5 = vpop.f32.mrb[46].mxu0  ;;  %v16890_v21 = vpop.f32.mrb[20].mxu1 }
 0x679   : > { %v16946_v18 = vpop.f32.mrb[47].mxu0  ;;  %v16891_v57 = vpop.f32.mrb[21].mxu1 }
 0x67a   : > { %v23473_v51 = vadd.f32 %v16944_v52, %v14161_v1  ;;  %v16947_v13 = vadd.f32 %v16946_v18, %v16945_v5  ;;  %v16892_v56 = vadd.f32 %v16891_v57, %v16890_v21  ;;  %v16893_v46 = vpop.f32.mrb[22].mxu1 }
 0x67b   : > { %v16894_v39 = vpop.f32.mrb[23].mxu1 }
 0x67c   : > { %v23475_v7 = vadd.f32 %v16947_v13, %v14164_v63  ;;  %v14177_v35 = vadd.f32 %v16892_v56, %v23435_v33  ;;  %v16895_v2 = vadd.f32 %v16894_v39, %v16893_v46 }
 0x67e   : > { %v16948_v43 = vpop.f32.mrb[48].mxu0  ;;  %v14180_v40 = vadd.f32 %v16895_v2, %v23437_v37 }
 0x67f   : > { %v16949_v17 = vpop.f32.mrb[49].mxu0 }
 0x680   : > { %v16950_v60 = vadd.f32 %v16949_v17, %v16948_v43  ;;  %v16951_v14 = vpop.f32.mrb[50].mxu0  ;;  %v16896_v49 = vpop.f32.mrb[24].mxu1 }
 0x681   : > { %v16952_v22 = vpop.f32.mrb[51].mxu0  ;;  %v16897_v9 = vpop.f32.mrb[25].mxu1 }
 0x682   : > { %v23479_v59 = vadd.f32 %v16950_v60, %v14169_v0  ;;  %v16953_v26 = vadd.f32 %v16952_v22, %v16951_v14  ;;  %v16898_v15 = vadd.f32 %v16897_v9, %v16896_v49  ;;  %v16899_v3 = vpop.f32.mrb[26].mxu1 }
 0x683   : > { %v16900_v16 = vpop.f32.mrb[27].mxu1 }
 0x684   : > { %v23481_v42 = vadd.f32 %v16953_v26, %v14172_v29  ;;  %v14185_v33 = vadd.f32 %v16898_v15, %v23442_v20  ;;  %v16901_v45 = vadd.f32 %v16900_v16, %v16899_v3 }
 0x686   : > { %v16954_v32 = vpop.f32.mrb[52].mxu0  ;;  %v14188_v37 = vadd.f32 %v16901_v45, %v23444_v23 }
 0x687   : > { %v16955_v44 = vpop.f32.mrb[53].mxu0 }
 0x688   : > { %v16956_v28 = vadd.f32 %v16955_v44, %v16954_v32  ;;  %v16957_v11 = vpop.f32.mrb[54].mxu0  ;;  %v16902_v54 = vpop.f32.mrb[28].mxu1 }
 0x689   : > { %v16958_v1 = vpop.f32.mrb[55].mxu0  ;;  %v16903_v12 = vpop.f32.mrb[29].mxu1 }
 0x68a   : > { %v23485_v38 = vadd.f32 %v16956_v28, %v14177_v35  ;;  %v16959_v63 = vadd.f32 %v16958_v1, %v16957_v11  ;;  %v16904_v10 = vadd.f32 %v16903_v12, %v16902_v54  ;;  %v16905_v58 = vpop.f32.mrb[30].mxu1 }
 0x68b   : > { %v16906_v48 = vpop.f32.mrb[31].mxu1 }
 0x68c   : > { %v23487_v6 = vadd.f32 %v16959_v63, %v14180_v40  ;;  %v14193_v20 = vadd.f32 %v16904_v10, %v23448_v8  ;;  %v16907_v30 = vadd.f32 %v16906_v48, %v16905_v58 }
 0x68e   : > { %v16960_v61 = vpop.f32.mrb[56].mxu0  ;;  %v14196_v23 = vadd.f32 %v16907_v30, %v23450_v25 }
 0x68f   : > { %v16961_v31 = vpop.f32.mrb[57].mxu0 }
 0x690   : > { %v16962_v19 = vadd.f32 %v16961_v31, %v16960_v61  ;;  %v16963_v41 = vpop.f32.mrb[58].mxu0  ;;  %v16988_v34 = vpop.f32.mrb[32].mxu1 }
 0x691   : > { %v16964_v0 = vpop.f32.mrb[59].mxu0  ;;  %v16989_v27 = vpop.f32.mrb[33].mxu1 }
 0x692   : > { %v23491_v24 = vadd.f32 %v16962_v19, %v14185_v33  ;;  %v16965_v29 = vadd.f32 %v16964_v0, %v16963_v41  ;;  %v16990_v36 = vadd.f32 %v16989_v27, %v16988_v34  ;;  %v16991_v52 = vpop.f32.mrb[34].mxu1 }
 0x693   : > { %v16992_v5 = vpop.f32.mrb[35].mxu1 }
 0x694   : > { %v23493_v21 = vadd.f32 %v16965_v29, %v14188_v37  ;;  %v14331_v8 = vadd.f32 %v16990_v36, %v23455_v55  ;;  %v16993_v18 = vadd.f32 %v16992_v5, %v16991_v52 }
 0x696   : > { %v16966_v57 = vpop.f32.mrb[60].mxu0  ;;  %v14334_v25 = vadd.f32 %v16993_v18, %v23457_v50 }
 0x697   : > { %v16967_v13 = vpop.f32.mrb[61].mxu0 }
 0x698   : > { %v16968_v56 = vadd.f32 %v16967_v13, %v16966_v57  ;;  %v16969_v46 = vpop.f32.mrb[62].mxu0  ;;  %v16994_v39 = vpop.f32.mrb[36].mxu1 }
 0x699   : > { %v16970_v35 = vpop.f32.mrb[63].mxu0  ;;  %v16995_v2 = vpop.f32.mrb[37].mxu1 }
 0x69a   : > { %v23497_v43 = vadd.f32 %v16968_v56, %v14193_v20  ;;  %v16971_v40 = vadd.f32 %v16970_v35, %v16969_v46  ;;  %v16996_v17 = vadd.f32 %v16995_v2, %v16994_v39  ;;  %v16997_v60 = vpop.f32.mrb[38].mxu1 }
 0x69b   : > { %v16998_v14 = vpop.f32.mrb[39].mxu1 }
 0x69c   : > { %v23499_v49 = vadd.f32 %v16971_v40, %v14196_v23  ;;  %v14339_v55 = vadd.f32 %v16996_v17, %v23461_v4  ;;  %v16999_v22 = vadd.f32 %v16998_v14, %v16997_v60 }
 0x69e   : > { %v17052_v9 = vpop.f32.mrb[64].mxu0  ;;  %v14342_v50 = vadd.f32 %v16999_v22, %v23463_v62 }
 0x69f   : > { %v17053_v26 = vpop.f32.mrb[65].mxu0 }
 0x6a0   : > { %v17054_v15 = vadd.f32 %v17053_v26, %v17052_v9  ;;  %v17055_v3 = vpop.f32.mrb[66].mxu0  ;;  %v17000_v16 = vpop.f32.mrb[40].mxu1 }
 0x6a1   : > { %v17056_v33 = vpop.f32.mrb[67].mxu0  ;;  %v17001_v45 = vpop.f32.mrb[41].mxu1 }
 0x6a2   : > { %v14428_v32 = vadd.f32 %v17054_v15, %v14331_v8  ;;  %v17057_v37 = vadd.f32 %v17056_v33, %v17055_v3  ;;  %v17002_v44 = vadd.f32 %v17001_v45, %v17000_v16  ;;  %v17003_v28 = vpop.f32.mrb[42].mxu1 }
 0x6a3   : > { %v17004_v11 = vpop.f32.mrb[43].mxu1 }
 0x6a4   : > { %v14431_v54 = vadd.f32 %v17057_v37, %v14334_v25  ;;  %v14347_v1 = vadd.f32 %v17002_v44, %v23467_v53  ;;  %v17005_v12 = vadd.f32 %v17004_v11, %v17003_v28  ;;  %v14490_v41 = vmax.f32 %v14428_v32, 0.0 }
 0x6a6   : > { %v17058_v4 = vpop.f32.mrb[68].mxu0  ;;  %v14350_v63 = vadd.f32 %v17005_v12, %v23469_v47  ;;  %v14491_v36 = vmax.f32 %v14431_v54, 0.0 }
 0x6a7   : > { %v17059_v10 = vpop.f32.mrb[69].mxu0 }
 0x6a8   : > { %v17060_v62 = vadd.f32 %v17059_v10, %v17058_v4  ;;  %v17061_v58 = vpop.f32.mrb[70].mxu0  ;;  %v17006_v48 = vpop.f32.mrb[44].mxu1 }
 0x6a9   : > { %v17062_v20 = vpop.f32.mrb[71].mxu0  ;;  %v17007_v30 = vpop.f32.mrb[45].mxu1 }
 0x6aa   : > { %v14436_v61 = vadd.f32 %v17060_v62, %v14339_v55  ;;  %v17063_v23 = vadd.f32 %v17062_v20, %v17061_v58  ;;  %v17008_v31 = vadd.f32 %v17007_v30, %v17006_v48  ;;  %v17009_v19 = vpop.f32.mrb[46].mxu1 }
 0x6ab   : > { %v17010_v34 = vpop.f32.mrb[47].mxu1 }
 0x6ac   : > { %v14492_v0 = vmax.f32 %v14436_v61, 0.0  ;;  %v14439_v27 = vadd.f32 %v17063_v23, %v14342_v50  ;;  %v14355_v53 = vadd.f32 %v17008_v31, %v23473_v51  ;;  %v17011_v29 = vadd.f32 %v17010_v34, %v17009_v19 }
 0x6ae   : > { %v14506_v52 = vmax.f32 %v14490_v41, %v14492_v0  ;;  %v14493_v47 = vmax.f32 %v14439_v27, 0.0  ;;  %v17064_v5 = vpop.f32.mrb[72].mxu0  ;;  %v14358_v8 = vadd.f32 %v17011_v29, %v23475_v7 }
 0x6af   : > { %v17065_v18 = vpop.f32.mrb[73].mxu0 }
 0x6b0   : > { %14514 = vst [vmem:[#allocation4] sm:$0xff] %v14506_v52  ;;  %v14507_v57 = vmax.f32 %v14491_v36, %v14493_v47  ;;  %v17066_v25 = vadd.f32 %v17065_v18, %v17064_v5  ;;  %v17067_v13 = vpop.f32.mrb[74].mxu0  ;;  %v17012_v56 = vpop.f32.mrb[48].mxu1 }
 0x6b1   : > { %v17068_v46 = vpop.f32.mrb[75].mxu0  ;;  %v17013_v39 = vpop.f32.mrb[49].mxu1 }
 0x6b2   : > { %14515 = vst [vmem:[#allocation4 + $0x8] sm:$0xff] %v14507_v57  ;;  %v14444_v35 = vadd.f32 %v17066_v25, %v14347_v1  ;;  %v17069_v2 = vadd.f32 %v17068_v46, %v17067_v13  ;;  %v17014_v40 = vadd.f32 %v17013_v39, %v17012_v56  ;;  %v17015_v51 = vpop.f32.mrb[50].mxu1 }
 0x6b3   : > { %v17016_v17 = vpop.f32.mrb[51].mxu1 }
 0x6b4   : > { %v14447_v60 = vadd.f32 %v17069_v2, %v14350_v63  ;;  %v14363_v14 = vadd.f32 %v17014_v40, %v23479_v59  ;;  %v17017_v55 = vadd.f32 %v17016_v17, %v17015_v51  ;;  %v14494_v54 = vmax.f32 %v14444_v35, 0.0 }
 0x6b6   : > { %v17070_v22 = vpop.f32.mrb[76].mxu0  ;;  %v14366_v7 = vadd.f32 %v17017_v55, %v23481_v42  ;;  %v14495_v63 = vmax.f32 %v14447_v60, 0.0 }
 0x6b7   : > { %v17071_v9 = vpop.f32.mrb[77].mxu0 }
 0x6b8   : > { %v17072_v50 = vadd.f32 %v17071_v9, %v17070_v22  ;;  %v17073_v26 = vpop.f32.mrb[78].mxu0  ;;  %v17018_v15 = vpop.f32.mrb[52].mxu1 }
 0x6b9   : > { %v14522_v3 = vld [vmem:[#allocation4] ss:$2 sm:$0xff]  ;;  %v14526_v16 = vld [vmem:[#allocation4 + $0x1] ss:$2 sm:$0xff]  ;;  %v17074_v33 = vpop.f32.mrb[79].mxu0  ;;  %v17019_v45 = vpop.f32.mrb[53].mxu1 }
 0x6ba   : > { %v14530_v32 = vmax.f32 %v14522_v3, %v14526_v16  ;;  %v14452_v37 = vadd.f32 %v17072_v50, %v14355_v53  ;;  %v17075_v44 = vadd.f32 %v17074_v33, %v17073_v26  ;;  %v17020_v28 = vadd.f32 %v17019_v45, %v17018_v15  ;;  %v17021_v11 = vpop.f32.mrb[54].mxu1 }
 0x6bb   : > { %v17022_v59 = vpop.f32.mrb[55].mxu1 }
 0x6bc   : > { %15854 = vst [vmem:[%s23407_s15 + $0x20] sm:$0xff] %v14530_v32  ;;  %v14496_v1 = vmax.f32 %v14452_v37, 0.0  ;;  %v14455_v12 = vadd.f32 %v17075_v44, %v14358_v8  ;;  %v14371_v42 = vadd.f32 %v17020_v28, %v23485_v38  ;;  %v17023_v4 = vadd.f32 %v17022_v59, %v17021_v11 }
 0x6be   : > { %v14508_v10 = vmax.f32 %v14494_v54, %v14496_v1  ;;  %v14497_v62 = vmax.f32 %v14455_v12, 0.0  ;;  %v17076_v58 = vpop.f32.mrb[80].mxu0  ;;  %v14374_v48 = vadd.f32 %v17023_v4, %v23487_v6 }
 0x6bf   : > { %v17077_v20 = vpop.f32.mrb[81].mxu0 }
 0x6c0   : > { %14516 = vst [vmem:[#allocation4 + $0x10] sm:$0xff] %v14508_v10  ;;  %v14509_v30 = vmax.f32 %v14495_v63, %v14497_v62  ;;  %v17078_v61 = vadd.f32 %v17077_v20, %v17076_v58  ;;  %v17079_v23 = vpop.f32.mrb[82].mxu0  ;;  %v17024_v31 = vpop.f32.mrb[56].mxu1 }
 0x6c1   : > { %v17080_v19 = vpop.f32.mrb[83].mxu0  ;;  %v17025_v41 = vpop.f32.mrb[57].mxu1 }
 0x6c2   : > { %14517 = vst [vmem:[#allocation4 + $0x18] sm:$0xff] %v14509_v30  ;;  %v14460_v34 = vadd.f32 %v17078_v61, %v14363_v14  ;;  %v17081_v0 = vadd.f32 %v17080_v19, %v17079_v23  ;;  %v17026_v27 = vadd.f32 %v17025_v41, %v17024_v31  ;;  %v17027_v38 = vpop.f32.mrb[58].mxu1 }
 0x6c3   : > { %v17028_v53 = vpop.f32.mrb[59].mxu1 }
 0x6c4   : > { %v14463_v29 = vadd.f32 %v17081_v0, %v14366_v7  ;;  %v14379_v36 = vadd.f32 %v17026_v27, %v23491_v24  ;;  %v17029_v52 = vadd.f32 %v17028_v53, %v17027_v38  ;;  %v14498_v17 = vmax.f32 %v14460_v34, 0.0 }
 0x6c6   : > { %v17082_v47 = vpop.f32.mrb[84].mxu0  ;;  %v14382_v6 = vadd.f32 %v17029_v52, %v23493_v21  ;;  %v14499_v22 = vmax.f32 %v14463_v29, 0.0 }
 0x6c7   : > { %v17083_v5 = vpop.f32.mrb[85].mxu0 }
 0x6c8   : > { %v17084_v8 = vadd.f32 %v17083_v5, %v17082_v47  ;;  %v17085_v18 = vpop.f32.mrb[86].mxu0  ;;  %v17030_v57 = vpop.f32.mrb[60].mxu1 }
 0x6c9   : > { %v14523_v25 = vld [vmem:[#allocation4 + $0x10] ss:$2 sm:$0xff]  ;;  %v14527_v13 = vld [vmem:[#allocation4 + $0x11] ss:$2 sm:$0xff]  ;;  %v17086_v56 = vpop.f32.mrb[87].mxu0  ;;  %v17031_v46 = vpop.f32.mrb[61].mxu1 }
 0x6ca   : > { %v14531_v39 = vmax.f32 %v14523_v25, %v14527_v13  ;;  %v14468_v35 = vadd.f32 %v17084_v8, %v14371_v42  ;;  %v17087_v2 = vadd.f32 %v17086_v56, %v17085_v18  ;;  %v17032_v40 = vadd.f32 %v17031_v46, %v17030_v57  ;;  %v17033_v51 = vpop.f32.mrb[62].mxu1 }
 0x6cb   : > { %v17034_v24 = vpop.f32.mrb[63].mxu1 }
 0x6cc   : > { %15855 = vst [vmem:[%s23407_s15 + $0x28] sm:$0xff] %v14531_v39  ;;  %v14500_v60 = vmax.f32 %v14468_v35, 0.0  ;;  %v14471_v14 = vadd.f32 %v17087_v2, %v14374_v48  ;;  %v14387_v21 = vadd.f32 %v17032_v40, %v23497_v43  ;;  %v17035_v55 = vadd.f32 %v17034_v24, %v17033_v51 }
 0x6ce   : > { %v14510_v7 = vmax.f32 %v14498_v17, %v14500_v60  ;;  %v14501_v9 = vmax.f32 %v14471_v14, 0.0  ;;  %v17088_v50 = vpop.f32.mrb[88].mxu0  ;;  %v14390_v26 = vadd.f32 %v17035_v55, %v23499_v49 }
 0x6cf   : > { %v17089_v15 = vpop.f32.mrb[89].mxu0 }
 0x6d0   : > { %14518 = vst [vmem:[#allocation4 + $0x20] sm:$0xff] %v14510_v7  ;;  %v14511_v3 = vmax.f32 %v14499_v22, %v14501_v9  ;;  %v17090_v16 = vadd.f32 %v17089_v15, %v17088_v50  ;;  %v17091_v33 = vpop.f32.mrb[90].mxu0 }
 0x6d1   : > { %v17092_v45 = vpop.f32.mrb[91].mxu0 }
 0x6d2   : > { %14519 = vst [vmem:[#allocation4 + $0x28] sm:$0xff] %v14511_v3  ;;  %v14476_v32 = vadd.f32 %v17090_v16, %v14379_v36  ;;  %v17093_v37 = vadd.f32 %v17092_v45, %v17091_v33 }
 0x6d4   : > { %v14479_v44 = vadd.f32 %v17093_v37, %v14382_v6  ;;  %v14502_v63 = vmax.f32 %v14476_v32, 0.0 }
 0x6d6   : > { %v17094_v28 = vpop.f32.mrb[92].mxu0  ;;  %v14503_v58 = vmax.f32 %v14479_v44, 0.0 }
 0x6d7   : > { %v17095_v43 = vpop.f32.mrb[93].mxu0 }
 0x6d8   : > { %v17096_v11 = vadd.f32 %v17095_v43, %v17094_v28  ;;  %v17097_v54 = vpop.f32.mrb[94].mxu0 }
 0x6d9   : > { %v14524_v59 = vld [vmem:[#allocation4 + $0x20] ss:$2 sm:$0xff]  ;;  %v14528_v1 = vld [vmem:[#allocation4 + $0x21] ss:$2 sm:$0xff]  ;;  %v17098_v49 = vpop.f32.mrb[95].mxu0 }
 0x6da   : > { %v14532_v12 = vmax.f32 %v14524_v59, %v14528_v1  ;;  %v14484_v42 = vadd.f32 %v17096_v11, %v14387_v21  ;;  %v17099_v4 = vadd.f32 %v17098_v49, %v17097_v54 }
 0x6dc   : > { %15856 = vst [vmem:[%s23407_s15 + $0x30] sm:$0xff] %v14532_v12  ;;  %v14504_v10 = vmax.f32 %v14484_v42, 0.0  ;;  %v14487_v62 = vadd.f32 %v17099_v4, %v14390_v26 }
 0x6de   : > { %v14512_v48 = vmax.f32 %v14502_v63, %v14504_v10  ;;  %v14505_v20 = vmax.f32 %v14487_v62, 0.0 }
 0x6e0   : > { %14520 = vst [vmem:[#allocation4 + $0x30] sm:$0xff] %v14512_v48  ;;  %v14513_v30 = vmax.f32 %v14503_v58, %v14505_v20 }
 0x6e2   : > { %14521 = vst [vmem:[#allocation4 + $0x38] sm:$0xff] %v14513_v30 }
 0x6e9   : > { %v14525_v61 = vld [vmem:[#allocation4 + $0x30] ss:$2 sm:$0xff]  ;;  %v14529_v23 = vld [vmem:[#allocation4 + $0x31] ss:$2 sm:$0xff] }
 0x6ea   : > { %v14533_v31 = vmax.f32 %v14525_v61, %v14529_v23 }
 0x6ec   : > { %15857 = vst [vmem:[%s23407_s15 + $0x38] sm:$0xff] %v14533_v31 }
 0x6ed   : > { %18308 = shalt.err (!%p18305_p11)
}
 0x6ee   : > { %s18309_s22 = scalar_lea.hbm %s23523_s13, 1024  ;;  %s18313_s8 = scalar_lea.hbm %s23578_s7, 2048 }
 0x6ef   : > { %p18310_p13 = scmp.ne.s32.totalorder %s23523_s13, %s18309_s22  ;;  %p18314_p6 = scmp.lt.u32.totalorder %s23523_s13, %s23578_s7 }
 0x6f0   : > { %p18315_p9 = scmp.lt.u32.totalorder %s18313_s8, %s18309_s22  ;;  %p18317_p12 = scmp.lt.u32.totalorder %s18309_s22, %s23523_s13 }
 0x6f1   : > { %p18311_p0 = pnand %p18310_p13, %p23976_p1 }
 0x6f2   : > { %p18316_p10 = por %p18315_p9, %p18314_p6 }
 0x6f3   : > { %p18312_p5 = pneg %p18311_p0 }
 0x6f4   : > { %p18318_p2 = por %p18317_p12, %p18316_p10 }
 0x6f6   : > { %p18319_p3 = pnand %p18318_p2, %p18312_p5 }
 0x6f8   : > { %18322 = shalt.err (!%p18319_p3)
}
 0x6f9   : > { %s18375_s10 = smov 128   ;;  %s18376_s17 = smov 8  }
 0x6fa   : > { %17467 = dma.vmem_to_hbm [thread:$0]  (%p23976_p1), %s23525_s14, 1024, %s23523_s13, %s23530_s16, %s18375_s10, %s18375_s10, %s18376_s17  }
 0x6fb PF: > { %p17484_p4 = scmp.ge.s32.totalorder %s18365_s27, 2  ;;  %s14568_s19 = sand.u32 1, %s18353_s24  }
 0x6fc   : > { %p23977_p7 = scmp.ne.s32.totalorder %s23681_s12, 0  ;;  %s14569_s18 = scalar_lea.sflag [#allocation7], %s14568_s19 }
 0x6fe   : > { %p17477_p8 = pnand %p17484_p4, %p23977_p7 }
 0x700   : > { %18348 = dma.done.wait (!%p17477_p8), %s14569_s18, 1024  }
 0x701   : > { %18350 = vsyncadd (!%p17477_p8), %s14569_s18, 4294966272  ;;  %s23978_s28 = sld [smem:[#allocation14_spill]]  ;;  %p19_p11 = scmp.ge.s32.totalorder %s18442_s30, 4  }
 0x702   : > { %s23979_s24 = smov %s18357_s25  ;;  %s23980_s25 = smov %s18361_s26 }
 0x703   : > { %s23982_s27 = smov %s18442_s30  ;;  %21 = sbr.rel (!%p19_p11) target bundleno = 5 (0x5), region = 110 }
 0x707   : > { %s23981_s26 = smov %s23978_s28 }
 0x70a   :  { %14574 = vsyncpa [#allocation6], 1 }
 0x70b   :  { %14576 = vsyncpa [#allocation6 + $0x1], 1 }
 0x70c   :  { %14577 = vsyncpa [#allocation9], 1 }
 0x70d   :  { %14578 = vsyncpa [#allocation7], 1 }
 0x70e   :  { %14580 = vsyncpa [#allocation7 + $0x1], 1 }

</bundles_post_ra>
